<compile_context>
chip_gen: v6e
topology: v6e:2x2x1
jax: 0.10.0
libtpu: 0.0.40
codegen_flags: <defaults>
</compile_context>

<pallas_src>
import jax
import jax.numpy as jnp
from jax import lax
from jax.experimental import pallas as pl
from jax.experimental.pallas import tpu as pltpu


# ----------------------- fused conv (+ optional BN/ReLU prologue) ------------

def _conv_layer(x_nhwc, w_hwio_bf16, scale=None, bias=None):
    """3x3 same conv.  Optionally applies y = relu(x*scale+bias) to the input
    tile first (fused BN+ReLU prologue of the *previous* BatchNorm).  Also
    emits per-image per-channel (sum, sum-of-squares) of the conv output so
    the *next* BatchNorm needs no extra full-tensor pass."""
    N, H, W, Cin = x_nhwc.shape
    Cout = w_hwio_bf16.shape[-1]
    apply_prologue = scale is not None

    def kernel(*refs):
        if apply_prologue:
            x_ref, w_ref, scale_ref, bias_ref, y_ref, stats_ref, xpad_ref = refs
        else:
            x_ref, w_ref, y_ref, stats_ref, xpad_ref = refs
            scale_ref = bias_ref = None

        # ---- prologue: (optional) BN+ReLU of the previous layer, in f32 ----
        x4 = x_ref[...].astype(jnp.float32)                  # (1, H, W, Cin)
        if apply_prologue:
            x4 = jnp.maximum(x4 * scale_ref[...] + bias_ref[...], 0.0)

        # ---- in-kernel zero halo (replaces any HBM-side jnp.pad) ------------
        xpad_ref[...] = jnp.zeros_like(xpad_ref)             # (H+2, W+2, Cin)
        xpad_ref[1:H + 1, 1:W + 1, :] = x4.reshape(H, W, Cin)

        # ---- 3x3 conv as 9 statically-unrolled MXU matmuls (bf16 in, f32 acc)
        acc = jnp.zeros((H * W, Cout), jnp.float32)
        for dy in range(3):
            for dx in range(3):
                patch = xpad_ref[dy:dy + H, dx:dx + W, :].reshape(H * W, Cin)
                acc = acc + jnp.dot(patch.astype(jnp.bfloat16), w_ref[dy, dx],
                                    preferred_element_type=jnp.float32)

        # ---- outputs: bf16 activation + f32 per-image channel stats --------
        y_ref[...] = acc.reshape(1, H, W, Cout).astype(y_ref.dtype)
        s = jnp.sum(acc, axis=0, keepdims=True)               # (1, Cout)
        ss = jnp.sum(acc * acc, axis=0, keepdims=True)         # (1, Cout)
        stats_ref[...] = jnp.concatenate([s, ss], axis=0).reshape(1, 2, Cout)

    in_specs = [
        pl.BlockSpec((1, H, W, Cin), lambda n: (n, 0, 0, 0)),
        pl.BlockSpec((3, 3, Cin, Cout), lambda n: (0, 0, 0, 0)),
    ]
    args = [x_nhwc, w_hwio_bf16]
    if apply_prologue:
        in_specs += [pl.BlockSpec((1, 1, 1, Cin), lambda n: (0, 0, 0, 0)),
                     pl.BlockSpec((1, 1, 1, Cin), lambda n: (0, 0, 0, 0))]
        args += [scale.reshape(1, 1, 1, Cin), bias.reshape(1, 1, 1, Cin)]

    y, stats = pl.pallas_call(
        kernel,
        out_shape=(jax.ShapeDtypeStruct((N, H, W, Cout), jnp.bfloat16),
                   jax.ShapeDtypeStruct((N, 2, Cout), jnp.float32)),
        grid=(N,),
        in_specs=in_specs,
        out_specs=(pl.BlockSpec((1, H, W, Cout), lambda n: (n, 0, 0, 0)),
                   pl.BlockSpec((1, 2, Cout), lambda n: (n, 0, 0))),
        scratch_shapes=[pltpu.VMEM((H + 2, W + 2, Cin), jnp.float32)],
        compiler_params=pltpu.CompilerParams(dimension_semantics=("parallel",)),
    )(*args)
    return y, stats


# ------------------------- fused BN + ReLU + maxpool 2x2 ---------------------

def _bn_relu_pool(y_nhwc, scale, bias):
    N, H, W, C = y_nhwc.shape
    Hh, Wh = H // 2, W // 2

    def kernel(y_ref, scale_ref, bias_ref, feat_ref, pool_ref):
        z = jnp.maximum(y_ref[...].astype(jnp.float32) * scale_ref[...] + bias_ref[...],
                        0.0)                                  # (1, H, W, C) f32
        feat_ref[...] = z
        zp = z.reshape(Hh, 2, Wh, 2, C)
        pool_ref[...] = jnp.max(jnp.max(zp, axis=3), axis=1).reshape(1, Hh, Wh, C)

    feat, pooled = pl.pallas_call(
        kernel,
        out_shape=(jax.ShapeDtypeStruct((N, H, W, C), jnp.float32),
                   jax.ShapeDtypeStruct((N, Hh, Wh, C), jnp.float32)),
        grid=(N,),
        in_specs=[pl.BlockSpec((1, H, W, C), lambda n: (n, 0, 0, 0)),
                  pl.BlockSpec((1, 1, 1, C), lambda n: (0, 0, 0, 0)),
                  pl.BlockSpec((1, 1, 1, C), lambda n: (0, 0, 0, 0))],
        out_specs=(pl.BlockSpec((1, H, W, C), lambda n: (n, 0, 0, 0)),
                   pl.BlockSpec((1, Hh, Wh, C), lambda n: (n, 0, 0, 0))),
        compiler_params=pltpu.CompilerParams(dimension_semantics=("parallel",)),
    )(y_nhwc, scale.reshape(1, 1, 1, C), bias.reshape(1, 1, 1, C))
    return feat, pooled


# ------------------------------ BN finalize (tiny) ---------------------------

def _bn_affine(stats, gamma, beta, count, eps):
    """Turn per-image channel partial sums (N, 2, C) into the BN affine
    (scale, bias).  Matches PyTorch training-mode forward (biased variance)."""
    s = jnp.sum(stats[:, 0, :], axis=0)
    ss = jnp.sum(stats[:, 1, :], axis=0)
    mean = s / count
    var = jnp.maximum(ss / count - mean * mean, 0.0)
    inv = gamma / jnp.sqrt(var + eps)
    return inv, beta - mean * inv


# ------------------------------- forward pass --------------------------------

def down_conv_forward(x_nchw, params, eps=1e-5):
    """Pallas implementation of DownConv.forward. Returns (pooled, pre_pool), NCHW."""
    x = jnp.transpose(x_nchw, (0, 2, 3, 1))                   # NCHW -> NHWC
    N, H, W, _ = x.shape
    assert H % 2 == 0 and W % 2 == 0, "MaxPool2d(2) path assumes even H, W"
    count = N * H * W

    w1 = params["w1"].astype(jnp.bfloat16)                    # (3,3,Cin,Cout)
    w2 = params["w2"].astype(jnp.bfloat16)                    # (3,3,Cout,Cout)

    # layer 1: conv1 + BN1 partial stats
    y1, st1 = _conv_layer(x, w1)
    scale1, bias1 = _bn_affine(st1, params["g1"], params["b1"], count, eps)
    # layer 2: BN1+ReLU prologue fused into conv2, + BN2 partial stats
    y2, st2 = _conv_layer(y1, w2, scale1, bias1)
    scale2, bias2 = _bn_affine(st2, params["g2"], params["b2"], count, eps)
    # BN2 + ReLU + 2x2 maxpool, fused
    feat, pooled = _bn_relu_pool(y2, scale2, bias2)

    return jnp.transpose(pooled, (0, 3, 1, 2)), jnp.transpose(feat, (0, 3, 1, 2))


# ---------------------------- pure-JAX reference -----------------------------

def ref_forward(x_nchw, params, eps=1e-5):
    def conv(x, w):
        return lax.conv_general_dilated(
            x, w, (1, 1), ((1, 1), (1, 1)),
            dimension_numbers=("NHWC", "HWIO", "NHWC"))

    def bnrelu(y, g, b):
        m = jnp.mean(y, axis=(0, 1, 2))
        v = jnp.mean(jnp.square(y - m), axis=(0, 1, 2))
        return jnp.maximum((y - m) / jnp.sqrt(v + eps) * g + b, 0.0)

    x = jnp.transpose(x_nchw, (0, 2, 3, 1))
    y = bnrelu(conv(x, params["w1"]), params["g1"], params["b1"])
    y = bnrelu(conv(y, params["w2"]), params["g2"], params["b2"])
    N, H, W, C = y.shape
    p = jnp.max(y.reshape(N, H // 2, 2, W // 2, 2, C), axis=(2, 4))
    return jnp.transpose(p, (0, 3, 1, 2)), jnp.transpose(y, (0, 3, 1, 2))


# ------------------------------------ main ------------------------------------

if __name__ == "__main__":
    N, Cin, Cout, H, W = 2, 4, 8, 16, 16

    key = jax.random.PRNGKey(0)
    kx, kw1, kw2 = jax.random.split(key, 3)

    x = jax.random.normal(kx, (N, Cin, H, W), dtype=jnp.float32)   # NCHW, like PyTorch
    params = {
        # conv weights in HWIO layout (3, 3, Cin, Cout); deterministic init
        "w1": 0.1 * jax.random.normal(kw1, (3, 3, Cin, Cout), dtype=jnp.float32),
        "w2": 0.1 * jax.random.normal(kw2, (3, 3, Cout, Cout), dtype=jnp.float32),
        # BatchNorm affine params (PyTorch default init: weight=1, bias=0)
        "g1": jnp.ones((Cout,), jnp.float32), "b1": jnp.zeros((Cout,), jnp.float32),
        "g2": jnp.ones((Cout,), jnp.float32), "b2": jnp.zeros((Cout,), jnp.float32),
    }

    pooled, feat = jax.jit(down_conv_forward)(x, params)
    pooled = jax.block_until_ready(pooled)
    feat = jax.block_until_ready(feat)

    ref_pooled, ref_feat = ref_forward(x, params)
    assert pooled.shape == (N, Cout, H // 2, W // 2) and feat.shape == (N, Cout, H, W)

    # bf16 MXU operands + bf16 intermediate storage -> compare against the pure
    # f32 reference with a correspondingly loose tolerance.
    err_f = float(jnp.max(jnp.abs(feat - ref_feat)))
    err_p = float(jnp.max(jnp.abs(pooled - ref_pooled)))
    assert jnp.allclose(feat, ref_feat, rtol=5e-2, atol=5e-2), f"feat max err {err_f}"
    assert jnp.allclose(pooled, ref_pooled, rtol=5e-2, atol=5e-2), f"pool max err {err_p}"

    print("KERNEL_OK")
</pallas_src>

<mosaic_0001>
module attributes {stable_mosaic.version = 11 : i64} {
  func.func @kernel(%arg0: i32, %arg1: memref<1x16x16x4xf32, #tpu.memory_space<vmem>>, %arg2: memref<3x3x4x8xbf16, #tpu.memory_space<vmem>>, %arg3: memref<1x16x16x8xbf16, #tpu.memory_space<vmem>>, %arg4: memref<1x2x8xf32, #tpu.memory_space<vmem>>, %arg5: memref<18x18x4xf32, #tpu.memory_space<vmem>>) attributes {dimension_semantics = [#tpu.dimension_semantics<parallel>], iteration_bounds = array<i64: 2>, scalar_prefetch = 0 : i64, scratch_operands = 1 : i64, tpu.core_type = #tpu.core_type<tc>, window_params = [{transform_indices = @transform_0, window_bounds = array<i64: 1, 16, 16, 4>}, {pipeline_mode = #tpu.pipeline_mode<synchronous>, transform_indices = @transform_1, window_bounds = array<i64: 3, 3, 4, 8>}, {transform_indices = @transform_2, window_bounds = array<i64: 1, 16, 16, 8>}, {transform_indices = @transform_3, window_bounds = array<i64: 1, 2, 8>}]} {
    %c0 = arith.constant 0 : index
    %c0_0 = arith.constant 0 : index
    %c0_1 = arith.constant 0 : index
    %c0_2 = arith.constant 0 : index
    %0 = vector.load %arg1[%c0, %c0_0, %c0_1, %c0_2] : memref<1x16x16x4xf32, #tpu.memory_space<vmem>>, vector<1x16x16x4xf32>
    %cst = arith.constant 0.000000e+00 : f32
    %1 = vector.broadcast %cst : f32 to vector<18x18x4xf32>
    %c0_3 = arith.constant 0 : index
    %c0_4 = arith.constant 0 : index
    %c0_5 = arith.constant 0 : index
    %2 = vector.load %arg5[%c0_3, %c0_4, %c0_5] : memref<18x18x4xf32, #tpu.memory_space<vmem>>, vector<18x18x4xf32>
    tpu.vector_store %arg5[%c0_3, %c0_4, %c0_5], %1 {strides = array<i32>} : memref<18x18x4xf32, #tpu.memory_space<vmem>>, vector<18x18x4xf32>,
    %3 = vector.shape_cast %0 : vector<1x16x16x4xf32> to vector<16x16x4xf32>
    %c1 = arith.constant 1 : index
    %c1_6 = arith.constant 1 : index
    %c0_7 = arith.constant 0 : index
    %4 = vector.load %arg5[%c1, %c1_6, %c0_7] : memref<18x18x4xf32, #tpu.memory_space<vmem>>, vector<16x16x4xf32>
    tpu.vector_store %arg5[%c1, %c1_6, %c0_7], %3 {strides = array<i32>} : memref<18x18x4xf32, #tpu.memory_space<vmem>>, vector<16x16x4xf32>,
    %cst_8 = arith.constant 0.000000e+00 : f32
    %5 = vector.broadcast %cst_8 : f32 to vector<256x8xf32>
    %c0_9 = arith.constant 0 : index
    %c0_10 = arith.constant 0 : index
    %c0_11 = arith.constant 0 : index
    %6 = vector.load %arg5[%c0_9, %c0_10, %c0_11] : memref<18x18x4xf32, #tpu.memory_space<vmem>>, vector<16x16x4xf32>
    %7 = vector.shape_cast %6 : vector<16x16x4xf32> to vector<256x4xf32>
    %8 = arith.truncf %7 : vector<256x4xf32> to vector<256x4xbf16>
    %c0_12 = arith.constant 0 : index
    %c0_13 = arith.constant 0 : index
    %c0_14 = arith.constant 0 : index
    %c0_15 = arith.constant 0 : index
    %9 = vector.load %arg2[%c0_12, %c0_13, %c0_14, %c0_15] : memref<3x3x4x8xbf16, #tpu.memory_space<vmem>>, vector<1x1x4x8xbf16>
    %10 = vector.shape_cast %9 : vector<1x1x4x8xbf16> to vector<4x8xbf16>
    %cst_16 = arith.constant dense<0.000000e+00> : vector<256x8xf32>
    %11 = tpu.matmul %8, %10, %cst_16 {dimension_numbers = #tpu.dot_dimension_numbers<[1], [0], [0], [1], [0, 0, 1, 1], [], []>} : vector<256x4xbf16>, vector<4x8xbf16>, vector<256x8xf32> -> vector<256x8xf32>
    %12 = arith.addf %5, %11 : vector<256x8xf32>
    %c0_17 = arith.constant 0 : index
    %c1_18 = arith.constant 1 : index
    %c0_19 = arith.constant 0 : index
    %13 = vector.load %arg5[%c0_17, %c1_18, %c0_19] : memref<18x18x4xf32, #tpu.memory_space<vmem>>, vector<16x16x4xf32>
    %14 = vector.shape_cast %13 : vector<16x16x4xf32> to vector<256x4xf32>
    %15 = arith.truncf %14 : vector<256x4xf32> to vector<256x4xbf16>
    %c0_20 = arith.constant 0 : index
    %c1_21 = arith.constant 1 : index
    %c0_22 = arith.constant 0 : index
    %c0_23 = arith.constant 0 : index
    %16 = vector.load %arg2[%c0_20, %c1_21, %c0_22, %c0_23] : memref<3x3x4x8xbf16, #tpu.memory_space<vmem>>, vector<1x1x4x8xbf16>
    %17 = vector.shape_cast %16 : vector<1x1x4x8xbf16> to vector<4x8xbf16>
    %cst_24 = arith.constant dense<0.000000e+00> : vector<256x8xf32>
    %18 = tpu.matmul %15, %17, %cst_24 {dimension_numbers = #tpu.dot_dimension_numbers<[1], [0], [0], [1], [0, 0, 1, 1], [], []>} : vector<256x4xbf16>, vector<4x8xbf16>, vector<256x8xf32> -> vector<256x8xf32>
    %19 = arith.addf %12, %18 : vector<256x8xf32>
    %c0_25 = arith.constant 0 : index
    %c2 = arith.constant 2 : index
    %c0_26 = arith.constant 0 : index
    %20 = vector.load %arg5[%c0_25, %c2, %c0_26] : memref<18x18x4xf32, #tpu.memory_space<vmem>>, vector<16x16x4xf32>
    %21 = vector.shape_cast %20 : vector<16x16x4xf32> to vector<256x4xf32>
    %22 = arith.truncf %21 : vector<256x4xf32> to vector<256x4xbf16>
    %c0_27 = arith.constant 0 : index
    %c2_28 = arith.constant 2 : index
    %c0_29 = arith.constant 0 : index
    %c0_30 = arith.constant 0 : index
    %23 = vector.load %arg2[%c0_27, %c2_28, %c0_29, %c0_30] : memref<3x3x4x8xbf16, #tpu.memory_space<vmem>>, vector<1x1x4x8xbf16>
    %24 = vector.shape_cast %23 : vector<1x1x4x8xbf16> to vector<4x8xbf16>
    %cst_31 = arith.constant dense<0.000000e+00> : vector<256x8xf32>
    %25 = tpu.matmul %22, %24, %cst_31 {dimension_numbers = #tpu.dot_dimension_numbers<[1], [0], [0], [1], [0, 0, 1, 1], [], []>} : vector<256x4xbf16>, vector<4x8xbf16>, vector<256x8xf32> -> vector<256x8xf32>
    %26 = arith.addf %19, %25 : vector<256x8xf32>
    %c1_32 = arith.constant 1 : index
    %c0_33 = arith.constant 0 : index
    %c0_34 = arith.constant 0 : index
    %27 = vector.load %arg5[%c1_32, %c0_33, %c0_34] : memref<18x18x4xf32, #tpu.memory_space<vmem>>, vector<16x16x4xf32>
    %28 = vector.shape_cast %27 : vector<16x16x4xf32> to vector<256x4xf32>
    %29 = arith.truncf %28 : vector<256x4xf32> to vector<256x4xbf16>
    %c1_35 = arith.constant 1 : index
    %c0_36 = arith.constant 0 : index
    %c0_37 = arith.constant 0 : index
    %c0_38 = arith.constant 0 : index
    %30 = vector.load %arg2[%c1_35, %c0_36, %c0_37, %c0_38] : memref<3x3x4x8xbf16, #tpu.memory_space<vmem>>, vector<1x1x4x8xbf16>
    %31 = vector.shape_cast %30 : vector<1x1x4x8xbf16> to vector<4x8xbf16>
    %cst_39 = arith.constant dense<0.000000e+00> : vector<256x8xf32>
    %32 = tpu.matmul %29, %31, %cst_39 {dimension_numbers = #tpu.dot_dimension_numbers<[1], [0], [0], [1], [0, 0, 1, 1], [], []>} : vector<256x4xbf16>, vector<4x8xbf16>, vector<256x8xf32> -> vector<256x8xf32>
    %33 = arith.addf %26, %32 : vector<256x8xf32>
    %c1_40 = arith.constant 1 : index
    %c1_41 = arith.constant 1 : index
    %c0_42 = arith.constant 0 : index
    %34 = vector.load %arg5[%c1_40, %c1_41, %c0_42] : memref<18x18x4xf32, #tpu.memory_space<vmem>>, vector<16x16x4xf32>
    %35 = vector.shape_cast %34 : vector<16x16x4xf32> to vector<256x4xf32>
    %36 = arith.truncf %35 : vector<256x4xf32> to vector<256x4xbf16>
    %c1_43 = arith.constant 1 : index
    %c1_44 = arith.constant 1 : index
    %c0_45 = arith.constant 0 : index
    %c0_46 = arith.constant 0 : index
    %37 = vector.load %arg2[%c1_43, %c1_44, %c0_45, %c0_46] : memref<3x3x4x8xbf16, #tpu.memory_space<vmem>>, vector<1x1x4x8xbf16>
    %38 = vector.shape_cast %37 : vector<1x1x4x8xbf16> to vector<4x8xbf16>
    %cst_47 = arith.constant dense<0.000000e+00> : vector<256x8xf32>
    %39 = tpu.matmul %36, %38, %cst_47 {dimension_numbers = #tpu.dot_dimension_numbers<[1], [0], [0], [1], [0, 0, 1, 1], [], []>} : vector<256x4xbf16>, vector<4x8xbf16>, vector<256x8xf32> -> vector<256x8xf32>
    %40 = arith.addf %33, %39 : vector<256x8xf32>
    %c1_48 = arith.constant 1 : index
    %c2_49 = arith.constant 2 : index
    %c0_50 = arith.constant 0 : index
    %41 = vector.load %arg5[%c1_48, %c2_49, %c0_50] : memref<18x18x4xf32, #tpu.memory_space<vmem>>, vector<16x16x4xf32>
    %42 = vector.shape_cast %41 : vector<16x16x4xf32> to vector<256x4xf32>
    %43 = arith.truncf %42 : vector<256x4xf32> to vector<256x4xbf16>
    %c1_51 = arith.constant 1 : index
    %c2_52 = arith.constant 2 : index
    %c0_53 = arith.constant 0 : index
    %c0_54 = arith.constant 0 : index
    %44 = vector.load %arg2[%c1_51, %c2_52, %c0_53, %c0_54] : memref<3x3x4x8xbf16, #tpu.memory_space<vmem>>, vector<1x1x4x8xbf16>
    %45 = vector.shape_cast %44 : vector<1x1x4x8xbf16> to vector<4x8xbf16>
    %cst_55 = arith.constant dense<0.000000e+00> : vector<256x8xf32>
    %46 = tpu.matmul %43, %45, %cst_55 {dimension_numbers = #tpu.dot_dimension_numbers<[1], [0], [0], [1], [0, 0, 1, 1], [], []>} : vector<256x4xbf16>, vector<4x8xbf16>, vector<256x8xf32> -> vector<256x8xf32>
    %47 = arith.addf %40, %46 : vector<256x8xf32>
    %c2_56 = arith.constant 2 : index
    %c0_57 = arith.constant 0 : index
    %c0_58 = arith.constant 0 : index
    %48 = vector.load %arg5[%c2_56, %c0_57, %c0_58] : memref<18x18x4xf32, #tpu.memory_space<vmem>>, vector<16x16x4xf32>
    %49 = vector.shape_cast %48 : vector<16x16x4xf32> to vector<256x4xf32>
    %50 = arith.truncf %49 : vector<256x4xf32> to vector<256x4xbf16>
    %c2_59 = arith.constant 2 : index
    %c0_60 = arith.constant 0 : index
    %c0_61 = arith.constant 0 : index
    %c0_62 = arith.constant 0 : index
    %51 = vector.load %arg2[%c2_59, %c0_60, %c0_61, %c0_62] : memref<3x3x4x8xbf16, #tpu.memory_space<vmem>>, vector<1x1x4x8xbf16>
    %52 = vector.shape_cast %51 : vector<1x1x4x8xbf16> to vector<4x8xbf16>
    %cst_63 = arith.constant dense<0.000000e+00> : vector<256x8xf32>
    %53 = tpu.matmul %50, %52, %cst_63 {dimension_numbers = #tpu.dot_dimension_numbers<[1], [0], [0], [1], [0, 0, 1, 1], [], []>} : vector<256x4xbf16>, vector<4x8xbf16>, vector<256x8xf32> -> vector<256x8xf32>
    %54 = arith.addf %47, %53 : vector<256x8xf32>
    %c2_64 = arith.constant 2 : index
    %c1_65 = arith.constant 1 : index
    %c0_66 = arith.constant 0 : index
    %55 = vector.load %arg5[%c2_64, %c1_65, %c0_66] : memref<18x18x4xf32, #tpu.memory_space<vmem>>, vector<16x16x4xf32>
    %56 = vector.shape_cast %55 : vector<16x16x4xf32> to vector<256x4xf32>
    %57 = arith.truncf %56 : vector<256x4xf32> to vector<256x4xbf16>
    %c2_67 = arith.constant 2 : index
    %c1_68 = arith.constant 1 : index
    %c0_69 = arith.constant 0 : index
    %c0_70 = arith.constant 0 : index
    %58 = vector.load %arg2[%c2_67, %c1_68, %c0_69, %c0_70] : memref<3x3x4x8xbf16, #tpu.memory_space<vmem>>, vector<1x1x4x8xbf16>
    %59 = vector.shape_cast %58 : vector<1x1x4x8xbf16> to vector<4x8xbf16>
    %cst_71 = arith.constant dense<0.000000e+00> : vector<256x8xf32>
    %60 = tpu.matmul %57, %59, %cst_71 {dimension_numbers = #tpu.dot_dimension_numbers<[1], [0], [0], [1], [0, 0, 1, 1], [], []>} : vector<256x4xbf16>, vector<4x8xbf16>, vector<256x8xf32> -> vector<256x8xf32>
    %61 = arith.addf %54, %60 : vector<256x8xf32>
    %c2_72 = arith.constant 2 : index
    %c2_73 = arith.constant 2 : index
    %c0_74 = arith.constant 0 : index
    %62 = vector.load %arg5[%c2_72, %c2_73, %c0_74] : memref<18x18x4xf32, #tpu.memory_space<vmem>>, vector<16x16x4xf32>
    %63 = vector.shape_cast %62 : vector<16x16x4xf32> to vector<256x4xf32>
    %64 = arith.truncf %63 : vector<256x4xf32> to vector<256x4xbf16>
    %c2_75 = arith.constant 2 : index
    %c2_76 = arith.constant 2 : index
    %c0_77 = arith.constant 0 : index
    %c0_78 = arith.constant 0 : index
    %65 = vector.load %arg2[%c2_75, %c2_76, %c0_77, %c0_78] : memref<3x3x4x8xbf16, #tpu.memory_space<vmem>>, vector<1x1x4x8xbf16>
    %66 = vector.shape_cast %65 : vector<1x1x4x8xbf16> to vector<4x8xbf16>
    %cst_79 = arith.constant dense<0.000000e+00> : vector<256x8xf32>
    %67 = tpu.matmul %64, %66, %cst_79 {dimension_numbers = #tpu.dot_dimension_numbers<[1], [0], [0], [1], [0, 0, 1, 1], [], []>} : vector<256x4xbf16>, vector<4x8xbf16>, vector<256x8xf32> -> vector<256x8xf32>
    %68 = arith.addf %61, %67 : vector<256x8xf32>
    %69 = vector.shape_cast %68 : vector<256x8xf32> to vector<1x16x16x8xf32>
    %70 = arith.truncf %69 : vector<1x16x16x8xf32> to vector<1x16x16x8xbf16>
    %c0_80 = arith.constant 0 : index
    %c0_81 = arith.constant 0 : index
    %c0_82 = arith.constant 0 : index
    %c0_83 = arith.constant 0 : index
    %71 = vector.load %arg3[%c0_80, %c0_81, %c0_82, %c0_83] : memref<1x16x16x8xbf16, #tpu.memory_space<vmem>>, vector<1x16x16x8xbf16>
    tpu.vector_store %arg3[%c0_80, %c0_81, %c0_82, %c0_83], %70 {strides = array<i32>} : memref<1x16x16x8xbf16, #tpu.memory_space<vmem>>, vector<1x16x16x8xbf16>,
    %cst_84 = arith.constant dense<0.000000e+00> : vector<8xf32>
    %72 = vector.multi_reduction <add>, %68, %cst_84 [0] : vector<256x8xf32> to vector<8xf32>
    %73 = vector.shape_cast %72 : vector<8xf32> to vector<1x8xf32>
    %74 = arith.mulf %68, %68 : vector<256x8xf32>
    %cst_85 = arith.constant dense<0.000000e+00> : vector<8xf32>
    %75 = vector.multi_reduction <add>, %74, %cst_85 [0] : vector<256x8xf32> to vector<8xf32>
    %76 = vector.shape_cast %75 : vector<8xf32> to vector<1x8xf32>
    %77 = tpu.concatenate %73, %76 in 0 : vector<1x8xf32>, vector<1x8xf32> -> vector<2x8xf32>
    %78 = vector.shape_cast %77 : vector<2x8xf32> to vector<1x2x8xf32>
    %c0_86 = arith.constant 0 : index
    %c0_87 = arith.constant 0 : index
    %c0_88 = arith.constant 0 : index
    %79 = vector.load %arg4[%c0_86, %c0_87, %c0_88] : memref<1x2x8xf32, #tpu.memory_space<vmem>>, vector<1x2x8xf32>
    tpu.vector_store %arg4[%c0_86, %c0_87, %c0_88], %78 {strides = array<i32>} : memref<1x2x8xf32, #tpu.memory_space<vmem>>, vector<1x2x8xf32>,
    return
  }
  func.func @transform_0(%arg0: i32) -> (i32, i32, i32, i32) {
    %c0_i32 = arith.constant 0 : i32
    %c0_i32_0 = arith.constant 0 : i32
    %c0_i32_1 = arith.constant 0 : i32
    %c0_i32_2 = arith.constant 0 : i32
    return %arg0, %c0_i32, %c0_i32_0, %c0_i32_1 : i32, i32, i32, i32
  }
  func.func @transform_1(%arg0: i32) -> (i32, i32, i32, i32) {
    %c0_i32 = arith.constant 0 : i32
    %c0_i32_0 = arith.constant 0 : i32
    %c0_i32_1 = arith.constant 0 : i32
    %c0_i32_2 = arith.constant 0 : i32
    %c0_i32_3 = arith.constant 0 : i32
    return %c0_i32, %c0_i32_0, %c0_i32_1, %c0_i32_2 : i32, i32, i32, i32
  }
  func.func @transform_2(%arg0: i32) -> (i32, i32, i32, i32) {
    %c0_i32 = arith.constant 0 : i32
    %c0_i32_0 = arith.constant 0 : i32
    %c0_i32_1 = arith.constant 0 : i32
    %c0_i32_2 = arith.constant 0 : i32
    return %arg0, %c0_i32, %c0_i32_0, %c0_i32_1 : i32, i32, i32, i32
  }
  func.func @transform_3(%arg0: i32) -> (i32, i32, i32) {
    %c0_i32 = arith.constant 0 : i32
    %c0_i32_0 = arith.constant 0 : i32
    %c0_i32_1 = arith.constant 0 : i32
    return %arg0, %c0_i32, %c0_i32_0 : i32, i32, i32
  }
}

module attributes {stable_mosaic.version = 11 : i64} {
  func.func @kernel(%arg0: i32, %arg1: memref<1x16x16x8xbf16, #tpu.memory_space<vmem>>, %arg2: memref<1x1x1x8xf32, #tpu.memory_space<vmem>>, %arg3: memref<1x1x1x8xf32, #tpu.memory_space<vmem>>, %arg4: memref<1x16x16x8xf32, #tpu.memory_space<vmem>>, %arg5: memref<1x8x8x8xf32, #tpu.memory_space<vmem>>) attributes {dimension_semantics = [#tpu.dimension_semantics<parallel>], iteration_bounds = array<i64: 2>, scalar_prefetch = 0 : i64, scratch_operands = 0 : i64, tpu.core_type = #tpu.core_type<tc>, window_params = [{transform_indices = @transform_0, window_bounds = array<i64: 1, 16, 16, 8>}, {pipeline_mode = #tpu.pipeline_mode<synchronous>, transform_indices = @transform_1, window_bounds = array<i64: 1, 1, 1, 8>}, {pipeline_mode = #tpu.pipeline_mode<synchronous>, transform_indices = @transform_2, window_bounds = array<i64: 1, 1, 1, 8>}, {transform_indices = @transform_3, window_bounds = array<i64: 1, 16, 16, 8>}, {transform_indices = @transform_4, window_bounds = array<i64: 1, 8, 8, 8>}]} {
    %c0 = arith.constant 0 : index
    %c0_0 = arith.constant 0 : index
    %c0_1 = arith.constant 0 : index
    %c0_2 = arith.constant 0 : index
    %0 = vector.load %arg1[%c0, %c0_0, %c0_1, %c0_2] : memref<1x16x16x8xbf16, #tpu.memory_space<vmem>>, vector<1x16x16x8xbf16>
    %1 = arith.extf %0 : vector<1x16x16x8xbf16> to vector<1x16x16x8xf32>
    %c0_3 = arith.constant 0 : index
    %c0_4 = arith.constant 0 : index
    %c0_5 = arith.constant 0 : index
    %c0_6 = arith.constant 0 : index
    %2 = vector.load %arg2[%c0_3, %c0_4, %c0_5, %c0_6] : memref<1x1x1x8xf32, #tpu.memory_space<vmem>>, vector<1x1x1x8xf32>
    %3 = vector.broadcast %2 : vector<1x1x1x8xf32> to vector<1x16x16x8xf32>
    %4 = arith.mulf %1, %3 : vector<1x16x16x8xf32>
    %c0_7 = arith.constant 0 : index
    %c0_8 = arith.constant 0 : index
    %c0_9 = arith.constant 0 : index
    %c0_10 = arith.constant 0 : index
    %5 = vector.load %arg3[%c0_7, %c0_8, %c0_9, %c0_10] : memref<1x1x1x8xf32, #tpu.memory_space<vmem>>, vector<1x1x1x8xf32>
    %6 = vector.broadcast %5 : vector<1x1x1x8xf32> to vector<1x16x16x8xf32>
    %7 = arith.addf %4, %6 : vector<1x16x16x8xf32>
    %cst = arith.constant 0.000000e+00 : f32
    %8 = vector.broadcast %cst : f32 to vector<1x16x16x8xf32>
    %9 = arith.maximumf %7, %8 : vector<1x16x16x8xf32>
    %c0_11 = arith.constant 0 : index
    %c0_12 = arith.constant 0 : index
    %c0_13 = arith.constant 0 : index
    %c0_14 = arith.constant 0 : index
    %10 = vector.load %arg4[%c0_11, %c0_12, %c0_13, %c0_14] : memref<1x16x16x8xf32, #tpu.memory_space<vmem>>, vector<1x16x16x8xf32>
    tpu.vector_store %arg4[%c0_11, %c0_12, %c0_13, %c0_14], %9 {strides = array<i32>} : memref<1x16x16x8xf32, #tpu.memory_space<vmem>>, vector<1x16x16x8xf32>,
    %11 = vector.shape_cast %9 : vector<1x16x16x8xf32> to vector<8x2x8x2x8xf32>
    %cst_15 = arith.constant dense<0xFF800000> : vector<8x2x8x8xf32>
    %12 = vector.multi_reduction <maximumf>, %11, %cst_15 [3] : vector<8x2x8x2x8xf32> to vector<8x2x8x8xf32>
    %cst_16 = arith.constant dense<0xFF800000> : vector<8x8x8xf32>
    %13 = vector.multi_reduction <maximumf>, %12, %cst_16 [1] : vector<8x2x8x8xf32> to vector<8x8x8xf32>
    %14 = vector.shape_cast %13 : vector<8x8x8xf32> to vector<1x8x8x8xf32>
    %c0_17 = arith.constant 0 : index
    %c0_18 = arith.constant 0 : index
    %c0_19 = arith.constant 0 : index
    %c0_20 = arith.constant 0 : index
    %15 = vector.load %arg5[%c0_17, %c0_18, %c0_19, %c0_20] : memref<1x8x8x8xf32, #tpu.memory_space<vmem>>, vector<1x8x8x8xf32>
    tpu.vector_store %arg5[%c0_17, %c0_18, %c0_19, %c0_20], %14 {strides = array<i32>} : memref<1x8x8x8xf32, #tpu.memory_space<vmem>>, vector<1x8x8x8xf32>,
    return
  }
  func.func @transform_0(%arg0: i32) -> (i32, i32, i32, i32) {
    %c0_i32 = arith.constant 0 : i32
    %c0_i32_0 = arith.constant 0 : i32
    %c0_i32_1 = arith.constant 0 : i32
    %c0_i32_2 = arith.constant 0 : i32
    return %arg0, %c0_i32, %c0_i32_0, %c0_i32_1 : i32, i32, i32, i32
  }
  func.func @transform_1(%arg0: i32) -> (i32, i32, i32, i32) {
    %c0_i32 = arith.constant 0 : i32
    %c0_i32_0 = arith.constant 0 : i32
    %c0_i32_1 = arith.constant 0 : i32
    %c0_i32_2 = arith.constant 0 : i32
    %c0_i32_3 = arith.constant 0 : i32
    return %c0_i32, %c0_i32_0, %c0_i32_1, %c0_i32_2 : i32, i32, i32, i32
  }
  func.func @transform_2(%arg0: i32) -> (i32, i32, i32, i32) {
    %c0_i32 = arith.constant 0 : i32
    %c0_i32_0 = arith.constant 0 : i32
    %c0_i32_1 = arith.constant 0 : i32
    %c0_i32_2 = arith.constant 0 : i32
    %c0_i32_3 = arith.constant 0 : i32
    return %c0_i32, %c0_i32_0, %c0_i32_1, %c0_i32_2 : i32, i32, i32, i32
  }
  func.func @transform_3(%arg0: i32) -> (i32, i32, i32, i32) {
    %c0_i32 = arith.constant 0 : i32
    %c0_i32_0 = arith.constant 0 : i32
    %c0_i32_1 = arith.constant 0 : i32
    %c0_i32_2 = arith.constant 0 : i32
    return %arg0, %c0_i32, %c0_i32_0, %c0_i32_1 : i32, i32, i32, i32
  }
  func.func @transform_4(%arg0: i32) -> (i32, i32, i32, i32) {
    %c0_i32 = arith.constant 0 : i32
    %c0_i32_0 = arith.constant 0 : i32
    %c0_i32_1 = arith.constant 0 : i32
    %c0_i32_2 = arith.constant 0 : i32
    return %arg0, %c0_i32, %c0_i32_0, %c0_i32_1 : i32, i32, i32, i32
  }
}

module attributes {stable_mosaic.version = 11 : i64} {
  func.func @kernel(%arg0: i32, %arg1: memref<1x16x16x8xbf16, #tpu.memory_space<vmem>>, %arg2: memref<3x3x8x8xbf16, #tpu.memory_space<vmem>>, %arg3: memref<1x1x1x8xf32, #tpu.memory_space<vmem>>, %arg4: memref<1x1x1x8xf32, #tpu.memory_space<vmem>>, %arg5: memref<1x16x16x8xbf16, #tpu.memory_space<vmem>>, %arg6: memref<1x2x8xf32, #tpu.memory_space<vmem>>, %arg7: memref<18x18x8xf32, #tpu.memory_space<vmem>>) attributes {dimension_semantics = [#tpu.dimension_semantics<parallel>], iteration_bounds = array<i64: 2>, scalar_prefetch = 0 : i64, scratch_operands = 1 : i64, tpu.core_type = #tpu.core_type<tc>, window_params = [{transform_indices = @transform_0, window_bounds = array<i64: 1, 16, 16, 8>}, {pipeline_mode = #tpu.pipeline_mode<synchronous>, transform_indices = @transform_1, window_bounds = array<i64: 3, 3, 8, 8>}, {pipeline_mode = #tpu.pipeline_mode<synchronous>, transform_indices = @transform_2, window_bounds = array<i64: 1, 1, 1, 8>}, {pipeline_mode = #tpu.pipeline_mode<synchronous>, transform_indices = @transform_3, window_bounds = array<i64: 1, 1, 1, 8>}, {transform_indices = @transform_4, window_bounds = array<i64: 1, 16, 16, 8>}, {transform_indices = @transform_5, window_bounds = array<i64: 1, 2, 8>}]} {
    %c0 = arith.constant 0 : index
    %c0_0 = arith.constant 0 : index
    %c0_1 = arith.constant 0 : index
    %c0_2 = arith.constant 0 : index
    %0 = vector.load %arg1[%c0, %c0_0, %c0_1, %c0_2] : memref<1x16x16x8xbf16, #tpu.memory_space<vmem>>, vector<1x16x16x8xbf16>
    %1 = arith.extf %0 : vector<1x16x16x8xbf16> to vector<1x16x16x8xf32>
    %c0_3 = arith.constant 0 : index
    %c0_4 = arith.constant 0 : index
    %c0_5 = arith.constant 0 : index
    %c0_6 = arith.constant 0 : index
    %2 = vector.load %arg3[%c0_3, %c0_4, %c0_5, %c0_6] : memref<1x1x1x8xf32, #tpu.memory_space<vmem>>, vector<1x1x1x8xf32>
    %3 = vector.broadcast %2 : vector<1x1x1x8xf32> to vector<1x16x16x8xf32>
    %4 = arith.mulf %1, %3 : vector<1x16x16x8xf32>
    %c0_7 = arith.constant 0 : index
    %c0_8 = arith.constant 0 : index
    %c0_9 = arith.constant 0 : index
    %c0_10 = arith.constant 0 : index
    %5 = vector.load %arg4[%c0_7, %c0_8, %c0_9, %c0_10] : memref<1x1x1x8xf32, #tpu.memory_space<vmem>>, vector<1x1x1x8xf32>
    %6 = vector.broadcast %5 : vector<1x1x1x8xf32> to vector<1x16x16x8xf32>
    %7 = arith.addf %4, %6 : vector<1x16x16x8xf32>
    %cst = arith.constant 0.000000e+00 : f32
    %8 = vector.broadcast %cst : f32 to vector<1x16x16x8xf32>
    %9 = arith.maximumf %7, %8 : vector<1x16x16x8xf32>
    %cst_11 = arith.constant 0.000000e+00 : f32
    %10 = vector.broadcast %cst_11 : f32 to vector<18x18x8xf32>
    %c0_12 = arith.constant 0 : index
    %c0_13 = arith.constant 0 : index
    %c0_14 = arith.constant 0 : index
    %11 = vector.load %arg7[%c0_12, %c0_13, %c0_14] : memref<18x18x8xf32, #tpu.memory_space<vmem>>, vector<18x18x8xf32>
    tpu.vector_store %arg7[%c0_12, %c0_13, %c0_14], %10 {strides = array<i32>} : memref<18x18x8xf32, #tpu.memory_space<vmem>>, vector<18x18x8xf32>,
    %12 = vector.shape_cast %9 : vector<1x16x16x8xf32> to vector<16x16x8xf32>
    %c1 = arith.constant 1 : index
    %c1_15 = arith.constant 1 : index
    %c0_16 = arith.constant 0 : index
    %13 = vector.load %arg7[%c1, %c1_15, %c0_16] : memref<18x18x8xf32, #tpu.memory_space<vmem>>, vector<16x16x8xf32>
    tpu.vector_store %arg7[%c1, %c1_15, %c0_16], %12 {strides = array<i32>} : memref<18x18x8xf32, #tpu.memory_space<vmem>>, vector<16x16x8xf32>,
    %cst_17 = arith.constant 0.000000e+00 : f32
    %14 = vector.broadcast %cst_17 : f32 to vector<256x8xf32>
    %c0_18 = arith.constant 0 : index
    %c0_19 = arith.constant 0 : index
    %c0_20 = arith.constant 0 : index
    %15 = vector.load %arg7[%c0_18, %c0_19, %c0_20] : memref<18x18x8xf32, #tpu.memory_space<vmem>>, vector<16x16x8xf32>
    %16 = vector.shape_cast %15 : vector<16x16x8xf32> to vector<256x8xf32>
    %17 = arith.truncf %16 : vector<256x8xf32> to vector<256x8xbf16>
    %c0_21 = arith.constant 0 : index
    %c0_22 = arith.constant 0 : index
    %c0_23 = arith.constant 0 : index
    %c0_24 = arith.constant 0 : index
    %18 = vector.load %arg2[%c0_21, %c0_22, %c0_23, %c0_24] : memref<3x3x8x8xbf16, #tpu.memory_space<vmem>>, vector<1x1x8x8xbf16>
    %19 = vector.shape_cast %18 : vector<1x1x8x8xbf16> to vector<8x8xbf16>
    %cst_25 = arith.constant dense<0.000000e+00> : vector<256x8xf32>
    %20 = tpu.matmul %17, %19, %cst_25 {dimension_numbers = #tpu.dot_dimension_numbers<[1], [0], [0], [1], [0, 0, 1, 1], [], []>} : vector<256x8xbf16>, vector<8x8xbf16>, vector<256x8xf32> -> vector<256x8xf32>
    %21 = arith.addf %14, %20 : vector<256x8xf32>
    %c0_26 = arith.constant 0 : index
    %c1_27 = arith.constant 1 : index
    %c0_28 = arith.constant 0 : index
    %22 = vector.load %arg7[%c0_26, %c1_27, %c0_28] : memref<18x18x8xf32, #tpu.memory_space<vmem>>, vector<16x16x8xf32>
    %23 = vector.shape_cast %22 : vector<16x16x8xf32> to vector<256x8xf32>
    %24 = arith.truncf %23 : vector<256x8xf32> to vector<256x8xbf16>
    %c0_29 = arith.constant 0 : index
    %c1_30 = arith.constant 1 : index
    %c0_31 = arith.constant 0 : index
    %c0_32 = arith.constant 0 : index
    %25 = vector.load %arg2[%c0_29, %c1_30, %c0_31, %c0_32] : memref<3x3x8x8xbf16, #tpu.memory_space<vmem>>, vector<1x1x8x8xbf16>
    %26 = vector.shape_cast %25 : vector<1x1x8x8xbf16> to vector<8x8xbf16>
    %cst_33 = arith.constant dense<0.000000e+00> : vector<256x8xf32>
    %27 = tpu.matmul %24, %26, %cst_33 {dimension_numbers = #tpu.dot_dimension_numbers<[1], [0], [0], [1], [0, 0, 1, 1], [], []>} : vector<256x8xbf16>, vector<8x8xbf16>, vector<256x8xf32> -> vector<256x8xf32>
    %28 = arith.addf %21, %27 : vector<256x8xf32>
    %c0_34 = arith.constant 0 : index
    %c2 = arith.constant 2 : index
    %c0_35 = arith.constant 0 : index
    %29 = vector.load %arg7[%c0_34, %c2, %c0_35] : memref<18x18x8xf32, #tpu.memory_space<vmem>>, vector<16x16x8xf32>
    %30 = vector.shape_cast %29 : vector<16x16x8xf32> to vector<256x8xf32>
    %31 = arith.truncf %30 : vector<256x8xf32> to vector<256x8xbf16>
    %c0_36 = arith.constant 0 : index
    %c2_37 = arith.constant 2 : index
    %c0_38 = arith.constant 0 : index
    %c0_39 = arith.constant 0 : index
    %32 = vector.load %arg2[%c0_36, %c2_37, %c0_38, %c0_39] : memref<3x3x8x8xbf16, #tpu.memory_space<vmem>>, vector<1x1x8x8xbf16>
    %33 = vector.shape_cast %32 : vector<1x1x8x8xbf16> to vector<8x8xbf16>
    %cst_40 = arith.constant dense<0.000000e+00> : vector<256x8xf32>
    %34 = tpu.matmul %31, %33, %cst_40 {dimension_numbers = #tpu.dot_dimension_numbers<[1], [0], [0], [1], [0, 0, 1, 1], [], []>} : vector<256x8xbf16>, vector<8x8xbf16>, vector<256x8xf32> -> vector<256x8xf32>
    %35 = arith.addf %28, %34 : vector<256x8xf32>
    %c1_41 = arith.constant 1 : index
    %c0_42 = arith.constant 0 : index
    %c0_43 = arith.constant 0 : index
    %36 = vector.load %arg7[%c1_41, %c0_42, %c0_43] : memref<18x18x8xf32, #tpu.memory_space<vmem>>, vector<16x16x8xf32>
    %37 = vector.shape_cast %36 : vector<16x16x8xf32> to vector<256x8xf32>
    %38 = arith.truncf %37 : vector<256x8xf32> to vector<256x8xbf16>
    %c1_44 = arith.constant 1 : index
    %c0_45 = arith.constant 0 : index
    %c0_46 = arith.constant 0 : index
    %c0_47 = arith.constant 0 : index
    %39 = vector.load %arg2[%c1_44, %c0_45, %c0_46, %c0_47] : memref<3x3x8x8xbf16, #tpu.memory_space<vmem>>, vector<1x1x8x8xbf16>
    %40 = vector.shape_cast %39 : vector<1x1x8x8xbf16> to vector<8x8xbf16>
    %cst_48 = arith.constant dense<0.000000e+00> : vector<256x8xf32>
    %41 = tpu.matmul %38, %40, %cst_48 {dimension_numbers = #tpu.dot_dimension_numbers<[1], [0], [0], [1], [0, 0, 1, 1], [], []>} : vector<256x8xbf16>, vector<8x8xbf16>, vector<256x8xf32> -> vector<256x8xf32>
    %42 = arith.addf %35, %41 : vector<256x8xf32>
    %c1_49 = arith.constant 1 : index
    %c1_50 = arith.constant 1 : index
    %c0_51 = arith.constant 0 : index
    %43 = vector.load %arg7[%c1_49, %c1_50, %c0_51] : memref<18x18x8xf32, #tpu.memory_space<vmem>>, vector<16x16x8xf32>
    %44 = vector.shape_cast %43 : vector<16x16x8xf32> to vector<256x8xf32>
    %45 = arith.truncf %44 : vector<256x8xf32> to vector<256x8xbf16>
    %c1_52 = arith.constant 1 : index
    %c1_53 = arith.constant 1 : index
    %c0_54 = arith.constant 0 : index
    %c0_55 = arith.constant 0 : index
    %46 = vector.load %arg2[%c1_52, %c1_53, %c0_54, %c0_55] : memref<3x3x8x8xbf16, #tpu.memory_space<vmem>>, vector<1x1x8x8xbf16>
    %47 = vector.shape_cast %46 : vector<1x1x8x8xbf16> to vector<8x8xbf16>
    %cst_56 = arith.constant dense<0.000000e+00> : vector<256x8xf32>
    %48 = tpu.matmul %45, %47, %cst_56 {dimension_numbers = #tpu.dot_dimension_numbers<[1], [0], [0], [1], [0, 0, 1, 1], [], []>} : vector<256x8xbf16>, vector<8x8xbf16>, vector<256x8xf32> -> vector<256x8xf32>
    %49 = arith.addf %42, %48 : vector<256x8xf32>
    %c1_57 = arith.constant 1 : index
    %c2_58 = arith.constant 2 : index
    %c0_59 = arith.constant 0 : index
    %50 = vector.load %arg7[%c1_57, %c2_58, %c0_59] : memref<18x18x8xf32, #tpu.memory_space<vmem>>, vector<16x16x8xf32>
    %51 = vector.shape_cast %50 : vector<16x16x8xf32> to vector<256x8xf32>
    %52 = arith.truncf %51 : vector<256x8xf32> to vector<256x8xbf16>
    %c1_60 = arith.constant 1 : index
    %c2_61 = arith.constant 2 : index
    %c0_62 = arith.constant 0 : index
    %c0_63 = arith.constant 0 : index
    %53 = vector.load %arg2[%c1_60, %c2_61, %c0_62, %c0_63] : memref<3x3x8x8xbf16, #tpu.memory_space<vmem>>, vector<1x1x8x8xbf16>
    %54 = vector.shape_cast %53 : vector<1x1x8x8xbf16> to vector<8x8xbf16>
    %cst_64 = arith.constant dense<0.000000e+00> : vector<256x8xf32>
    %55 = tpu.matmul %52, %54, %cst_64 {dimension_numbers = #tpu.dot_dimension_numbers<[1], [0], [0], [1], [0, 0, 1, 1], [], []>} : vector<256x8xbf16>, vector<8x8xbf16>, vector<256x8xf32> -> vector<256x8xf32>
    %56 = arith.addf %49, %55 : vector<256x8xf32>
    %c2_65 = arith.constant 2 : index
    %c0_66 = arith.constant 0 : index
    %c0_67 = arith.constant 0 : index
    %57 = vector.load %arg7[%c2_65, %c0_66, %c0_67] : memref<18x18x8xf32, #tpu.memory_space<vmem>>, vector<16x16x8xf32>
    %58 = vector.shape_cast %57 : vector<16x16x8xf32> to vector<256x8xf32>
    %59 = arith.truncf %58 : vector<256x8xf32> to vector<256x8xbf16>
    %c2_68 = arith.constant 2 : index
    %c0_69 = arith.constant 0 : index
    %c0_70 = arith.constant 0 : index
    %c0_71 = arith.constant 0 : index
    %60 = vector.load %arg2[%c2_68, %c0_69, %c0_70, %c0_71] : memref<3x3x8x8xbf16, #tpu.memory_space<vmem>>, vector<1x1x8x8xbf16>
    %61 = vector.shape_cast %60 : vector<1x1x8x8xbf16> to vector<8x8xbf16>
    %cst_72 = arith.constant dense<0.000000e+00> : vector<256x8xf32>
    %62 = tpu.matmul %59, %61, %cst_72 {dimension_numbers = #tpu.dot_dimension_numbers<[1], [0], [0], [1], [0, 0, 1, 1], [], []>} : vector<256x8xbf16>, vector<8x8xbf16>, vector<256x8xf32> -> vector<256x8xf32>
    %63 = arith.addf %56, %62 : vector<256x8xf32>
    %c2_73 = arith.constant 2 : index
    %c1_74 = arith.constant 1 : index
    %c0_75 = arith.constant 0 : index
    %64 = vector.load %arg7[%c2_73, %c1_74, %c0_75] : memref<18x18x8xf32, #tpu.memory_space<vmem>>, vector<16x16x8xf32>
    %65 = vector.shape_cast %64 : vector<16x16x8xf32> to vector<256x8xf32>
    %66 = arith.truncf %65 : vector<256x8xf32> to vector<256x8xbf16>
    %c2_76 = arith.constant 2 : index
    %c1_77 = arith.constant 1 : index
    %c0_78 = arith.constant 0 : index
    %c0_79 = arith.constant 0 : index
    %67 = vector.load %arg2[%c2_76, %c1_77, %c0_78, %c0_79] : memref<3x3x8x8xbf16, #tpu.memory_space<vmem>>, vector<1x1x8x8xbf16>
    %68 = vector.shape_cast %67 : vector<1x1x8x8xbf16> to vector<8x8xbf16>
    %cst_80 = arith.constant dense<0.000000e+00> : vector<256x8xf32>
    %69 = tpu.matmul %66, %68, %cst_80 {dimension_numbers = #tpu.dot_dimension_numbers<[1], [0], [0], [1], [0, 0, 1, 1], [], []>} : vector<256x8xbf16>, vector<8x8xbf16>, vector<256x8xf32> -> vector<256x8xf32>
    %70 = arith.addf %63, %69 : vector<256x8xf32>
    %c2_81 = arith.constant 2 : index
    %c2_82 = arith.constant 2 : index
    %c0_83 = arith.constant 0 : index
    %71 = vector.load %arg7[%c2_81, %c2_82, %c0_83] : memref<18x18x8xf32, #tpu.memory_space<vmem>>, vector<16x16x8xf32>
    %72 = vector.shape_cast %71 : vector<16x16x8xf32> to vector<256x8xf32>
    %73 = arith.truncf %72 : vector<256x8xf32> to vector<256x8xbf16>
    %c2_84 = arith.constant 2 : index
    %c2_85 = arith.constant 2 : index
    %c0_86 = arith.constant 0 : index
    %c0_87 = arith.constant 0 : index
    %74 = vector.load %arg2[%c2_84, %c2_85, %c0_86, %c0_87] : memref<3x3x8x8xbf16, #tpu.memory_space<vmem>>, vector<1x1x8x8xbf16>
    %75 = vector.shape_cast %74 : vector<1x1x8x8xbf16> to vector<8x8xbf16>
    %cst_88 = arith.constant dense<0.000000e+00> : vector<256x8xf32>
    %76 = tpu.matmul %73, %75, %cst_88 {dimension_numbers = #tpu.dot_dimension_numbers<[1], [0], [0], [1], [0, 0, 1, 1], [], []>} : vector<256x8xbf16>, vector<8x8xbf16>, vector<256x8xf32> -> vector<256x8xf32>
    %77 = arith.addf %70, %76 : vector<256x8xf32>
    %78 = vector.shape_cast %77 : vector<256x8xf32> to vector<1x16x16x8xf32>
    %79 = arith.truncf %78 : vector<1x16x16x8xf32> to vector<1x16x16x8xbf16>
    %c0_89 = arith.constant 0 : index
    %c0_90 = arith.constant 0 : index
    %c0_91 = arith.constant 0 : index
    %c0_92 = arith.constant 0 : index
    %80 = vector.load %arg5[%c0_89, %c0_90, %c0_91, %c0_92] : memref<1x16x16x8xbf16, #tpu.memory_space<vmem>>, vector<1x16x16x8xbf16>
    tpu.vector_store %arg5[%c0_89, %c0_90, %c0_91, %c0_92], %79 {strides = array<i32>} : memref<1x16x16x8xbf16, #tpu.memory_space<vmem>>, vector<1x16x16x8xbf16>,
    %cst_93 = arith.constant dense<0.000000e+00> : vector<8xf32>
    %81 = vector.multi_reduction <add>, %77, %cst_93 [0] : vector<256x8xf32> to vector<8xf32>
    %82 = vector.shape_cast %81 : vector<8xf32> to vector<1x8xf32>
    %83 = arith.mulf %77, %77 : vector<256x8xf32>
    %cst_94 = arith.constant dense<0.000000e+00> : vector<8xf32>
    %84 = vector.multi_reduction <add>, %83, %cst_94 [0] : vector<256x8xf32> to vector<8xf32>
    %85 = vector.shape_cast %84 : vector<8xf32> to vector<1x8xf32>
    %86 = tpu.concatenate %82, %85 in 0 : vector<1x8xf32>, vector<1x8xf32> -> vector<2x8xf32>
    %87 = vector.shape_cast %86 : vector<2x8xf32> to vector<1x2x8xf32>
    %c0_95 = arith.constant 0 : index
    %c0_96 = arith.constant 0 : index
    %c0_97 = arith.constant 0 : index
    %88 = vector.load %arg6[%c0_95, %c0_96, %c0_97] : memref<1x2x8xf32, #tpu.memory_space<vmem>>, vector<1x2x8xf32>
    tpu.vector_store %arg6[%c0_95, %c0_96, %c0_97], %87 {strides = array<i32>} : memref<1x2x8xf32, #tpu.memory_space<vmem>>, vector<1x2x8xf32>,
    return
  }
  func.func @transform_0(%arg0: i32) -> (i32, i32, i32, i32) {
    %c0_i32 = arith.constant 0 : i32
    %c0_i32_0 = arith.constant 0 : i32
    %c0_i32_1 = arith.constant 0 : i32
    %c0_i32_2 = arith.constant 0 : i32
    return %arg0, %c0_i32, %c0_i32_0, %c0_i32_1 : i32, i32, i32, i32
  }
  func.func @transform_1(%arg0: i32) -> (i32, i32, i32, i32) {
    %c0_i32 = arith.constant 0 : i32
    %c0_i32_0 = arith.constant 0 : i32
    %c0_i32_1 = arith.constant 0 : i32
    %c0_i32_2 = arith.constant 0 : i32
    %c0_i32_3 = arith.constant 0 : i32
    return %c0_i32, %c0_i32_0, %c0_i32_1, %c0_i32_2 : i32, i32, i32, i32
  }
  func.func @transform_2(%arg0: i32) -> (i32, i32, i32, i32) {
    %c0_i32 = arith.constant 0 : i32
    %c0_i32_0 = arith.constant 0 : i32
    %c0_i32_1 = arith.constant 0 : i32
    %c0_i32_2 = arith.constant 0 : i32
    %c0_i32_3 = arith.constant 0 : i32
    return %c0_i32, %c0_i32_0, %c0_i32_1, %c0_i32_2 : i32, i32, i32, i32
  }
  func.func @transform_3(%arg0: i32) -> (i32, i32, i32, i32) {
    %c0_i32 = arith.constant 0 : i32
    %c0_i32_0 = arith.constant 0 : i32
    %c0_i32_1 = arith.constant 0 : i32
    %c0_i32_2 = arith.constant 0 : i32
    %c0_i32_3 = arith.constant 0 : i32
    return %c0_i32, %c0_i32_0, %c0_i32_1, %c0_i32_2 : i32, i32, i32, i32
  }
  func.func @transform_4(%arg0: i32) -> (i32, i32, i32, i32) {
    %c0_i32 = arith.constant 0 : i32
    %c0_i32_0 = arith.constant 0 : i32
    %c0_i32_1 = arith.constant 0 : i32
    %c0_i32_2 = arith.constant 0 : i32
    return %arg0, %c0_i32, %c0_i32_0, %c0_i32_1 : i32, i32, i32, i32
  }
  func.func @transform_5(%arg0: i32) -> (i32, i32, i32) {
    %c0_i32 = arith.constant 0 : i32
    %c0_i32_0 = arith.constant 0 : i32
    %c0_i32_1 = arith.constant 0 : i32
    return %arg0, %c0_i32, %c0_i32_0 : i32, i32, i32
  }
}

</mosaic_0001>

<bundles_post_ra>
// kernel: down_conv_forward.5
= control target key start
LH: loop header
LB: loop body
LE: loop exit
PB: predicated region body
PF: predicated region fallthrough
CT: control target
= control target key end

     0   :  { %s2584_s15 = smov 0   ;;  %s3834_s0 = inlined_call_operand.vmem [shape: bf16[2,16,16,8], index: 0, kind: input, shape index: {}]   ;;  %s3835_s1 = inlined_call_operand.vmem [shape: f32[1,1,1,8], index: 1, kind: input, shape index: {}]   ;;  %s3836_s2 = inlined_call_operand.vmem [shape: f32[1,1,1,8], index: 2, kind: input, shape index: {}]   ;;  %s3837_s3 = inlined_call_operand.vmem [shape: f32[2,16,16,8], index: 3, kind: output, shape index: {0}]   ;;  %s3838_s4 = inlined_call_operand.vmem [shape: f32[2,8,8,8], index: 4, kind: output, shape index: {1}]  }
   0x1 LB: > { %s2442_s16 = sadd.s32 4294967295, %s2556_s15   ;;  %p2446_p0 = scmp.ge.s32.totalorder %s2556_s15, 1  ;;  %s2556_s15 = sphi %s2584_s15, %s15_s15  }
   0x2   : > { %p165_p1 = scmp.lt.s32.totalorder %s2556_s15, 3 }
   0x4   : > { %p166_p2 = pnand %p2446_p0, %p165_p1 }
   0x6   : > { %169 = sbr.rel (%p166_p2) target bundleno = 383 (0x17f), region = 32 }
   0xb   : > { %p196_p3 = scmp.lt.s32.totalorder %s2442_s16, 1  ;;  %v454_v0 = vlaneseq  ;;  %v2558_v1 = vmov 1983009808   ;;  %v2603_v5 = vld [vmem:[%s3835_s1] ss:$0 sm:$0xff]  ;;  %vm385_vm0 = vcmask 64512  }
   0xc   : > { %v452_v2 = vunpack.c.l.s4 %v2558_v1  ;;  %vm1122_vm1 = vcmask 58368   ;;  %v2614_v15 = vld [vmem:[%s3836_s2] ss:$0 sm:$0xff]  ;;  %vm2275_vm2 = vcmask 1041409   ;;  %vm2277_vm3 = vcmask 1042434  }
   0xd   : > { %s4111_s16 = smov (!%p196_p3, %s2442_s16), 1  ;;  %v455_v3 = vshrl.u32 %v454_v0, 7  ;;  %vm2279_vm4 = vcmask 1043459   ;;  %vm2281_vm5 = vcmask 1044484   ;;  %vm2283_vm6 = vcmask 1045509  }
   0xe   : > { %s2457_s17 = sshll.u32 %s4111_s16, 7  ;;  %v453_v4 = vunpack.c.0.s8 %v452_v2  ;;  %s2458_s25 = sshll.u32 %s4111_s16, 8  ;;  %vm2285_vm7 = vcmask 1046534   ;;  %vm2287_vm8 = vcmask 1047559  }
   0xf   : > { %s2598_s20 = scalar_lea.vmem %s3834_s0, %s2457_s17  ;;  %s2632_s28 = scalar_lea.vmem %s3837_s3, %s2458_s25 }
  0x10   : > { %v2461_v6 = vld [vmem:[%s2598_s20] sm:$0xff]   ;;  %v2606_v7 = vsub.s32 %v453_v4, %v455_v3  ;;  %v2524_v8 = vld [vmem:[%s2598_s20 + $0x8] sm:$0xff]   ;;  %v2525_v9 = vld [vmem:[%s2598_s20 + $0x10] sm:$0xff]   ;;  %s2459_s7 = sshll.u32 %s4111_s16, 6 }
  0x11   : > { %v2462_v10 = vunpack.c.l.bf16 %v2461_v6  ;;  %v2463_v11 = vunpack.c.h.bf16 %v2461_v6  ;;  %v2466_v12 = vunpack.c.l.bf16 %v2524_v8  ;;  %v2467_v13 = vunpack.c.h.bf16 %v2524_v8  ;;  %v2526_v14 = vld [vmem:[%s2598_s20 + $0x18] sm:$0xff]   ;;  %s3474_s10 = scalar_lea.vmem %s3838_s4, %s2459_s7 }
  0x12   : > { %v2470_v16 = vunpack.c.l.bf16 %v2525_v9  ;;  %v2471_v17 = vunpack.c.h.bf16 %v2525_v9  ;;  %v2474_v18 = vunpack.c.l.bf16 %v2526_v14  ;;  %v2475_v19 = vunpack.c.h.bf16 %v2526_v14 }
  0x13   : > { %v282_v20 = vmul.f32 %v2462_v10, %v2603_v5  ;;  %v283_v21 = vmul.f32 %v2463_v11, %v2603_v5  ;;  %v284_v22 = vmul.f32 %v2466_v12, %v2603_v5  ;;  %v285_v23 = vmul.f32 %v2467_v13, %v2603_v5 }
  0x14   : > { %v286_v24 = vmul.f32 %v2470_v16, %v2603_v5  ;;  %v287_v25 = vmul.f32 %v2471_v17, %v2603_v5  ;;  %v288_v26 = vmul.f32 %v2474_v18, %v2603_v5  ;;  %v289_v27 = vmul.f32 %v2475_v19, %v2603_v5 }
  0x15   : > { %v321_v28 = vadd.f32 %v2614_v15, %v282_v20  ;;  %v322_v29 = vadd.f32 %v2614_v15, %v283_v21  ;;  %v323_v30 = vadd.f32 %v2614_v15, %v284_v22  ;;  %v324_v31 = vadd.f32 %v2614_v15, %v285_v23 }
  0x16   : > { %v325_v32 = vadd.f32 %v2614_v15, %v286_v24  ;;  %v326_v33 = vadd.f32 %v2614_v15, %v287_v25  ;;  %v327_v34 = vadd.f32 %v2614_v15, %v288_v26  ;;  %v328_v35 = vadd.f32 %v2614_v15, %v289_v27 }
  0x17   : > { %v353_v36 = vmax.f32 %v321_v28, 0.0  ;;  %v354_v37 = vmax.f32 %v322_v29, 0.0  ;;  %v355_v38 = vmax.f32 %v323_v30, 0.0  ;;  %v2638_v39 = vmax.f32 %v324_v31, 0.0 }
  0x18   : > { %v2640_v40 = vmax.f32 %v325_v32, 0.0  ;;  %v2642_v41 = vmax.f32 %v326_v33, 0.0  ;;  %v2644_v42 = vmax.f32 %v327_v34, 0.0  ;;  %v2646_v43 = vmax.f32 %v328_v35, 0.0 }
  0x19   : > { %386 = vst.msk [vmem:[%s2632_s28] sm:$0xff] %vm385_vm0, %v353_v36  ;;  %v450_v44 = vcombine.high %v353_v36, %v353_v36  ;;  %v457_v45 = vrot.slane %v353_v36, %v2606_v7  ;;  %387 = vst.msk [vmem:[%s2632_s28 + $0x8] sm:$0xff] %vm385_vm0, %v354_v37  ;;  %v467_v46 = vcombine.high %v354_v37, %v354_v37 }
  0x1a   : > { %v474_v47 = vrot.slane %v354_v37, %v2606_v7  ;;  %388 = vst.msk [vmem:[%s2632_s28 + $0x10] sm:$0xff] %vm385_vm0, %v355_v38  ;;  %389 = vst.msk [vmem:[%s2632_s28 + $0x18] sm:$0xff] %vm385_vm0, %v2638_v39  ;;  %v484_v48 = vcombine.high %v355_v38, %v355_v38  ;;  %v491_v49 = vrot.slane %v355_v38, %v2606_v7 }
  0x1b   : > { %v501_v50 = vcombine.high %v2638_v39, %v2638_v39  ;;  %v2664_v51 = vrot.slane %v2638_v39, %v2606_v7  ;;  %390 = vst.msk [vmem:[%s2632_s28 + $0x20] sm:$0xff] %vm385_vm0, %v2640_v40  ;;  %391 = vst.msk [vmem:[%s2632_s28 + $0x28] sm:$0xff] %vm385_vm0, %v2642_v41  ;;  %v464_v52 = vrot.slane %v450_v44, %v2606_v7  ;;  %v1123_v54 = vsel %vm1122_vm1, %v457_v45, -inf }
  0x1c   : > { %392 = vst.msk [vmem:[%s2632_s28 + $0x30] sm:$0xff] %vm385_vm0, %v2644_v42  ;;  %393 = vst.msk [vmem:[%s2632_s28 + $0x38] sm:$0xff] %vm385_vm0, %v2646_v43  ;;  %v465_v53 = vcombine.high %v457_v45, %v457_v45  ;;  %v2681_v55 = vrot.slane %v467_v46, %v2606_v7  ;;  %v1124_v56 = vrot.slane %v1123_v54, 4  ;;  %v482_v57 = vcombine.high %v474_v47, %v474_v47 }
  0x1d   : > { %v1151_v58 = vsel %vm1122_vm1, %v474_v47, -inf  ;;  %v498_v59 = vrot.slane %v484_v48, %v2606_v7  ;;  %v466_v60 = vcombine.high %v464_v52, %v464_v52  ;;  %v1137_v62 = vsel %vm1122_vm1, %v464_v52, -inf }
  0x1e   : > { %v1130_v61 = vsel %vm1122_vm1, %v465_v53, -inf  ;;  %v1125_v0 = vmax.f32 %v1123_v54, %v1124_v56  ;;  %v1138_v2 = vrot.slane %v1137_v62, 4  ;;  %v1152_v3 = vrot.slane %v1151_v58, 4 }
  0x1f   : > { %v1131_v1 = vrot.slane %v1130_v61, 4  ;;  %v1144_v4 = vsel %vm1122_vm1, %v466_v60, -inf  ;;  %v1158_v6 = vsel %vm1122_vm1, %v482_v57, -inf  ;;  %v1165_v8 = vsel %vm1122_vm1, %v2681_v55, -inf }
  0x20   : > { %v499_v9 = vcombine.high %v491_v49, %v491_v49  ;;  %v1126_v10 = vrot.slane %v1125_v0, 2  ;;  %v1139_v12 = vmax.f32 %v1137_v62, %v1138_v2  ;;  %v1145_v13 = vrot.slane %v1144_v4, 4 }
  0x21   : > { %v1132_v11 = vmax.f32 %v1130_v61, %v1131_v1  ;;  %v1153_v14 = vmax.f32 %v1151_v58, %v1152_v3  ;;  %v1159_v16 = vrot.slane %v1158_v6, 4  ;;  %v1166_v17 = vrot.slane %v1165_v8, 4 }
  0x22   : > { %v500_v18 = vcombine.high %v498_v59, %v498_v59  ;;  %v1127_v19 = vmax.f32 %v1125_v0, %v1126_v10  ;;  %v1140_v21 = vrot.slane %v1139_v12, 2  ;;  %v1146_v22 = vmax.f32 %v1144_v4, %v1145_v13 }
  0x23   : > { %v1133_v20 = vrot.slane %v1132_v11, 2  ;;  %v1154_v23 = vrot.slane %v1153_v14, 2  ;;  %v1160_v24 = vmax.f32 %v1158_v6, %v1159_v16  ;;  %v2693_v25 = vmax.f32 %v1165_v8, %v1166_v17 }
  0x24   : > { %v1179_v26 = vsel %vm1122_vm1, %v491_v49, -inf  ;;  %v1128_v27 = vrot.slane %v1127_v19, 1  ;;  %v1141_v29 = vmax.f32 %v1139_v12, %v1140_v21  ;;  %v1147_v30 = vrot.slane %v1146_v22, 2 }
  0x25   : > { %v1134_v28 = vmax.f32 %v1132_v11, %v1133_v20  ;;  %v1155_v31 = vmax.f32 %v1153_v14, %v1154_v23  ;;  %v1161_v32 = vrot.slane %v1160_v24, 2  ;;  %v1180_v33 = vrot.slane %v1179_v26, 4 }
  0x26   : > { %v1186_v34 = vsel %vm1122_vm1, %v499_v9, -inf  ;;  %v1129_v35 = vmax.f32 %v1127_v19, %v1128_v27  ;;  %v1142_v37 = vrot.slane %v1141_v29, 1  ;;  %v2697_v38 = vmax.f32 %v1146_v22, %v1147_v30 }
  0x27   : > { %v1135_v36 = vrot.slane %v1134_v28, 1  ;;  %v1156_v44 = vrot.slane %v1155_v31, 1  ;;  %v2699_v45 = vmax.f32 %v1160_v24, %v1161_v32  ;;  %v1181_v46 = vmax.f32 %v1179_v26, %v1180_v33 }
  0x28   : > { %v1187_v47 = vrot.slane %v1186_v34, 4  ;;  %v2701_v49 = vmax.f32 %v1141_v29, %v1142_v37  ;;  %v2705_v53 = vsel %vm385_vm0, %v1129_v35, -inf  ;;  %v1193_v58 = vsel %vm1122_vm1, %v498_v59, -inf }
  0x29   : > { %v1136_v48 = vmax.f32 %v1134_v28, %v1135_v36  ;;  %v2707_v54 = vmax.f32 %v1155_v31, %v1156_v44  ;;  %v1182_v56 = vrot.slane %v1181_v46, 2  ;;  %v1194_v61 = vrot.slane %v1193_v58, 4 }
  0x2a   : > { %v1188_v57 = vmax.f32 %v1186_v34, %v1187_v47  ;;  %v1200_v62 = vsel %vm1122_vm1, %v500_v18, -inf  ;;  %v2718_v0 = vrot.slane %v501_v50, %v2606_v7  ;;  %v516_v4 = vcombine.high %v2664_v51, %v2664_v51 }
  0x2b   : > { %v2711_v60 = vsel %vm385_vm0, %v1136_v48, -inf  ;;  %v1183_v1 = vmax.f32 %v1181_v46, %v1182_v56  ;;  %v1201_v3 = vrot.slane %v1200_v62, 4  ;;  %v1195_v6 = vmax.f32 %v1193_v58, %v1194_v61 }
  0x2c   : > { %v1189_v2 = vrot.slane %v1188_v57, 2  ;;  %v1207_v8 = vsel %vm1122_vm1, %v2664_v51, -inf  ;;  %v1221_v9 = vsel %vm1122_vm1, %v2718_v0, -inf  ;;  %v1214_v13 = vsel %vm1122_vm1, %v516_v4, -inf }
  0x2d   : > { %v1184_v10 = vrot.slane %v1183_v1, 1  ;;  %v1202_v50 = vmax.f32 %v1200_v62, %v1201_v3  ;;  %v1208_v11 = vrot.slane %v1207_v8, 4  ;;  %v1196_v12 = vrot.slane %v1195_v6, 2 }
  0x2e   : > { %v1190_v39 = vmax.f32 %v1188_v57, %v1189_v2  ;;  %v1222_v14 = vrot.slane %v1221_v9, 4  ;;  %v518_v16 = vcombine.high %v2640_v40, %v2640_v40  ;;  %v1215_v51 = vrot.slane %v1214_v13, 4 }
  0x2f   : > { %v1185_v17 = vmax.f32 %v1183_v1, %v1184_v10  ;;  %v1203_v19 = vrot.slane %v1202_v50, 2  ;;  %v1209_v20 = vmax.f32 %v1207_v8, %v1208_v11  ;;  %v1197_v21 = vmax.f32 %v1195_v6, %v1196_v12 }
  0x30   : > { %v1191_v18 = vrot.slane %v1190_v39, 1  ;;  %v2731_v22 = vmax.f32 %v1221_v9, %v1222_v14  ;;  %v525_v23 = vrot.slane %v2640_v40, %v2606_v7  ;;  %v1216_v31 = vmax.f32 %v1214_v13, %v1215_v51 }
  0x31   : > { %v2735_v26 = vmax.f32 %v1202_v50, %v1203_v19  ;;  %v2738_v27 = vsel %vm385_vm0, %v1185_v17, -inf  ;;  %v1210_v28 = vrot.slane %v1209_v20, 2  ;;  %v1198_v29 = vrot.slane %v1197_v21, 1 }
  0x32   : > { %v1192_v24 = vmax.f32 %v1190_v39, %v1191_v18  ;;  %v532_v32 = vrot.slane %v518_v16, %v2606_v7  ;;  %v533_v35 = vcombine.high %v525_v23, %v525_v23  ;;  %v1217_v37 = vrot.slane %v1216_v31, 2 }
  0x33   : > { %v1211_v40 = vmax.f32 %v1209_v20, %v1210_v28  ;;  %v2747_v36 = vmax.f32 %v1197_v21, %v1198_v29  ;;  %v1235_v46 = vsel %vm1122_vm1, %v525_v23, -inf  ;;  %v535_v6 = vcombine.high %v2642_v41, %v2642_v41 }
  0x34   : > { %v2745_v34 = vsel %vm385_vm0, %v1192_v24, -inf  ;;  %v534_v44 = vcombine.high %v532_v32, %v532_v32  ;;  %v1236_v48 = vrot.slane %v1235_v46, 4  ;;  %v1242_v56 = vsel %vm1122_vm1, %v533_v35, -inf }
  0x35   : > { %v1212_v47 = vrot.slane %v1211_v40, 1  ;;  %v1249_v57 = vsel %vm1122_vm1, %v532_v32, -inf  ;;  %v2752_v58 = vmax.f32 %v1216_v31, %v1217_v37  ;;  %v1243_v61 = vrot.slane %v1242_v56, 4 }
  0x36   : > { %v1250_v62 = vrot.slane %v1249_v57, 4  ;;  %v1256_v1 = vsel %vm1122_vm1, %v534_v44, -inf  ;;  %v1237_v3 = vmax.f32 %v1235_v46, %v1236_v48  ;;  %v542_v10 = vrot.slane %v2642_v41, %v2606_v7 }
  0x37   : > { %v2755_v2 = vmax.f32 %v1211_v40, %v1212_v47  ;;  %v1257_v4 = vrot.slane %v1256_v1, 4  ;;  %v1244_v8 = vmax.f32 %v1242_v56, %v1243_v61  ;;  %v552_v39 = vcombine.high %v2644_v42, %v2644_v42 }
  0x38   : > { %v1251_v9 = vmax.f32 %v1249_v57, %v1250_v62  ;;  %v1238_v50 = vrot.slane %v1237_v3, 2  ;;  %v2764_v12 = vrot.slane %v535_v6, %v2606_v7  ;;  %v559_v13 = vrot.slane %v2644_v42, %v2606_v7 }
  0x39   : > { %v1258_v11 = vmax.f32 %v1256_v1, %v1257_v4  ;;  %v1245_v14 = vrot.slane %v1244_v8, 2  ;;  %v550_v17 = vcombine.high %v542_v10, %v542_v10  ;;  %v1263_v18 = vsel %vm1122_vm1, %v542_v10, -inf }
  0x3a   : > { %v1252_v16 = vrot.slane %v1251_v9, 2  ;;  %v1239_v19 = vmax.f32 %v1237_v3, %v1238_v50  ;;  %v1264_v21 = vrot.slane %v1263_v18, 4  ;;  %v1277_v28 = vsel %vm1122_vm1, %v2764_v12, -inf }
  0x3b   : > { %v1259_v20 = vrot.slane %v1258_v11, 2  ;;  %v1246_v51 = vmax.f32 %v1244_v8, %v1245_v14  ;;  %v1270_v24 = vsel %vm1122_vm1, %v550_v17, -inf  ;;  %v1278_v37 = vrot.slane %v1277_v28, 4 }
  0x3c   : > { %v1253_v23 = vmax.f32 %v1251_v9, %v1252_v16  ;;  %v1240_v29 = vrot.slane %v1239_v19, 1  ;;  %v1265_v31 = vmax.f32 %v1263_v18, %v1264_v21  ;;  %v1271_v32 = vrot.slane %v1270_v24, 4 }
  0x3d   : > { %v2774_v42 = vmax.f32 %v1258_v11, %v1259_v20  ;;  %v1247_v40 = vrot.slane %v1246_v51, 1  ;;  %v566_v44 = vrot.slane %v552_v39, %v2606_v7  ;;  %v2780_v62 = vmax.f32 %v1277_v28, %v1278_v37 }
  0x3e   : > { %v1254_v35 = vrot.slane %v1253_v23, 1  ;;  %v1241_v46 = vmax.f32 %v1239_v19, %v1240_v29  ;;  %v1266_v48 = vrot.slane %v1265_v31, 2  ;;  %v1272_v56 = vmax.f32 %v1270_v24, %v1271_v32 }
  0x3f   : > { %v1248_v57 = vmax.f32 %v1246_v51, %v1247_v40  ;;  %v567_v1 = vcombine.high %v559_v13, %v559_v13  ;;  %v568_v8 = vcombine.high %v566_v44, %v566_v44  ;;  %v1291_v10 = vsel %vm1122_vm1, %v559_v13, -inf }
  0x40   : > { %v2778_v61 = vmax.f32 %v1253_v23, %v1254_v35  ;;  %v2783_v3 = vsel %vm385_vm0, %v1241_v46, -inf  ;;  %v1267_v4 = vmax.f32 %v1265_v31, %v1266_v48  ;;  %v1273_v6 = vrot.slane %v1272_v56, 2  ;;  %v2527_v46 = vld [vmem:[%s2598_s20 + $0x20] sm:$0xff]  }
  0x41   : > { %3905 = vst [vmem:[#allocation3_spill] sm:$0xff] %v2783_v3  ;;  %v2786_v9 = vsel %vm385_vm0, %v1248_v57, -inf  ;;  %v1298_v39 = vsel %vm1122_vm1, %v567_v1, -inf  ;;  %v1305_v50 = vsel %vm1122_vm1, %v566_v44, -inf  ;;  %v1292_v16 = vrot.slane %v1291_v10, 4 }
  0x42   : > { %3904 = vst [vmem:[#allocation2_spill] sm:$0xff] %v2778_v61  ;;  %v1268_v11 = vrot.slane %v1267_v4, 1  ;;  %v2791_v14 = vmax.f32 %v1272_v56, %v1273_v6  ;;  %v1299_v17 = vrot.slane %v1298_v39, 4  ;;  %v1306_v18 = vrot.slane %v1305_v50, 4 }
  0x43   : > { %v1312_v19 = vsel %vm1122_vm1, %v568_v8, -inf  ;;  %v569_v20 = vcombine.high %v2646_v43, %v2646_v43  ;;  %v576_v21 = vrot.slane %v2646_v43, %v2606_v7  ;;  %v1293_v51 = vmax.f32 %v1291_v10, %v1292_v16 }
  0x44   : > { %v2798_v13 = vmax.f32 %v1267_v4, %v1268_v11  ;;  %v1300_v23 = vmax.f32 %v1298_v39, %v1299_v17  ;;  %v1313_v24 = vrot.slane %v1312_v19, 4  ;;  %v1307_v28 = vmax.f32 %v1305_v50, %v1306_v18 }
  0x45   : > { %v2801_v29 = vrot.slane %v569_v20, %v2606_v7  ;;  %v584_v31 = vcombine.high %v576_v21, %v576_v21  ;;  %v1319_v32 = vsel %vm1122_vm1, %v576_v21, -inf  ;;  %v1294_v40 = vrot.slane %v1293_v51, 2 }
  0x46   : > { %3906 = vst [vmem:[#allocation4_spill] sm:$0xff] %v2798_v13  ;;  %v1301_v35 = vrot.slane %v1300_v23, 2  ;;  %v1314_v37 = vmax.f32 %v1312_v19, %v1313_v24  ;;  %v1320_v44 = vrot.slane %v1319_v32, 4  ;;  %v1308_v48 = vrot.slane %v1307_v28, 2 }
  0x47   : > { %v1326_v56 = vsel %vm1122_vm1, %v584_v31, -inf  ;;  %v1333_v57 = vsel %vm1122_vm1, %v2801_v29, -inf  ;;  %v1295_v1 = vmax.f32 %v1293_v51, %v1294_v40  ;;  %v2478_v11 = vunpack.c.l.bf16 %v2527_v46  ;;  %v2528_v31 = vld [vmem:[%s2598_s20 + $0x28] sm:$0xff]  }
  0x48   : > { %v1302_v4 = vmax.f32 %v1300_v23, %v1301_v35  ;;  %v1315_v6 = vrot.slane %v1314_v37, 2  ;;  %v1321_v8 = vmax.f32 %v1319_v32, %v1320_v44  ;;  %v1309_v10 = vmax.f32 %v1307_v28, %v1308_v48 }
  0x49   : > { %v1327_v39 = vrot.slane %v1326_v56, 4  ;;  %v1334_v50 = vrot.slane %v1333_v57, 4  ;;  %v1296_v16 = vrot.slane %v1295_v1, 1  ;;  %v290_v51 = vmul.f32 %v2478_v11, %v2603_v5  ;;  %v2835_v11 = vld [vmem:[%s2598_s20 + $0x38] sm:$0xff]  }
  0x4a   : > { %v1303_v17 = vrot.slane %v1302_v4, 1  ;;  %v2810_v18 = vmax.f32 %v1314_v37, %v1315_v6  ;;  %v1322_v19 = vrot.slane %v1321_v8, 2  ;;  %v1310_v20 = vrot.slane %v1309_v10, 1  ;;  %v2821_v6 = vld [vmem:[%s2598_s20 + $0x30] sm:$0xff]  }
  0x4b   : > { %v1328_v21 = vmax.f32 %v1326_v56, %v1327_v39  ;;  %v2812_v24 = vmax.f32 %v1333_v57, %v1334_v50  ;;  %v1297_v23 = vmax.f32 %v1295_v1, %v1296_v16  ;;  %v329_v37 = vadd.f32 %v2614_v15, %v290_v51 }
  0x4c   : > { %v1304_v40 = vmax.f32 %v1302_v4, %v1303_v17  ;;  %v1323_v32 = vmax.f32 %v1321_v8, %v1322_v19  ;;  %v2817_v35 = vmax.f32 %v1309_v10, %v1310_v20  ;;  %v2479_v48 = vunpack.c.h.bf16 %v2527_v46 }
  0x4d   : > { %v1329_v44 = vrot.slane %v1328_v21, 2  ;;  %v2824_v56 = vsel %vm385_vm0, %v1297_v23, -inf  ;;  %v2482_v4 = vunpack.c.l.bf16 %v2528_v31  ;;  %v361_v39 = vmax.f32 %v329_v37, 0.0 }
  0x4e   : > { %3907 = vst [vmem:[#allocation5_spill] sm:$0xff] %v2817_v35  ;;  %3908 = vst [vmem:[#allocation6_spill] sm:$0xff] %v2824_v56  ;;  %v2827_v57 = vsel %vm385_vm0, %v1304_v40, -inf  ;;  %v1324_v1 = vrot.slane %v1323_v32, 1  ;;  %v291_v50 = vmul.f32 %v2479_v48, %v2603_v5  ;;  %v2483_v17 = vunpack.c.h.bf16 %v2528_v31 }
  0x4f   : > { %v2831_v10 = vmax.f32 %v1328_v21, %v1329_v44  ;;  %v292_v16 = vmul.f32 %v2482_v4, %v2603_v5  ;;  %v2486_v19 = vunpack.c.l.bf16 %v2821_v6  ;;  %394 = vst.msk [vmem:[%s2632_s28 + $0x40] sm:$0xff] %vm385_vm0, %v361_v39  ;;  %v586_v20 = vcombine.high %v361_v39, %v361_v39 }
  0x50   : > { %v2837_v46 = vmax.f32 %v1323_v32, %v1324_v1  ;;  %v593_v51 = vrot.slane %v361_v39, %v2606_v7  ;;  %v330_v21 = vadd.f32 %v2614_v15, %v291_v50  ;;  %v293_v32 = vmul.f32 %v2483_v17, %v2603_v5 }
  0x51   : > { %v331_v40 = vadd.f32 %v2614_v15, %v292_v16  ;;  %v294_v44 = vmul.f32 %v2486_v19, %v2603_v5  ;;  %v600_v37 = vrot.slane %v586_v20, %v2606_v7 }
  0x52   : > { %3909 = vst [vmem:[#allocation7_spill] sm:$0xff] %v2837_v46  ;;  %v601_v48 = vcombine.high %v593_v51, %v593_v51  ;;  %v1347_v1 = vsel %vm1122_vm1, %v593_v51, -inf  ;;  %v362_v4 = vmax.f32 %v330_v21, 0.0  ;;  %v2853_v8 = vadd.f32 %v2614_v15, %v293_v32 }
  0x53   : > { %v1348_v39 = vrot.slane %v1347_v1, 4  ;;  %v363_v50 = vmax.f32 %v331_v40, 0.0  ;;  %v2856_v16 = vadd.f32 %v2614_v15, %v294_v44  ;;  %v602_v17 = vcombine.high %v600_v37, %v600_v37 }
  0x54   : > { %v1354_v19 = vsel %vm1122_vm1, %v601_v48, -inf  ;;  %v1361_v43 = vsel %vm1122_vm1, %v600_v37, -inf  ;;  %395 = vst.msk [vmem:[%s2632_s28 + $0x48] sm:$0xff] %vm385_vm0, %v362_v4  ;;  %v603_v20 = vcombine.high %v362_v4, %v362_v4  ;;  %v610_v21 = vrot.slane %v362_v4, %v2606_v7 }
  0x55   : > { %v1349_v28 = vmax.f32 %v1347_v1, %v1348_v39  ;;  %v1355_v41 = vrot.slane %v1354_v19, 4  ;;  %v1362_v51 = vrot.slane %v1361_v43, 4  ;;  %396 = vst.msk [vmem:[%s2632_s28 + $0x50] sm:$0xff] %vm385_vm0, %v363_v50  ;;  %v1368_v40 = vsel %vm1122_vm1, %v602_v17, -inf }
  0x56   : > { %v2867_v32 = vrot.slane %v603_v20, %v2606_v7  ;;  %v620_v44 = vcombine.high %v363_v50, %v363_v50  ;;  %v627_v48 = vrot.slane %v363_v50, %v2606_v7  ;;  %v1369_v59 = vrot.slane %v1368_v40, 4 }
  0x57   : > { %v1350_v47 = vrot.slane %v1349_v28, 2  ;;  %v1356_v37 = vmax.f32 %v1354_v19, %v1355_v41  ;;  %v1363_v30 = vmax.f32 %v1361_v43, %v1362_v51  ;;  %v618_v33 = vcombine.high %v610_v21, %v610_v21 }
  0x58   : > { %3910 = vst [vmem:[#allocation8_spill] sm:$0xff] %v2867_v32  ;;  %v1375_v4 = vsel %vm1122_vm1, %v610_v21, -inf  ;;  %v1389_v39 = vsel %vm1122_vm1, %v2867_v32, -inf  ;;  %v1370_v52 = vmax.f32 %v1368_v40, %v1369_v59  ;;  %v634_v41 = vrot.slane %v620_v44, %v2606_v7 }
  0x59   : > { %v1351_v17 = vmax.f32 %v1349_v28, %v1350_v47  ;;  %v1357_v63 = vrot.slane %v1356_v37, 2  ;;  %v1364_v20 = vrot.slane %v1363_v30, 2  ;;  %v1376_v31 = vrot.slane %v1375_v4, 4 }
  0x5a   : > { %v1382_v50 = vsel %vm1122_vm1, %v618_v33, -inf  ;;  %v1390_v23 = vrot.slane %v1389_v39, 4  ;;  %v1371_v56 = vrot.slane %v1370_v52, 2  ;;  %v635_v46 = vcombine.high %v627_v48, %v627_v48 }
  0x5b   : > { %v1352_v43 = vrot.slane %v1351_v17, 1  ;;  %v1358_v19 = vmax.f32 %v1356_v37, %v1357_v63  ;;  %v1365_v51 = vmax.f32 %v1363_v30, %v1364_v20  ;;  %v1377_v1 = vmax.f32 %v1375_v4, %v1376_v31 }
  0x5c   : > { %v1383_v3 = vrot.slane %v1382_v50, 4  ;;  %v2877_v21 = vmax.f32 %v1389_v39, %v1390_v23  ;;  %v2879_v13 = vmax.f32 %v1370_v52, %v1371_v56  ;;  %v636_v33 = vcombine.high %v634_v41, %v634_v41 }
  0x5d   : > { %v1353_v32 = vmax.f32 %v1351_v17, %v1352_v43  ;;  %v1359_v47 = vrot.slane %v1358_v19, 1  ;;  %v1366_v28 = vrot.slane %v1365_v51, 1  ;;  %v1378_v59 = vrot.slane %v1377_v1, 2 }
  0x5e   : > { %v1384_v40 = vmax.f32 %v1382_v50, %v1383_v3  ;;  %v1403_v35 = vsel %vm1122_vm1, %v627_v48, -inf  ;;  %v1410_v4 = vsel %vm1122_vm1, %v635_v46, -inf  ;;  %v1417_v56 = vsel %vm1122_vm1, %v634_v41, -inf }
  0x5f   : > { %v1360_v44 = vmax.f32 %v1358_v19, %v1359_v47  ;;  %v2882_v61 = vmax.f32 %v1365_v51, %v1366_v28  ;;  %v2886_v30 = vsel %vm385_vm0, %v1353_v32, -inf  ;;  %v1379_v23 = vmax.f32 %v1377_v1, %v1378_v59 }
  0x60   : > { %3912 = vst [vmem:[#allocation10_spill] sm:$0xff] %v2886_v30  ;;  %v1385_v31 = vrot.slane %v1384_v40, 2  ;;  %v1404_v37 = vrot.slane %v1403_v35, 4  ;;  %v1411_v3 = vrot.slane %v1410_v4, 4  ;;  %v1424_v48 = vsel %vm1122_vm1, %v636_v33, -inf }
  0x61   : > { %3911 = vst [vmem:[#allocation9_spill] sm:$0xff] %v2882_v61  ;;  %v2890_v52 = vsel %vm385_vm0, %v1360_v44, -inf  ;;  %v1380_v39 = vrot.slane %v1379_v23, 1  ;;  %v1418_v20 = vrot.slane %v1417_v56, 4  ;;  %v1425_v50 = vrot.slane %v1424_v48, 4 }
  0x62   : > { %3913 = vst [vmem:[#allocation11_spill] sm:$0xff] %v2890_v52  ;;  %v2894_v17 = vmax.f32 %v1384_v40, %v1385_v31  ;;  %v1405_v32 = vmax.f32 %v1403_v35, %v1404_v37  ;;  %v1412_v1 = vmax.f32 %v1410_v4, %v1411_v3  ;;  %v364_v43 = vmax.f32 %v2853_v8, 0.0 }
  0x63   : > { %v365_v46 = vmax.f32 %v2856_v16, 0.0  ;;  %v2898_v19 = vmax.f32 %v1379_v23, %v1380_v39  ;;  %v1419_v47 = vmax.f32 %v1417_v56, %v1418_v20  ;;  %v3915_v41 = vunpack.c.h.bf16 %v2821_v6 }
  0x64   : > { %v1406_v51 = vrot.slane %v1405_v32, 2  ;;  %v1413_v59 = vrot.slane %v1412_v1, 2  ;;  %v1426_v40 = vmax.f32 %v1424_v48, %v1425_v50  ;;  %397 = vst.msk [vmem:[%s2632_s28 + $0x58] sm:$0xff] %vm385_vm0, %v364_v43  ;;  %v637_v35 = vcombine.high %v364_v43, %v364_v43 }
  0x65   : > { %3914 = vst [vmem:[#allocation12_spill] sm:$0xff] %v2898_v19  ;;  %v295_v28 = vmul.f32 %v3915_v41, %v2603_v5  ;;  %v644_v33 = vrot.slane %v364_v43, %v2606_v7  ;;  %398 = vst.msk [vmem:[%s2632_s28 + $0x60] sm:$0xff] %vm385_vm0, %v365_v46  ;;  %v1420_v44 = vrot.slane %v1419_v47, 2  ;;  %v654_v16 = vcombine.high %v365_v46, %v365_v46 }
  0x66   : > { %v1407_v8 = vmax.f32 %v1405_v32, %v1406_v51  ;;  %v661_v23 = vrot.slane %v365_v46, %v2606_v7  ;;  %v1414_v31 = vmax.f32 %v1412_v1, %v1413_v59  ;;  %v1427_v37 = vrot.slane %v1426_v40, 2 }
  0x67   : > { %v2910_v4 = vrot.slane %v637_v35, %v2606_v7  ;;  %v652_v6 = vcombine.high %v644_v33, %v644_v33  ;;  %v1421_v56 = vmax.f32 %v1419_v47, %v1420_v44  ;;  %v1431_v48 = vsel %vm1122_vm1, %v644_v33, -inf }
  0x68   : > { %v1408_v3 = vrot.slane %v1407_v8, 1  ;;  %v668_v39 = vrot.slane %v654_v16, %v2606_v7  ;;  %v1415_v20 = vrot.slane %v1414_v31, 1  ;;  %v2914_v50 = vmax.f32 %v1426_v40, %v1427_v37 }
  0x69   : > { %3916 = vst [vmem:[#allocation13_spill] sm:$0xff] %v2910_v4  ;;  %v1432_v43 = vrot.slane %v1431_v48, 4  ;;  %v1422_v1 = vrot.slane %v1421_v56, 1  ;;  %v1438_v51 = vsel %vm1122_vm1, %v652_v6, -inf  ;;  %v1445_v41 = vsel %vm1122_vm1, %v2910_v4, -inf }
  0x6a   : > { %v1409_v46 = vmax.f32 %v1407_v8, %v1408_v3  ;;  %v1416_v59 = vmax.f32 %v1414_v31, %v1415_v20  ;;  %v1439_v33 = vrot.slane %v1438_v51, 4  ;;  %v1446_v16 = vrot.slane %v1445_v41, 4 }
  0x6b   : > { %v1433_v35 = vmax.f32 %v1431_v48, %v1432_v43  ;;  %v2922_v44 = vmax.f32 %v1421_v56, %v1422_v1  ;;  %v669_v37 = vcombine.high %v661_v23, %v661_v23  ;;  %v670_v20 = vcombine.high %v668_v39, %v668_v39 }
  0x6c   : > { %v2925_v40 = vsel %vm385_vm0, %v1409_v46, -inf  ;;  %v2930_v6 = vsel %vm385_vm0, %v1416_v59, -inf  ;;  %v1440_v32 = vmax.f32 %v1438_v51, %v1439_v33  ;;  %v2932_v31 = vmax.f32 %v1445_v41, %v1446_v16 }
  0x6d   : > { %3917 = vst [vmem:[#allocation14_spill] sm:$0xff] %v2922_v44  ;;  %3918 = vst [vmem:[#allocation15_spill] sm:$0xff] %v2925_v40  ;;  %v1434_v3 = vrot.slane %v1433_v35, 2  ;;  %v1459_v48 = vsel %vm1122_vm1, %v661_v23, -inf  ;;  %v1466_v56 = vsel %vm1122_vm1, %v669_v37, -inf  ;;  %v1473_v63 = vsel %vm1122_vm1, %v668_v39, -inf }
  0x6e   : > { %3919 = vst [vmem:[#allocation16_spill] sm:$0xff] %v2930_v6  ;;  %3920 = vst [vmem:[#allocation17_spill] sm:$0xff] %v2932_v31  ;;  %v1441_v46 = vrot.slane %v1440_v32, 2  ;;  %v1460_v1 = vrot.slane %v1459_v48, 4  ;;  %v1467_v47 = vrot.slane %v1466_v56, 4  ;;  %v1480_v8 = vsel %vm1122_vm1, %v670_v20, -inf }
  0x6f   : > { %v1435_v43 = vmax.f32 %v1433_v35, %v1434_v3  ;;  %v334_v59 = vadd.f32 %v2614_v15, %v295_v28  ;;  %v3921_v51 = vunpack.c.l.bf16 %v2835_v11  ;;  %v1474_v35 = vrot.slane %v1473_v63, 4 }
  0x70   : > { %v2942_v16 = vmax.f32 %v1440_v32, %v1441_v46  ;;  %v1461_v23 = vmax.f32 %v1459_v48, %v1460_v1  ;;  %v1468_v37 = vmax.f32 %v1466_v56, %v1467_v47  ;;  %v1481_v3 = vrot.slane %v1480_v8, 4 }
  0x71   : > { %v296_v41 = vmul.f32 %v3921_v51, %v2603_v5  ;;  %v1436_v33 = vrot.slane %v1435_v43, 1  ;;  %v366_v40 = vmax.f32 %v334_v59, 0.0  ;;  %v2491_v28 = vunpack.c.h.bf16 %v2835_v11 }
  0x72   : > { %v1462_v20 = vrot.slane %v1461_v23, 2  ;;  %v1469_v19 = vrot.slane %v1468_v37, 2  ;;  %v1475_v44 = vmax.f32 %v1473_v63, %v1474_v35  ;;  %v1482_v61 = vmax.f32 %v1480_v8, %v1481_v3 }
  0x73   : > { %v335_v30 = vadd.f32 %v2614_v15, %v296_v41  ;;  %v2945_v39 = vmax.f32 %v1435_v43, %v1436_v33  ;;  %399 = vst.msk [vmem:[%s2632_s28 + $0x68] sm:$0xff] %vm385_vm0, %v366_v40  ;;  %v671_v32 = vcombine.high %v366_v40, %v366_v40  ;;  %v678_v48 = vrot.slane %v366_v40, %v2606_v7 }
  0x74   : > { %v1463_v47 = vmax.f32 %v1461_v23, %v1462_v20  ;;  %v1470_v56 = vmax.f32 %v1468_v37, %v1469_v19  ;;  %v297_v1 = vmul.f32 %v2491_v28, %v2603_v5  ;;  %v1476_v59 = vrot.slane %v1475_v44, 2 }
  0x75   : > { %3922 = vst [vmem:[#allocation18_spill] sm:$0xff] %v2945_v39  ;;  %v367_v46 = vmax.f32 %v335_v30, 0.0  ;;  %v1483_v43 = vrot.slane %v1482_v61, 2  ;;  %v2953_v51 = vrot.slane %v671_v32, %v2606_v7  ;;  %v686_v41 = vcombine.high %v678_v48, %v678_v48 }
  0x76   : > { %v1464_v11 = vrot.slane %v1463_v47, 1  ;;  %v1471_v63 = vrot.slane %v1470_v56, 1  ;;  %v1487_v8 = vsel %vm1122_vm1, %v678_v48, -inf  ;;  %v1477_v35 = vmax.f32 %v1475_v44, %v1476_v59 }
  0x77   : > { %3923 = vst [vmem:[#allocation19_spill] sm:$0xff] %v2953_v51  ;;  %400 = vst.msk [vmem:[%s2632_s28 + $0x70] sm:$0xff] %vm385_vm0, %v367_v46  ;;  %v688_v33 = vcombine.high %v367_v46, %v367_v46  ;;  %v2958_v40 = vmax.f32 %v1482_v61, %v1483_v43  ;;  %v1488_v5 = vrot.slane %v1487_v8, 4  ;;  %v1494_v37 = vsel %vm1122_vm1, %v686_v41, -inf }
  0x78   : > { %v1465_v19 = vmax.f32 %v1463_v47, %v1464_v11  ;;  %v1472_v23 = vmax.f32 %v1470_v56, %v1471_v63  ;;  %v1501_v3 = vsel %vm1122_vm1, %v2953_v51, -inf  ;;  %v1478_v20 = vrot.slane %v1477_v35, 1  ;;  %v2977_v63 = vld [vmem:[%s2598_s20 + $0x40] sm:$0xff]  }
  0x79   : > { %3924 = vst [vmem:[#allocation20_spill] sm:$0xff] %v2958_v40  ;;  %v1489_v32 = vmax.f32 %v1487_v8, %v1488_v5  ;;  %v1495_v48 = vrot.slane %v1494_v37, 4  ;;  %v1502_v59 = vrot.slane %v1501_v3, 4  ;;  %v695_v47 = vrot.slane %v367_v46, %v2606_v7 }
  0x7a   : > { %v2967_v61 = vsel %vm385_vm0, %v1465_v19, -inf  ;;  %v2970_v44 = vsel %vm385_vm0, %v1472_v23, -inf  ;;  %v2973_v56 = vmax.f32 %v1477_v35, %v1478_v20  ;;  %v702_v11 = vrot.slane %v688_v33, %v2606_v7 }
  0x7b   : > { %3925 = vst [vmem:[#allocation21_spill] sm:$0xff] %v2967_v61  ;;  %3926 = vst [vmem:[#allocation22_spill] sm:$0xff] %v2970_v44  ;;  %v1490_v43 = vrot.slane %v1489_v32, 2  ;;  %v1496_v41 = vmax.f32 %v1494_v37, %v1495_v48  ;;  %v2979_v30 = vmax.f32 %v1501_v3, %v1502_v59  ;;  %v703_v8 = vcombine.high %v695_v47, %v695_v47 }
  0x7c   : > { %3927 = vst [vmem:[#allocation23_spill] sm:$0xff] %v2973_v56  ;;  %v1515_v5 = vsel %vm1122_vm1, %v695_v47, -inf  ;;  %v336_v19 = vadd.f32 %v2614_v15, %v297_v1  ;;  %v704_v44 = vcombine.high %v702_v11, %v702_v11  ;;  %v1529_v37 = vsel %vm1122_vm1, %v702_v11, -inf }
  0x7d   : > { %3928 = vst [vmem:[#allocation24_spill] sm:$0xff] %v2979_v30  ;;  %v1491_v23 = vmax.f32 %v1489_v32, %v1490_v43  ;;  %v1497_v28 = vrot.slane %v1496_v41, 2  ;;  %v1516_v46 = vrot.slane %v1515_v5, 4  ;;  %v1522_v35 = vsel %vm1122_vm1, %v703_v8, -inf }
  0x7e   : > { %v368_v20 = vmax.f32 %v336_v19, 0.0  ;;  %v2494_v33 = vunpack.c.l.bf16 %v2977_v63  ;;  %v1523_v56 = vrot.slane %v1522_v35, 4  ;;  %v1530_v47 = vrot.slane %v1529_v37, 4 }
  0x7f   : > { %v1492_v48 = vrot.slane %v1491_v23, 1  ;;  %v2986_v3 = vmax.f32 %v1496_v41, %v1497_v28  ;;  %v1517_v59 = vmax.f32 %v1515_v5, %v1516_v46  ;;  %v1536_v51 = vsel %vm1122_vm1, %v704_v44, -inf }
  0x80   : > { %401 = vst.msk [vmem:[%s2632_s28 + $0x78] sm:$0xff] %vm385_vm0, %v368_v20  ;;  %v705_v1 = vcombine.high %v368_v20, %v368_v20  ;;  %v712_v32 = vrot.slane %v368_v20, %v2606_v7  ;;  %v1524_v11 = vmax.f32 %v1522_v35, %v1523_v56  ;;  %v1537_v19 = vrot.slane %v1536_v51, 4 }
  0x81   : > { %3929 = vst [vmem:[#allocation25_spill] sm:$0xff] %v2986_v3  ;;  %v2992_v43 = vmax.f32 %v1491_v23, %v1492_v48  ;;  %v1518_v8 = vrot.slane %v1517_v59, 2  ;;  %v1531_v30 = vmax.f32 %v1529_v37, %v1530_v47 }
  0x82   : > { %v2995_v40 = vrot.slane %v705_v1, %v2606_v7  ;;  %v720_v28 = vcombine.high %v712_v32, %v712_v32  ;;  %v1543_v41 = vsel %vm1122_vm1, %v712_v32, -inf  ;;  %v1525_v46 = vrot.slane %v1524_v11, 2 }
  0x83   : > { %3930 = vst [vmem:[#allocation26_spill] sm:$0xff] %v2992_v43  ;;  %v1519_v5 = vmax.f32 %v1517_v59, %v1518_v8  ;;  %v1538_v44 = vmax.f32 %v1536_v51, %v1537_v19  ;;  %v1544_v3 = vrot.slane %v1543_v41, 4  ;;  %v1532_v39 = vrot.slane %v1531_v30, 2  ;;  %v3006_v51 = vld [vmem:[%s3835_s1] ss:$0 sm:$0xff] }
  0x84   : > { %3931 = vst [vmem:[#allocation27_spill] sm:$0xff] %v2995_v40  ;;  %v1550_v23 = vsel %vm1122_vm1, %v720_v28, -inf  ;;  %v1557_v56 = vsel %vm1122_vm1, %v2995_v40, -inf  ;;  %v1526_v37 = vmax.f32 %v1524_v11, %v1525_v46  ;;  %v298_v8 = vmul.f32 %v3006_v51, %v2494_v33 }
  0x85   : > { %v1520_v35 = vrot.slane %v1519_v5, 1  ;;  %v1539_v48 = vrot.slane %v1538_v44, 2  ;;  %v1545_v47 = vmax.f32 %v1543_v41, %v1544_v3  ;;  %v1533_v1 = vmax.f32 %v1531_v30, %v1532_v39  ;;  %v2532_v30 = vld [vmem:[%s2598_s20 + $0x48] sm:$0xff]  }
  0x86   : > { %v1551_v32 = vrot.slane %v1550_v23, 4  ;;  %v1558_v59 = vrot.slane %v1557_v56, 4  ;;  %v1527_v28 = vrot.slane %v1526_v37, 1  ;;  %v337_v39 = vadd.f32 %v2614_v15, %v298_v8 }
  0x87   : > { %v1521_v19 = vmax.f32 %v1519_v5, %v1520_v35  ;;  %v3009_v20 = vmax.f32 %v1538_v44, %v1539_v48  ;;  %v1546_v43 = vrot.slane %v1545_v47, 2  ;;  %v1534_v11 = vrot.slane %v1533_v1, 1 }
  0x88   : > { %v1552_v46 = vmax.f32 %v1550_v23, %v1551_v32  ;;  %v3011_v40 = vmax.f32 %v1557_v56, %v1558_v59  ;;  %v1528_v3 = vmax.f32 %v1526_v37, %v1527_v28  ;;  %v369_v23 = vmax.f32 %v337_v39, 0.0  ;;  %v3024_v56 = vld [vmem:[%s2598_s20 + $0x50] sm:$0xff]  }
  0x89   : > { %3932 = vst [vmem:[#allocation28_spill] sm:$0xff] %v3009_v20  ;;  %v3017_v52 = vsel %vm385_vm0, %v1521_v19, -inf  ;;  %v1547_v33 = vmax.f32 %v1545_v47, %v1546_v43  ;;  %v3019_v5 = vmax.f32 %v1533_v1, %v1534_v11  ;;  %v2495_v37 = vunpack.c.h.bf16 %v2977_v63 }
  0x8a   : > { %3933 = vst [vmem:[#allocation29_spill] sm:$0xff] %v3011_v40  ;;  %3934 = vst [vmem:[#allocation30_spill] sm:$0xff] %v3017_v52  ;;  %v1553_v35 = vrot.slane %v1552_v46, 2  ;;  %v3027_v15 = vsel %vm385_vm0, %v1528_v3, -inf  ;;  %v2498_v32 = vunpack.c.l.bf16 %v2532_v30  ;;  %v722_v43 = vcombine.high %v369_v23, %v369_v23 }
  0x8b   : > { %3935 = vst [vmem:[#allocation31_spill] sm:$0xff] %v3019_v5  ;;  %3936 = vst [vmem:[#allocation32_spill] sm:$0xff] %v3027_v15  ;;  %v1548_v48 = vrot.slane %v1547_v33, 1  ;;  %v729_v47 = vrot.slane %v369_v23, %v2606_v7  ;;  %v2499_v1 = vunpack.c.h.bf16 %v2532_v30  ;;  %v299_v19 = vmul.f32 %v3006_v51, %v2495_v37  ;;  %v3046_v30 = vld [vmem:[%s3836_s2] ss:$0 sm:$0xff] }
  0x8c   : > { %v3030_v59 = vmax.f32 %v1552_v46, %v1553_v35  ;;  %402 = vst.msk [vmem:[%s2632_s28 + $0x80] sm:$0xff] %vm385_vm0, %v369_v23  ;;  %v300_v28 = vmul.f32 %v3006_v51, %v2498_v32  ;;  %v2502_v11 = vunpack.c.l.bf16 %v3024_v56  ;;  %v736_v39 = vrot.slane %v722_v43, %v2606_v7 }
  0x8d   : > { %v3035_v8 = vmax.f32 %v1547_v33, %v1548_v48  ;;  %v737_v63 = vcombine.high %v729_v47, %v729_v47  ;;  %v1571_v46 = vsel %vm1122_vm1, %v729_v47, -inf  ;;  %v301_v3 = vmul.f32 %v3006_v51, %v2499_v1 }
  0x8e   : > { %3937 = vst [vmem:[#allocation33_spill] sm:$0xff] %v3030_v59  ;;  %v1572_v35 = vrot.slane %v1571_v46, 4  ;;  %v338_v33 = vadd.f32 %v3046_v30, %v299_v19  ;;  %v339_v23 = vadd.f32 %v3046_v30, %v300_v28  ;;  %v302_v48 = vmul.f32 %v3006_v51, %v2502_v11 }
  0x8f   : > { %3938 = vst [vmem:[#allocation34_spill] sm:$0xff] %v3035_v8  ;;  %v738_v37 = vcombine.high %v736_v39, %v736_v39  ;;  %v1578_v32 = vsel %vm1122_vm1, %v737_v63, -inf  ;;  %v1585_v43 = vsel %vm1122_vm1, %v736_v39, -inf  ;;  %v340_v47 = vadd.f32 %v3046_v30, %v301_v3 }
  0x90   : > { %v1573_v1 = vmax.f32 %v1571_v46, %v1572_v35  ;;  %v1579_v44 = vrot.slane %v1578_v32, 4  ;;  %v1586_v41 = vrot.slane %v1585_v43, 4  ;;  %v370_v52 = vmax.f32 %v338_v33, 0.0 }
  0x91   : > { %v1592_v19 = vsel %vm1122_vm1, %v738_v37, -inf  ;;  %v371_v61 = vmax.f32 %v339_v23, 0.0  ;;  %v3055_v28 = vmax.f32 %v340_v47, 0.0  ;;  %v3058_v11 = vadd.f32 %v3046_v30, %v302_v48 }
  0x92   : > { %v1574_v8 = vrot.slane %v1573_v1, 2  ;;  %v1580_v63 = vmax.f32 %v1578_v32, %v1579_v44  ;;  %v1587_v5 = vmax.f32 %v1585_v43, %v1586_v41  ;;  %v1593_v39 = vrot.slane %v1592_v19, 4  ;;  %403 = vst.msk [vmem:[%s2632_s28 + $0x88] sm:$0xff] %vm385_vm0, %v370_v52 }
  0x93   : > { %v739_v3 = vcombine.high %v370_v52, %v370_v52  ;;  %v746_v46 = vrot.slane %v370_v52, %v2606_v7  ;;  %404 = vst.msk [vmem:[%s2632_s28 + $0x90] sm:$0xff] %vm385_vm0, %v371_v61  ;;  %v756_v35 = vcombine.high %v371_v61, %v371_v61  ;;  %v763_v33 = vrot.slane %v371_v61, %v2606_v7 }
  0x94   : > { %405 = vst.msk [vmem:[%s2632_s28 + $0x98] sm:$0xff] %vm385_vm0, %v3055_v28  ;;  %v1575_v23 = vmax.f32 %v1573_v1, %v1574_v8  ;;  %v1581_v48 = vrot.slane %v1580_v63, 2  ;;  %v1588_v37 = vrot.slane %v1587_v5, 2  ;;  %v1594_v47 = vmax.f32 %v1592_v19, %v1593_v39 }
  0x95   : > { %v3070_v41 = vrot.slane %v739_v3, %v2606_v7  ;;  %v754_v44 = vcombine.high %v746_v46, %v746_v46  ;;  %v1599_v32 = vsel %vm1122_vm1, %v746_v46, -inf  ;;  %v770_v52 = vrot.slane %v756_v35, %v2606_v7 }
  0x96   : > { %v1576_v43 = vrot.slane %v1575_v23, 1  ;;  %v1582_v15 = vmax.f32 %v1580_v63, %v1581_v48  ;;  %v1589_v40 = vmax.f32 %v1587_v5, %v1588_v37  ;;  %v1595_v59 = vrot.slane %v1594_v47, 2 }
  0x97   : > { %3939 = vst [vmem:[#allocation35_spill] sm:$0xff] %v3070_v41  ;;  %v1600_v20 = vrot.slane %v1599_v32, 4  ;;  %v1606_v8 = vsel %vm1122_vm1, %v754_v44, -inf  ;;  %v1613_v1 = vsel %vm1122_vm1, %v3070_v41, -inf  ;;  %v771_v63 = vcombine.high %v763_v33, %v763_v33 }
  0x98   : > { %v1577_v19 = vmax.f32 %v1575_v23, %v1576_v43  ;;  %v1583_v39 = vrot.slane %v1582_v15, 1  ;;  %v1590_v3 = vrot.slane %v1589_v40, 1  ;;  %v3079_v6 = vmax.f32 %v1594_v47, %v1595_v59 }
  0x99   : > { %v1601_v46 = vmax.f32 %v1599_v32, %v1600_v20  ;;  %v1607_v35 = vrot.slane %v1606_v8, 4  ;;  %v1614_v4 = vrot.slane %v1613_v1, 4  ;;  %v772_v23 = vcombine.high %v770_v52, %v770_v52 }
  0x9a   : > { %3940 = vst [vmem:[#allocation36_spill] sm:$0xff] %v3079_v6  ;;  %v1584_v5 = vmax.f32 %v1582_v15, %v1583_v39  ;;  %v3081_v48 = vmax.f32 %v1589_v40, %v1590_v3  ;;  %v3085_v61 = vsel %vm385_vm0, %v1577_v19, -inf  ;;  %v1627_v20 = vsel %vm1122_vm1, %v763_v33, -inf }
  0x9b   : > { %3942 = vst [vmem:[#allocation38_spill] sm:$0xff] %v3085_v61  ;;  %v1602_v44 = vrot.slane %v1601_v46, 2  ;;  %v1608_v31 = vmax.f32 %v1606_v8, %v1607_v35  ;;  %v3087_v41 = vmax.f32 %v1613_v1, %v1614_v4  ;;  %v1634_v47 = vsel %vm1122_vm1, %v771_v63, -inf }
  0x9c   : > { %3941 = vst [vmem:[#allocation37_spill] sm:$0xff] %v3081_v48  ;;  %v3090_v59 = vsel %vm385_vm0, %v1584_v5, -inf  ;;  %v1641_v40 = vsel %vm1122_vm1, %v770_v52, -inf  ;;  %v1628_v43 = vrot.slane %v1627_v20, 4  ;;  %v1635_v39 = vrot.slane %v1634_v47, 4 }
  0x9d   : > { %3943 = vst [vmem:[#allocation39_spill] sm:$0xff] %v3087_v41  ;;  %3944 = vst [vmem:[#allocation40_spill] sm:$0xff] %v3090_v59  ;;  %v1603_v15 = vmax.f32 %v1601_v46, %v1602_v44  ;;  %v1609_v32 = vrot.slane %v1608_v31, 2  ;;  %v1642_v19 = vrot.slane %v1641_v40, 4  ;;  %v1648_v3 = vsel %vm1122_vm1, %v772_v23, -inf }
  0x9e   : > { %v773_v4 = vcombine.high %v3055_v28, %v3055_v28  ;;  %v780_v8 = vrot.slane %v3055_v28, %v2606_v7  ;;  %v1629_v33 = vmax.f32 %v1627_v20, %v1628_v43  ;;  %v1636_v63 = vmax.f32 %v1634_v47, %v1635_v39 }
  0x9f   : > { %v1604_v1 = vrot.slane %v1603_v15, 1  ;;  %v3100_v35 = vmax.f32 %v1608_v31, %v1609_v32  ;;  %v1643_v5 = vmax.f32 %v1641_v40, %v1642_v19  ;;  %v1649_v52 = vrot.slane %v1648_v3, 4 }
  0xa0   : > { %v3103_v46 = vrot.slane %v773_v4, %v2606_v7  ;;  %v788_v44 = vcombine.high %v780_v8, %v780_v8  ;;  %v1630_v23 = vrot.slane %v1629_v33, 2  ;;  %v1637_v48 = vrot.slane %v1636_v63, 2 }
  0xa1   : > { %v3105_v37 = vmax.f32 %v1603_v15, %v1604_v1  ;;  %v1655_v59 = vsel %vm1122_vm1, %v780_v8, -inf  ;;  %v1644_v41 = vrot.slane %v1643_v5, 2  ;;  %v1650_v6 = vmax.f32 %v1648_v3, %v1649_v52 }
  0xa2   : > { %3945 = vst [vmem:[#allocation41_spill] sm:$0xff] %v3103_v46  ;;  %v1656_v28 = vrot.slane %v1655_v59, 4  ;;  %v1631_v20 = vmax.f32 %v1629_v33, %v1630_v23  ;;  %v1638_v47 = vmax.f32 %v1636_v63, %v1637_v48  ;;  %v1662_v40 = vsel %vm1122_vm1, %v788_v44, -inf }
  0xa3   : > { %3946 = vst [vmem:[#allocation42_spill] sm:$0xff] %v3105_v37  ;;  %v1669_v32 = vsel %vm1122_vm1, %v3103_v46, -inf  ;;  %v1645_v15 = vmax.f32 %v1643_v5, %v1644_v41  ;;  %v1651_v43 = vrot.slane %v1650_v6, 2  ;;  %v1663_v19 = vrot.slane %v1662_v40, 4 }
  0xa4   : > { %v1657_v39 = vmax.f32 %v1655_v59, %v1656_v28  ;;  %v1632_v4 = vrot.slane %v1631_v20, 1  ;;  %v1639_v8 = vrot.slane %v1638_v47, 1  ;;  %v1670_v1 = vrot.slane %v1669_v32, 4 }
  0xa5   : > { %v373_v3 = vmax.f32 %v3058_v11, 0.0  ;;  %v1646_v52 = vrot.slane %v1645_v15, 1  ;;  %v3114_v31 = vmax.f32 %v1650_v6, %v1651_v43  ;;  %v1664_v48 = vmax.f32 %v1662_v40, %v1663_v19 }
  0xa6   : > { %v1658_v33 = vrot.slane %v1657_v39, 2  ;;  %v1633_v63 = vmax.f32 %v1631_v20, %v1632_v4  ;;  %v1640_v44 = vmax.f32 %v1638_v47, %v1639_v8  ;;  %v3116_v23 = vmax.f32 %v1669_v32, %v1670_v1 }
  0xa7   : > { %3947 = vst [vmem:[#allocation43_spill] sm:$0xff] %v3114_v31  ;;  %406 = vst.msk [vmem:[%s2632_s28 + $0xa0] sm:$0xff] %vm385_vm0, %v373_v3  ;;  %v790_v41 = vcombine.high %v373_v3, %v373_v3  ;;  %v3120_v59 = vmax.f32 %v1645_v15, %v1646_v52  ;;  %v1665_v37 = vrot.slane %v1664_v48, 2  ;;  %v797_v20 = vrot.slane %v373_v3, %v2606_v7 }
  0xa8   : > { %3948 = vst [vmem:[#allocation44_spill] sm:$0xff] %v3116_v23  ;;  %v1659_v28 = vmax.f32 %v1657_v39, %v1658_v33  ;;  %v3124_v11 = vsel %vm385_vm0, %v1633_v63, -inf  ;;  %v3127_v6 = vsel %vm385_vm0, %v1640_v44, -inf  ;;  %v2503_v43 = vunpack.c.h.bf16 %v3024_v56  ;;  %v2534_v39 = vld [vmem:[%s2598_s20 + $0x58] sm:$0xff]   ;;  %v3143_v44 = vld [vmem:[%s2598_s20 + $0x60] sm:$0xff]  }
  0xa9   : > { %3949 = vst [vmem:[#allocation45_spill] sm:$0xff] %v3120_v59  ;;  %3950 = vst [vmem:[#allocation46_spill] sm:$0xff] %v3124_v11  ;;  %v804_v47 = vrot.slane %v790_v41, %v2606_v7  ;;  %v3133_v15 = vmax.f32 %v1664_v48, %v1665_v37  ;;  %v805_v19 = vcombine.high %v797_v20, %v797_v20  ;;  %v1683_v8 = vsel %vm1122_vm1, %v797_v20, -inf }
  0xaa   : > { %3951 = vst [vmem:[#allocation47_spill] sm:$0xff] %v3127_v6  ;;  %v1660_v32 = vrot.slane %v1659_v28, 1  ;;  %v1684_v3 = vrot.slane %v1683_v8, 4  ;;  %v303_v63 = vmul.f32 %v3006_v51, %v2503_v43  ;;  %v2506_v56 = vunpack.c.l.bf16 %v2534_v39 }
  0xab   : > { %3952 = vst [vmem:[#allocation48_spill] sm:$0xff] %v3133_v15  ;;  %v806_v4 = vcombine.high %v804_v47, %v804_v47  ;;  %v1697_v1 = vsel %vm1122_vm1, %v804_v47, -inf  ;;  %v1690_v37 = vsel %vm1122_vm1, %v805_v19, -inf  ;;  %v2507_v41 = vunpack.c.h.bf16 %v2534_v39 }
  0xac   : > { %v3139_v52 = vmax.f32 %v1659_v28, %v1660_v32  ;;  %v1698_v33 = vrot.slane %v1697_v1, 4  ;;  %v1685_v40 = vmax.f32 %v1683_v8, %v1684_v3  ;;  %v1691_v5 = vrot.slane %v1690_v37, 4 }
  0xad   : > { %v1704_v48 = vsel %vm1122_vm1, %v806_v4, -inf  ;;  %v342_v47 = vadd.f32 %v3046_v30, %v303_v63  ;;  %v304_v28 = vmul.f32 %v3006_v51, %v2506_v56  ;;  %v305_v32 = vmul.f32 %v3006_v51, %v2507_v41 }
  0xae   : > { %3953 = vst [vmem:[#allocation49_spill] sm:$0xff] %v3139_v52  ;;  %v1699_v11 = vmax.f32 %v1697_v1, %v1698_v33  ;;  %v1705_v20 = vrot.slane %v1704_v48, 4  ;;  %v2510_v43 = vunpack.c.l.bf16 %v3143_v44  ;;  %v1686_v61 = vrot.slane %v1685_v40, 2 }
  0xaf   : > { %v1692_v52 = vmax.f32 %v1690_v37, %v1691_v5  ;;  %v374_v4 = vmax.f32 %v342_v47, 0.0  ;;  %v343_v39 = vadd.f32 %v3046_v30, %v304_v28  ;;  %v344_v8 = vadd.f32 %v3046_v30, %v305_v32 }
  0xb0   : > { %v1700_v19 = vrot.slane %v1699_v11, 2  ;;  %v1706_v59 = vmax.f32 %v1704_v48, %v1705_v20  ;;  %v3154_v1 = vmul.f32 %v3006_v51, %v2510_v43  ;;  %v1687_v3 = vmax.f32 %v1685_v40, %v1686_v61 }
  0xb1   : > { %v1693_v33 = vrot.slane %v1692_v52, 2  ;;  %407 = vst.msk [vmem:[%s2632_s28 + $0xa8] sm:$0xff] %vm385_vm0, %v374_v4  ;;  %v807_v41 = vcombine.high %v374_v4, %v374_v4  ;;  %v814_v5 = vrot.slane %v374_v4, %v2606_v7  ;;  %v375_v37 = vmax.f32 %v343_v39, 0.0 }
  0xb2   : > { %v1701_v63 = vmax.f32 %v1699_v11, %v1700_v19  ;;  %v1707_v56 = vrot.slane %v1706_v59, 2  ;;  %v376_v48 = vmax.f32 %v344_v8, 0.0  ;;  %v1688_v20 = vrot.slane %v1687_v3, 1 }
  0xb3   : > { %v1694_v47 = vmax.f32 %v1692_v52, %v1693_v33  ;;  %v3162_v43 = vrot.slane %v807_v41, %v2606_v7  ;;  %v822_v61 = vcombine.high %v814_v5, %v814_v5  ;;  %v1711_v11 = vsel %vm1122_vm1, %v814_v5, -inf  ;;  %408 = vst.msk [vmem:[%s2632_s28 + $0xb0] sm:$0xff] %vm385_vm0, %v375_v37 }
  0xb4   : > { %v1702_v28 = vrot.slane %v1701_v63, 1  ;;  %v3159_v32 = vmax.f32 %v1706_v59, %v1707_v56  ;;  %v824_v40 = vcombine.high %v375_v37, %v375_v37  ;;  %409 = vst.msk [vmem:[%s2632_s28 + $0xb8] sm:$0xff] %vm385_vm0, %v376_v48  ;;  %v1689_v19 = vmax.f32 %v1687_v3, %v1688_v20 }
  0xb5   : > { %3955 = vst [vmem:[#allocation51_spill] sm:$0xff] %v3162_v43  ;;  %v1695_v4 = vrot.slane %v1694_v47, 1  ;;  %v1712_v8 = vrot.slane %v1711_v11, 4  ;;  %v1718_v33 = vsel %vm1122_vm1, %v822_v61, -inf  ;;  %v1725_v56 = vsel %vm1122_vm1, %v3162_v43, -inf }
  0xb6   : > { %3954 = vst [vmem:[#allocation50_spill] sm:$0xff] %v3159_v32  ;;  %v3169_v39 = vmax.f32 %v1701_v63, %v1702_v28  ;;  %v3178_v5 = vsel %vm385_vm0, %v1689_v19, -inf  ;;  %v1719_v6 = vrot.slane %v1718_v33, 4  ;;  %v1726_v3 = vrot.slane %v1725_v56, 4 }
  0xb7   : > { %v1696_v41 = vmax.f32 %v1694_v47, %v1695_v4  ;;  %3957 = vst [vmem:[#allocation53_spill] sm:$0xff] %v3178_v5  ;;  %v1713_v20 = vmax.f32 %v1711_v11, %v1712_v8  ;;  %v831_v63 = vrot.slane %v375_v37, %v2606_v7  ;;  %v838_v28 = vrot.slane %v824_v40, %v2606_v7 }
  0xb8   : > { %3956 = vst [vmem:[#allocation52_spill] sm:$0xff] %v3169_v39  ;;  %v841_v52 = vcombine.high %v376_v48, %v376_v48  ;;  %v1720_v39 = vmax.f32 %v1718_v33, %v1719_v6  ;;  %v3185_v61 = vmax.f32 %v1725_v56, %v1726_v3  ;;  %v848_v43 = vrot.slane %v376_v48, %v2606_v7 }
  0xb9   : > { %v3183_v59 = vsel %vm385_vm0, %v1696_v41, -inf  ;;  %v1714_v47 = vrot.slane %v1713_v20, 2  ;;  %v839_v4 = vcombine.high %v831_v63, %v831_v63  ;;  %v840_v19 = vcombine.high %v838_v28, %v838_v28 }
  0xba   : > { %3958 = vst [vmem:[#allocation54_spill] sm:$0xff] %v3183_v59  ;;  %3959 = vst [vmem:[#allocation55_spill] sm:$0xff] %v3185_v61  ;;  %v1739_v32 = vsel %vm1122_vm1, %v831_v63, -inf  ;;  %v1721_v46 = vrot.slane %v1720_v39, 2  ;;  %v1753_v37 = vsel %vm1122_vm1, %v838_v28, -inf  ;;  %v3191_v40 = vrot.slane %v841_v52, %v2606_v7 }
  0xbb   : > { %v1740_v11 = vrot.slane %v1739_v32, 4  ;;  %v1715_v8 = vmax.f32 %v1713_v20, %v1714_v47  ;;  %v1746_v41 = vsel %vm1122_vm1, %v839_v4, -inf  ;;  %v1754_v6 = vrot.slane %v1753_v37, 4 }
  0xbc   : > { %3960 = vst [vmem:[#allocation56_spill] sm:$0xff] %v3191_v40  ;;  %v1760_v33 = vsel %vm1122_vm1, %v840_v19, -inf  ;;  %v3195_v56 = vmax.f32 %v1720_v39, %v1721_v46  ;;  %v1747_v3 = vrot.slane %v1746_v41, 4  ;;  %v856_v23 = vcombine.high %v848_v43, %v848_v43 }
  0xbd   : > { %v1741_v48 = vmax.f32 %v1739_v32, %v1740_v11  ;;  %v1761_v59 = vrot.slane %v1760_v33, 4  ;;  %v1716_v61 = vrot.slane %v1715_v8, 1  ;;  %v1755_v63 = vmax.f32 %v1753_v37, %v1754_v6 }
  0xbe   : > { %3961 = vst [vmem:[#allocation57_spill] sm:$0xff] %v3195_v56  ;;  %v1748_v52 = vmax.f32 %v1746_v41, %v1747_v3  ;;  %v1767_v20 = vsel %vm1122_vm1, %v848_v43, -inf  ;;  %v1774_v46 = vsel %vm1122_vm1, %v856_v23, -inf  ;;  %v1781_v28 = vsel %vm1122_vm1, %v3191_v40, -inf }
  0xbf   : > { %v1742_v15 = vrot.slane %v1741_v48, 2  ;;  %v1762_v31 = vmax.f32 %v1760_v33, %v1761_v59  ;;  %v3200_v47 = vmax.f32 %v1715_v8, %v1716_v61  ;;  %v1756_v4 = vrot.slane %v1755_v63, 2 }
  0xc0   : > { %v1768_v19 = vrot.slane %v1767_v20, 4  ;;  %v1749_v39 = vrot.slane %v1748_v52, 2  ;;  %v1775_v56 = vrot.slane %v1774_v46, 4  ;;  %v345_v59 = vadd.f32 %v3046_v30, %v3154_v1 }
  0xc1   : > { %3962 = vst [vmem:[#allocation58_spill] sm:$0xff] %v3200_v47  ;;  %v1743_v32 = vmax.f32 %v1741_v48, %v1742_v15  ;;  %v1763_v11 = vrot.slane %v1762_v31, 2  ;;  %v1757_v37 = vmax.f32 %v1755_v63, %v1756_v4  ;;  %v1782_v33 = vrot.slane %v1781_v28, 4 }
  0xc2   : > { %v1769_v6 = vmax.f32 %v1767_v20, %v1768_v19  ;;  %v1750_v61 = vmax.f32 %v1748_v52, %v1749_v39  ;;  %v1776_v41 = vmax.f32 %v1774_v46, %v1775_v56  ;;  %v377_v48 = vmax.f32 %v345_v59, 0.0 }
  0xc3   : > { %v1744_v43 = vrot.slane %v1743_v32, 1  ;;  %v3207_v8 = vmax.f32 %v1762_v31, %v1763_v11  ;;  %v1758_v23 = vrot.slane %v1757_v37, 1  ;;  %v3212_v1 = vmax.f32 %v1781_v28, %v1782_v33  ;;  %v2536_v31 = vld [vmem:[%s2598_s20 + $0x68] sm:$0xff]  }
  0xc4   : > { %v1770_v15 = vrot.slane %v1769_v6, 2  ;;  %v1751_v63 = vrot.slane %v1750_v61, 1  ;;  %v1777_v4 = vrot.slane %v1776_v41, 2  ;;  %410 = vst.msk [vmem:[%s2632_s28 + $0xc0] sm:$0xff] %vm385_vm0, %v377_v48  ;;  %v858_v52 = vcombine.high %v377_v48, %v377_v48 }
  0xc5   : > { %3963 = vst [vmem:[#allocation59_spill] sm:$0xff] %v3207_v8  ;;  %v1745_v3 = vmax.f32 %v1743_v32, %v1744_v43  ;;  %v3210_v19 = vmax.f32 %v1757_v37, %v1758_v23  ;;  %3965 = vst [vmem:[#allocation61_spill] sm:$0xff] %v3212_v1  ;;  %v865_v32 = vrot.slane %v377_v48, %v2606_v7  ;;  %v2514_v23 = vunpack.c.l.bf16 %v2536_v31 }
  0xc6   : > { %v1771_v47 = vmax.f32 %v1769_v6, %v1770_v15  ;;  %v1752_v39 = vmax.f32 %v1750_v61, %v1751_v63  ;;  %v3220_v46 = vmax.f32 %v1776_v41, %v1777_v4  ;;  %v872_v28 = vrot.slane %v858_v52, %v2606_v7  ;;  %v3238_v52 = vld [vmem:[%s2598_s20 + $0x70] sm:$0xff]  }
  0xc7   : > { %3964 = vst [vmem:[#allocation60_spill] sm:$0xff] %v3210_v19  ;;  %v3218_v56 = vsel %vm385_vm0, %v1745_v3, -inf  ;;  %v2511_v6 = vunpack.c.h.bf16 %v3143_v44  ;;  %v873_v43 = vcombine.high %v865_v32, %v865_v32  ;;  %v1795_v61 = vsel %vm1122_vm1, %v865_v32, -inf }
  0xc8   : > { %3966 = vst [vmem:[#allocation62_spill] sm:$0xff] %v3218_v56  ;;  %3967 = vst [vmem:[#allocation63_spill] sm:$0xff] %v3220_v46  ;;  %v1772_v37 = vrot.slane %v1771_v47, 1  ;;  %v3228_v59 = vsel %vm385_vm0, %v1752_v39, -inf  ;;  %v874_v15 = vcombine.high %v872_v28, %v872_v28  ;;  %v1796_v33 = vrot.slane %v1795_v61, 4 }
  0xc9   : > { %3968 = vst [vmem:[#allocation64_spill] sm:$0xff] %v3228_v59  ;;  %v1809_v48 = vsel %vm1122_vm1, %v872_v28, -inf  ;;  %v1802_v3 = vsel %vm1122_vm1, %v873_v43, -inf  ;;  %v307_v4 = vmul.f32 %v3006_v51, %v2511_v6  ;;  %v308_v44 = vmul.f32 %v3006_v51, %v2514_v23 }
  0xca   : > { %v3231_v41 = vmax.f32 %v1771_v47, %v1772_v37  ;;  %v1810_v63 = vrot.slane %v1809_v48, 4  ;;  %v1797_v39 = vmax.f32 %v1795_v61, %v1796_v33  ;;  %v1803_v11 = vrot.slane %v1802_v3, 4 }
  0xcb   : > { %v1816_v32 = vsel %vm1122_vm1, %v874_v15, -inf  ;;  %v2515_v20 = vunpack.c.h.bf16 %v2536_v31  ;;  %v346_v56 = vadd.f32 %v3046_v30, %v307_v4  ;;  %v347_v28 = vadd.f32 %v3046_v30, %v308_v44 }
  0xcc   : > { %3969 = vst [vmem:[#allocation65_spill] sm:$0xff] %v3231_v41  ;;  %v1811_v47 = vmax.f32 %v1809_v48, %v1810_v63  ;;  %v1817_v37 = vrot.slane %v1816_v32, 4  ;;  %v1798_v43 = vrot.slane %v1797_v39, 2  ;;  %v1804_v5 = vmax.f32 %v1802_v3, %v1803_v11 }
  0xcd   : > { %v309_v6 = vmul.f32 %v3006_v51, %v2515_v20  ;;  %v2518_v23 = vunpack.c.l.bf16 %v3238_v52  ;;  %v378_v33 = vmax.f32 %v346_v56, 0.0  ;;  %v379_v19 = vmax.f32 %v347_v28, 0.0 }
  0xce   : > { %v1812_v41 = vrot.slane %v1811_v47, 2  ;;  %v1818_v61 = vmax.f32 %v1816_v32, %v1817_v37  ;;  %v1799_v15 = vmax.f32 %v1797_v39, %v1798_v43  ;;  %v1805_v31 = vrot.slane %v1804_v5, 2 }
  0xcf   : > { %v348_v48 = vadd.f32 %v3046_v30, %v309_v6  ;;  %v3247_v63 = vmul.f32 %v3006_v51, %v2518_v23  ;;  %411 = vst.msk [vmem:[%s2632_s28 + $0xc8] sm:$0xff] %vm385_vm0, %v378_v33  ;;  %v875_v11 = vcombine.high %v378_v33, %v378_v33  ;;  %v882_v20 = vrot.slane %v378_v33, %v2606_v7 }
  0xd0   : > { %v1813_v4 = vmax.f32 %v1811_v47, %v1812_v41  ;;  %v1819_v44 = vrot.slane %v1818_v61, 2  ;;  %412 = vst.msk [vmem:[%s2632_s28 + $0xd0] sm:$0xff] %vm385_vm0, %v379_v19  ;;  %v1800_v3 = vrot.slane %v1799_v15, 1  ;;  %v1806_v32 = vmax.f32 %v1804_v5, %v1805_v31 }
  0xd1   : > { %v892_v56 = vcombine.high %v379_v19, %v379_v19  ;;  %v899_v39 = vrot.slane %v379_v19, %v2606_v7  ;;  %v3258_v43 = vrot.slane %v875_v11, %v2606_v7  ;;  %v890_v41 = vcombine.high %v882_v20, %v882_v20 }
  0xd2   : > { %v1814_v37 = vrot.slane %v1813_v4, 1  ;;  %v3255_v28 = vmax.f32 %v1818_v61, %v1819_v44  ;;  %v1801_v47 = vmax.f32 %v1799_v15, %v1800_v3  ;;  %v1807_v6 = vrot.slane %v1806_v32, 1 }
  0xd3   : > { %3971 = vst [vmem:[#allocation67_spill] sm:$0xff] %v3258_v43  ;;  %v1823_v23 = vsel %vm1122_vm1, %v882_v20, -inf  ;;  %v906_v33 = vrot.slane %v892_v56, %v2606_v7  ;;  %v1830_v11 = vsel %vm1122_vm1, %v890_v41, -inf  ;;  %v1837_v15 = vsel %vm1122_vm1, %v3258_v43, -inf }
  0xd4   : > { %3970 = vst [vmem:[#allocation66_spill] sm:$0xff] %v3255_v28  ;;  %v3262_v59 = vmax.f32 %v1813_v4, %v1814_v37  ;;  %v1824_v31 = vrot.slane %v1823_v23, 4  ;;  %v1808_v61 = vmax.f32 %v1806_v32, %v1807_v6  ;;  %v3268_v44 = vsel %vm385_vm0, %v1801_v47, -inf }
  0xd5   : > { %3973 = vst [vmem:[#allocation69_spill] sm:$0xff] %v3268_v44  ;;  %v1831_v3 = vrot.slane %v1830_v11, 4  ;;  %v1838_v56 = vrot.slane %v1837_v15, 4  ;;  %v907_v4 = vcombine.high %v899_v39, %v899_v39  ;;  %v908_v5 = vcombine.high %v906_v33, %v906_v33 }
  0xd6   : > { %3972 = vst [vmem:[#allocation68_spill] sm:$0xff] %v3262_v59  ;;  %v1825_v20 = vmax.f32 %v1823_v23, %v1824_v31  ;;  %v3274_v37 = vsel %vm385_vm0, %v1808_v61, -inf  ;;  %v1851_v19 = vsel %vm1122_vm1, %v899_v39, -inf  ;;  %v1865_v32 = vsel %vm1122_vm1, %v906_v33, -inf }
  0xd7   : > { %3974 = vst [vmem:[#allocation70_spill] sm:$0xff] %v3274_v37  ;;  %v1832_v6 = vmax.f32 %v1830_v11, %v1831_v3  ;;  %v3278_v59 = vmax.f32 %v1837_v15, %v1838_v56  ;;  %v1852_v41 = vrot.slane %v1851_v19, 4  ;;  %v1858_v43 = vsel %vm1122_vm1, %v907_v4, -inf }
  0xd8   : > { %v1826_v47 = vrot.slane %v1825_v20, 2  ;;  %v1866_v23 = vrot.slane %v1865_v32, 4  ;;  %v1872_v31 = vsel %vm1122_vm1, %v908_v5, -inf  ;;  %v380_v28 = vmax.f32 %v348_v48, 0.0 }
  0xd9   : > { %3975 = vst [vmem:[#allocation71_spill] sm:$0xff] %v3278_v59  ;;  %v1833_v61 = vrot.slane %v1832_v6, 2  ;;  %v1853_v37 = vmax.f32 %v1851_v19, %v1852_v41  ;;  %v1859_v1 = vrot.slane %v1858_v43, 4  ;;  %v1873_v39 = vrot.slane %v1872_v31, 4 }
  0xda   : > { %v1827_v40 = vmax.f32 %v1825_v20, %v1826_v47  ;;  %v1867_v46 = vmax.f32 %v1865_v32, %v1866_v23  ;;  %413 = vst.msk [vmem:[%s2632_s28 + $0xd8] sm:$0xff] %vm385_vm0, %v380_v28  ;;  %v909_v33 = vcombine.high %v380_v28, %v380_v28  ;;  %v916_v11 = vrot.slane %v380_v28, %v2606_v7  ;;  %v2538_v28 = vld [vmem:[%s2598_s20 + $0x78] sm:$0xff]  }
  0xdb   : > { %v3285_v3 = vmax.f32 %v1832_v6, %v1833_v61  ;;  %v1854_v56 = vrot.slane %v1853_v37, 2  ;;  %v1860_v4 = vmax.f32 %v1858_v43, %v1859_v1  ;;  %v1874_v8 = vmax.f32 %v1872_v31, %v1873_v39 }
  0xdc   : > { %v1828_v15 = vrot.slane %v1827_v40, 1  ;;  %v1868_v59 = vrot.slane %v1867_v46, 2  ;;  %v3288_v48 = vrot.slane %v909_v33, %v2606_v7  ;;  %v924_v5 = vcombine.high %v916_v11, %v916_v11 }
  0xdd   : > { %v1855_v20 = vmax.f32 %v1853_v37, %v1854_v56  ;;  %v1861_v32 = vrot.slane %v1860_v4, 2  ;;  %v1879_v47 = vsel %vm1122_vm1, %v916_v11, -inf  ;;  %v1875_v23 = vrot.slane %v1874_v8, 2 }
  0xde   : > { %3976 = vst [vmem:[#allocation72_spill] sm:$0xff] %v3288_v48  ;;  %v3290_v19 = vmax.f32 %v1827_v40, %v1828_v15  ;;  %v1869_v41 = vmax.f32 %v1867_v46, %v1868_v59  ;;  %v1880_v6 = vrot.slane %v1879_v47, 4  ;;  %v1886_v43 = vsel %vm1122_vm1, %v924_v5, -inf }
  0xdf   : > { %v1856_v61 = vrot.slane %v1855_v20, 1  ;;  %v1862_v1 = vmax.f32 %v1860_v4, %v1861_v32  ;;  %v1893_v31 = vsel %vm1122_vm1, %v3288_v48, -inf  ;;  %v3298_v39 = vmax.f32 %v1874_v8, %v1875_v23 }
  0xe0   : > { %3977 = vst [vmem:[#allocation73_spill] sm:$0xff] %v3290_v19  ;;  %v1870_v40 = vrot.slane %v1869_v41, 1  ;;  %v1881_v37 = vmax.f32 %v1879_v47, %v1880_v6  ;;  %v1887_v33 = vrot.slane %v1886_v43, 4  ;;  %v1894_v59 = vrot.slane %v1893_v31, 4 }
  0xe1   : > { %v1857_v11 = vmax.f32 %v1855_v20, %v1856_v61  ;;  %v1863_v46 = vrot.slane %v1862_v1, 1  ;;  %v349_v15 = vadd.f32 %v3046_v30, %v3247_v63  ;;  %v2519_v63 = vunpack.c.h.bf16 %v3238_v52 }
  0xe2   : > { %v3302_v56 = vmax.f32 %v1869_v41, %v1870_v40  ;;  %v1882_v5 = vrot.slane %v1881_v37, 2  ;;  %v1888_v32 = vmax.f32 %v1886_v43, %v1887_v33  ;;  %v3309_v47 = vmax.f32 %v1893_v31, %v1894_v59 }
  0xe3   : > { %v1864_v19 = vmax.f32 %v1862_v1, %v1863_v46  ;;  %v3307_v8 = vsel %vm385_vm0, %v1857_v11, -inf  ;;  %v381_v20 = vmax.f32 %v349_v15, 0.0  ;;  %v2522_v40 = vunpack.c.l.bf16 %v2538_v28 }
  0xe4   : > { %3978 = vst [vmem:[#allocation74_spill] sm:$0xff] %v3302_v56  ;;  %3979 = vst [vmem:[#allocation75_spill] sm:$0xff] %v3307_v8  ;;  %v1883_v6 = vmax.f32 %v1881_v37, %v1882_v5  ;;  %v1889_v61 = vrot.slane %v1888_v32, 2  ;;  %v311_v11 = vmul.f32 %v3006_v51, %v2519_v63  ;;  %v2523_v46 = vunpack.c.h.bf16 %v2538_v28 }
  0xe5   : > { %3980 = vst [vmem:[#allocation76_spill] sm:$0xff] %v3309_v47  ;;  %v3315_v41 = vsel %vm385_vm0, %v1864_v19, -inf  ;;  %414 = vst.msk [vmem:[%s2632_s28 + $0xe0] sm:$0xff] %vm385_vm0, %v381_v20  ;;  %v926_v43 = vcombine.high %v381_v20, %v381_v20  ;;  %v933_v1 = vrot.slane %v381_v20, %v2606_v7  ;;  %v312_v19 = vmul.f32 %v3006_v51, %v2522_v40 }
  0xe6   : > { %3981 = vst [vmem:[#allocation77_spill] sm:$0xff] %v3315_v41  ;;  %v1884_v33 = vrot.slane %v1883_v6, 1  ;;  %v3320_v31 = vmax.f32 %v1888_v32, %v1889_v61  ;;  %v350_v23 = vadd.f32 %v3046_v30, %v311_v11  ;;  %v313_v20 = vmul.f32 %v3006_v51, %v2523_v46 }
  0xe7   : > { %v940_v37 = vrot.slane %v926_v43, %v2606_v7  ;;  %v941_v59 = vcombine.high %v933_v1, %v933_v1  ;;  %v1907_v52 = vsel %vm1122_vm1, %v933_v1, -inf  ;;  %v351_v61 = vadd.f32 %v3046_v30, %v312_v19 }
  0xe8   : > { %v3326_v15 = vmax.f32 %v1883_v6, %v1884_v33  ;;  %v1908_v5 = vrot.slane %v1907_v52, 4  ;;  %v382_v40 = vmax.f32 %v350_v23, 0.0  ;;  %v352_v11 = vadd.f32 %v3046_v30, %v313_v20 }
  0xe9   : > { %v942_v4 = vcombine.high %v940_v37, %v940_v37  ;;  %v1914_v32 = vsel %vm1122_vm1, %v941_v59, -inf  ;;  %v1921_v28 = vsel %vm1122_vm1, %v940_v37, -inf  ;;  %v383_v33 = vmax.f32 %v351_v61, 0.0 }
  0xea   : > { %3982 = vst [vmem:[#allocation78_spill] sm:$0xff] %v3326_v15  ;;  %v1909_v63 = vmax.f32 %v1907_v52, %v1908_v5  ;;  %v1915_v43 = vrot.slane %v1914_v32, 4  ;;  %v1922_v1 = vrot.slane %v1921_v28, 4  ;;  %v3983_v51 = vrot.slane %v2697_v38, 1  ;;  %415 = vst.msk [vmem:[%s2632_s28 + $0xe8] sm:$0xff] %vm385_vm0, %v382_v40 }
  0xeb   : > { %v1928_v6 = vsel %vm1122_vm1, %v942_v4, -inf  ;;  %v943_v52 = vcombine.high %v382_v40, %v382_v40  ;;  %v950_v19 = vrot.slane %v382_v40, %v2606_v7  ;;  %416 = vst.msk [vmem:[%s2632_s28 + $0xf0] sm:$0xff] %vm385_vm0, %v383_v33  ;;  %v960_v4 = vcombine.high %v383_v33, %v383_v33 }
  0xec   : > { %v3338_v46 = vmax.f32 %v2697_v38, %v3983_v51  ;;  %v1910_v59 = vrot.slane %v1909_v63, 2  ;;  %v1916_v8 = vmax.f32 %v1914_v32, %v1915_v43  ;;  %v1923_v37 = vmax.f32 %v1921_v28, %v1922_v1 }
  0xed   : > { %v1929_v44 = vrot.slane %v1928_v6, 4  ;;  %v967_v23 = vrot.slane %v383_v33, %v2606_v7  ;;  %v3347_v38 = vrot.slane %v943_v52, %v2606_v7  ;;  %v958_v32 = vcombine.high %v950_v19, %v950_v19 }
  0xee   : > { %v1911_v30 = vmax.f32 %v1909_v63, %v1910_v59  ;;  %v1917_v5 = vrot.slane %v1916_v8, 2  ;;  %v1924_v20 = vrot.slane %v1923_v37, 2  ;;  %v1935_v28 = vsel %vm1122_vm1, %v950_v19, -inf }
  0xef   : > { %v1930_v61 = vmax.f32 %v1928_v6, %v1929_v44  ;;  %3984 = vst [vmem:[#allocation79_spill] sm:$0xff] %v3347_v38  ;;  %v974_v43 = vrot.slane %v960_v4, %v2606_v7  ;;  %v1936_v33 = vrot.slane %v1935_v28, 4  ;;  %v1942_v63 = vsel %vm1122_vm1, %v958_v32, -inf }
  0xf0   : > { %v1912_v1 = vrot.slane %v1911_v30, 1  ;;  %v1918_v51 = vmax.f32 %v1916_v8, %v1917_v5  ;;  %v1925_v40 = vmax.f32 %v1923_v37, %v1924_v20  ;;  %v1949_v44 = vsel %vm1122_vm1, %v3347_v38, -inf }
  0xf1   : > { %v1931_v15 = vrot.slane %v1930_v61, 2  ;;  %v1937_v19 = vmax.f32 %v1935_v28, %v1936_v33  ;;  %v1943_v4 = vrot.slane %v1942_v63, 4  ;;  %v1950_v48 = vrot.slane %v1949_v44, 4 }
  0xf2   : > { %v1913_v6 = vmax.f32 %v1911_v30, %v1912_v1  ;;  %v1919_v59 = vrot.slane %v1918_v51, 1  ;;  %v1926_v52 = vrot.slane %v1925_v40, 1  ;;  %v975_v8 = vcombine.high %v967_v23, %v967_v23 }
  0xf3   : > { %v3356_v41 = vmax.f32 %v1930_v61, %v1931_v15  ;;  %v1938_v32 = vrot.slane %v1937_v19, 2  ;;  %v1944_v47 = vmax.f32 %v1942_v63, %v1943_v4  ;;  %v3364_v38 = vmax.f32 %v1949_v44, %v1950_v48 }
  0xf4   : > { %v1920_v37 = vmax.f32 %v1918_v51, %v1919_v59  ;;  %v3358_v5 = vmax.f32 %v1925_v40, %v1926_v52  ;;  %v3362_v56 = vsel %vm385_vm0, %v1913_v6, -inf  ;;  %v976_v30 = vcombine.high %v974_v43, %v974_v43 }
  0xf5   : > { %3986 = vst [vmem:[#allocation81_spill] sm:$0xff] %v3364_v38  ;;  %v1963_v61 = vsel %vm1122_vm1, %v967_v23, -inf  ;;  %v1970_v28 = vsel %vm1122_vm1, %v975_v8, -inf  ;;  %v1977_v1 = vsel %vm1122_vm1, %v974_v43, -inf  ;;  %v1939_v51 = vmax.f32 %v1937_v19, %v1938_v32 }
  0xf6   : > { %3985 = vst [vmem:[#allocation80_spill] sm:$0xff] %v3358_v5  ;;  %v3367_v15 = vsel %vm385_vm0, %v1920_v37, -inf  ;;  %v1945_v40 = vrot.slane %v1944_v47, 2  ;;  %v1964_v33 = vrot.slane %v1963_v61, 4  ;;  %v1971_v6 = vrot.slane %v1970_v28, 4 }
  0xf7   : > { %3987 = vst [vmem:[#allocation82_spill] sm:$0xff] %v3367_v15  ;;  %v1978_v59 = vrot.slane %v1977_v1, 4  ;;  %v1984_v63 = vsel %vm1122_vm1, %v976_v30, -inf  ;;  %v384_v48 = vmax.f32 %v352_v11, 0.0  ;;  %v1163_v44 = vrot.slane %v2699_v45, 1 }
  0xf8   : > { %v1940_v52 = vrot.slane %v1939_v51, 1  ;;  %v3374_v4 = vmax.f32 %v1944_v47, %v1945_v40  ;;  %v1965_v37 = vmax.f32 %v1963_v61, %v1964_v33  ;;  %v1972_v23 = vmax.f32 %v1970_v28, %v1971_v6 }
  0xf9   : > { %v1979_v20 = vmax.f32 %v1977_v1, %v1978_v59  ;;  %v1985_v8 = vrot.slane %v1984_v63, 4  ;;  %417 = vst.msk [vmem:[%s2632_s28 + $0xf8] sm:$0xff] %vm385_vm0, %v384_v48  ;;  %v977_v43 = vcombine.high %v384_v48, %v384_v48  ;;  %v984_v19 = vrot.slane %v384_v48, %v2606_v7 }
  0xfa   : > { %v3379_v32 = vmax.f32 %v1939_v51, %v1940_v52  ;;  %v1966_v5 = vrot.slane %v1965_v37, 2  ;;  %v1973_v15 = vrot.slane %v1972_v23, 2  ;;  %v3382_v11 = vmax.f32 %v2699_v45, %v1163_v44 }
  0xfb   : > { %v1980_v30 = vrot.slane %v1979_v20, 2  ;;  %v1986_v38 = vmax.f32 %v1984_v63, %v1985_v8  ;;  %v3385_v47 = vrot.slane %v977_v43, %v2606_v7  ;;  %v992_v61 = vcombine.high %v984_v19, %v984_v19 }
  0xfc   : > { %3988 = vst [vmem:[#allocation83_spill] sm:$0xff] %v3379_v32  ;;  %v1967_v28 = vmax.f32 %v1965_v37, %v1966_v5  ;;  %v1974_v1 = vmax.f32 %v1972_v23, %v1973_v15  ;;  %v1991_v40 = vsel %vm1122_vm1, %v984_v19, -inf  ;;  %v1168_v33 = vrot.slane %v2693_v25, 2 }
  0xfd   : > { %3989 = vst [vmem:[#allocation84_spill] sm:$0xff] %v3385_v47  ;;  %v1981_v6 = vmax.f32 %v1979_v20, %v1980_v30  ;;  %v1987_v51 = vrot.slane %v1986_v38, 2  ;;  %v1992_v48 = vrot.slane %v1991_v40, 4  ;;  %v1998_v63 = vsel %vm1122_vm1, %v992_v61, -inf }
  0xfe   : > { %v1968_v45 = vrot.slane %v1967_v28, 1  ;;  %v1975_v44 = vrot.slane %v1974_v1, 1  ;;  %v2005_v7 = vsel %vm1122_vm1, %v3385_v47, -inf  ;;  %v1999_v37 = vrot.slane %v1998_v63, 4 }
  0xff   : > { %v1982_v52 = vrot.slane %v1981_v6, 1  ;;  %v3394_v5 = vmax.f32 %v1986_v38, %v1987_v51  ;;  %v1993_v15 = vmax.f32 %v1991_v40, %v1992_v48  ;;  %v2006_v20 = vrot.slane %v2005_v7, 4 }
 0x100   : > { %v1969_v23 = vmax.f32 %v1967_v28, %v1968_v45  ;;  %v1976_v8 = vmax.f32 %v1974_v1, %v1975_v44  ;;  %v1169_v43 = vmax.f32 %v2693_v25, %v1168_v33  ;;  %v2000_v32 = vmax.f32 %v1998_v63, %v1999_v37 }
 0x101   : > { %v3397_v19 = vmax.f32 %v1981_v6, %v1982_v52  ;;  %v1989_v30 = vrot.slane %v3394_v5, 1  ;;  %v1994_v59 = vrot.slane %v1993_v15, 2  ;;  %v3406_v38 = vmax.f32 %v2005_v7, %v2006_v20 }
 0x102   : > { %v3401_v61 = vsel %vm385_vm0, %v1969_v23, -inf  ;;  %v3404_v47 = vsel %vm385_vm0, %v1976_v8, -inf  ;;  %v1170_v40 = vrot.slane %v1169_v43, 1  ;;  %v2001_v25 = vrot.slane %v2000_v32, 2 }
 0x103   : > { %v2189_v28 = vmax.f32 %v3362_v56, %v3401_v61  ;;  %v1995_v1 = vmax.f32 %v1993_v15, %v1994_v59  ;;  %v3990_v33 = vcombine.high %v2681_v55, %v2681_v55  ;;  %v3991_v45 = vrot.slane %v2735_v26, 1 }
 0x104   : > { %v1171_v51 = vmax.f32 %v1169_v43, %v1170_v40  ;;  %v1219_v63 = vrot.slane %v2752_v58, 1  ;;  %v3418_v52 = vmax.f32 %v2000_v32, %v2001_v25  ;;  %v1224_v37 = vrot.slane %v2731_v22, 2 }
 0x105   : > { %v1172_v6 = vsel %vm1122_vm1, %v3990_v33, -inf  ;;  %v1206_v44 = vmax.f32 %v2735_v26, %v3991_v45  ;;  %v1996_v7 = vrot.slane %v1995_v1, 1  ;;  %v3992_v59 = vcombine.high %v2718_v0, %v2718_v0 }
 0x106   : > { %v1173_v48 = vrot.slane %v1172_v6, 4  ;;  %v1220_v23 = vmax.f32 %v2752_v58, %v1219_v63  ;;  %v2024_v20 = vmax.f32 %v2711_v60, %v2745_v34  ;;  %v1225_v43 = vmax.f32 %v2731_v22, %v1224_v37 }
 0x107   : > { %v1228_v55 = vsel %vm1122_vm1, %v3992_v59, -inf  ;;  %v3428_v26 = vmax.f32 %v1995_v1, %v1996_v7  ;;  %v2025_v32 = vsel %vm385_vm0, %v2701_v49, -inf  ;;  %v2026_v40 = vsel %vm385_vm0, %v2747_v36, -inf }
 0x108   : > { %v1174_v15 = vmax.f32 %v1172_v6, %v1173_v48  ;;  %v1229_v8 = vrot.slane %v1228_v55, 4  ;;  %v2027_v33 = vmax.f32 %v2025_v32, %v2026_v40  ;;  %v2028_v58 = vsel %vm385_vm0, %v3338_v46, -inf }
 0x109   : > { %v1226_v6 = vrot.slane %v1225_v43, 1  ;;  %v2029_v48 = vsel %vm385_vm0, %v1206_v44, -inf  ;;  %v2031_v60 = vsel %vm385_vm0, %v2707_v54, -inf  ;;  %v2032_v22 = vsel %vm385_vm0, %v2755_v2, -inf }
 0x10a   : > { %v1175_v0 = vrot.slane %v1174_v15, 2  ;;  %v1230_v25 = vmax.f32 %v1228_v55, %v1229_v8  ;;  %v2030_v1 = vmax.f32 %v2028_v58, %v2029_v48  ;;  %v2033_v45 = vmax.f32 %v2031_v60, %v2032_v22 }
 0x10b   : > { %v1227_v36 = vmax.f32 %v1225_v43, %v1226_v6  ;;  %v2034_v63 = vsel %vm385_vm0, %v3382_v11, -inf  ;;  %v2035_v7 = vsel %vm385_vm0, %v1220_v23, -inf  ;;  %v2037_v46 = vsel %vm385_vm0, %v1171_v51, -inf }
 0x10c   : > { %v1176_v34 = vmax.f32 %v1174_v15, %v1175_v0  ;;  %v1231_v49 = vrot.slane %v1230_v25, 2  ;;  %v2036_v59 = vmax.f32 %v2034_v63, %v2035_v7  ;;  %v3993_v2 = vmax.f32 %v2705_v53, %v2738_v27 }
 0x10d   : > { %v2038_v54 = vsel %vm385_vm0, %v1227_v36, -inf  ;;  %v1275_v0 = vrot.slane %v2791_v14, 1  ;;  %v3995_v6 = vcombine.high %v2764_v12, %v2764_v12  ;;  %v3996_v60 = vrot.slane %v2810_v18, 1 }
 0x10e   : > { %v1177_v37 = vrot.slane %v1176_v34, 1  ;;  %v1232_v44 = vmax.f32 %v1230_v25, %v1231_v49  ;;  %v2276_v55 = vsel %vm2275_vm2, %v2024_v20, %v3993_v2  ;;  %v2039_v8 = vmax.f32 %v2037_v46, %v2038_v54 }
 0x10f   : > { %v2278_v23 = vsel %vm2277_vm3, %v2027_v33, %v2276_v55  ;;  %v3994_v20 = vrot.slane %v2774_v42, 1  ;;  %v1280_v25 = vrot.slane %v2780_v62, 2  ;;  %v1284_v48 = vsel %vm1122_vm1, %v3995_v6, -inf }
 0x110   : > { %v1178_v15 = vmax.f32 %v1176_v34, %v1177_v37  ;;  %v1233_v11 = vrot.slane %v1232_v44, 1  ;;  %v2280_v51 = vsel %vm2279_vm4, %v2030_v1, %v2278_v23  ;;  %v1318_v22 = vmax.f32 %v2810_v18, %v3996_v60 }
 0x111   : > { %v2282_v53 = vsel %vm2281_vm5, %v2033_v45, %v2280_v51  ;;  %v1262_v40 = vmax.f32 %v2774_v42, %v3994_v20  ;;  %v1276_v34 = vmax.f32 %v2791_v14, %v1275_v0  ;;  %v1281_v49 = vmax.f32 %v2780_v62, %v1280_v25  ;;  %v4000_v51 = vld [vmem:[#allocation4_spill] sm:$0xff] }
 0x112   : > { %v1234_v43 = vmax.f32 %v1232_v44, %v1233_v11  ;;  %v2040_v32 = vsel %vm385_vm0, %v1178_v15, -inf  ;;  %v2284_v27 = vsel %vm2283_vm6, %v2036_v59, %v2282_v53  ;;  %v1285_v1 = vrot.slane %v1284_v48, 4  ;;  %v3998_v59 = vld [vmem:[#allocation2_spill] sm:$0xff]  ;;  %v4001_v53 = vld [vmem:[#allocation7_spill] sm:$0xff] }
 0x113   : > { %v2286_v58 = vsel %vm2285_vm7, %v2039_v8, %v2284_v27  ;;  %v1331_v12 = vrot.slane %v2831_v10, 1  ;;  %v1336_v45 = vrot.slane %v2812_v24, 2  ;;  %v3997_v36 = vcombine.high %v2801_v29, %v2801_v29  ;;  %v3999_v29 = vld [vmem:[#allocation5_spill] sm:$0xff] }
 0x114   : > { %v2041_v33 = vsel %vm385_vm0, %v1234_v43, -inf  ;;  %v2048_v63 = vmax.f32 %v2786_v9, %v2827_v57  ;;  %v1282_v46 = vrot.slane %v1281_v49, 1  ;;  %v1286_v37 = vmax.f32 %v1284_v48, %v1285_v1 }
 0x115   : > { %v2042_v42 = vmax.f32 %v2040_v32, %v2041_v33  ;;  %v1340_v18 = vsel %vm1122_vm1, %v3997_v36, -inf  ;;  %v1332_v62 = vmax.f32 %v2831_v10, %v1331_v12  ;;  %v1337_v44 = vmax.f32 %v2812_v24, %v1336_v45 }
 0x116   : > { %v1341_v14 = vrot.slane %v1340_v18, 4  ;;  %v2049_v54 = vsel %vm385_vm0, %v3998_v59, -inf  ;;  %v2050_v2 = vsel %vm385_vm0, %v3999_v29, -inf  ;;  %v1283_v55 = vmax.f32 %v1281_v49, %v1282_v46 }
 0x117   : > { %v2288_v7 = vsel %vm2287_vm8, %v2042_v42, %v2286_v58  ;;  %v1287_v15 = vrot.slane %v1286_v37, 2  ;;  %v2051_v57 = vmax.f32 %v2049_v54, %v2050_v2  ;;  %v1338_v11 = vrot.slane %v1337_v44, 1  ;;  %v4003_v42 = vld [vmem:[#allocation6_spill] sm:$0xff] }
 0x118   : > { %2346 = vst.msk [vmem:[%s3474_s10] sm:$0xff] %vm385_vm0, %v2288_v7  ;;  %v1342_v9 = vmax.f32 %v1340_v18, %v1341_v14  ;;  %v2052_v8 = vsel %vm385_vm0, %v1262_v40, -inf  ;;  %v2053_v23 = vsel %vm385_vm0, %v1318_v22, -inf  ;;  %v2055_v10 = vsel %vm385_vm0, %v4000_v51, -inf  ;;  %v4002_v22 = vld [vmem:[#allocation3_spill] sm:$0xff]  ;;  %v4009_v51 = vld [vmem:[#allocation17_spill] sm:$0xff] }
 0x119   : > { %v1288_v43 = vmax.f32 %v1286_v37, %v1287_v15  ;;  %v2054_v32 = vmax.f32 %v2052_v8, %v2053_v23  ;;  %v2056_v27 = vsel %vm385_vm0, %v4001_v53, -inf  ;;  %v1339_v20 = vmax.f32 %v1337_v44, %v1338_v11  ;;  %v4006_v44 = vld [vmem:[#allocation8_spill] sm:$0xff]  ;;  %v4010_v53 = vld [vmem:[#allocation13_spill] sm:$0xff] }
 0x11a   : > { %v1343_v24 = vrot.slane %v1342_v9, 2  ;;  %v2057_v0 = vmax.f32 %v2055_v10, %v2056_v27  ;;  %v2058_v25 = vsel %vm385_vm0, %v1276_v34, -inf  ;;  %v2059_v33 = vsel %vm385_vm0, %v1332_v62, -inf }
 0x11b   : > { %v1289_v58 = vrot.slane %v1288_v43, 1  ;;  %v2060_v40 = vmax.f32 %v2058_v25, %v2059_v33  ;;  %v2061_v48 = vsel %vm385_vm0, %v1283_v55, -inf  ;;  %v2062_v60 = vsel %vm385_vm0, %v1339_v20, -inf  ;;  %v4012_v25 = vld [vmem:[#allocation16_spill] sm:$0xff]  ;;  %v4013_v33 = vld [vmem:[#allocation11_spill] sm:$0xff] }
 0x11c   : > { %v1344_v6 = vmax.f32 %v1342_v9, %v1343_v24  ;;  %v4004_v49 = vmax.f32 %v4002_v22, %v4003_v42  ;;  %v4005_v12 = vrot.slane %v2879_v13, 1  ;;  %v1387_v34 = vrot.slane %v2894_v17, 1  ;;  %v4015_v22 = vld [vmem:[#allocation14_spill] sm:$0xff] }
 0x11d   : > { %v1290_v36 = vmax.f32 %v1288_v43, %v1289_v58  ;;  %v2063_v7 = vmax.f32 %v2061_v48, %v2062_v60  ;;  %v1392_v62 = vrot.slane %v2877_v21, 2  ;;  %v4008_v9 = vrot.slane %v2914_v50, 1  ;;  %v4014_v48 = vld [vmem:[#allocation9_spill] sm:$0xff] }
 0x11e   : > { %v2289_v1 = vsel %vm2275_vm2, %v2048_v63, %v4004_v49  ;;  %v1374_v45 = vmax.f32 %v2879_v13, %v4005_v12  ;;  %v1345_v18 = vrot.slane %v1344_v6, 1  ;;  %v1388_v14 = vmax.f32 %v2894_v17, %v1387_v34 }
 0x11f   : > { %v2290_v46 = vsel %vm2277_vm3, %v2051_v57, %v2289_v1  ;;  %v4007_v63 = vcombine.high %v4006_v44, %v4006_v44  ;;  %v2064_v13 = vsel %vm385_vm0, %v1290_v36, -inf  ;;  %v1393_v15 = vmax.f32 %v2877_v21, %v1392_v62 }
 0x120   : > { %v2291_v37 = vsel %vm2279_vm4, %v2054_v32, %v2290_v46  ;;  %v1346_v54 = vmax.f32 %v1344_v6, %v1345_v18  ;;  %v1430_v17 = vmax.f32 %v2914_v50, %v4008_v9  ;;  %v1443_v57 = vrot.slane %v2942_v16, 1  ;;  %v4016_v18 = vld [vmem:[#allocation12_spill] sm:$0xff]  ;;  %v4017_v46 = vld [vmem:[#allocation18_spill] sm:$0xff] }
 0x121   : > { %v1396_v59 = vsel %vm1122_vm1, %v4007_v63, -inf  ;;  %v2292_v29 = vsel %vm2281_vm5, %v2057_v0, %v2291_v37  ;;  %v1448_v10 = vrot.slane %v4009_v51, 2  ;;  %v1394_v24 = vrot.slane %v1393_v15, 1 }
 0x122   : > { %v1397_v2 = vrot.slane %v1396_v59, 4  ;;  %v2293_v55 = vsel %vm2283_vm6, %v2060_v40, %v2292_v29  ;;  %v2065_v11 = vsel %vm385_vm0, %v1346_v54, -inf  ;;  %v1444_v32 = vmax.f32 %v2942_v16, %v1443_v57  ;;  %v4018_v57 = vld [vmem:[#allocation10_spill] sm:$0xff] }
 0x123   : > { %v2294_v8 = vsel %vm2285_vm7, %v2063_v7, %v2293_v55  ;;  %v2066_v43 = vmax.f32 %v2064_v13, %v2065_v11  ;;  %v4011_v21 = vcombine.high %v4010_v53, %v4010_v53  ;;  %v1449_v20 = vmax.f32 %v4009_v51, %v1448_v10  ;;  %v4019_v11 = vld [vmem:[#allocation15_spill] sm:$0xff]  ;;  %v4021_v51 = vld [vmem:[#allocation20_spill] sm:$0xff] }
 0x124   : > { %v1398_v23 = vmax.f32 %v1396_v59, %v1397_v2  ;;  %v2072_v58 = vmax.f32 %v4013_v33, %v4012_v25  ;;  %v1395_v40 = vmax.f32 %v1393_v15, %v1394_v24  ;;  %v2073_v60 = vsel %vm385_vm0, %v4014_v48, -inf  ;;  %v4025_v25 = vld [vmem:[#allocation19_spill] sm:$0xff] }
 0x125   : > { %v1452_v27 = vsel %vm1122_vm1, %v4011_v21, -inf  ;;  %v2295_v6 = vsel %vm2287_vm8, %v2066_v43, %v2294_v8  ;;  %v2074_v16 = vsel %vm385_vm0, %v4015_v22, -inf  ;;  %v1450_v49 = vrot.slane %v1449_v20, 1 }
 0x126   : > { %v1399_v50 = vrot.slane %v1398_v23, 2  ;;  %v1453_v0 = vrot.slane %v1452_v27, 4  ;;  %2347 = vst.msk [vmem:[%s3474_s10 + $0x8] sm:$0xff] %vm385_vm0, %v2295_v6  ;;  %v2075_v12 = vmax.f32 %v2073_v60, %v2074_v16  ;;  %v2076_v34 = vsel %vm385_vm0, %v1374_v45, -inf  ;;  %v4027_v6 = vld [vmem:[#allocation28_spill] sm:$0xff] }
 0x127   : > { %v2077_v36 = vsel %vm385_vm0, %v1430_v17, -inf  ;;  %v2079_v7 = vsel %vm385_vm0, %v4016_v18, -inf  ;;  %v2080_v37 = vsel %vm385_vm0, %v4017_v46, -inf  ;;  %v1451_v44 = vmax.f32 %v1449_v20, %v1450_v49  ;;  %v4031_v18 = vld [vmem:[#allocation27_spill] sm:$0xff] }
 0x128   : > { %v1400_v42 = vmax.f32 %v1398_v23, %v1399_v50  ;;  %v1454_v1 = vmax.f32 %v1452_v27, %v1453_v0  ;;  %v2078_v59 = vmax.f32 %v2076_v34, %v2077_v36  ;;  %v2081_v54 = vmax.f32 %v2079_v7, %v2080_v37  ;;  %v4024_v27 = vld [vmem:[#allocation24_spill] sm:$0xff]  ;;  %v4030_v34 = vld [vmem:[#allocation29_spill] sm:$0xff] }
 0x129   : > { %v2082_v13 = vsel %vm385_vm0, %v1388_v14, -inf  ;;  %v2083_v29 = vsel %vm385_vm0, %v1444_v32, -inf  ;;  %v2085_v2 = vsel %vm385_vm0, %v1395_v40, -inf  ;;  %v2086_v9 = vsel %vm385_vm0, %v1451_v44, -inf  ;;  %v4023_v14 = vld [vmem:[#allocation25_spill] sm:$0xff] }
 0x12a   : > { %v1401_v62 = vrot.slane %v1400_v42, 1  ;;  %v1455_v63 = vrot.slane %v1454_v1, 2  ;;  %v2084_v15 = vmax.f32 %v2082_v13, %v2083_v29  ;;  %v2087_v17 = vmax.f32 %v2085_v2, %v2086_v9 }
 0x12b   : > { %v4020_v8 = vmax.f32 %v4018_v57, %v4019_v11  ;;  %v4022_v10 = vrot.slane %v4021_v51, 1  ;;  %v1499_v24 = vrot.slane %v4023_v14, 1  ;;  %v1504_v50 = vrot.slane %v4024_v27, 2  ;;  %v4035_v57 = vld [vmem:[#allocation23_spill] sm:$0xff] }
 0x12c   : > { %v1402_v45 = vmax.f32 %v1400_v42, %v1401_v62  ;;  %v1456_v55 = vmax.f32 %v1454_v1, %v1455_v63  ;;  %v4026_v33 = vcombine.high %v4025_v25, %v4025_v25  ;;  %v4028_v40 = vrot.slane %v4027_v6, 1  ;;  %v4029_v1 = vld [vmem:[#allocation33_spill] sm:$0xff] }
 0x12d   : > { %v2296_v23 = vsel %vm2275_vm2, %v2072_v58, %v4020_v8  ;;  %v1486_v43 = vmax.f32 %v4021_v51, %v4022_v10  ;;  %v1500_v0 = vmax.f32 %v4023_v14, %v1499_v24  ;;  %v1505_v16 = vmax.f32 %v4024_v27, %v1504_v50  ;;  %v4036_v51 = vld [vmem:[#allocation31_spill] sm:$0xff] }
 0x12e   : > { %v1457_v32 = vrot.slane %v1456_v55, 1  ;;  %v2088_v53 = vsel %vm385_vm0, %v1402_v45, -inf  ;;  %v2297_v21 = vsel %vm2277_vm3, %v2075_v12, %v2296_v23  ;;  %v1508_v58 = vsel %vm1122_vm1, %v4026_v33, -inf }
 0x12f   : > { %v2298_v20 = vsel %vm2279_vm4, %v2078_v59, %v2297_v21  ;;  %v1542_v48 = vmax.f32 %v4027_v6, %v4028_v40  ;;  %v1509_v42 = vrot.slane %v1508_v58, 4  ;;  %v1555_v12 = vrot.slane %v4029_v1, 1 }
 0x130   : > { %v1458_v60 = vmax.f32 %v1456_v55, %v1457_v32  ;;  %v2299_v22 = vsel %vm2281_vm5, %v2081_v54, %v2298_v20  ;;  %v1560_v36 = vrot.slane %v4030_v34, 2  ;;  %v4032_v7 = vcombine.high %v4031_v18, %v4031_v18  ;;  %v4033_v55 = vld [vmem:[#allocation32_spill] sm:$0xff]  ;;  %v4037_v20 = vld [vmem:[#allocation26_spill] sm:$0xff] }
 0x131   : > { %v2300_v49 = vsel %vm2283_vm6, %v2084_v15, %v2299_v22  ;;  %v1506_v44 = vrot.slane %v1505_v16, 1  ;;  %v1510_v63 = vmax.f32 %v1508_v58, %v1509_v42  ;;  %v1556_v54 = vmax.f32 %v4029_v1, %v1555_v12  ;;  %v4034_v15 = vld [vmem:[#allocation22_spill] sm:$0xff]  ;;  %v4039_v1 = vld [vmem:[#allocation21_spill] sm:$0xff]  ;;  %v4042_v18 = vld [vmem:[#allocation36_spill] sm:$0xff] }
 0x132   : > { %v1564_v46 = vsel %vm1122_vm1, %v4032_v7, -inf  ;;  %v2089_v37 = vsel %vm385_vm0, %v1458_v60, -inf  ;;  %v2301_v62 = vsel %vm2285_vm7, %v2087_v17, %v2300_v49  ;;  %v1561_v13 = vmax.f32 %v4030_v34, %v1560_v36  ;;  %v4038_v58 = vld [vmem:[#allocation34_spill] sm:$0xff] }
 0x133   : > { %v2090_v59 = vmax.f32 %v2088_v53, %v2089_v37  ;;  %v1565_v29 = vrot.slane %v1564_v46, 4  ;;  %v1507_v2 = vmax.f32 %v1505_v16, %v1506_v44  ;;  %v1511_v45 = vrot.slane %v1510_v63, 2  ;;  %v4040_v12 = vld [vmem:[#allocation30_spill] sm:$0xff] }
 0x134   : > { %v2096_v9 = vmax.f32 %v4034_v15, %v4033_v55  ;;  %v2097_v11 = vsel %vm385_vm0, %v4035_v57, -inf  ;;  %v1562_v23 = vrot.slane %v1561_v13, 1  ;;  %v2098_v10 = vsel %vm385_vm0, %v4036_v51, -inf }
 0x135   : > { %v2302_v8 = vsel %vm2287_vm8, %v2090_v59, %v2301_v62  ;;  %v1566_v17 = vmax.f32 %v1564_v46, %v1565_v29  ;;  %v1512_v14 = vmax.f32 %v1510_v63, %v1511_v45  ;;  %v2099_v24 = vmax.f32 %v2097_v11, %v2098_v10  ;;  %v4045_v29 = vld [vmem:[#allocation35_spill] sm:$0xff]  ;;  %v4049_v10 = vld [vmem:[#allocation48_spill] sm:$0xff] }
 0x136   : > { %2348 = vst.msk [vmem:[%s3474_s10 + $0x10] sm:$0xff] %vm385_vm0, %v2302_v8  ;;  %v2100_v32 = vsel %vm385_vm0, %v1486_v43, -inf  ;;  %v2101_v53 = vsel %vm385_vm0, %v1542_v48, -inf  ;;  %v1563_v21 = vmax.f32 %v1561_v13, %v1562_v23  ;;  %v2103_v25 = vsel %vm385_vm0, %v4037_v20, -inf  ;;  %v4047_v23 = vld [vmem:[#allocation43_spill] sm:$0xff] }
 0x137   : > { %v1567_v27 = vrot.slane %v1566_v17, 2  ;;  %v2102_v50 = vmax.f32 %v2100_v32, %v2101_v53  ;;  %v1513_v33 = vrot.slane %v1512_v14, 1  ;;  %v2104_v6 = vsel %vm385_vm0, %v4038_v58, -inf }
 0x138   : > { %v2106_v40 = vsel %vm385_vm0, %v1500_v0, -inf  ;;  %v2107_v60 = vsel %vm385_vm0, %v1556_v54, -inf  ;;  %v2105_v16 = vmax.f32 %v2103_v25, %v2104_v6  ;;  %v2109_v43 = vsel %vm385_vm0, %v1507_v2, -inf  ;;  %v4044_v54 = vld [vmem:[#allocation39_spill] sm:$0xff]  ;;  %v4051_v25 = vld [vmem:[#allocation41_spill] sm:$0xff] }
 0x139   : > { %v1568_v22 = vmax.f32 %v1566_v17, %v1567_v27  ;;  %v2108_v42 = vmax.f32 %v2106_v40, %v2107_v60  ;;  %v1514_v48 = vmax.f32 %v1512_v14, %v1513_v33  ;;  %v2110_v49 = vsel %vm385_vm0, %v1563_v21, -inf  ;;  %v4050_v21 = vld [vmem:[#allocation44_spill] sm:$0xff] }
 0x13a   : > { %v4041_v34 = vmax.f32 %v4039_v1, %v4040_v12  ;;  %v4043_v7 = vrot.slane %v4042_v18, 1  ;;  %v2111_v37 = vmax.f32 %v2109_v43, %v2110_v49  ;;  %v1611_v44 = vrot.slane %v3100_v35, 1  ;;  %v4055_v49 = vld [vmem:[#allocation37_spill] sm:$0xff] }
 0x13b   : > { %v1569_v0 = vrot.slane %v1568_v22, 1  ;;  %v2112_v63 = vsel %vm385_vm0, %v1514_v48, -inf  ;;  %v1616_v13 = vrot.slane %v4044_v54, 2  ;;  %v4046_v2 = vcombine.high %v4045_v29, %v4045_v29  ;;  %v4056_v12 = vld [vmem:[#allocation45_spill] sm:$0xff] }
 0x13c   : > { %v2303_v36 = vsel %vm2275_vm2, %v2096_v9, %v4041_v34  ;;  %v1598_v46 = vmax.f32 %v4042_v18, %v4043_v7  ;;  %v1612_v9 = vmax.f32 %v3100_v35, %v1611_v44  ;;  %v4048_v17 = vrot.slane %v4047_v23, 1  ;;  %v4057_v44 = vld [vmem:[#allocation42_spill] sm:$0xff] }
 0x13d   : > { %v2304_v62 = vsel %vm2277_vm3, %v2099_v24, %v2303_v36  ;;  %v1620_v45 = vsel %vm1122_vm1, %v4046_v2, -inf  ;;  %v1570_v55 = vmax.f32 %v1568_v22, %v1569_v0  ;;  %v1617_v8 = vmax.f32 %v4044_v54, %v1616_v13  ;;  %v4053_v22 = vld [vmem:[#allocation47_spill] sm:$0xff] }
 0x13e   : > { %v2305_v59 = vsel %vm2279_vm4, %v2102_v50, %v2304_v62  ;;  %v1621_v57 = vrot.slane %v1620_v45, 4  ;;  %v1654_v51 = vmax.f32 %v4047_v23, %v4048_v17  ;;  %v1667_v14 = vrot.slane %v4049_v10, 1 }
 0x13f   : > { %v2306_v15 = vsel %vm2281_vm5, %v2105_v16, %v2305_v59  ;;  %v2113_v24 = vsel %vm385_vm0, %v1570_v55, -inf  ;;  %v1672_v27 = vrot.slane %v4050_v21, 2  ;;  %v1618_v50 = vrot.slane %v1617_v8, 1  ;;  %v4054_v16 = vld [vmem:[#allocation40_spill] sm:$0xff]  ;;  %v4058_v59 = vld [vmem:[#allocation49_spill] sm:$0xff] }
 0x140   : > { %v2307_v11 = vsel %vm2283_vm6, %v2108_v42, %v2306_v15  ;;  %v1622_v53 = vmax.f32 %v1620_v45, %v1621_v57  ;;  %v2114_v35 = vmax.f32 %v2112_v63, %v2113_v24  ;;  %v1668_v20 = vmax.f32 %v4049_v10, %v1667_v14  ;;  %v4059_v10 = vld [vmem:[#allocation38_spill] sm:$0xff] }
 0x141   : > { %v2308_v32 = vsel %vm2285_vm7, %v2111_v37, %v2307_v11  ;;  %v4052_v33 = vcombine.high %v4051_v25, %v4051_v25  ;;  %v1673_v40 = vmax.f32 %v4050_v21, %v1672_v27  ;;  %v2120_v42 = vmax.f32 %v4054_v16, %v4053_v22  ;;  %v4060_v14 = vld [vmem:[#allocation46_spill] sm:$0xff] }
 0x142   : > { %v1623_v6 = vrot.slane %v1622_v53, 2  ;;  %v2309_v43 = vsel %vm2287_vm8, %v2114_v35, %v2308_v32  ;;  %v1619_v48 = vmax.f32 %v1617_v8, %v1618_v50  ;;  %v2121_v1 = vsel %vm385_vm0, %v4055_v49, -inf }
 0x143   : > { %v1676_v58 = vsel %vm1122_vm1, %v4052_v33, -inf  ;;  %v2122_v34 = vsel %vm385_vm0, %v4056_v12, -inf  ;;  %2349 = vst.msk [vmem:[%s3474_s10 + $0x18] sm:$0xff] %vm385_vm0, %v2309_v43  ;;  %v1674_v18 = vrot.slane %v1673_v40, 1  ;;  %v2124_v37 = vsel %vm385_vm0, %v1598_v46, -inf  ;;  %v4065_v33 = vld [vmem:[#allocation55_spill] sm:$0xff] }
 0x144   : > { %v1677_v60 = vrot.slane %v1676_v58, 4  ;;  %v1624_v36 = vmax.f32 %v1622_v53, %v1623_v6  ;;  %v2123_v0 = vmax.f32 %v2121_v1, %v2122_v34  ;;  %v2125_v62 = vsel %vm385_vm0, %v1654_v51, -inf  ;;  %v4062_v53 = vld [vmem:[#allocation50_spill] sm:$0xff] }
 0x145   : > { %v2127_v63 = vsel %vm385_vm0, %v4057_v44, -inf  ;;  %v2128_v54 = vsel %vm385_vm0, %v4058_v59, -inf  ;;  %v1675_v29 = vmax.f32 %v1673_v40, %v1674_v18  ;;  %v2126_v45 = vmax.f32 %v2124_v37, %v2125_v62  ;;  %v4070_v18 = vld [vmem:[#allocation63_spill] sm:$0xff]  ;;  %v4072_v62 = vld [vmem:[#allocation56_spill] sm:$0xff] }
 0x146   : > { %v1678_v7 = vmax.f32 %v1676_v58, %v1677_v60  ;;  %v1625_v13 = vrot.slane %v1624_v36, 1  ;;  %v2129_v55 = vmax.f32 %v2127_v63, %v2128_v54  ;;  %v2130_v15 = vsel %vm385_vm0, %v1612_v9, -inf  ;;  %v4064_v9 = vld [vmem:[#allocation57_spill] sm:$0xff]  ;;  %v4066_v60 = vld [vmem:[#allocation51_spill] sm:$0xff] }
 0x147   : > { %v2131_v57 = vsel %vm385_vm0, %v1668_v20, -inf  ;;  %v2133_v11 = vsel %vm385_vm0, %v1619_v48, -inf  ;;  %v2134_v17 = vsel %vm385_vm0, %v1675_v29, -inf  ;;  %v4061_v24 = vmax.f32 %v4059_v10, %v4060_v14 }
 0x148   : > { %v1679_v2 = vrot.slane %v1678_v7, 2  ;;  %v1626_v46 = vmax.f32 %v1624_v36, %v1625_v13  ;;  %v2132_v23 = vmax.f32 %v2130_v15, %v2131_v57  ;;  %v2135_v51 = vmax.f32 %v2133_v11, %v2134_v17  ;;  %v4076_v17 = vld [vmem:[#allocation52_spill] sm:$0xff] }
 0x149   : > { %v2310_v32 = vsel %vm2275_vm2, %v2120_v42, %v4061_v24  ;;  %v4063_v21 = vrot.slane %v4062_v53, 1  ;;  %v1723_v35 = vrot.slane %v4064_v9, 1  ;;  %v1728_v58 = vrot.slane %v4065_v33, 2  ;;  %v4068_v42 = vld [vmem:[#allocation59_spill] sm:$0xff] }
 0x14a   : > { %v1680_v8 = vmax.f32 %v1678_v7, %v1679_v2  ;;  %v2136_v20 = vsel %vm385_vm0, %v1626_v46, -inf  ;;  %v2311_v25 = vsel %vm2277_vm3, %v2123_v0, %v2310_v32  ;;  %v4067_v22 = vcombine.high %v4066_v60, %v4066_v60  ;;  %v4071_v0 = vld [vmem:[#allocation61_spill] sm:$0xff]  ;;  %v4074_v46 = vld [vmem:[#allocation64_spill] sm:$0xff] }
 0x14b   : > { %v1710_v27 = vmax.f32 %v4062_v53, %v4063_v21  ;;  %v2312_v6 = vsel %vm2279_vm4, %v2126_v45, %v2311_v25  ;;  %v1724_v40 = vmax.f32 %v4064_v9, %v1723_v35  ;;  %v4069_v43 = vrot.slane %v4068_v42, 1  ;;  %v4077_v32 = vld [vmem:[#allocation60_spill] sm:$0xff] }
 0x14c   : > { %v1681_v50 = vrot.slane %v1680_v8, 1  ;;  %v1732_v16 = vsel %vm1122_vm1, %v4067_v22, -inf  ;;  %v2313_v1 = vsel %vm2281_vm5, %v2129_v55, %v2312_v6  ;;  %v1729_v12 = vmax.f32 %v4065_v33, %v1728_v58  ;;  %v4078_v58 = vld [vmem:[#allocation58_spill] sm:$0xff]  ;;  %v4079_v22 = vld [vmem:[#allocation65_spill] sm:$0xff] }
 0x14d   : > { %v1766_v48 = vmax.f32 %v4068_v42, %v4069_v43  ;;  %v1733_v34 = vrot.slane %v1732_v16, 4  ;;  %v2314_v36 = vsel %vm2283_vm6, %v2132_v23, %v2313_v1  ;;  %v1779_v7 = vrot.slane %v4070_v18, 1 }
 0x14e   : > { %v1682_v49 = vmax.f32 %v1680_v8, %v1681_v50  ;;  %v1784_v37 = vrot.slane %v4071_v0, 2  ;;  %v4073_v44 = vcombine.high %v4072_v62, %v4072_v62  ;;  %v2315_v54 = vsel %vm2285_vm7, %v2135_v51, %v2314_v36  ;;  %v4075_v8 = vld [vmem:[#allocation54_spill] sm:$0xff]  ;;  %v4080_v36 = vld [vmem:[#allocation53_spill] sm:$0xff] }
 0x14f   : > { %v1730_v13 = vrot.slane %v1729_v12, 1  ;;  %v1734_v29 = vmax.f32 %v1732_v16, %v1733_v34  ;;  %v1780_v45 = vmax.f32 %v4070_v18, %v1779_v7  ;;  %v2144_v23 = vmax.f32 %v4075_v8, %v4074_v46  ;;  %v4081_v18 = vld [vmem:[#allocation62_spill] sm:$0xff] }
 0x150   : > { %v1788_v63 = vsel %vm1122_vm1, %v4073_v44, -inf  ;;  %v2137_v59 = vsel %vm385_vm0, %v1682_v49, -inf  ;;  %v1785_v55 = vmax.f32 %v4071_v0, %v1784_v37  ;;  %v2145_v10 = vsel %vm385_vm0, %v4076_v17, -inf  ;;  %v4083_v37 = vld [vmem:[#allocation66_spill] sm:$0xff] }
 0x151   : > { %v2138_v2 = vmax.f32 %v2136_v20, %v2137_v59  ;;  %v1789_v15 = vrot.slane %v1788_v63, 4  ;;  %v1731_v57 = vmax.f32 %v1729_v12, %v1730_v13  ;;  %v1735_v11 = vrot.slane %v1734_v29, 2 }
 0x152   : > { %v1786_v24 = vrot.slane %v1785_v55, 1  ;;  %v2146_v53 = vsel %vm385_vm0, %v4077_v32, -inf  ;;  %v2148_v35 = vsel %vm385_vm0, %v1710_v27, -inf  ;;  %v2149_v50 = vsel %vm385_vm0, %v1766_v48, -inf }
 0x153   : > { %v2316_v14 = vsel %vm2287_vm8, %v2138_v2, %v2315_v54  ;;  %v1790_v51 = vmax.f32 %v1788_v63, %v1789_v15  ;;  %v1736_v21 = vmax.f32 %v1734_v29, %v1735_v11  ;;  %v2147_v9 = vmax.f32 %v2145_v10, %v2146_v53  ;;  %v4085_v2 = vld [vmem:[#allocation71_spill] sm:$0xff] }
 0x154   : > { %2350 = vst.msk [vmem:[%s3474_s10 + $0x20] sm:$0xff] %vm385_vm0, %v2316_v14  ;;  %v1787_v20 = vmax.f32 %v1785_v55, %v1786_v24  ;;  %v2150_v33 = vmax.f32 %v2148_v35, %v2149_v50  ;;  %v2151_v6 = vsel %vm385_vm0, %v4078_v58, -inf  ;;  %v2152_v16 = vsel %vm385_vm0, %v4079_v22, -inf  ;;  %v4086_v55 = vld [vmem:[#allocation67_spill] sm:$0xff]  ;;  %v4092_v22 = vld [vmem:[#allocation77_spill] sm:$0xff] }
 0x155   : > { %v1791_v25 = vrot.slane %v1790_v51, 2  ;;  %v1737_v60 = vrot.slane %v1736_v21, 1  ;;  %v2154_v42 = vsel %vm385_vm0, %v1724_v40, -inf  ;;  %v2155_v43 = vsel %vm385_vm0, %v1780_v45, -inf }
 0x156   : > { %v2153_v1 = vmax.f32 %v2151_v6, %v2152_v16  ;;  %v2156_v12 = vmax.f32 %v2154_v42, %v2155_v43  ;;  %v2157_v27 = vsel %vm385_vm0, %v1731_v57, -inf  ;;  %v2158_v34 = vsel %vm385_vm0, %v1787_v20, -inf  ;;  %v4093_v16 = vld [vmem:[#allocation70_spill] sm:$0xff] }
 0x157   : > { %v1792_v49 = vmax.f32 %v1790_v51, %v1791_v25  ;;  %v1738_v48 = vmax.f32 %v1736_v21, %v1737_v60  ;;  %v4082_v7 = vmax.f32 %v4080_v36, %v4081_v18  ;;  %v4084_v62 = vrot.slane %v4083_v37, 1  ;;  %v4090_v25 = vld [vmem:[#allocation72_spill] sm:$0xff] }
 0x158   : > { %v2159_v63 = vmax.f32 %v2157_v27, %v2158_v34  ;;  %v1835_v54 = vrot.slane %v3285_v3, 1  ;;  %v1840_v45 = vrot.slane %v4085_v2, 2  ;;  %v4087_v15 = vcombine.high %v4086_v55, %v4086_v55  ;;  %v4095_v27 = vld [vmem:[#allocation74_spill] sm:$0xff] }
 0x159   : > { %v2317_v0 = vsel %vm2275_vm2, %v2144_v23, %v4082_v7  ;;  %v1822_v44 = vmax.f32 %v4083_v37, %v4084_v62  ;;  %v1793_v40 = vrot.slane %v1792_v49, 1  ;;  %v2160_v13 = vsel %vm385_vm0, %v1738_v48, -inf  ;;  %v4096_v37 = vld [vmem:[#allocation73_spill] sm:$0xff] }
 0x15a   : > { %v2318_v59 = vsel %vm2277_vm3, %v2147_v9, %v2317_v0  ;;  %v1844_v57 = vsel %vm1122_vm1, %v4087_v15, -inf  ;;  %v1836_v8 = vmax.f32 %v3285_v3, %v1835_v54  ;;  %v1841_v10 = vmax.f32 %v4085_v2, %v1840_v45  ;;  %v4089_v9 = vld [vmem:[#allocation76_spill] sm:$0xff] }
 0x15b   : > { %v2319_v29 = vsel %vm2279_vm4, %v2150_v33, %v2318_v59  ;;  %v1794_v11 = vmax.f32 %v1792_v49, %v1793_v40  ;;  %v1845_v23 = vrot.slane %v1844_v57, 4  ;;  %v4088_v14 = vrot.slane %v3298_v39, 1  ;;  %v4097_v40 = vld [vmem:[#allocation78_spill] sm:$0xff] }
 0x15c   : > { %v2320_v46 = vsel %vm2281_vm5, %v2153_v1, %v2319_v29  ;;  %v1891_v51 = vrot.slane %v3320_v31, 1  ;;  %v1896_v35 = vrot.slane %v4089_v9, 2  ;;  %v1842_v50 = vrot.slane %v1841_v10, 1  ;;  %v4094_v1 = vld [vmem:[#allocation68_spill] sm:$0xff] }
 0x15d   : > { %v2321_v17 = vsel %vm2283_vm6, %v2156_v12, %v2320_v46  ;;  %v1878_v24 = vmax.f32 %v3298_v39, %v4088_v14  ;;  %v2161_v32 = vsel %vm385_vm0, %v1794_v11, -inf  ;;  %v1846_v21 = vmax.f32 %v1844_v57, %v1845_v23 }
 0x15e   : > { %v2322_v53 = vsel %vm2285_vm7, %v2159_v63, %v2321_v17  ;;  %v2162_v3 = vmax.f32 %v2160_v13, %v2161_v32  ;;  %v1892_v20 = vmax.f32 %v3320_v31, %v1891_v51  ;;  %v4091_v33 = vcombine.high %v4090_v25, %v4090_v25  ;;  %v4098_v17 = vld [vmem:[#allocation69_spill] sm:$0xff]  ;;  %v4103_v25 = vld [vmem:[#allocation79_spill] sm:$0xff] }
 0x15f   : > { %v1847_v39 = vrot.slane %v1846_v21, 2  ;;  %v1897_v6 = vmax.f32 %v4089_v9, %v1896_v35  ;;  %v2168_v42 = vmax.f32 %v4093_v16, %v4092_v22  ;;  %v1843_v49 = vmax.f32 %v1841_v10, %v1842_v50  ;;  %v4099_v10 = vld [vmem:[#allocation75_spill] sm:$0xff]  ;;  %v4102_v35 = vld [vmem:[#allocation81_spill] sm:$0xff] }
 0x160   : > { %v1900_v58 = vsel %vm1122_vm1, %v4091_v33, -inf  ;;  %v2323_v43 = vsel %vm2287_vm8, %v2162_v3, %v2322_v53  ;;  %v2169_v12 = vsel %vm385_vm0, %v4094_v1, -inf  ;;  %v2170_v31 = vsel %vm385_vm0, %v4095_v27, -inf }
 0x161   : > { %v1901_v60 = vrot.slane %v1900_v58, 4  ;;  %2351 = vst.msk [vmem:[%s3474_s10 + $0x28] sm:$0xff] %vm385_vm0, %v2323_v43  ;;  %v1848_v48 = vmax.f32 %v1846_v21, %v1847_v39  ;;  %v1898_v34 = vrot.slane %v1897_v6, 1  ;;  %v2171_v18 = vmax.f32 %v2169_v12, %v2170_v31  ;;  %v4105_v43 = vld [vmem:[#allocation84_spill] sm:$0xff] }
 0x162   : > { %v2172_v7 = vsel %vm385_vm0, %v1822_v44, -inf  ;;  %v2173_v0 = vsel %vm385_vm0, %v1878_v24, -inf  ;;  %v2175_v62 = vsel %vm385_vm0, %v4096_v37, -inf  ;;  %v2176_v63 = vsel %vm385_vm0, %v4097_v40, -inf }
 0x163   : > { %v1902_v36 = vmax.f32 %v1900_v58, %v1901_v60  ;;  %v1849_v59 = vrot.slane %v1848_v48, 1  ;;  %v1899_v54 = vmax.f32 %v1897_v6, %v1898_v34  ;;  %v2174_v29 = vmax.f32 %v2172_v7, %v2173_v0  ;;  %v4107_v0 = vld [vmem:[#allocation82_spill] sm:$0xff] }
 0x164   : > { %v2177_v2 = vmax.f32 %v2175_v62, %v2176_v63  ;;  %v2178_v45 = vsel %vm385_vm0, %v1836_v8, -inf  ;;  %v2179_v55 = vsel %vm385_vm0, %v1892_v20, -inf  ;;  %v2181_v15 = vsel %vm385_vm0, %v1843_v49, -inf  ;;  %v4108_v62 = vld [vmem:[#allocation80_spill] sm:$0xff] }
 0x165   : > { %v1903_v13 = vrot.slane %v1902_v36, 2  ;;  %v1850_v44 = vmax.f32 %v1848_v48, %v1849_v59  ;;  %v2180_v11 = vmax.f32 %v2178_v45, %v2179_v55  ;;  %v2182_v46 = vsel %vm385_vm0, %v1899_v54, -inf }
 0x166   : > { %v2183_v23 = vmax.f32 %v2181_v15, %v2182_v46  ;;  %v4100_v14 = vmax.f32 %v4098_v17, %v4099_v10  ;;  %v4101_v51 = vrot.slane %v3356_v41, 1  ;;  %v1947_v8 = vrot.slane %v3374_v4, 1  ;;  %v4109_v15 = vld [vmem:[#allocation83_spill] sm:$0xff] }
 0x167   : > { %v1904_v57 = vmax.f32 %v1902_v36, %v1903_v13  ;;  %v2184_v21 = vsel %vm385_vm0, %v1850_v44, -inf  ;;  %v1952_v3 = vrot.slane %v4102_v35, 2  ;;  %v4104_v33 = vcombine.high %v4103_v25, %v4103_v25 }
 0x168   : > { %v2324_v24 = vsel %vm2275_vm2, %v2168_v42, %v4100_v14  ;;  %v1934_v32 = vmax.f32 %v3356_v41, %v4101_v51  ;;  %v1948_v20 = vmax.f32 %v3374_v4, %v1947_v8  ;;  %v1990_v41 = vmax.f32 %v3394_v5, %v1989_v30 }
 0x169   : > { %v1905_v53 = vrot.slane %v1904_v57, 1  ;;  %v2325_v9 = vsel %vm2277_vm3, %v2171_v18, %v2324_v24  ;;  %v1956_v58 = vsel %vm1122_vm1, %v4104_v33, -inf  ;;  %v1953_v60 = vmax.f32 %v4102_v35, %v1952_v3 }
 0x16a   : > { %v2326_v50 = vsel %vm2279_vm4, %v2174_v29, %v2325_v9  ;;  %v1957_v22 = vrot.slane %v1956_v58, 4  ;;  %v2003_v42 = vrot.slane %v3418_v52, 1  ;;  %v2008_v4 = vrot.slane %v3406_v38, 2 }
 0x16b   : > { %v1906_v39 = vmax.f32 %v1904_v57, %v1905_v53  ;;  %v2327_v6 = vsel %vm2281_vm5, %v2177_v2, %v2326_v50  ;;  %v4106_v49 = vcombine.high %v4105_v43, %v4105_v43  ;;  %v1954_v30 = vrot.slane %v1953_v60, 1 }
 0x16c   : > { %v2328_v16 = vsel %vm2283_vm6, %v2180_v11, %v2327_v6  ;;  %v1958_v27 = vmax.f32 %v1956_v58, %v1957_v22  ;;  %v2004_v48 = vmax.f32 %v3418_v52, %v2003_v42  ;;  %v2009_v34 = vmax.f32 %v3406_v38, %v2008_v4 }
 0x16d   : > { %v2012_v1 = vsel %vm1122_vm1, %v4106_v49, -inf  ;;  %v2185_v12 = vsel %vm385_vm0, %v1906_v39, -inf  ;;  %v2329_v5 = vsel %vm2285_vm7, %v2183_v23, %v2328_v16  ;;  %v1955_v18 = vmax.f32 %v1953_v60, %v1954_v30 }
 0x16e   : > { %v2186_v31 = vmax.f32 %v2184_v21, %v2185_v12  ;;  %v2013_v36 = vrot.slane %v2012_v1, 4  ;;  %v1959_v7 = vrot.slane %v1958_v27, 2  ;;  %v2192_v37 = vmax.f32 %v4107_v0, %v3404_v47 }
 0x16f   : > { %v2193_v40 = vsel %vm385_vm0, %v4108_v62, -inf  ;;  %v2010_v59 = vrot.slane %v2009_v34, 1  ;;  %v2194_v13 = vsel %vm385_vm0, %v3397_v19, -inf  ;;  %v2196_v29 = vsel %vm385_vm0, %v1934_v32, -inf }
 0x170   : > { %v2330_v63 = vsel %vm2287_vm8, %v2186_v31, %v2329_v5  ;;  %v2014_v54 = vmax.f32 %v2012_v1, %v2013_v36  ;;  %v1960_v52 = vmax.f32 %v1958_v27, %v1959_v7  ;;  %v2195_v38 = vmax.f32 %v2193_v40, %v2194_v13 }
 0x171   : > { %2352 = vst.msk [vmem:[%s3474_s10 + $0x30] sm:$0xff] %vm385_vm0, %v2330_v63  ;;  %v2197_v2 = vsel %vm385_vm0, %v1990_v41, -inf  ;;  %v2011_v45 = vmax.f32 %v2009_v34, %v2010_v59  ;;  %v2199_v44 = vsel %vm385_vm0, %v4109_v15, -inf  ;;  %v2200_v11 = vsel %vm385_vm0, %v3428_v26, -inf }
 0x172   : > { %v2015_v47 = vrot.slane %v2014_v54, 2  ;;  %v2198_v55 = vmax.f32 %v2196_v29, %v2197_v2  ;;  %v1961_v57 = vrot.slane %v1960_v52, 1  ;;  %v2202_v19 = vsel %vm385_vm0, %v1948_v20, -inf }
 0x173   : > { %v2203_v46 = vsel %vm385_vm0, %v2004_v48, -inf  ;;  %v2201_v17 = vmax.f32 %v2199_v44, %v2200_v11  ;;  %v2205_v14 = vsel %vm385_vm0, %v1955_v18, -inf  ;;  %v2206_v51 = vsel %vm385_vm0, %v2011_v45, -inf }
 0x174   : > { %v2016_v23 = vmax.f32 %v2014_v54, %v2015_v47  ;;  %v2204_v10 = vmax.f32 %v2202_v19, %v2203_v46  ;;  %v1962_v24 = vmax.f32 %v1960_v52, %v1961_v57  ;;  %v2331_v32 = vsel %vm2275_vm2, %v2192_v37, %v2189_v28 }
 0x175   : > { %v2207_v26 = vmax.f32 %v2205_v14, %v2206_v51  ;;  %v2332_v53 = vsel %vm2277_vm3, %v2195_v38, %v2331_v32 }
 0x176   : > { %v2017_v8 = vrot.slane %v2016_v23, 1  ;;  %v2333_v21 = vsel %vm2279_vm4, %v2198_v55, %v2332_v53  ;;  %v2208_v35 = vsel %vm385_vm0, %v1962_v24, -inf }
 0x177   : > { %v2334_v3 = vsel %vm2281_vm5, %v2201_v17, %v2333_v21 }
 0x178   : > { %v2018_v9 = vmax.f32 %v2016_v23, %v2017_v8  ;;  %v2335_v50 = vsel %vm2283_vm6, %v2204_v10, %v2334_v3 }
 0x179   : > { %v2336_v25 = vsel %vm2285_vm7, %v2207_v26, %v2335_v50 }
 0x17a   : > { %v2209_v20 = vsel %vm385_vm0, %v2018_v9, -inf }
 0x17b   : > { %v2210_v56 = vmax.f32 %v2208_v35, %v2209_v20 }
 0x17d   : > { %v2337_v61 = vsel %vm2287_vm8, %v2210_v56, %v2336_v25 }
 0x17e   : > { %2353 = vst.msk [vmem:[%s3474_s10 + $0x38] sm:$0xff] %vm385_vm0, %v2337_v61 }
 0x17f PF: > { %s15_s15 = sadd.s32 1, %s2556_s15  }
 0x180   : > { %p12_p4 = scmp.ge.s32.totalorder %s15_s15, 4  }
 0x182   :  { %14 = sbr.rel (!%p12_p4) target bundleno = 1 (0x1), region = 74 }

// kernel: down_conv_forward.3
= control target key start
LH: loop header
LB: loop body
LE: loop exit
PB: predicated region body
PF: predicated region fallthrough
CT: control target
= control target key end

     0   :  { %s4048_s12 = smov 0   ;;  %s5263_s0 = inlined_call_operand.vmem [shape: f32[2,16,16,4], index: 0, kind: input, shape index: {}]   ;;  %s5264_s1 = inlined_call_operand.vmem [shape: bf16[3,3,4,8], index: 1, kind: input, shape index: {}]   ;;  %s5265_s2 = inlined_call_operand.vmem [shape: bf16[2,16,16,8], index: 2, kind: output, shape index: {0}]   ;;  %s5266_s3 = inlined_call_operand.vmem [shape: f32[2,2,8], index: 3, kind: output, shape index: {1}]  }
   0x1 LB: > { %s3309_s13 = sadd.s32 4294967295, %s4025_s12   ;;  %p3313_p0 = scmp.ge.s32.totalorder %s4025_s12, 1  ;;  %s4025_s12 = sphi %s4048_s12, %s14_s12  }
   0x2   : > { %p140_p1 = scmp.lt.s32.totalorder %s4025_s12, 3 }
   0x4   : > { %p141_p2 = pnand %p3313_p0, %p140_p1 }
   0x6   : > { %144 = sbr.rel (%p141_p2) target bundleno = 558 (0x22e), region = 28 }
   0xb   : > { %v3319_v0 = vld [vmem:[%s5264_s1 + $0x2] sm:$0x3]  ;;  %vm451_vm0 = vcmask 1041408   ;;  %vm215_vm1 = vcmask 31744   ;;  %vm218_vm2 = vcmask 25600   ;;  %v4027_v2 = vmov 0.0  }
   0xc   : > { %4000 = vmatprep.subr.msk.bf16.mxu0 %vm451_vm0, %v3319_v0  ;;  %4001 = vmatprep.subr.msk.bf16.mxu1 %vm451_vm0, %v3319_v0  ;;  %v453_v1 = vsel %vm451_vm0, %v3319_v0, 0  ;;  %216 = vst.msk [vmem:[#allocation2] sm:$0xff] %vm215_vm1, %v4027_v2  ;;  %217 = vst.msk [vmem:[#allocation2 + $0x8] sm:$0xff] %vm215_vm1, %v4027_v2  ;;  %p168_p3 = scmp.lt.s32.totalorder %s3309_s13, 1  ;;  %v4121_v3 = vld [vmem:[%s5264_s1] sm:$0x3] }
   0xd   : > { %219 = vst.msk [vmem:[#allocation2 + $0x10] sm:$0x3] %vm218_vm2, %v4027_v2  ;;  %222 = vst.msk [vmem:[#allocation2 + $0x28] sm:$0x3] %vm218_vm2, %v4027_v2  ;;  %v3352_v4 = vld [vmem:[%s5264_s1 + $0x4] sm:$0x3]  ;;  %3693 = vmatpush3.bf16.msra.mxu0 %v453_v1  ;;  %3999 = vmatpush3.bf16.msra.mxu1 %v453_v1 }
   0xe   : > { %220 = vst.msk [vmem:[#allocation2 + $0x18] sm:$0xff] %vm215_vm1, %v4027_v2  ;;  %221 = vst.msk [vmem:[#allocation2 + $0x20] sm:$0xff] %vm215_vm1, %v4027_v2  ;;  %s5336_s13 = smov (!%p168_p3, %s3309_s13), 1  ;;  %4002 = vmatprep.subr.msk.bf16.mxu1 %vm451_vm0, %v4121_v3  ;;  %4003 = vmatprep.subr.msk.bf16.mxu0 %vm451_vm0, %v3352_v4  ;;  %v4187_v33 = vld [vmem:[%s5264_s1 + $0x8] sm:$0x3]  ;;  %v927_v36 = vsel %vm451_vm0, %v3352_v4, 0 }
   0xf   : > { %223 = vst.msk [vmem:[#allocation2 + $0x30] sm:$0xff] %vm215_vm1, %v4027_v2  ;;  %224 = vst.msk [vmem:[#allocation2 + $0x38] sm:$0xff] %vm215_vm1, %v4027_v2  ;;  %s3505_s20 = sshll.u32 %s5336_s13, 8  ;;  %v665_v44 = vsel %vm451_vm0, %v4121_v3, 0  ;;  %v4207_v47 = vld [vmem:[%s5264_s1 + $0x6] sm:$0x3] }
  0x10   : > { %225 = vst.msk [vmem:[#allocation2 + $0x40] sm:$0x3] %vm218_vm2, %v4027_v2  ;;  %228 = vst.msk [vmem:[#allocation2 + $0x58] sm:$0x3] %vm218_vm2, %v4027_v2  ;;  %s4137_s23 = scalar_lea.vmem %s5263_s0, %s3505_s20  ;;  %vm3015_vm3 = vcmask 60416   ;;  %s3506_s9 = sshll.u32 %s5336_s13, 7 }
  0x11   : > { %226 = vst.msk [vmem:[#allocation2 + $0x48] sm:$0xff] %vm215_vm1, %v4027_v2  ;;  %227 = vst.msk [vmem:[#allocation2 + $0x50] sm:$0xff] %vm215_vm1, %v4027_v2  ;;  %v183_v5 = vld [vmem:[%s4137_s23] sm:$0xff]  ;;  %v184_v6 = vld [vmem:[%s4137_s23 + $0x8] sm:$0xff]  ;;  %vm3048_vm4 = vcmask 64512   ;;  %s5036_s14 = scalar_lea.vmem %s5265_s2, %s3506_s9  ;;  %s3318_s15 = sshll.u32 %s5336_s13, 1 }
  0x12   : > { %229 = vst.msk [vmem:[#allocation2 + $0x60] sm:$0xff] %vm215_vm1, %v4027_v2  ;;  %230 = vst.msk [vmem:[#allocation2 + $0x68] sm:$0xff] %vm215_vm1, %v4027_v2  ;;  %v197_v7 = vld [vmem:[%s4137_s23 + $0x70] sm:$0xff]  ;;  %v198_v10 = vld [vmem:[%s4137_s23 + $0x78] sm:$0xff]  ;;  %vm3219_vm5 = vcmask 1040384   ;;  %s181_s18 = scalar_lea.vmem %s5266_s3, %s3318_s15  ;;  %vm3221_vm6 = vcmask 58368  }
  0x13   : > { %231 = vst.msk [vmem:[#allocation2 + $0x70] sm:$0x3] %vm218_vm2, %v4027_v2  ;;  %234 = vst.msk [vmem:[#allocation2 + $0x88] sm:$0x3] %vm218_vm2, %v4027_v2  ;;  %v353_v8 = vld [vmem:[#allocation2 + $0x1] sm:$0xff]  ;;  %v185_v14 = vld [vmem:[%s4137_s23 + $0x10] sm:$0xff] }
  0x14   : > { %232 = vst.msk [vmem:[#allocation2 + $0x78] sm:$0xff] %vm215_vm1, %v4027_v2  ;;  %233 = vst.msk [vmem:[#allocation2 + $0x80] sm:$0xff] %vm215_vm1, %v4027_v2  ;;  %v354_v9 = vld [vmem:[#allocation2 + $0x9] sm:$0xff]  ;;  %v199_v12 = vld [vmem:[%s4137_s23 + $0x80] sm:$0xff] }
  0x15   : > { %235 = vst.msk [vmem:[#allocation2 + $0x90] sm:$0xff] %vm215_vm1, %v4027_v2  ;;  %236 = vst.msk [vmem:[#allocation2 + $0x98] sm:$0xff] %vm215_vm1, %v4027_v2  ;;  %v385_v11 = vpack.c.bf16 %v354_v9, %v353_v8  ;;  %v200_v13 = vld [vmem:[%s4137_s23 + $0x88] sm:$0xff]  ;;  %v186_v15 = vld [vmem:[%s4137_s23 + $0x18] sm:$0xff] }
  0x16   : > { %237 = vst.msk [vmem:[#allocation2 + $0xa0] sm:$0x3] %vm218_vm2, %v4027_v2  ;;  %240 = vst.msk [vmem:[#allocation2 + $0xb8] sm:$0x3] %vm218_vm2, %v4027_v2  ;;  %v187_v16 = vld [vmem:[%s4137_s23 + $0x20] sm:$0xff]  ;;  %v188_v17 = vld [vmem:[%s4137_s23 + $0x28] sm:$0xff] }
  0x17   : > { %238 = vst.msk [vmem:[#allocation2 + $0xa8] sm:$0xff] %vm215_vm1, %v4027_v2  ;;  %239 = vst.msk [vmem:[#allocation2 + $0xb0] sm:$0xff] %vm215_vm1, %v4027_v2  ;;  %3694 = vmatprep.mubr.msk.bf16.mxu0 %vm215_vm1, %v385_v11  ;;  %v201_v18 = vld [vmem:[%s4137_s23 + $0x90] sm:$0xff]  ;;  %v202_v19 = vld [vmem:[%s4137_s23 + $0x98] sm:$0xff] }
  0x18   : > { %241 = vst.msk [vmem:[#allocation2 + $0xc0] sm:$0xff] %vm215_vm1, %v4027_v2  ;;  %242 = vst.msk [vmem:[#allocation2 + $0xc8] sm:$0xff] %vm215_vm1, %v4027_v2  ;;  %v203_v20 = vld [vmem:[%s4137_s23 + $0xa0] sm:$0xff]  ;;  %v204_v21 = vld [vmem:[%s4137_s23 + $0xa8] sm:$0xff] }
  0x19   : > { %243 = vst.msk [vmem:[#allocation2 + $0xd0] sm:$0x3] %vm218_vm2, %v4027_v2  ;;  %246 = vst.msk [vmem:[#allocation2 + $0xe8] sm:$0x3] %vm218_vm2, %v4027_v2  ;;  %v189_v22 = vld [vmem:[%s4137_s23 + $0x30] sm:$0xff]  ;;  %v190_v23 = vld [vmem:[%s4137_s23 + $0x38] sm:$0xff] }
  0x1a   : > { %244 = vst.msk [vmem:[#allocation2 + $0xd8] sm:$0xff] %vm215_vm1, %v4027_v2  ;;  %245 = vst.msk [vmem:[#allocation2 + $0xe0] sm:$0xff] %vm215_vm1, %v4027_v2  ;;  %v191_v24 = vld [vmem:[%s4137_s23 + $0x40] sm:$0xff]  ;;  %v192_v25 = vld [vmem:[%s4137_s23 + $0x48] sm:$0xff] }
  0x1b   : > { %247 = vst.msk [vmem:[#allocation2 + $0xf0] sm:$0xff] %vm215_vm1, %v4027_v2  ;;  %248 = vst.msk [vmem:[#allocation2 + $0xf8] sm:$0xff] %vm215_vm1, %v4027_v2  ;;  %v205_v26 = vld [vmem:[%s4137_s23 + $0xb0] sm:$0xff]  ;;  %v206_v27 = vld [vmem:[%s4137_s23 + $0xb8] sm:$0xff] }
  0x1c   : > { %249 = vst.msk [vmem:[#allocation2 + $0x100] sm:$0x3] %vm218_vm2, %v4027_v2  ;;  %252 = vst.msk [vmem:[#allocation2 + $0x118] sm:$0x3] %vm218_vm2, %v4027_v2  ;;  %v207_v28 = vld [vmem:[%s4137_s23 + $0xc0] sm:$0xff]  ;;  %v208_v29 = vld [vmem:[%s4137_s23 + $0xc8] sm:$0xff] }
  0x1d   : > { %250 = vst.msk [vmem:[#allocation2 + $0x108] sm:$0xff] %vm215_vm1, %v4027_v2  ;;  %251 = vst.msk [vmem:[#allocation2 + $0x110] sm:$0xff] %vm215_vm1, %v4027_v2  ;;  %v193_v37 = vld [vmem:[%s4137_s23 + $0x50] sm:$0xff]  ;;  %v194_v38 = vld [vmem:[%s4137_s23 + $0x58] sm:$0xff] }
  0x1e   : > { %253 = vst.msk [vmem:[#allocation2 + $0x120] sm:$0xff] %vm215_vm1, %v4027_v2  ;;  %254 = vst.msk [vmem:[#allocation2 + $0x128] sm:$0xff] %vm215_vm1, %v4027_v2  ;;  %v195_v61 = vld [vmem:[%s4137_s23 + $0x60] sm:$0xff]  ;;  %v196_v62 = vld [vmem:[%s4137_s23 + $0x68] sm:$0xff] }
  0x1f   : > { %255 = vst.msk [vmem:[#allocation2 + $0x130] sm:$0x3] %vm218_vm2, %v4027_v2  ;;  %258 = vst.msk [vmem:[#allocation2 + $0x148] sm:$0x3] %vm218_vm2, %v4027_v2  ;;  %v209_v63 = vld [vmem:[%s4137_s23 + $0xd0] sm:$0xff]  ;;  %v210_v1 = vld [vmem:[%s4137_s23 + $0xd8] sm:$0xff] }
  0x20   : > { %256 = vst.msk [vmem:[#allocation2 + $0x138] sm:$0xff] %vm215_vm1, %v4027_v2  ;;  %257 = vst.msk [vmem:[#allocation2 + $0x140] sm:$0xff] %vm215_vm1, %v4027_v2  ;;  %v211_v3 = vld [vmem:[%s4137_s23 + $0xe0] sm:$0xff]  ;;  %v212_v4 = vld [vmem:[%s4137_s23 + $0xe8] sm:$0xff] }
  0x21   : > { %259 = vst.msk [vmem:[#allocation2 + $0x150] sm:$0xff] %vm215_vm1, %v4027_v2  ;;  %260 = vst.msk [vmem:[#allocation2 + $0x158] sm:$0xff] %vm215_vm1, %v4027_v2 }
  0x22   : > { %261 = vst.msk [vmem:[#allocation2 + $0x160] sm:$0x3] %vm218_vm2, %v4027_v2  ;;  %264 = vst.msk [vmem:[#allocation2 + $0x178] sm:$0x3] %vm218_vm2, %v4027_v2 }
  0x23   : > { %262 = vst.msk [vmem:[#allocation2 + $0x168] sm:$0xff] %vm215_vm1, %v4027_v2  ;;  %263 = vst.msk [vmem:[#allocation2 + $0x170] sm:$0xff] %vm215_vm1, %v4027_v2 }
  0x24   : > { %265 = vst.msk [vmem:[#allocation2 + $0x180] sm:$0xff] %vm215_vm1, %v4027_v2  ;;  %266 = vst.msk [vmem:[#allocation2 + $0x188] sm:$0xff] %vm215_vm1, %v4027_v2 }
  0x25   : > { %267 = vst.msk [vmem:[#allocation2 + $0x190] sm:$0x3] %vm218_vm2, %v4027_v2  ;;  %270 = vst.msk [vmem:[#allocation2 + $0x1a8] sm:$0x3] %vm218_vm2, %v4027_v2 }
  0x26   : > { %268 = vst.msk [vmem:[#allocation2 + $0x198] sm:$0xff] %vm215_vm1, %v4027_v2  ;;  %269 = vst.msk [vmem:[#allocation2 + $0x1a0] sm:$0xff] %vm215_vm1, %v4027_v2 }
  0x27   : > { %272 = vst.msk [vmem:[#allocation2 + $0x19] sm:$0xff] %vm215_vm1, %v183_v5  ;;  %273 = vst.msk [vmem:[#allocation2 + $0x21] sm:$0xff] %vm215_vm1, %v184_v6 }
  0x28   : > { %286 = vst.msk [vmem:[#allocation2 + $0xc1] sm:$0xff] %vm215_vm1, %v197_v7  ;;  %287 = vst.msk [vmem:[#allocation2 + $0xc9] sm:$0xff] %vm215_vm1, %v198_v10 }
  0x29   : > { %288 = vst.msk [vmem:[#allocation2 + $0xd9] sm:$0xff] %vm215_vm1, %v199_v12  ;;  %289 = vst.msk [vmem:[#allocation2 + $0xe1] sm:$0xff] %vm215_vm1, %v200_v13 }
  0x2a   : > { %274 = vst.msk [vmem:[#allocation2 + $0x31] sm:$0xff] %vm215_vm1, %v185_v14  ;;  %275 = vst.msk [vmem:[#allocation2 + $0x39] sm:$0xff] %vm215_vm1, %v186_v15 }
  0x2b   : > { %276 = vst.msk [vmem:[#allocation2 + $0x49] sm:$0xff] %vm215_vm1, %v187_v16  ;;  %277 = vst.msk [vmem:[#allocation2 + $0x51] sm:$0xff] %vm215_vm1, %v188_v17 }
  0x2c   : > { %290 = vst.msk [vmem:[#allocation2 + $0xf1] sm:$0xff] %vm215_vm1, %v201_v18  ;;  %291 = vst.msk [vmem:[#allocation2 + $0xf9] sm:$0xff] %vm215_vm1, %v202_v19  ;;  %v828_v19 = vld [vmem:[#allocation2 + $0x2] sm:$0xff] }
  0x2d   : > { %292 = vst.msk [vmem:[#allocation2 + $0x109] sm:$0xff] %vm215_vm1, %v203_v20  ;;  %293 = vst.msk [vmem:[#allocation2 + $0x111] sm:$0xff] %vm215_vm1, %v204_v21  ;;  %v829_v20 = vld [vmem:[#allocation2 + $0xa] sm:$0xff] }
  0x2e   : > { %278 = vst.msk [vmem:[#allocation2 + $0x61] sm:$0xff] %vm215_vm1, %v189_v22  ;;  %279 = vst.msk [vmem:[#allocation2 + $0x69] sm:$0xff] %vm215_vm1, %v190_v23  ;;  %v355_v30 = vld [vmem:[#allocation2 + $0x19] sm:$0xff]  ;;  %v356_v31 = vld [vmem:[#allocation2 + $0x21] sm:$0xff] }
  0x2f   : > { %280 = vst.msk [vmem:[#allocation2 + $0x79] sm:$0xff] %vm215_vm1, %v191_v24  ;;  %281 = vst.msk [vmem:[#allocation2 + $0x81] sm:$0xff] %vm215_vm1, %v192_v25  ;;  %v369_v32 = vld [vmem:[#allocation2 + $0xc1] sm:$0xff]  ;;  %v4189_v34 = vpack.c.bf16 %v356_v31, %v355_v30  ;;  %v370_v35 = vld [vmem:[#allocation2 + $0xc9] sm:$0xff] }
  0x30   : > { %294 = vst.msk [vmem:[#allocation2 + $0x121] sm:$0xff] %vm215_vm1, %v205_v26  ;;  %295 = vst.msk [vmem:[#allocation2 + $0x129] sm:$0xff] %vm215_vm1, %v206_v27  ;;  %v4194_v39 = vpack.c.bf16 %v370_v35, %v369_v32  ;;  %v371_v40 = vld [vmem:[#allocation2 + $0xd9] sm:$0xff]  ;;  %v372_v41 = vld [vmem:[#allocation2 + $0xe1] sm:$0xff]  ;;  %v860_v26 = vpack.c.bf16 %v829_v20, %v828_v19 }
  0x31   : > { %296 = vst.msk [vmem:[#allocation2 + $0x139] sm:$0xff] %vm215_vm1, %v207_v28  ;;  %297 = vst.msk [vmem:[#allocation2 + $0x141] sm:$0xff] %vm215_vm1, %v208_v29  ;;  %v357_v42 = vld [vmem:[#allocation2 + $0x31] sm:$0xff]  ;;  %3695 = vmatmul.mubr.msk.bf16.vlgmr.msra.gmra.mxu0 %vm215_vm1, %v4189_v34  ;;  %v4200_v43 = vpack.c.bf16 %v372_v41, %v371_v40  ;;  %v358_v45 = vld [vmem:[#allocation2 + $0x39] sm:$0xff] }
  0x32   : > { %282 = vst.msk [vmem:[#allocation2 + $0x91] sm:$0xff] %vm215_vm1, %v193_v37  ;;  %283 = vst.msk [vmem:[#allocation2 + $0x99] sm:$0xff] %vm215_vm1, %v194_v38  ;;  %v359_v46 = vld [vmem:[#allocation2 + $0x49] sm:$0xff]  ;;  %3710 = vmatprep.mubr.msk.bf16.mxu1 %vm215_vm1, %v4194_v39  ;;  %3761 = vmatpush3.bf16.msra.mxu0 %v927_v36  ;;  %v4211_v48 = vpack.c.bf16 %v358_v45, %v357_v42  ;;  %v360_v49 = vld [vmem:[#allocation2 + $0x51] sm:$0xff] }
  0x33   : > { %v373_v50 = vld [vmem:[#allocation2 + $0xf1] sm:$0xff]  ;;  %v374_v51 = vld [vmem:[#allocation2 + $0xf9] sm:$0xff]  ;;  %3711 = vmatmul.mubr.msk.bf16.vlgmr.msra.gmra.mxu1 %vm215_vm1, %v4200_v43  ;;  %4005 = vmatprep.subr.msk.bf16.mxu0 %vm451_vm0, %v4187_v33  ;;  %v4221_v57 = vpack.c.bf16 %v360_v49, %v359_v46  ;;  %284 = vst.msk [vmem:[#allocation2 + $0xa9] sm:$0xff] %vm215_vm1, %v195_v61  ;;  %285 = vst.msk [vmem:[#allocation2 + $0xb1] sm:$0xff] %vm215_vm1, %v196_v62 }
  0x34   : > { %v4215_v52 = vpack.c.bf16 %v374_v51, %v373_v50  ;;  %3727 = vmatpush3.bf16.msra.mxu1 %v665_v44  ;;  %3698 = vmatprep.mubr.msk.bf16.mxu0 %vm215_vm1, %v4211_v48  ;;  %v375_v55 = vld [vmem:[#allocation2 + $0x109] sm:$0xff]  ;;  %v376_v56 = vld [vmem:[#allocation2 + $0x111] sm:$0xff]  ;;  %298 = vst.msk [vmem:[#allocation2 + $0x151] sm:$0xff] %vm215_vm1, %v209_v63  ;;  %299 = vst.msk [vmem:[#allocation2 + $0x159] sm:$0xff] %vm215_vm1, %v210_v1  ;;  %v1515_v44 = vsel %vm451_vm0, %v4187_v33, 0  ;;  %v1221_v51 = vsel %vm451_vm0, %v4207_v47, 0 }
  0x35   : > { %v361_v53 = vld [vmem:[#allocation2 + $0x61] sm:$0xff]  ;;  %v362_v54 = vld [vmem:[#allocation2 + $0x69] sm:$0xff]  ;;  %4004 = vmatprep.subr.msk.bf16.mxu1 %vm451_vm0, %v4207_v47  ;;  %v4232_v0 = vpack.c.bf16 %v376_v56, %v375_v55  ;;  %300 = vst.msk [vmem:[#allocation2 + $0x169] sm:$0xff] %vm215_vm1, %v211_v3  ;;  %301 = vst.msk [vmem:[#allocation2 + $0x171] sm:$0xff] %vm215_vm1, %v212_v4 }
  0x36   : > { %3714 = vmatprep.mubr.msk.bf16.mxu1 %vm215_vm1, %v4215_v52  ;;  %v4227_v60 = vpack.c.bf16 %v362_v54, %v361_v53  ;;  %v363_v5 = vld [vmem:[#allocation2 + $0x79] sm:$0xff]  ;;  %v364_v6 = vld [vmem:[#allocation2 + $0x81] sm:$0xff]  ;;  %v308_v38 = vld [vmem:[#allocation2 + $0x30] sm:$0xff] }
  0x37   : > { %v377_v58 = vld [vmem:[#allocation2 + $0x121] sm:$0xff]  ;;  %v378_v59 = vld [vmem:[#allocation2 + $0x129] sm:$0xff]  ;;  %v4253_v11 = vpack.c.bf16 %v364_v6, %v363_v5  ;;  %v832_v31 = vld [vmem:[#allocation2 + $0x32] sm:$0xff] }
  0x38   : > { %v4238_v2 = vpack.c.bf16 %v378_v59, %v377_v58  ;;  %v379_v9 = vld [vmem:[#allocation2 + $0x139] sm:$0xff]  ;;  %v380_v10 = vld [vmem:[#allocation2 + $0x141] sm:$0xff]  ;;  %v4292_v46 = vld [vmem:[%s5264_s1 + $0xc] sm:$0x3] }
  0x39   : > { %3699 = vmatmul.mubr.msk.bf16.gmra.mxu0 %vm215_vm1, %v4221_v57  ;;  %v365_v7 = vld [vmem:[#allocation2 + $0x91] sm:$0xff]  ;;  %v366_v8 = vld [vmem:[#allocation2 + $0x99] sm:$0xff]  ;;  %v4257_v14 = vpack.c.bf16 %v380_v10, %v379_v9  ;;  %v305_v25 = vld [vmem:[#allocation2 + $0x8] sm:$0xff] }
  0x3a   : > { %3702 = vmatprep.mubr.msk.bf16.mxu0 %vm215_vm1, %v4227_v60  ;;  %v4255_v12 = vpack.c.bf16 %v366_v8, %v365_v7  ;;  %v367_v17 = vld [vmem:[#allocation2 + $0xa9] sm:$0xff]  ;;  %v368_v18 = vld [vmem:[#allocation2 + $0xb1] sm:$0xff]  ;;  %v304_v24 = vld [vmem:[#allocation2] sm:$0xff] }
  0x3b   : > { %3715 = vmatmul.mubr.msk.bf16.gmra.mxu1 %vm215_vm1, %v4232_v0  ;;  %v381_v13 = vld [vmem:[#allocation2 + $0x151] sm:$0xff]  ;;  %v382_v15 = vld [vmem:[#allocation2 + $0x159] sm:$0xff]  ;;  %v4269_v23 = vpack.c.bf16 %v368_v18, %v367_v17  ;;  %v336_v28 = vpack.c.bf16 %v305_v25, %v304_v24  ;;  %v831_v30 = vld [vmem:[#allocation2 + $0x22] sm:$0xff] }
  0x3c   : > { %3718 = vmatprep.mubr.msk.bf16.mxu1 %vm215_vm1, %v4238_v2  ;;  %v4259_v16 = vpack.c.bf16 %v382_v15, %v381_v13  ;;  %v383_v21 = vld [vmem:[#allocation2 + $0x169] sm:$0xff]  ;;  %v384_v22 = vld [vmem:[#allocation2 + $0x171] sm:$0xff]  ;;  %v830_v29 = vld [vmem:[#allocation2 + $0x1a] sm:$0xff] }
  0x3d   : > { %v4271_v27 = vpack.c.bf16 %v384_v22, %v383_v21  ;;  %v833_v32 = vld [vmem:[#allocation2 + $0x3a] sm:$0xff]  ;;  %v4279_v37 = vpack.c.bf16 %v831_v30, %v830_v29  ;;  %v213_v49 = vld [vmem:[%s4137_s23 + $0xf0] sm:$0xff]  ;;  %v4307_v54 = vld [vmem:[%s5264_s1 + $0xa] sm:$0x3] }
  0x3e   : > { %v306_v35 = vld [vmem:[#allocation2 + $0x18] sm:$0xff]  ;;  %v307_v36 = vld [vmem:[#allocation2 + $0x20] sm:$0xff]  ;;  %v4281_v41 = vpack.c.bf16 %v833_v32, %v832_v31  ;;  %302 = vst.msk [vmem:[#allocation2 + $0x181] sm:$0xff] %vm215_vm1, %v213_v49  ;;  %v834_v33 = vld [vmem:[#allocation2 + $0x4a] sm:$0xff] }
  0x3f   : > { %v309_v40 = vld [vmem:[#allocation2 + $0x38] sm:$0xff]  ;;  %v4283_v42 = vpack.c.bf16 %v307_v36, %v306_v35  ;;  %v836_v55 = vld [vmem:[#allocation2 + $0x62] sm:$0xff]  ;;  %v837_v47 = vld [vmem:[#allocation2 + $0x6a] sm:$0xff] }
  0x40   : > { %v4287_v45 = vpack.c.bf16 %v309_v40, %v308_v38  ;;  %v214_v50 = vld [vmem:[%s4137_s23 + $0xf8] sm:$0xff]  ;;  %v310_v56 = vld [vmem:[#allocation2 + $0x48] sm:$0xff]  ;;  %v311_v58 = vld [vmem:[#allocation2 + $0x50] sm:$0xff]  ;;  %v4319_v63 = vpack.c.bf16 %v837_v47, %v836_v55 }
  0x41   : > { %3703 = vmatmul.mubr.msk.bf16.gmra.mxu0 %vm215_vm1, %v4253_v11  ;;  %303 = vst.msk [vmem:[#allocation2 + $0x189] sm:$0xff] %vm215_vm1, %v214_v50  ;;  %v835_v53 = vld [vmem:[#allocation2 + $0x52] sm:$0xff]  ;;  %v312_v61 = vld [vmem:[#allocation2 + $0x60] sm:$0xff]  ;;  %v313_v62 = vld [vmem:[#allocation2 + $0x68] sm:$0xff]  ;;  %v4321_v1 = vpack.c.bf16 %v311_v58, %v310_v56 }
  0x42   : > { %3706 = vmatprep.mubr.msk.bf16.mxu0 %vm215_vm1, %v4255_v12  ;;  %v4315_v59 = vpack.c.bf16 %v835_v53, %v834_v33  ;;  %v4323_v3 = vpack.c.bf16 %v313_v62, %v312_v61  ;;  %v838_v4 = vld [vmem:[#allocation2 + $0x7a] sm:$0xff]  ;;  %v839_v5 = vld [vmem:[#allocation2 + $0x82] sm:$0xff]  ;;  %v840_v6 = vld [vmem:[#allocation2 + $0x92] sm:$0xff] }
  0x43   : > { %3719 = vmatmul.mubr.msk.bf16.gmra.mxu1 %vm215_vm1, %v4257_v14  ;;  %v841_v7 = vld [vmem:[#allocation2 + $0x9a] sm:$0xff]  ;;  %v4333_v10 = vpack.c.bf16 %v839_v5, %v838_v4  ;;  %v316_v13 = vld [vmem:[#allocation2 + $0x90] sm:$0xff]  ;;  %v844_v22 = vld [vmem:[#allocation2 + $0xc2] sm:$0xff] }
  0x44   : > { %3722 = vmatprep.mubr.msk.bf16.mxu1 %vm215_vm1, %v4259_v16  ;;  %v314_v8 = vld [vmem:[#allocation2 + $0x78] sm:$0xff]  ;;  %v315_v9 = vld [vmem:[#allocation2 + $0x80] sm:$0xff]  ;;  %v4335_v17 = vpack.c.bf16 %v841_v7, %v840_v6  ;;  %v842_v20 = vld [vmem:[#allocation2 + $0xaa] sm:$0xff] }
  0x45   : > { %v317_v15 = vld [vmem:[#allocation2 + $0x98] sm:$0xff]  ;;  %v4337_v18 = vpack.c.bf16 %v315_v9, %v314_v8  ;;  %v845_v24 = vld [vmem:[#allocation2 + $0xca] sm:$0xff]  ;;  %v320_v29 = vld [vmem:[#allocation2 + $0xc0] sm:$0xff] }
  0x46   : > { %v4339_v19 = vpack.c.bf16 %v317_v15, %v316_v13  ;;  %v843_v21 = vld [vmem:[#allocation2 + $0xb2] sm:$0xff]  ;;  %v318_v25 = vld [vmem:[#allocation2 + $0xa8] sm:$0xff]  ;;  %v4351_v31 = vpack.c.bf16 %v845_v24, %v844_v22  ;;  %v846_v36 = vld [vmem:[#allocation2 + $0xda] sm:$0xff] }
  0x47   : > { %v321_v30 = vld [vmem:[#allocation2 + $0xc8] sm:$0xff]  ;;  %v848_v40 = vld [vmem:[#allocation2 + $0xf2] sm:$0xff]  ;;  %v323_v50 = vld [vmem:[#allocation2 + $0xe0] sm:$0xff] }
  0x48   : > { %v4355_v35 = vpack.c.bf16 %v321_v30, %v320_v29  ;;  %v847_v38 = vld [vmem:[#allocation2 + $0xe2] sm:$0xff]  ;;  %v322_v49 = vld [vmem:[#allocation2 + $0xd8] sm:$0xff]  ;;  %v324_v33 = vld [vmem:[#allocation2 + $0xf0] sm:$0xff] }
  0x49   : > { %3707 = vmatmul.mubr.msk.bf16.gmra.mxu0 %vm215_vm1, %v4269_v23  ;;  %v325_v53 = vld [vmem:[#allocation2 + $0xf8] sm:$0xff]  ;;  %v4369_v47 = vpack.c.bf16 %v323_v50, %v322_v49  ;;  %v850_v58 = vld [vmem:[#allocation2 + $0x10a] sm:$0xff]  ;;  %v852_v62 = vld [vmem:[#allocation2 + $0x122] sm:$0xff] }
  0x4a   : > { %3762 = vmatprep.mubr.msk.bf16.mxu0 %vm215_vm1, %v860_v26  ;;  %v319_v26 = vld [vmem:[#allocation2 + $0xb0] sm:$0xff]  ;;  %v4371_v56 = vpack.c.bf16 %v325_v53, %v324_v33  ;;  %v326_v5 = vld [vmem:[#allocation2 + $0x108] sm:$0xff]  ;;  %v328_v8 = vld [vmem:[#allocation2 + $0x120] sm:$0xff] }
  0x4b   : > { %3723 = vmatmul.mubr.msk.bf16.gmra.mxu1 %vm215_vm1, %v4271_v27  ;;  %v4353_v32 = vpack.c.bf16 %v319_v26, %v318_v25  ;;  %v851_v61 = vld [vmem:[#allocation2 + $0x112] sm:$0xff]  ;;  %v853_v4 = vld [vmem:[#allocation2 + $0x12a] sm:$0xff]  ;;  %v855_v22 = vld [vmem:[#allocation2 + $0x142] sm:$0xff] }
  0x4c   : > { %3728 = vmatprep.mubr.msk.bf16.mxu1 %vm215_vm1, %v336_v28  ;;  %v4349_v28 = vpack.c.bf16 %v843_v21, %v842_v20  ;;  %v327_v6 = vld [vmem:[#allocation2 + $0x110] sm:$0xff]  ;;  %v4381_v7 = vpack.c.bf16 %v851_v61, %v850_v58  ;;  %v329_v9 = vld [vmem:[#allocation2 + $0x128] sm:$0xff]  ;;  %v4383_v13 = vpack.c.bf16 %v853_v4, %v852_v62  ;;  %v854_v21 = vld [vmem:[#allocation2 + $0x13a] sm:$0xff]  ;;  %v2104_v4 = vsel %vm451_vm0, %v4292_v46, 0 }
  0x4d   : > { %v4385_v15 = vpack.c.bf16 %v327_v6, %v326_v5  ;;  %v4387_v20 = vpack.c.bf16 %v329_v9, %v328_v8  ;;  %v856_v24 = vld [vmem:[#allocation2 + $0x152] sm:$0xff]  ;;  %v857_v25 = vld [vmem:[#allocation2 + $0x15a] sm:$0xff]  ;;  %v4397_v30 = vpack.c.bf16 %v855_v22, %v854_v21  ;;  %v858_v50 = vld [vmem:[#allocation2 + $0x16a] sm:$0xff]  ;;  %v1809_v6 = vsel %vm451_vm0, %v4307_v54, 0 }
  0x4e   : > { %v330_v26 = vld [vmem:[#allocation2 + $0x138] sm:$0xff]  ;;  %v331_v29 = vld [vmem:[#allocation2 + $0x140] sm:$0xff]  ;;  %v334_v53 = vld [vmem:[#allocation2 + $0x168] sm:$0xff] }
  0x4f   : > { %v859_v33 = vld [vmem:[#allocation2 + $0x172] sm:$0xff]  ;;  %v3454_v5 = vld [vmem:[%s5264_s1 + $0x10] sm:$0x3] }
  0x50   : > { %v335_v58 = vld [vmem:[#allocation2 + $0x170] sm:$0xff]  ;;  %v4413_v61 = vpack.c.bf16 %v859_v33, %v858_v50 }
  0x51   : > { %3763 = vmatmul.mubr.msk.bf16.vlgmr.msra.gmra.mxu0 %vm215_vm1, %v4279_v37  ;;  %v4415_v62 = vpack.c.bf16 %v335_v58, %v334_v53  ;;  %v2301_v58 = vld [vmem:[#allocation2 + $0x49] sm:$0xff] }
  0x52   : > { %3829 = vmatpush3.bf16.msra.mxu0 %v1515_v44  ;;  %3766 = vmatprep.mubr.msk.bf16.mxu0 %vm215_vm1, %v4281_v41  ;;  %v849_v44 = vld [vmem:[#allocation2 + $0xfa] sm:$0xff] }
  0x53   : > { %3729 = vmatmul.mubr.msk.bf16.vlgmr.msra.gmra.mxu1 %vm215_vm1, %v4283_v42  ;;  %4007 = vmatprep.subr.msk.bf16.mxu0 %vm451_vm0, %v4292_v46  ;;  %v4367_v55 = vpack.c.bf16 %v849_v44, %v848_v40  ;;  %v4399_v40 = vpack.c.bf16 %v857_v25, %v856_v24  ;;  %v4401_v44 = vpack.c.bf16 %v331_v29, %v330_v26  ;;  %v2299_v25 = vld [vmem:[#allocation2 + $0x31] sm:$0xff]  ;;  %v2300_v26 = vld [vmem:[#allocation2 + $0x39] sm:$0xff] }
  0x54   : > { %3795 = vmatpush3.bf16.msra.mxu1 %v1221_v51  ;;  %3732 = vmatprep.mubr.msk.bf16.mxu1 %vm215_vm1, %v4287_v45  ;;  %v4365_v51 = vpack.c.bf16 %v847_v38, %v846_v36  ;;  %v332_v36 = vld [vmem:[#allocation2 + $0x150] sm:$0xff]  ;;  %v333_v38 = vld [vmem:[#allocation2 + $0x158] sm:$0xff] }
  0x55   : > { %4006 = vmatprep.subr.msk.bf16.mxu1 %vm451_vm0, %v4307_v54  ;;  %v4403_v49 = vpack.c.bf16 %v333_v38, %v332_v36 }
  0x59   : > { %3767 = vmatmul.mubr.msk.bf16.gmra.mxu0 %vm215_vm1, %v4315_v59 }
  0x5a   : > { %3770 = vmatprep.mubr.msk.bf16.mxu0 %vm215_vm1, %v4319_v63 }
  0x5b   : > { %3733 = vmatmul.mubr.msk.bf16.gmra.mxu1 %vm215_vm1, %v4321_v1 }
  0x5c   : > { %3736 = vmatprep.mubr.msk.bf16.mxu1 %vm215_vm1, %v4323_v3 }
  0x61   : > { %3771 = vmatmul.mubr.msk.bf16.gmra.mxu0 %vm215_vm1, %v4333_v10 }
  0x62   : > { %3774 = vmatprep.mubr.msk.bf16.mxu0 %vm215_vm1, %v4335_v17 }
  0x63   : > { %3737 = vmatmul.mubr.msk.bf16.gmra.mxu1 %vm215_vm1, %v4337_v18 }
  0x64   : > { %3740 = vmatprep.mubr.msk.bf16.mxu1 %vm215_vm1, %v4339_v19 }
  0x69   : > { %3775 = vmatmul.mubr.msk.bf16.gmra.mxu0 %vm215_vm1, %v4349_v28 }
  0x6a   : > { %3778 = vmatprep.mubr.msk.bf16.mxu0 %vm215_vm1, %v4351_v31 }
  0x6b   : > { %3741 = vmatmul.mubr.msk.bf16.gmra.mxu1 %vm215_vm1, %v4353_v32 }
  0x6c   : > { %3744 = vmatprep.mubr.msk.bf16.mxu1 %vm215_vm1, %v4355_v35 }
  0x71   : > { %3779 = vmatmul.mubr.msk.bf16.gmra.mxu0 %vm215_vm1, %v4365_v51 }
  0x72   : > { %3782 = vmatprep.mubr.msk.bf16.mxu0 %vm215_vm1, %v4367_v55 }
  0x73   : > { %3745 = vmatmul.mubr.msk.bf16.gmra.mxu1 %vm215_vm1, %v4369_v47 }
  0x74   : > { %3748 = vmatprep.mubr.msk.bf16.mxu1 %vm215_vm1, %v4371_v56 }
  0x79   : > { %3783 = vmatmul.mubr.msk.bf16.gmra.mxu0 %vm215_vm1, %v4381_v7 }
  0x7a   : > { %3786 = vmatprep.mubr.msk.bf16.mxu0 %vm215_vm1, %v4383_v13 }
  0x7b   : > { %3749 = vmatmul.mubr.msk.bf16.gmra.mxu1 %vm215_vm1, %v4385_v15 }
  0x7c   : > { %3752 = vmatprep.mubr.msk.bf16.mxu1 %vm215_vm1, %v4387_v20 }
  0x81   : > { %3787 = vmatmul.mubr.msk.bf16.gmra.mxu0 %vm215_vm1, %v4397_v30 }
  0x82   : > { %3790 = vmatprep.mubr.msk.bf16.mxu0 %vm215_vm1, %v4399_v40 }
  0x83   : > { %3753 = vmatmul.mubr.msk.bf16.gmra.mxu1 %vm215_vm1, %v4401_v44 }
  0x84   : > { %3756 = vmatprep.mubr.msk.bf16.mxu1 %vm215_vm1, %v4403_v49 }
  0x89   : > { %3791 = vmatmul.mubr.msk.bf16.gmra.mxu0 %vm215_vm1, %v4413_v61 }
  0x8a   : > { %3830 = vmatprep.mubr.msk.bf16.mxu0 %vm215_vm1, %v4189_v34  ;;  %v3437_v34 = vld [vmem:[%s5264_s1 + $0xe] sm:$0x3] }
  0x8b   : > { %3757 = vmatmul.mubr.msk.bf16.gmra.mxu1 %vm215_vm1, %v4415_v62 }
  0x8c   : > { %3796 = vmatprep.mubr.msk.bf16.mxu1 %vm215_vm1, %v4283_v42 }
  0x91   : > { %3831 = vmatmul.mubr.msk.bf16.vlgmr.msra.gmra.mxu0 %vm215_vm1, %v4211_v48  ;;  %v1152_v48 = vld [vmem:[#allocation2 + $0x180] sm:$0xff] }
  0x92   : > { %3897 = vmatpush3.bf16.msra.mxu0 %v2104_v4  ;;  %3834 = vmatprep.mubr.msk.bf16.mxu0 %vm215_vm1, %v4221_v57 }
  0x93   : > { %3797 = vmatmul.mubr.msk.bf16.vlgmr.msra.gmra.mxu1 %vm215_vm1, %v4287_v45  ;;  %4009 = vmatprep.subr.msk.bf16.mxu0 %vm451_vm0, %v3454_v5 }
  0x94   : > { %3863 = vmatpush3.bf16.msra.mxu1 %v1809_v6  ;;  %3800 = vmatprep.mubr.msk.bf16.mxu1 %vm215_vm1, %v4321_v1  ;;  %v2303_v6 = vld [vmem:[#allocation2 + $0x61] sm:$0xff] }
  0x95   : > { %4008 = vmatprep.subr.msk.bf16.mxu1 %vm451_vm0, %v3437_v34 }
  0x99   : > { %3835 = vmatmul.mubr.msk.bf16.gmra.mxu0 %vm215_vm1, %v4227_v60 }
  0x9a   : > { %3838 = vmatprep.mubr.msk.bf16.mxu0 %vm215_vm1, %v4253_v11 }
  0x9b   : > { %3801 = vmatmul.mubr.msk.bf16.gmra.mxu1 %vm215_vm1, %v4323_v3 }
  0x9c   : > { %3804 = vmatprep.mubr.msk.bf16.mxu1 %vm215_vm1, %v4337_v18 }
  0xa1   : > { %3839 = vmatmul.mubr.msk.bf16.gmra.mxu0 %vm215_vm1, %v4255_v12 }
  0xa2   : > { %3842 = vmatprep.mubr.msk.bf16.mxu0 %vm215_vm1, %v4269_v23 }
  0xa3   : > { %3805 = vmatmul.mubr.msk.bf16.gmra.mxu1 %vm215_vm1, %v4339_v19 }
  0xa4   : > { %3808 = vmatprep.mubr.msk.bf16.mxu1 %vm215_vm1, %v4353_v32 }
  0xa9   : > { %3843 = vmatmul.mubr.msk.bf16.gmra.mxu0 %vm215_vm1, %v4194_v39  ;;  %v1446_v39 = vld [vmem:[#allocation2 + $0x181] sm:$0xff] }
  0xaa   : > { %3846 = vmatprep.mubr.msk.bf16.mxu0 %vm215_vm1, %v4200_v43  ;;  %v1447_v43 = vld [vmem:[#allocation2 + $0x189] sm:$0xff] }
  0xab   : > { %3809 = vmatmul.mubr.msk.bf16.gmra.mxu1 %vm215_vm1, %v4355_v35  ;;  %v4493_v57 = vpack.c.bf16 %v1447_v43, %v1446_v39 }
  0xac   : > { %3812 = vmatprep.mubr.msk.bf16.mxu1 %vm215_vm1, %v4369_v47 }
  0xb1   : > { %3847 = vmatmul.mubr.msk.bf16.gmra.mxu0 %vm215_vm1, %v4215_v52  ;;  %v1153_v52 = vld [vmem:[#allocation2 + $0x188] sm:$0xff] }
  0xb2   : > { %3850 = vmatprep.mubr.msk.bf16.mxu0 %vm215_vm1, %v4232_v0  ;;  %v1169_v60 = vpack.c.bf16 %v1153_v52, %v1152_v48  ;;  %v2692_v0 = vsel %vm451_vm0, %v3454_v5, 0 }
  0xb3   : > { %3813 = vmatmul.mubr.msk.bf16.gmra.mxu1 %vm215_vm1, %v4371_v56 }
  0xb4   : > { %3816 = vmatprep.mubr.msk.bf16.mxu1 %vm215_vm1, %v4385_v15 }
  0xb9   : > { %3851 = vmatmul.mubr.msk.bf16.gmra.mxu0 %vm215_vm1, %v4238_v2  ;;  %v2398_v2 = vsel %vm451_vm0, %v3437_v34, 0  ;;  %v2304_v34 = vld [vmem:[#allocation2 + $0x69] sm:$0xff] }
  0xba   : > { %3854 = vmatprep.mubr.msk.bf16.mxu0 %vm215_vm1, %v4257_v14  ;;  %v2333_v48 = vpack.c.bf16 %v2304_v34, %v2303_v6 }
  0xbb   : > { %3817 = vmatmul.mubr.msk.bf16.gmra.mxu1 %vm215_vm1, %v4387_v20 }
  0xbc   : > { %3820 = vmatprep.mubr.msk.bf16.mxu1 %vm215_vm1, %v4401_v44 }
  0xc1   : > { %3855 = vmatmul.mubr.msk.bf16.gmra.mxu0 %vm215_vm1, %v4259_v16 }
  0xc2   : > { %3858 = vmatprep.mubr.msk.bf16.mxu0 %vm215_vm1, %v4271_v27 }
  0xc3   : > { %3821 = vmatmul.mubr.msk.bf16.gmra.mxu1 %vm215_vm1, %v4403_v49 }
  0xc4   : > { %3824 = vmatprep.mubr.msk.bf16.mxu1 %vm215_vm1, %v4415_v62 }
  0xc9   : > { %3859 = vmatmul.mubr.msk.bf16.gmra.mxu0 %vm215_vm1, %v4493_v57 }
  0xca   : > { %3898 = vmatprep.mubr.msk.bf16.mxu0 %vm215_vm1, %v4287_v45 }
  0xcb   : > { %3825 = vmatmul.mubr.msk.bf16.gmra.mxu1 %vm215_vm1, %v1169_v60 }
  0xcc   : > { %3864 = vmatprep.mubr.msk.bf16.mxu1 %vm215_vm1, %v4279_v37 }
  0xd1   : > { %3899 = vmatmul.mubr.msk.bf16.vlgmr.msra.gmra.mxu0 %vm215_vm1, %v4321_v1 }
  0xd2   : > { %3965 = vmatpush3.bf16.msra.mxu0 %v2692_v0  ;;  %3902 = vmatprep.mubr.msk.bf16.mxu0 %vm215_vm1, %v4323_v3 }
  0xd3   : > { %3865 = vmatmul.mubr.msk.bf16.vlgmr.msra.gmra.mxu1 %vm215_vm1, %v4281_v41 }
  0xd4   : > { %3931 = vmatpush3.bf16.msra.mxu1 %v2398_v2  ;;  %3868 = vmatprep.mubr.msk.bf16.mxu1 %vm215_vm1, %v4315_v59 }
  0xd9   : > { %3903 = vmatmul.mubr.msk.bf16.gmra.mxu0 %vm215_vm1, %v4337_v18 }
  0xda   : > { %3906 = vmatprep.mubr.msk.bf16.mxu0 %vm215_vm1, %v4339_v19 }
  0xdb   : > { %3869 = vmatmul.mubr.msk.bf16.gmra.mxu1 %vm215_vm1, %v4319_v63 }
  0xdc   : > { %3872 = vmatprep.mubr.msk.bf16.mxu1 %vm215_vm1, %v4333_v10 }
  0xe1   : > { %3907 = vmatmul.mubr.msk.bf16.gmra.mxu0 %vm215_vm1, %v4353_v32 }
  0xe2   : > { %3910 = vmatprep.mubr.msk.bf16.mxu0 %vm215_vm1, %v4355_v35 }
  0xe3   : > { %3873 = vmatmul.mubr.msk.bf16.gmra.mxu1 %vm215_vm1, %v4335_v17 }
  0xe4   : > { %3876 = vmatprep.mubr.msk.bf16.mxu1 %vm215_vm1, %v4349_v28 }
  0xe9   : > { %3911 = vmatmul.mubr.msk.bf16.gmra.mxu0 %vm215_vm1, %v4369_v47  ;;  %v2035_v47 = vld [vmem:[#allocation2 + $0x198] sm:$0xff] }
  0xea   : > { %3914 = vmatprep.mubr.msk.bf16.mxu0 %vm215_vm1, %v4371_v56  ;;  %v2036_v56 = vld [vmem:[#allocation2 + $0x1a0] sm:$0xff] }
  0xeb   : > { %3877 = vmatmul.mubr.msk.bf16.gmra.mxu1 %vm215_vm1, %v4351_v31  ;;  %v2052_v24 = vpack.c.bf16 %v2036_v56, %v2035_v47  ;;  %v2305_v56 = vld [vmem:[#allocation2 + $0x79] sm:$0xff] }
  0xec   : > { %3880 = vmatprep.mubr.msk.bf16.mxu1 %vm215_vm1, %v4365_v51 }
  0xf1   : > { %v4536_v11 = vpop.f32.mrf.mxu0  ;;  %3915 = vmatmul.mubr.msk.bf16.gmra.mxu0 %vm215_vm1, %v4385_v15  ;;  %v1740_v15 = vld [vmem:[#allocation2 + $0x182] sm:$0xff] }
  0xf2   : > { %3918 = vmatprep.mubr.msk.bf16.mxu0 %vm215_vm1, %v4387_v20  ;;  %v1741_v20 = vld [vmem:[#allocation2 + $0x18a] sm:$0xff] }
  0xf3   : > { %v4542_v12 = vpop.f32.mrf.mxu1  ;;  %3881 = vmatmul.mubr.msk.bf16.gmra.mxu1 %vm215_vm1, %v4367_v55  ;;  %v4546_v14 = vpop.f32.mrf.mxu0  ;;  %v4605_v38 = vpack.c.bf16 %v1741_v20, %v1740_v15  ;;  %v2306_v15 = vld [vmem:[#allocation2 + $0x81] sm:$0xff] }
  0xf4   : > { %3884 = vmatprep.mubr.msk.bf16.mxu1 %vm215_vm1, %v4381_v7 }
  0xf5   : > { %v4550_v16 = vpop.f32.mrf.mxu1  ;;  %v4552_v23 = vpop.f32.mrf.mxu0 }
  0xf7   : > { %v4554_v27 = vpop.f32.mrf.mxu1  ;;  %v4556_v37 = vpop.f32.mrf.mxu0 }
  0xf9   : > { %v4558_v42 = vpop.f32.mrf.mxu1  ;;  %v4560_v45 = vpop.f32.mrf.mxu0  ;;  %3919 = vmatmul.mubr.msk.bf16.gmra.mxu0 %vm215_vm1, %v4401_v44  ;;  %v2331_v44 = vpack.c.bf16 %v2300_v26, %v2299_v25  ;;  %v2307_v25 = vld [vmem:[#allocation2 + $0x91] sm:$0xff]  ;;  %v2308_v26 = vld [vmem:[#allocation2 + $0x99] sm:$0xff] }
  0xfa   : > { %3922 = vmatprep.mubr.msk.bf16.mxu0 %vm215_vm1, %v4403_v49  ;;  %v2335_v34 = vpack.c.bf16 %v2308_v26, %v2307_v25  ;;  %v2312_v25 = vld [vmem:[#allocation2 + $0xc9] sm:$0xff] }
  0xfb   : > { %v4566_v46 = vpop.f32.mrf.mxu1  ;;  %3885 = vmatmul.mubr.msk.bf16.gmra.mxu1 %vm215_vm1, %v4383_v13  ;;  %v4570_v54 = vpop.f32.mrf.mxu0 }
  0xfc   : > { %3888 = vmatprep.mubr.msk.bf16.mxu1 %vm215_vm1, %v4397_v30 }
  0xfd   : > { %v4574_v1 = vpop.f32.mrf.mxu1  ;;  %v4576_v3 = vpop.f32.mrf.mxu0 }
  0xff   : > { %v4578_v18 = vpop.f32.mrf.mxu1  ;;  %v4580_v19 = vpop.f32.mrf.mxu0 }
 0x101   : > { %v4582_v32 = vpop.f32.mrf.mxu1  ;;  %v4584_v35 = vpop.f32.mrf.mxu0  ;;  %3923 = vmatmul.mubr.msk.bf16.gmra.mxu0 %vm215_vm1, %v4415_v62  ;;  %v2302_v62 = vld [vmem:[#allocation2 + $0x51] sm:$0xff] }
 0x102   : > { %3926 = vmatprep.mubr.msk.bf16.mxu0 %vm215_vm1, %v1169_v60  ;;  %v2332_v43 = vpack.c.bf16 %v2302_v62, %v2301_v58  ;;  %v2334_v62 = vpack.c.bf16 %v2306_v15, %v2305_v56  ;;  %v2310_v56 = vld [vmem:[#allocation2 + $0xb1] sm:$0xff] }
 0x103   : > { %v4589_v8 = vpop.f32.mrf.mxu1  ;;  %3889 = vmatmul.mubr.msk.bf16.gmra.mxu1 %vm215_vm1, %v4399_v40  ;;  %v4593_v9 = vpop.f32.mrf.mxu0 }
 0x104   : > { %3892 = vmatprep.mubr.msk.bf16.mxu1 %vm215_vm1, %v4413_v61 }
 0x105   : > { %v4597_v21 = vpop.f32.mrf.mxu1  ;;  %v4599_v22 = vpop.f32.mrf.mxu0 }
 0x107   : > { %v4601_v29 = vpop.f32.mrf.mxu1  ;;  %v4603_v36 = vpop.f32.mrf.mxu0 }
 0x109   : > { %v4607_v49 = vpop.f32.mrf.mxu1  ;;  %v4609_v50 = vpop.f32.mrf.mxu0  ;;  %3927 = vmatmul.mubr.msk.bf16.gmra.mxu0 %vm215_vm1, %v2052_v24 }
 0x10a   : > { %3966 = vmatprep.mubr.msk.bf16.mxu0 %vm215_vm1, %v4281_v41 }
 0x10b   : > { %v4614_v33 = vpop.f32.mrf.mxu1  ;;  %3893 = vmatmul.mubr.msk.bf16.gmra.mxu1 %vm215_vm1, %v4605_v38  ;;  %v4618_v53 = vpop.f32.mrf.mxu0 }
 0x10c   : > { %3932 = vmatprep.mubr.msk.bf16.mxu1 %vm215_vm1, %v2331_v44 }
 0x10d   : > { %v4621_v4 = vpop.f32.mrf.mxu1  ;;  %v4623_v5 = vpop.f32.mrf.mxu0 }
 0x10f   : > { %v4625_v39 = vpop.f32.mrf.mxu1  ;;  %v4627_v41 = vpop.f32.mrf.mxu0 }
 0x111   : > { %v4629_v52 = vpop.f32.mrf.mxu1  ;;  %v3764_v60 = vpop.f32.mrf.mxu0  ;;  %3967 = vmatmul.mubr.msk.bf16.vlgmr.msra.gmra.mxu0 %vm215_vm1, %v4315_v59 }
 0x112   : > { %3970 = vmatprep.mubr.msk.bf16.mxu0 %vm215_vm1, %v4319_v63 }
 0x113   : > { %v3730_v0 = vpop.f32.mrf.mxu1  ;;  %3933 = vmatmul.mubr.msk.bf16.vlgmr.msra.gmra.mxu1 %vm215_vm1, %v2332_v43  ;;  %v963_v2 = vpop.f32.mrf.mxu0 }
 0x114   : > { %v710_v47 = vadd.f32 %v3730_v0, %v4536_v11  ;;  %3936 = vmatprep.mubr.msk.bf16.mxu1 %vm215_vm1, %v2333_v48 }
 0x115   : > { %v701_v20 = vpop.f32.mrf.mxu1  ;;  %v3765_v24 = vpop.f32.mrf.mxu0 }
 0x116   : > { %v702_v44 = vadd.f32 %v701_v20, %v4546_v14  ;;  %v4639_v59 = vadd.f32 %v3764_v60, %v710_v47 }
 0x117   : > { %v3731_v58 = vpop.f32.mrf.mxu1  ;;  %v966_v63 = vpop.f32.mrf.mxu0 }
 0x118   : > { %v713_v6 = vadd.f32 %v3731_v58, %v4552_v23  ;;  %v4642_v43 = vadd.f32 %v963_v2, %v702_v44  ;;  %v2309_v2 = vld [vmem:[#allocation2 + $0xa9] sm:$0xff] }
 0x119   : > { %v704_v11 = vpop.f32.mrf.mxu1  ;;  %v3768_v48 = vpop.f32.mrf.mxu0  ;;  %3971 = vmatmul.mubr.msk.bf16.gmra.mxu0 %vm215_vm1, %v4333_v10  ;;  %v2336_v58 = vpack.c.bf16 %v2310_v56, %v2309_v2  ;;  %v2316_v56 = vld [vmem:[#allocation2 + $0xf9] sm:$0xff] }
 0x11a   : > { %v705_v0 = vadd.f32 %v704_v11, %v4556_v37  ;;  %3974 = vmatprep.mubr.msk.bf16.mxu0 %vm215_vm1, %v4335_v17  ;;  %v4649_v14 = vadd.f32 %v3765_v24, %v713_v6  ;;  %v2311_v37 = vld [vmem:[#allocation2 + $0xc1] sm:$0xff] }
 0x11b   : > { %v3734_v60 = vpop.f32.mrf.mxu1  ;;  %3937 = vmatmul.mubr.msk.bf16.gmra.mxu1 %vm215_vm1, %v2334_v62  ;;  %v979_v47 = vpop.f32.mrf.mxu0 }
 0x11c   : > { %v726_v23 = vadd.f32 %v3734_v60, %v4560_v45  ;;  %3940 = vmatprep.mubr.msk.bf16.mxu1 %vm215_vm1, %v2335_v34  ;;  %v4654_v15 = vadd.f32 %v966_v63, %v705_v0  ;;  %v2337_v45 = vpack.c.bf16 %v2312_v25, %v2311_v37  ;;  %v2313_v60 = vld [vmem:[#allocation2 + $0xd9] sm:$0xff] }
 0x11d   : > { %v717_v10 = vpop.f32.mrf.mxu1  ;;  %v3769_v20 = vpop.f32.mrf.mxu0 }
 0x11e   : > { %v718_v17 = vadd.f32 %v717_v10, %v4570_v54  ;;  %v4657_v24 = vadd.f32 %v3768_v48, %v726_v23 }
 0x11f   : > { %v3735_v26 = vpop.f32.mrf.mxu1  ;;  %v982_v44 = vpop.f32.mrf.mxu0 }
 0x120   : > { %v729_v62 = vadd.f32 %v3735_v26, %v4576_v3  ;;  %v4660_v6 = vadd.f32 %v979_v47, %v718_v17  ;;  %v2314_v47 = vld [vmem:[#allocation2 + $0xe1] sm:$0xff] }
 0x121   : > { %v720_v34 = vpop.f32.mrf.mxu1  ;;  %v3772_v11 = vpop.f32.mrf.mxu0  ;;  %3975 = vmatmul.mubr.msk.bf16.gmra.mxu0 %vm215_vm1, %v4349_v28  ;;  %v2338_v25 = vpack.c.bf16 %v2314_v47, %v2313_v60 }
 0x122   : > { %v721_v63 = vadd.f32 %v720_v34, %v4580_v19  ;;  %3978 = vmatprep.mubr.msk.bf16.mxu0 %vm215_vm1, %v4351_v31  ;;  %v4667_v54 = vadd.f32 %v3769_v20, %v729_v62  ;;  %v2315_v19 = vld [vmem:[#allocation2 + $0xf1] sm:$0xff] }
 0x123   : > { %v3738_v48 = vpop.f32.mrf.mxu1  ;;  %3941 = vmatmul.mubr.msk.bf16.gmra.mxu1 %vm215_vm1, %v2336_v58  ;;  %v995_v0 = vpop.f32.mrf.mxu0 }
 0x124   : > { %v742_v3 = vadd.f32 %v3738_v48, %v4584_v35  ;;  %3944 = vmatprep.mubr.msk.bf16.mxu1 %vm215_vm1, %v2337_v45  ;;  %v4672_v23 = vadd.f32 %v982_v44, %v721_v63  ;;  %v2339_v35 = vpack.c.bf16 %v2316_v56, %v2315_v19  ;;  %v2318_v63 = vld [vmem:[#allocation2 + $0x111] sm:$0xff] }
 0x125   : > { %v733_v28 = vpop.f32.mrf.mxu1  ;;  %v3773_v2 = vpop.f32.mrf.mxu0 }
 0x126   : > { %v734_v31 = vadd.f32 %v733_v28, %v4593_v9  ;;  %v4675_v10 = vadd.f32 %v3772_v11, %v742_v3  ;;  %v2317_v11 = vld [vmem:[#allocation2 + $0x109] sm:$0xff] }
 0x127   : > { %v3739_v20 = vpop.f32.mrf.mxu1  ;;  %v998_v37 = vpop.f32.mrf.mxu0  ;;  %v2320_v3 = vld [vmem:[#allocation2 + $0x129] sm:$0xff] }
 0x128   : > { %v745_v17 = vadd.f32 %v3739_v20, %v4599_v22  ;;  %v4678_v26 = vadd.f32 %v995_v0, %v734_v31 }
 0x129   : > { %v736_v58 = vpop.f32.mrf.mxu1  ;;  %v3776_v62 = vpop.f32.mrf.mxu0  ;;  %3979 = vmatmul.mubr.msk.bf16.gmra.mxu0 %vm215_vm1, %v4365_v51 }
 0x12a   : > { %v737_v44 = vadd.f32 %v736_v58, %v4603_v36  ;;  %3982 = vmatprep.mubr.msk.bf16.mxu0 %vm215_vm1, %v4367_v55  ;;  %v4685_v9 = vadd.f32 %v3773_v2, %v745_v17  ;;  %v2319_v36 = vld [vmem:[#allocation2 + $0x121] sm:$0xff]  ;;  %v2340_v2 = vpack.c.bf16 %v2318_v63, %v2317_v11 }
 0x12b   : > { %v3742_v45 = vpop.f32.mrf.mxu1  ;;  %3945 = vmatmul.mubr.msk.bf16.gmra.mxu1 %vm215_vm1, %v2338_v25  ;;  %v1011_v34 = vpop.f32.mrf.mxu0  ;;  %v2322_v58 = vld [vmem:[#allocation2 + $0x141] sm:$0xff] }
 0x12c   : > { %v758_v22 = vadd.f32 %v3742_v45, %v4609_v50  ;;  %3948 = vmatprep.mubr.msk.bf16.mxu1 %vm215_vm1, %v2339_v35  ;;  %v4690_v48 = vadd.f32 %v998_v37, %v737_v44  ;;  %v2341_v50 = vpack.c.bf16 %v2320_v3, %v2319_v36  ;;  %v2321_v35 = vld [vmem:[#allocation2 + $0x139] sm:$0xff] }
 0x12d   : > { %v749_v51 = vpop.f32.mrf.mxu1  ;;  %v3777_v0 = vpop.f32.mrf.mxu0  ;;  %v2324_v45 = vld [vmem:[#allocation2 + $0x159] sm:$0xff]  ;;  %v2342_v63 = vpack.c.bf16 %v2322_v58, %v2321_v35 }
 0x12e   : > { %v750_v55 = vadd.f32 %v749_v51, %v4618_v53  ;;  %v4693_v60 = vadd.f32 %v3776_v62, %v758_v22 }
 0x12f   : > { %v3743_v47 = vpop.f32.mrf.mxu1  ;;  %v1014_v28 = vpop.f32.mrf.mxu0 }
 0x130   : > { %v761_v19 = vadd.f32 %v3743_v47, %v4623_v5  ;;  %v4696_v56 = vadd.f32 %v1011_v34, %v750_v55 }
 0x131   : > { %v752_v31 = vpop.f32.mrf.mxu1  ;;  %v3780_v20 = vpop.f32.mrf.mxu0  ;;  %3983 = vmatmul.mubr.msk.bf16.gmra.mxu0 %vm215_vm1, %v4381_v7 }
 0x132   : > { %v753_v37 = vadd.f32 %v752_v31, %v4627_v41  ;;  %3986 = vmatprep.mubr.msk.bf16.mxu0 %vm215_vm1, %v4383_v13  ;;  %v4703_v53 = vadd.f32 %v3777_v0, %v761_v19  ;;  %v2323_v41 = vld [vmem:[#allocation2 + $0x151] sm:$0xff] }
 0x133   : > { %v3746_v25 = vpop.f32.mrf.mxu1  ;;  %3949 = vmatmul.mubr.msk.bf16.gmra.mxu1 %vm215_vm1, %v2340_v2  ;;  %v1027_v17 = vpop.f32.mrf.mxu0  ;;  %v2325_v2 = vld [vmem:[#allocation2 + $0x169] sm:$0xff]  ;;  %v2326_v19 = vld [vmem:[#allocation2 + $0x171] sm:$0xff] }
 0x134   : > { %v774_v5 = vadd.f32 %v3746_v25, %v4542_v12  ;;  %3952 = vmatprep.mubr.msk.bf16.mxu1 %vm215_vm1, %v2341_v50  ;;  %v4708_v62 = vadd.f32 %v1014_v28, %v753_v37  ;;  %v2343_v12 = vpack.c.bf16 %v2324_v45, %v2323_v41  ;;  %v2344_v25 = vpack.c.bf16 %v2326_v19, %v2325_v2 }
 0x135   : > { %v765_v7 = vpop.f32.mrf.mxu1  ;;  %v3781_v44 = vpop.f32.mrf.mxu0 }
 0x136   : > { %v766_v13 = vadd.f32 %v765_v7, %v4550_v16  ;;  %v4711_v34 = vadd.f32 %v3780_v20, %v774_v5  ;;  %v2624_v7 = vld [vmem:[#allocation2 + $0x1a2] sm:$0xff] }
 0x137   : > { %v3747_v22 = vpop.f32.mrf.mxu1  ;;  %v1030_v11 = vpop.f32.mrf.mxu0 }
 0x138   : > { %v777_v51 = vadd.f32 %v3747_v22, %v4554_v27  ;;  %v4714_v0 = vadd.f32 %v1027_v17, %v766_v13  ;;  %v2329_v13 = vld [vmem:[#allocation2 + $0x199] sm:$0xff] }
 0x139   : > { %v768_v36 = vpop.f32.mrf.mxu1  ;;  %v3784_v3 = vpop.f32.mrf.mxu0  ;;  %3987 = vmatmul.mubr.msk.bf16.gmra.mxu0 %vm215_vm1, %v4397_v30 }
 0x13a   : > { %v769_v55 = vadd.f32 %v768_v36, %v4558_v42  ;;  %3990 = vmatprep.mubr.msk.bf16.mxu0 %vm215_vm1, %v4399_v40  ;;  %v4721_v16 = vadd.f32 %v3781_v44, %v777_v51 }
 0x13b   : > { %v3750_v47 = vpop.f32.mrf.mxu1  ;;  %3953 = vmatmul.mubr.msk.bf16.gmra.mxu1 %vm215_vm1, %v2342_v63  ;;  %v1043_v28 = vpop.f32.mrf.mxu0 }
 0x13c   : > { %v790_v27 = vadd.f32 %v3750_v47, %v4566_v46  ;;  %3956 = vmatprep.mubr.msk.bf16.mxu1 %vm215_vm1, %v2343_v12  ;;  %v4726_v50 = vadd.f32 %v1030_v11, %v769_v55 }
 0x13d   : > { %v781_v30 = vpop.f32.mrf.mxu1  ;;  %v3785_v31 = vpop.f32.mrf.mxu0 }
 0x13e   : > { %v782_v42 = vadd.f32 %v781_v30, %v4574_v1  ;;  %v4729_v20 = vadd.f32 %v3784_v3, %v790_v27  ;;  %v2623_v1 = vld [vmem:[#allocation2 + $0x19a] sm:$0xff] }
 0x13f   : > { %v3751_v40 = vpop.f32.mrf.mxu1  ;;  %v1046_v37 = vpop.f32.mrf.mxu0 }
 0x140   : > { %v793_v17 = vadd.f32 %v3751_v40, %v4578_v18  ;;  %v4732_v5 = vadd.f32 %v1043_v28, %v782_v42 }
 0x141   : > { %v784_v46 = vpop.f32.mrf.mxu1  ;;  %v3788_v35 = vpop.f32.mrf.mxu0  ;;  %3991 = vmatmul.mubr.msk.bf16.gmra.mxu0 %vm215_vm1, %v4413_v61  ;;  %v2330_v61 = vld [vmem:[#allocation2 + $0x1a1] sm:$0xff] }
 0x142   : > { %v785_v58 = vadd.f32 %v784_v46, %v4582_v32  ;;  %3994 = vmatprep.mubr.msk.bf16.mxu0 %vm215_vm1, %v4605_v38  ;;  %v4739_v44 = vadd.f32 %v3785_v31, %v793_v17  ;;  %v2640_v38 = vpack.c.bf16 %v2624_v7, %v2623_v1  ;;  %v2346_v3 = vpack.c.bf16 %v2330_v61, %v2329_v13 }
 0x143   : > { %v3754_v41 = vpop.f32.mrf.mxu1  ;;  %3957 = vmatmul.mubr.msk.bf16.gmra.mxu1 %vm215_vm1, %v2344_v25  ;;  %v1059_v18 = vpop.f32.mrf.mxu0 }
 0x144   : > { %v806_v45 = vadd.f32 %v3754_v41, %v4589_v8  ;;  %3960 = vmatprep.mubr.msk.bf16.mxu1 %vm215_vm1, %v4493_v57  ;;  %v4745_v22 = vadd.f32 %v1046_v37, %v785_v58 }
 0x145   : > { %v797_v32 = vpop.f32.mrf.mxu1  ;;  %v3789_v11 = vpop.f32.mrf.mxu0 }
 0x146   : > { %v798_v63 = vadd.f32 %v797_v32, %v4597_v21  ;;  %v4748_v51 = vadd.f32 %v3788_v35, %v806_v45 }
 0x147   : > { %v3755_v12 = vpop.f32.mrf.mxu1  ;;  %v1062_v36 = vpop.f32.mrf.mxu0 }
 0x148   : > { %v809_v55 = vadd.f32 %v3755_v12, %v4601_v29  ;;  %v4751_v8 = vadd.f32 %v1059_v18, %v798_v63 }
 0x149   : > { %v800_v47 = vpop.f32.mrf.mxu1  ;;  %v3792_v57 = vpop.f32.mrf.mxu0  ;;  %3995 = vmatmul.mubr.msk.bf16.gmra.mxu0 %vm215_vm1, %v2640_v38 }
 0x14a   : > { %v801_v28 = vadd.f32 %v800_v47, %v4607_v49  ;;  %v4755_v27 = vadd.f32 %v3789_v11, %v809_v55 }
 0x14b   : > { %v3758_v2 = vpop.f32.mrf.mxu1  ;;  %3961 = vmatmul.mubr.msk.bf16.gmra.mxu1 %vm215_vm1, %v2346_v3  ;;  %v1075_v21 = vpop.f32.mrf.mxu0 }
 0x14c   : > { %v822_v19 = vadd.f32 %v3758_v2, %v4614_v33  ;;  %v4759_v30 = vadd.f32 %v1062_v36, %v801_v28 }
 0x14d   : > { %v813_v31 = vpop.f32.mrf.mxu1  ;;  %v3793_v29 = vpop.f32.mrf.mxu0 }
 0x14e   : > { %v814_v42 = vadd.f32 %v813_v31, %v4621_v4  ;;  %v4762_v40 = vadd.f32 %v3792_v57, %v822_v19 }
 0x14f   : > { %v3759_v37 = vpop.f32.mrf.mxu1  ;;  %v1078_v25 = vpop.f32.mrf.mxu0 }
 0x150   : > { %v825_v49 = vadd.f32 %v3759_v37, %v4625_v39  ;;  %v4765_v17 = vadd.f32 %v1075_v21, %v814_v42 }
 0x151   : > { %v816_v46 = vpop.f32.mrf.mxu1  ;;  %v3832_v35 = vpop.f32.mrf.mxu0 }
 0x152   : > { %v817_v58 = vadd.f32 %v816_v46, %v4629_v52  ;;  %v4768_v1 = vadd.f32 %v3793_v29, %v825_v49 }
 0x153   : > { %v3798_v33 = vpop.f32.mrf.mxu1  ;;  %v1551_v7 = vpop.f32.mrf.mxu0 }
 0x154   : > { %v1386_v41 = vadd.f32 %v3798_v33, %v4639_v59  ;;  %v4771_v18 = vadd.f32 %v1078_v25, %v817_v58 }
 0x155   : > { %v1257_v4 = vpop.f32.mrf.mxu1  ;;  %v3833_v45 = vpop.f32.mrf.mxu0 }
 0x156   : > { %v1384_v13 = vadd.f32 %v1257_v4, %v4642_v43  ;;  %v4774_v61 = vadd.f32 %v3832_v35, %v1386_v41 }
 0x157   : > { %v3799_v39 = vpop.f32.mrf.mxu1  ;;  %v1554_v32 = vpop.f32.mrf.mxu0 }
 0x158   : > { %v1387_v11 = vadd.f32 %v3799_v39, %v4649_v14  ;;  %v4777_v38 = vadd.f32 %v1551_v7, %v1384_v13 }
 0x159   : > { %v1260_v52 = vpop.f32.mrf.mxu1  ;;  %v3836_v63 = vpop.f32.mrf.mxu0 }
 0x15a   : > { %v1385_v12 = vadd.f32 %v1260_v52, %v4654_v15  ;;  %v4780_v36 = vadd.f32 %v3833_v45, %v1387_v11 }
 0x15b   : > { %v3802_v59 = vpop.f32.mrf.mxu1  ;;  %v1567_v3 = vpop.f32.mrf.mxu0 }
 0x15c   : > { %v1390_v55 = vadd.f32 %v3802_v59, %v4657_v24  ;;  %v4783_v47 = vadd.f32 %v1554_v32, %v1385_v12 }
 0x15d   : > { %v1273_v43 = vpop.f32.mrf.mxu1  ;;  %v3837_v57 = vpop.f32.mrf.mxu0 }
 0x15e   : > { %v1388_v28 = vadd.f32 %v1273_v43, %v4660_v6  ;;  %v4786_v2 = vadd.f32 %v3836_v63, %v1390_v55 }
 0x15f   : > { %v3803_v14 = vpop.f32.mrf.mxu1  ;;  %v1570_v21 = vpop.f32.mrf.mxu0 }
 0x160   : > { %v1391_v19 = vadd.f32 %v3803_v14, %v4667_v54  ;;  %v4789_v31 = vadd.f32 %v1567_v3, %v1388_v28 }
 0x161   : > { %v1276_v15 = vpop.f32.mrf.mxu1  ;;  %v3840_v29 = vpop.f32.mrf.mxu0 }
 0x162   : > { %v1389_v42 = vadd.f32 %v1276_v15, %v4672_v23  ;;  %v4792_v37 = vadd.f32 %v3837_v57, %v1391_v19 }
 0x163   : > { %v3806_v24 = vpop.f32.mrf.mxu1  ;;  %v1583_v25 = vpop.f32.mrf.mxu0 }
 0x164   : > { %v1394_v49 = vadd.f32 %v3806_v24, %v4675_v10  ;;  %v4795_v46 = vadd.f32 %v1570_v21, %v1389_v42 }
 0x165   : > { %v1289_v6 = vpop.f32.mrf.mxu1  ;;  %v3841_v35 = vpop.f32.mrf.mxu0 }
 0x166   : > { %v1392_v58 = vadd.f32 %v1289_v6, %v4678_v26  ;;  %v4798_v33 = vadd.f32 %v3840_v29, %v1394_v49 }
 0x167   : > { %v3807_v54 = vpop.f32.mrf.mxu1  ;;  %v1586_v7 = vpop.f32.mrf.mxu0 }
 0x168   : > { %v1395_v41 = vadd.f32 %v3807_v54, %v4685_v9  ;;  %v4801_v4 = vadd.f32 %v1583_v25, %v1392_v58 }
 0x169   : > { %v1292_v23 = vpop.f32.mrf.mxu1  ;;  %v3844_v45 = vpop.f32.mrf.mxu0 }
 0x16a   : > { %v1393_v13 = vadd.f32 %v1292_v23, %v4690_v48  ;;  %v4804_v39 = vadd.f32 %v3841_v35, %v1395_v41 }
 0x16b   : > { %v3810_v10 = vpop.f32.mrf.mxu1  ;;  %v1599_v32 = vpop.f32.mrf.mxu0 }
 0x16c   : > { %v1398_v11 = vadd.f32 %v3810_v10, %v4693_v60  ;;  %v4807_v52 = vadd.f32 %v1586_v7, %v1393_v13 }
 0x16d   : > { %v1305_v26 = vpop.f32.mrf.mxu1  ;;  %v3845_v63 = vpop.f32.mrf.mxu0 }
 0x16e   : > { %v1396_v12 = vadd.f32 %v1305_v26, %v4696_v56  ;;  %v4810_v59 = vadd.f32 %v3844_v45, %v1398_v11 }
 0x16f   : > { %v3811_v9 = vpop.f32.mrf.mxu1  ;;  %v1602_v3 = vpop.f32.mrf.mxu0 }
 0x170   : > { %v1399_v55 = vadd.f32 %v3811_v9, %v4703_v53  ;;  %v4813_v43 = vadd.f32 %v1599_v32, %v1396_v12 }
 0x171   : > { %v1308_v48 = vpop.f32.mrf.mxu1  ;;  %v3848_v57 = vpop.f32.mrf.mxu0 }
 0x172   : > { %v1397_v28 = vadd.f32 %v1308_v48, %v4708_v62  ;;  %v4816_v14 = vadd.f32 %v3845_v63, %v1399_v55 }
 0x173   : > { %v3814_v60 = vpop.f32.mrf.mxu1  ;;  %v1615_v21 = vpop.f32.mrf.mxu0 }
 0x174   : > { %v1402_v19 = vadd.f32 %v3814_v60, %v4711_v34  ;;  %v4819_v15 = vadd.f32 %v1602_v3, %v1397_v28 }
 0x175   : > { %v1321_v56 = vpop.f32.mrf.mxu1  ;;  %v3849_v29 = vpop.f32.mrf.mxu0 }
 0x176   : > { %v1400_v42 = vadd.f32 %v1321_v56, %v4714_v0  ;;  %v4822_v24 = vadd.f32 %v3848_v57, %v1402_v19 }
 0x177   : > { %v3815_v53 = vpop.f32.mrf.mxu1  ;;  %v1618_v25 = vpop.f32.mrf.mxu0 }
 0x178   : > { %v1403_v49 = vadd.f32 %v3815_v53, %v4721_v16  ;;  %v4825_v6 = vadd.f32 %v1615_v21, %v1400_v42 }
 0x179   : > { %v1324_v62 = vpop.f32.mrf.mxu1  ;;  %v3852_v35 = vpop.f32.mrf.mxu0 }
 0x17a   : > { %v1401_v58 = vadd.f32 %v1324_v62, %v4726_v50  ;;  %v4828_v54 = vadd.f32 %v3849_v29, %v1403_v49 }
 0x17b   : > { %v3818_v34 = vpop.f32.mrf.mxu1  ;;  %v1631_v7 = vpop.f32.mrf.mxu0 }
 0x17c   : > { %v1406_v41 = vadd.f32 %v3818_v34, %v4729_v20  ;;  %v4831_v23 = vadd.f32 %v1618_v25, %v1401_v58 }
 0x17d   : > { %v1337_v0 = vpop.f32.mrf.mxu1  ;;  %v3853_v45 = vpop.f32.mrf.mxu0 }
 0x17e   : > { %5267 = vst [vmem:[#allocation3_spill] sm:$0xff] %v4831_v23  ;;  %v1404_v13 = vadd.f32 %v1337_v0, %v4732_v5  ;;  %v4834_v10 = vadd.f32 %v3852_v35, %v1406_v41 }
 0x17f   : > { %v3819_v16 = vpop.f32.mrf.mxu1  ;;  %v1634_v32 = vpop.f32.mrf.mxu0 }
 0x180   : > { %5268 = vst [vmem:[#allocation4_spill] sm:$0xff] %v4834_v10  ;;  %v1407_v11 = vadd.f32 %v3819_v16, %v4739_v44  ;;  %v4837_v26 = vadd.f32 %v1631_v7, %v1404_v13 }
 0x181   : > { %v1340_v50 = vpop.f32.mrf.mxu1  ;;  %v3856_v63 = vpop.f32.mrf.mxu0 }
 0x182   : > { %5269 = vst [vmem:[#allocation5_spill] sm:$0xff] %v4837_v26  ;;  %v1405_v12 = vadd.f32 %v1340_v50, %v4745_v22  ;;  %v4840_v9 = vadd.f32 %v3853_v45, %v1407_v11 }
 0x183   : > { %v3822_v20 = vpop.f32.mrf.mxu1  ;;  %v1647_v3 = vpop.f32.mrf.mxu0 }
 0x184   : > { %5270 = vst [vmem:[#allocation6_spill] sm:$0xff] %v4840_v9  ;;  %v1410_v55 = vadd.f32 %v3822_v20, %v4748_v51  ;;  %v4843_v48 = vadd.f32 %v1634_v32, %v1405_v12 }
 0x185   : > { %v1353_v5 = vpop.f32.mrf.mxu1  ;;  %v3857_v57 = vpop.f32.mrf.mxu0 }
 0x186   : > { %5271 = vst [vmem:[#allocation7_spill] sm:$0xff] %v4843_v48  ;;  %v1408_v28 = vadd.f32 %v1353_v5, %v4751_v8  ;;  %v4846_v60 = vadd.f32 %v3856_v63, %v1410_v55 }
 0x187   : > { %v3823_v44 = vpop.f32.mrf.mxu1  ;;  %v1650_v21 = vpop.f32.mrf.mxu0 }
 0x188   : > { %5272 = vst [vmem:[#allocation8_spill] sm:$0xff] %v4846_v60  ;;  %v1411_v19 = vadd.f32 %v3823_v44, %v4755_v27  ;;  %v4849_v56 = vadd.f32 %v1647_v3, %v1408_v28 }
 0x189   : > { %v1356_v22 = vpop.f32.mrf.mxu1  ;;  %v3860_v29 = vpop.f32.mrf.mxu0 }
 0x18a   : > { %5273 = vst [vmem:[#allocation9_spill] sm:$0xff] %v4849_v56  ;;  %v1409_v42 = vadd.f32 %v1356_v22, %v4759_v30  ;;  %v4852_v53 = vadd.f32 %v3857_v57, %v1411_v19 }
 0x18b   : > { %v3826_v51 = vpop.f32.mrf.mxu1  ;;  %v1663_v25 = vpop.f32.mrf.mxu0 }
 0x18c   : > { %5274 = vst [vmem:[#allocation10_spill] sm:$0xff] %v4852_v53  ;;  %v1414_v49 = vadd.f32 %v3826_v51, %v4762_v40  ;;  %v4855_v62 = vadd.f32 %v1650_v21, %v1409_v42 }
 0x18d   : > { %v1369_v8 = vpop.f32.mrf.mxu1  ;;  %v3861_v35 = vpop.f32.mrf.mxu0 }
 0x18e   : > { %5275 = vst [vmem:[#allocation11_spill] sm:$0xff] %v4855_v62  ;;  %v1412_v58 = vadd.f32 %v1369_v8, %v4765_v17  ;;  %v4858_v34 = vadd.f32 %v3860_v29, %v1414_v49 }
 0x18f   : > { %v3827_v27 = vpop.f32.mrf.mxu1  ;;  %v1666_v7 = vpop.f32.mrf.mxu0 }
 0x190   : > { %5276 = vst [vmem:[#allocation12_spill] sm:$0xff] %v4858_v34  ;;  %v1415_v41 = vadd.f32 %v3827_v27, %v4768_v1  ;;  %v4861_v0 = vadd.f32 %v1663_v25, %v1412_v58 }
 0x191   : > { %v1372_v30 = vpop.f32.mrf.mxu1  ;;  %v4863_v45 = vpop.f32.mrf.mxu0 }
 0x192   : > { %5277 = vst [vmem:[#allocation13_spill] sm:$0xff] %v4861_v0  ;;  %v1413_v13 = vadd.f32 %v1372_v30, %v4771_v18  ;;  %v4866_v40 = vadd.f32 %v3861_v35, %v1415_v41 }
 0x193   : > { %v3866_v16 = vpop.f32.mrf.mxu1  ;;  %v4868_v32 = vpop.f32.mrf.mxu0 }
 0x194   : > { %5278 = vst [vmem:[#allocation14_spill] sm:$0xff] %v4866_v40  ;;  %v4870_v11 = vadd.f32 %v1666_v7, %v1413_v13 }
 0x195   : > { %v1845_v17 = vpop.f32.mrf.mxu1  ;;  %v4872_v50 = vpop.f32.mrf.mxu0 }
 0x196   : > { %5279 = vst [vmem:[#allocation15_spill] sm:$0xff] %v4870_v11 }
 0x197   : > { %v3867_v63 = vpop.f32.mrf.mxu1  ;;  %v4874_v12 = vpop.f32.mrf.mxu0 }
 0x199   : > { %v1848_v1 = vpop.f32.mrf.mxu1  ;;  %v4876_v20 = vpop.f32.mrf.mxu0 }
 0x19b   : > { %v3870_v3 = vpop.f32.mrf.mxu1  ;;  %v4878_v55 = vpop.f32.mrf.mxu0 }
 0x19d   : > { %v1861_v18 = vpop.f32.mrf.mxu1  ;;  %v4880_v5 = vpop.f32.mrf.mxu0 }
 0x19f   : > { %v3871_v57 = vpop.f32.mrf.mxu1  ;;  %v4882_v28 = vpop.f32.mrf.mxu0 }
 0x1a1   : > { %v1864_v44 = vpop.f32.mrf.mxu1  ;;  %v4884_v21 = vpop.f32.mrf.mxu0 }
 0x1a3   : > { %v3874_v19 = vpop.f32.mrf.mxu1  ;;  %v4886_v22 = vpop.f32.mrf.mxu0 }
 0x1a5   : > { %v1877_v29 = vpop.f32.mrf.mxu1  ;;  %v4888_v42 = vpop.f32.mrf.mxu0 }
 0x1a7   : > { %v3875_v51 = vpop.f32.mrf.mxu1  ;;  %v4890_v25 = vpop.f32.mrf.mxu0 }
 0x1a9   : > { %v1880_v49 = vpop.f32.mrf.mxu1  ;;  %v4892_v8 = vpop.f32.mrf.mxu0 }
 0x1ab   : > { %v3878_v35 = vpop.f32.mrf.mxu1  ;;  %v4894_v58 = vpop.f32.mrf.mxu0 }
 0x1ad   : > { %v1893_v27 = vpop.f32.mrf.mxu1  ;;  %v4896_v7 = vpop.f32.mrf.mxu0 }
 0x1af   : > { %v3879_v41 = vpop.f32.mrf.mxu1  ;;  %v4898_v30 = vpop.f32.mrf.mxu0 }
 0x1b0   : > { %5280 = vst [vmem:[#allocation16_spill] sm:$0xff] %v4898_v30 }
 0x1b1   : > { %v1896_v13 = vpop.f32.mrf.mxu1  ;;  %v4900_v11 = vpop.f32.mrf.mxu0 }
 0x1b2   : > { %5281 = vst [vmem:[#allocation17_spill] sm:$0xff] %v4900_v11 }
 0x1b3   : > { %v3882_v40 = vpop.f32.mrf.mxu1  ;;  %v4902_v0 = vpop.f32.mrf.mxu0 }
 0x1b4   : > { %5282 = vst [vmem:[#allocation18_spill] sm:$0xff] %v4902_v0 }
 0x1b5   : > { %v1909_v34 = vpop.f32.mrf.mxu1  ;;  %v4904_v62 = vpop.f32.mrf.mxu0 }
 0x1b6   : > { %5283 = vst [vmem:[#allocation19_spill] sm:$0xff] %v4904_v62 }
 0x1b7   : > { %v3883_v53 = vpop.f32.mrf.mxu1  ;;  %v4906_v56 = vpop.f32.mrf.mxu0 }
 0x1b8   : > { %5284 = vst [vmem:[#allocation20_spill] sm:$0xff] %v4906_v56 }
 0x1b9   : > { %v4908_v60 = vpop.f32.mrf.mxu1  ;;  %v4910_v48 = vpop.f32.mrf.mxu0 }
 0x1ba   : > { %5285 = vst [vmem:[#allocation21_spill] sm:$0xff] %v4908_v60  ;;  %5286 = vst [vmem:[#allocation22_spill] sm:$0xff] %v4910_v48 }
 0x1bb   : > { %v4912_v9 = vpop.f32.mrf.mxu1  ;;  %v4914_v26 = vpop.f32.mrf.mxu0 }
 0x1bc   : > { %5287 = vst [vmem:[#allocation23_spill] sm:$0xff] %v4912_v9  ;;  %5288 = vst [vmem:[#allocation24_spill] sm:$0xff] %v4914_v26 }
 0x1bd   : > { %v4916_v10 = vpop.f32.mrf.mxu1  ;;  %v4918_v11 = vpop.f32.mrf.mxu0 }
 0x1be   : > { %5289 = vst [vmem:[#allocation25_spill] sm:$0xff] %v4916_v10  ;;  %5290 = vst [vmem:[#allocation26_spill] sm:$0xff] %v4918_v11  ;;  %v1974_v11 = vadd.f32 %v3866_v16, %v4774_v61  ;;  %v1979_v61 = vadd.f32 %v3871_v57, %v4792_v37  ;;  %v5301_v57 = vld [vmem:[#allocation16_spill] sm:$0xff] }
 0x1bf   : > { %v4920_v23 = vpop.f32.mrf.mxu1  ;;  %v4922_v0 = vpop.f32.mrf.mxu0 }
 0x1c0   : > { %5291 = vst [vmem:[#allocation27_spill] sm:$0xff] %v4920_v23  ;;  %5292 = vst [vmem:[#allocation28_spill] sm:$0xff] %v4922_v0 }
 0x1c1   : > { %v4924_v62 = vpop.f32.mrf.mxu1  ;;  %v4926_v30 = vpop.f32.mrf.mxu0 }
 0x1c2   : > { %5293 = vst [vmem:[#allocation29_spill] sm:$0xff] %v4924_v62  ;;  %5294 = vst [vmem:[#allocation30_spill] sm:$0xff] %v4926_v30  ;;  %v1972_v30 = vadd.f32 %v1845_v17, %v4777_v38  ;;  %v2269_v38 = vadd.f32 %v4863_v45, %v1974_v11  ;;  %v1982_v17 = vadd.f32 %v3874_v19, %v4798_v33  ;;  %v5306_v19 = vld [vmem:[#allocation5_spill] sm:$0xff] }
 0x1c3   : > { %v4928_v56 = vpop.f32.mrf.mxu1  ;;  %v4930_v60 = vpop.f32.mrf.mxu0  ;;  %v1987_v33 = vadd.f32 %v3879_v41, %v4816_v14 }
 0x1c4   : > { %5295 = vst [vmem:[#allocation31_spill] sm:$0xff] %v4928_v56  ;;  %5296 = vst [vmem:[#allocation32_spill] sm:$0xff] %v4930_v60  ;;  %v1975_v56 = vadd.f32 %v3867_v63, %v4780_v36  ;;  %v1977_v36 = vadd.f32 %v1864_v44, %v4795_v46  ;;  %v1980_v63 = vadd.f32 %v1877_v29, %v4801_v4  ;;  %v5305_v44 = vld [vmem:[#allocation23_spill] sm:$0xff] }
 0x1c5   : > { %v4932_v48 = vpop.f32.mrf.mxu1  ;;  %v4934_v9 = vpop.f32.mrf.mxu0  ;;  %v1984_v46 = vadd.f32 %v1893_v27, %v4813_v43  ;;  %v1985_v4 = vadd.f32 %v1896_v13, %v4819_v15  ;;  %v4990_v14 = vadd.f32 %v4884_v21, %v1982_v17  ;;  %v5311_v27 = vld [vmem:[#allocation7_spill] sm:$0xff]  ;;  %v5315_v17 = vld [vmem:[#allocation9_spill] sm:$0xff] }
 0x1c6   : > { %5297 = vst [vmem:[#allocation33_spill] sm:$0xff] %v4934_v9  ;;  %v1973_v9 = vadd.f32 %v1848_v1, %v4783_v47  ;;  %v1983_v47 = vadd.f32 %v3875_v51, %v4804_v39  ;;  %v2270_v45 = vadd.f32 %v4872_v50, %v1975_v56  ;;  %v4984_v56 = vadd.f32 %v4880_v5, %v1979_v61  ;;  %v5313_v61 = vld [vmem:[#allocation8_spill] sm:$0xff] }
 0x1c7   : > { %v4936_v26 = vpop.f32.mrf.mxu1  ;;  %v4938_v10 = vpop.f32.mrf.mxu0  ;;  %v4987_v43 = vadd.f32 %v4882_v28, %v1977_v36  ;;  %v4993_v15 = vadd.f32 %v4886_v22, %v1980_v63  ;;  %v5011_v5 = vadd.f32 %v4896_v7, %v1987_v33  ;;  %v5304_v28 = vld [vmem:[#allocation4_spill] sm:$0xff]  ;;  %v5307_v22 = vld [vmem:[#allocation25_spill] sm:$0xff]  ;;  %v1996_v63 = vadd.f32 %v4932_v48, %v5315_v17  ;;  %v5317_v33 = vld [vmem:[#allocation19_spill] sm:$0xff] }
 0x1c8   : > { %5298 = vst [vmem:[#allocation34_spill] sm:$0xff] %v4936_v26  ;;  %5299 = vst [vmem:[#allocation35_spill] sm:$0xff] %v4938_v10  ;;  %v1978_v26 = vadd.f32 %v3870_v3, %v4786_v2  ;;  %v1976_v10 = vadd.f32 %v1861_v18, %v4789_v31  ;;  %v1981_v2 = vadd.f32 %v1880_v49, %v4807_v52 }
 0x1c9   : > { %v4941_v23 = vpop.f32.mrf.mxu1  ;;  %v4943_v0 = vpop.f32.mrf.mxu0  ;;  %v1986_v31 = vadd.f32 %v3878_v35, %v4810_v59  ;;  %v2267_v3 = vadd.f32 %v4868_v32, %v1972_v30  ;;  %v2268_v39 = vadd.f32 %v4874_v12, %v1973_v9  ;;  %v1990_v52 = vadd.f32 %v3882_v40, %v4822_v24  ;;  %v5310_v35 = vld [vmem:[#allocation27_spill] sm:$0xff]  ;;  %v5312_v7 = vld [vmem:[#allocation29_spill] sm:$0xff]  ;;  %v5328_v17 = vld [vmem:[#allocation30_spill] sm:$0xff] }
 0x1ca   : > { %5300 = vst [vmem:[#allocation36_spill] sm:$0xff] %v4941_v23  ;;  %v2273_v18 = vadd.f32 %v4876_v20, %v1978_v26  ;;  %v4981_v32 = vadd.f32 %v4878_v55, %v1976_v10  ;;  %v4996_v24 = vadd.f32 %v4888_v42, %v1983_v47  ;;  %v1988_v26 = vadd.f32 %v1909_v34, %v4825_v6 }
 0x1cb   : > { %v4947_v62 = vpop.f32.mrf.mxu1  ;;  %v4949_v60 = vpop.f32.mrf.mxu0  ;;  %v1991_v10 = vadd.f32 %v3883_v53, %v4828_v54  ;;  %v5001_v50 = vadd.f32 %v4890_v25, %v1981_v2  ;;  %v5004_v12 = vadd.f32 %v4892_v8, %v1986_v31  ;;  %v5008_v55 = vadd.f32 %v4894_v58, %v1984_v46  ;;  %v5302_v54 = vld [vmem:[#allocation3_spill] sm:$0xff]  ;;  %v5303_v53 = vld [vmem:[#allocation21_spill] sm:$0xff]  ;;  %v5309_v8 = vld [vmem:[#allocation6_spill] sm:$0xff] }
 0x1cc   : > { %v5014_v6 = vadd.f32 %v5301_v57, %v1985_v4  ;;  %v1989_v34 = vadd.f32 %v5303_v53, %v5302_v54  ;;  %v1994_v21 = vadd.f32 %v5305_v44, %v5304_v28  ;;  %v1992_v29 = vadd.f32 %v5307_v22, %v5306_v19  ;;  %v5308_v25 = vld [vmem:[#allocation17_spill] sm:$0xff]  ;;  %v5316_v31 = vld [vmem:[#allocation18_spill] sm:$0xff]  ;;  %v5322_v53 = vld [vmem:[#allocation12_spill] sm:$0xff] }
 0x1cd   : > { %v4955_v16 = vpop.f32.mrf.mxu1  ;;  %v4957_v23 = vpop.f32.mrf.mxu0  ;;  %v5023_v49 = vadd.f32 %v5308_v25, %v1990_v52  ;;  %v1995_v58 = vadd.f32 %v5310_v35, %v5309_v8  ;;  %v1993_v41 = vadd.f32 %v5312_v7, %v5311_v27  ;;  %v5039_v46 = vadd.f32 %v5316_v31, %v1988_v26  ;;  %v5323_v26 = vld [vmem:[#allocation20_spill] sm:$0xff] }
 0x1ce   : > { %v5042_v4 = vadd.f32 %v5317_v33, %v1991_v10  ;;  %v2002_v28 = vadd.f32 %v4947_v62, %v5322_v53  ;;  %v5324_v10 = vld [vmem:[#allocation22_spill] sm:$0xff]  ;;  %v5325_v35 = vld [vmem:[#allocation24_spill] sm:$0xff] }
 0x1cf   : > { %v4966_v1 = vpop.f32.mrf.mxu1  ;;  %v4968_v37 = vpop.f32.mrf.mxu0  ;;  %v5319_v52 = vld [vmem:[#allocation34_spill] sm:$0xff]  ;;  %v5054_v25 = vadd.f32 %v5324_v10, %v1994_v21  ;;  %v5059_v27 = vadd.f32 %v5325_v35, %v1992_v29  ;;  %v5327_v62 = vld [vmem:[#allocation28_spill] sm:$0xff] }
 0x1d0   : > { %v5329_v21 = vld [vmem:[#allocation32_spill] sm:$0xff]  ;;  %v5333_v53 = vld [vmem:[#allocation14_spill] sm:$0xff] }
 0x1d1   : > { %v4977_v59 = vpop.f32.mrf.mxu1  ;;  %v3968_v11 = vpop.f32.mrf.mxu0  ;;  %v5071_v31 = vadd.f32 %v5329_v21, %v1996_v63 }
 0x1d3   : > { %v3934_v9 = vpop.f32.mrf.mxu1  ;;  %v2728_v40 = vpop.f32.mrf.mxu0 }
 0x1d4   : > { %v2563_v20 = vadd.f32 %v3934_v9, %v2269_v38  ;;  %v5314_v38 = vld [vmem:[#allocation31_spill] sm:$0xff] }
 0x1d5   : > { %v2434_v42 = vpop.f32.mrf.mxu1  ;;  %v3969_v51 = vpop.f32.mrf.mxu0  ;;  %v1998_v36 = vadd.f32 %v5314_v38, %v5313_v61  ;;  %v5320_v9 = vld [vmem:[#allocation11_spill] sm:$0xff] }
 0x1d6   : > { %v2857_v30 = vadd.f32 %v3968_v11, %v2563_v20  ;;  %v2561_v13 = vadd.f32 %v2434_v42, %v2267_v3  ;;  %v5318_v3 = vld [vmem:[#allocation10_spill] sm:$0xff]  ;;  %v5321_v20 = vld [vmem:[#allocation36_spill] sm:$0xff]  ;;  %v5051_v42 = vadd.f32 %v5323_v26, %v1989_v34 }
 0x1d7   : > { %v3935_v47 = vpop.f32.mrf.mxu1  ;;  %v2731_v2 = vpop.f32.mrf.mxu0  ;;  %v1999_v11 = vadd.f32 %v5319_v52, %v5318_v3  ;;  %v1997_v48 = vadd.f32 %v5321_v20, %v5320_v9 }
 0x1d8   : > { %v3509_v57 = vpack.c.bf16 %v2857_v30, %v2857_v30  ;;  %v2855_v54 = vadd.f32 %v2728_v40, %v2561_v13  ;;  %v2564_v44 = vadd.f32 %v3935_v47, %v2270_v45  ;;  %v5326_v40 = vld [vmem:[#allocation26_spill] sm:$0xff]  ;;  %v5065_v45 = vadd.f32 %v5327_v62, %v1993_v41  ;;  %v5331_v41 = vld [vmem:[#allocation35_spill] sm:$0xff] }
 0x1d9   : > { %v2437_v19 = vpop.f32.mrf.mxu1  ;;  %v3972_v22 = vpop.f32.mrf.mxu0  ;;  %v5062_v7 = vadd.f32 %v5326_v40, %v1995_v58  ;;  %v5068_v47 = vadd.f32 %v5328_v17, %v1998_v36  ;;  %v5330_v58 = vld [vmem:[#allocation33_spill] sm:$0xff]  ;;  %v5079_v52 = vadd.f32 %v5331_v41, %v1997_v48 }
 0x1da   : > { %3018 = vst.msk [vmem:[%s5036_s14 + $0x8] sm:$0xf] %vm3015_vm3, %v3509_v57  ;;  %v3507_v8 = vpack.c.bf16 %v2855_v54, %v2855_v54  ;;  %v2858_v13 = vadd.f32 %v3969_v51, %v2564_v44  ;;  %v2562_v61 = vadd.f32 %v2437_v19, %v2268_v39  ;;  %v3118_v29 = vmul.f32 %v2855_v54, %v2855_v54  ;;  %v5332_v39 = vld [vmem:[#allocation13_spill] sm:$0xff] }
 0x1db   : > { %v3938_v38 = vpop.f32.mrf.mxu1  ;;  %v2744_v34 = vpop.f32.mrf.mxu0  ;;  %v5076_v3 = vadd.f32 %v5330_v58, %v1999_v11  ;;  %v5083_v51 = vadd.f32 %v4955_v16, %v5332_v39  ;;  %v5086_v57 = vadd.f32 %v4943_v0, %v2002_v28  ;;  %v3120_v11 = vmul.f32 %v2857_v30, %v2857_v30 }
 0x1dc   : > { %3016 = vst.msk [vmem:[%s5036_s14] sm:$0xf] %vm3015_vm3, %v3507_v8  ;;  %v2567_v33 = vadd.f32 %v3938_v38, %v2273_v18  ;;  %v3510_v36 = vpack.c.bf16 %v2858_v13, %v2858_v13  ;;  %v2856_v9 = vadd.f32 %v2731_v2, %v2562_v61  ;;  %v5090_v18 = vadd.f32 %v4966_v1, %v5333_v53 }
 0x1dd   : > { %v2450_v20 = vpop.f32.mrf.mxu1  ;;  %v3973_v63 = vpop.f32.mrf.mxu0  ;;  %v3049_v19 = vsel %vm3048_vm4, %v2855_v54, 0.0  ;;  %v3052_v28 = vsel %vm3048_vm4, %v2857_v30, 0.0  ;;  %v3150_v1 = vsel %vm3048_vm4, %v3118_v29, 0.0  ;;  %v3153_v38 = vsel %vm3048_vm4, %v3120_v11, 0.0 }
 0x1de   : > { %v2861_v44 = vadd.f32 %v3972_v22, %v2567_v33  ;;  %v2565_v48 = vadd.f32 %v2450_v20, %v4981_v32  ;;  %3019 = vst.msk [vmem:[%s5036_s14 + $0xc] sm:$0xf] %vm3015_vm3, %v3510_v36  ;;  %v3508_v16 = vpack.c.bf16 %v2856_v9, %v2856_v9  ;;  %v3050_v2 = vsel %vm3048_vm4, %v2856_v9, 0.0 }
 0x1df   : > { %v3119_v26 = vmul.f32 %v2856_v9, %v2856_v9  ;;  %v3939_v10 = vpop.f32.mrf.mxu1  ;;  %v2747_v0 = vpop.f32.mrf.mxu0  ;;  %v3051_v8 = vadd.f32 %v3050_v2, %v3049_v19  ;;  %v3121_v22 = vmul.f32 %v2858_v13, %v2858_v13  ;;  %v3054_v29 = vsel %vm3048_vm4, %v2858_v13, 0.0 }
 0x1e0   : > { %v3513_v35 = vpack.c.bf16 %v2861_v44, %v2861_v44  ;;  %3017 = vst.msk [vmem:[%s5036_s14 + $0x4] sm:$0xf] %vm3015_vm3, %v3508_v16  ;;  %v2859_v54 = vadd.f32 %v2744_v34, %v2565_v48  ;;  %v2568_v40 = vadd.f32 %v3939_v10, %v4984_v56  ;;  %v3124_v11 = vmul.f32 %v2861_v44, %v2861_v44 }
 0x1e1   : > { %v3151_v32 = vsel %vm3048_vm4, %v3119_v26, 0.0  ;;  %v2453_v62 = vpop.f32.mrf.mxu1  ;;  %v3976_v61 = vpop.f32.mrf.mxu0  ;;  %v3053_v17 = vadd.f32 %v3052_v28, %v3051_v8  ;;  %v3155_v53 = vsel %vm3048_vm4, %v3121_v22, 0.0 }
 0x1e2   : > { %v3152_v21 = vadd.f32 %v3151_v32, %v3150_v1  ;;  %3022 = vst.msk [vmem:[%s5036_s14 + $0x18] sm:$0xf] %vm3015_vm3, %v3513_v35  ;;  %v2566_v30 = vadd.f32 %v2453_v62, %v4987_v43  ;;  %v3511_v33 = vpack.c.bf16 %v2859_v54, %v2859_v54  ;;  %v3122_v58 = vmul.f32 %v2859_v54, %v2859_v54 }
 0x1e3   : > { %v2862_v41 = vadd.f32 %v3973_v63, %v2568_v40  ;;  %v3942_v39 = vpop.f32.mrf.mxu1  ;;  %v2760_v34 = vpop.f32.mrf.mxu0  ;;  %v3055_v56 = vadd.f32 %v3054_v29, %v3053_v17  ;;  %v3056_v43 = vsel %vm3048_vm4, %v2859_v54, 0.0  ;;  %v5123_v54 = vadd.f32 %v4949_v60, %v5083_v51 }
 0x1e4   : > { %v3154_v36 = vadd.f32 %v3153_v38, %v3152_v21  ;;  %v2860_v9 = vadd.f32 %v2747_v0, %v2566_v30  ;;  %v2571_v20 = vadd.f32 %v3942_v39, %v4990_v14  ;;  %3020 = vst.msk [vmem:[%s5036_s14 + $0x10] sm:$0xf] %vm3015_vm3, %v3511_v33  ;;  %v3157_v10 = vsel %vm3048_vm4, %v3122_v58, 0.0  ;;  %v5334_v58 = vld [vmem:[#allocation15_spill] sm:$0xff] }
 0x1e5   : > { %v3514_v13 = vpack.c.bf16 %v2862_v41, %v2862_v41  ;;  %v2466_v48 = vpop.f32.mrf.mxu1  ;;  %v3977_v19 = vpop.f32.mrf.mxu0  ;;  %v3057_v63 = vadd.f32 %v3056_v43, %v3055_v56  ;;  %v3060_v40 = vsel %vm3048_vm4, %v2861_v44, 0.0  ;;  %v3125_v62 = vmul.f32 %v2862_v41, %v2862_v41 }
 0x1e6   : > { %v3156_v16 = vadd.f32 %v3155_v53, %v3154_v36  ;;  %v3512_v2 = vpack.c.bf16 %v2860_v9, %v2860_v9  ;;  %v3058_v26 = vsel %vm3048_vm4, %v2860_v9, 0.0  ;;  %v3123_v14 = vmul.f32 %v2860_v9, %v2860_v9 }
 0x1e7   : > { %3023 = vst.msk [vmem:[%s5036_s14 + $0x1c] sm:$0xf] %vm3015_vm3, %v3514_v13  ;;  %v2865_v0 = vadd.f32 %v3976_v61, %v2571_v20  ;;  %v2569_v28 = vadd.f32 %v2466_v48, %v4993_v15  ;;  %v3943_v1 = vpop.f32.mrf.mxu1  ;;  %v2763_v8 = vpop.f32.mrf.mxu0  ;;  %v3059_v22 = vadd.f32 %v3058_v26, %v3057_v63  ;;  %v2001_v39 = vadd.f32 %v4977_v59, %v5334_v58 }
 0x1e8   : > { %v3158_v35 = vadd.f32 %v3157_v10, %v3156_v16  ;;  %3021 = vst.msk [vmem:[%s5036_s14 + $0x14] sm:$0xf] %vm3015_vm3, %v3512_v2  ;;  %v2572_v32 = vadd.f32 %v3943_v1, %v4996_v24  ;;  %v3159_v61 = vsel %vm3048_vm4, %v3123_v14, 0.0  ;;  %v3161_v24 = vsel %vm3048_vm4, %v3124_v11, 0.0 }
 0x1e9   : > { %v3517_v38 = vpack.c.bf16 %v2865_v0, %v2865_v0  ;;  %v2469_v15 = vpop.f32.mrf.mxu1  ;;  %v3980_v17 = vpop.f32.mrf.mxu0  ;;  %v3061_v21 = vadd.f32 %v3060_v40, %v3059_v22  ;;  %v2863_v29 = vadd.f32 %v2760_v34, %v2569_v28  ;;  %v3062_v60 = vsel %vm3048_vm4, %v2862_v41, 0.0 }
 0x1ea   : > { %v3160_v30 = vadd.f32 %v3159_v61, %v3158_v35  ;;  %v2866_v33 = vadd.f32 %v3977_v19, %v2572_v32  ;;  %v2570_v51 = vadd.f32 %v2469_v15, %v5001_v50  ;;  %v5136_v34 = vadd.f32 %v4957_v23, %v5090_v18 }
 0x1eb   : > { %3026 = vst.msk [vmem:[%s5036_s14 + $0x28] sm:$0xf] %vm3015_vm3, %v3517_v38  ;;  %v3946_v44 = vpop.f32.mrf.mxu1  ;;  %v2776_v36 = vpop.f32.mrf.mxu0  ;;  %v3515_v9 = vpack.c.bf16 %v2863_v29, %v2863_v29  ;;  %v3063_v20 = vadd.f32 %v3062_v60, %v3061_v21  ;;  %v3163_v59 = vsel %vm3048_vm4, %v3125_v62, 0.0  ;;  %v3064_v53 = vsel %vm3048_vm4, %v2863_v29, 0.0 }
 0x1ec   : > { %v3162_v56 = vadd.f32 %v3161_v24, %v3160_v30  ;;  %v3126_v11 = vmul.f32 %v2863_v29, %v2863_v29  ;;  %v3518_v41 = vpack.c.bf16 %v2866_v33, %v2866_v33  ;;  %v2864_v19 = vadd.f32 %v2763_v8, %v2570_v51 }
 0x1ed   : > { %v2482_v43 = vpop.f32.mrf.mxu1  ;;  %v3981_v13 = vpop.f32.mrf.mxu0  ;;  %3024 = vst.msk [vmem:[%s5036_s14 + $0x20] sm:$0xf] %vm3015_vm3, %v3515_v9  ;;  %v3065_v50 = vadd.f32 %v3064_v53, %v3063_v20  ;;  %v2575_v63 = vadd.f32 %v3946_v44, %v5004_v12  ;;  %v3128_v16 = vmul.f32 %v2865_v0, %v2865_v0  ;;  %v3129_v23 = vmul.f32 %v2866_v33, %v2866_v33 }
 0x1ee   : > { %v3164_v48 = vadd.f32 %v3163_v59, %v3162_v56  ;;  %v3165_v2 = vsel %vm3048_vm4, %v3126_v11, 0.0  ;;  %3027 = vst.msk [vmem:[%s5036_s14 + $0x2c] sm:$0xf] %vm3015_vm3, %v3518_v41  ;;  %v2573_v18 = vadd.f32 %v2482_v43, %v5008_v55  ;;  %v3516_v28 = vpack.c.bf16 %v2864_v19, %v2864_v19 }
 0x1ef   : > { %v3947_v26 = vpop.f32.mrf.mxu1  ;;  %v2779_v10 = vpop.f32.mrf.mxu0  ;;  %v3066_v1 = vsel %vm3048_vm4, %v2864_v19, 0.0  ;;  %v3127_v35 = vmul.f32 %v2864_v19, %v2864_v19  ;;  %v2869_v8 = vadd.f32 %v3980_v17, %v2575_v63  ;;  %v3068_v61 = vsel %vm3048_vm4, %v2865_v0, 0.0 }
 0x1f0   : > { %v3166_v14 = vadd.f32 %v3165_v2, %v3164_v48  ;;  %v3067_v22 = vadd.f32 %v3066_v1, %v3065_v50  ;;  %v2867_v32 = vadd.f32 %v2776_v36, %v2573_v18  ;;  %v2576_v12 = vadd.f32 %v3947_v26, %v5011_v5  ;;  %3025 = vst.msk [vmem:[%s5036_s14 + $0x24] sm:$0xf] %vm3015_vm3, %v3516_v28 }
 0x1f1   : > { %v2485_v40 = vpop.f32.mrf.mxu1  ;;  %v3984_v62 = vpop.f32.mrf.mxu0  ;;  %v3167_v55 = vsel %vm3048_vm4, %v3127_v35, 0.0  ;;  %v5155_v15 = vadd.f32 %v4968_v37, %v2001_v39  ;;  %v3169_v21 = vsel %vm3048_vm4, %v3128_v16, 0.0  ;;  %v3521_v5 = vpack.c.bf16 %v2869_v8, %v2869_v8 }
 0x1f2   : > { %v2574_v38 = vadd.f32 %v2485_v40, %v5014_v6  ;;  %v3069_v17 = vadd.f32 %v3068_v61, %v3067_v22  ;;  %v3168_v30 = vadd.f32 %v3167_v55, %v3166_v14  ;;  %v3070_v0 = vsel %vm3048_vm4, %v2866_v33, 0.0 }
 0x1f3   : > { %v3950_v29 = vpop.f32.mrf.mxu1  ;;  %v2792_v58 = vpop.f32.mrf.mxu0  ;;  %v3171_v24 = vsel %vm3048_vm4, %v3129_v23, 0.0  ;;  %v3519_v60 = vpack.c.bf16 %v2867_v32, %v2867_v32  ;;  %v3130_v51 = vmul.f32 %v2867_v32, %v2867_v32  ;;  %3030 = vst.msk [vmem:[%s5036_s14 + $0x38] sm:$0xf] %vm3015_vm3, %v3521_v5  ;;  %v2870_v37 = vadd.f32 %v3981_v13, %v2576_v12 }
 0x1f4   : > { %v3170_v44 = vadd.f32 %v3169_v21, %v3168_v30  ;;  %v3071_v6 = vadd.f32 %v3070_v0, %v3069_v17  ;;  %v2868_v39 = vadd.f32 %v2779_v10, %v2574_v38  ;;  %v3132_v9 = vmul.f32 %v2869_v8, %v2869_v8 }
 0x1f5   : > { %v2498_v36 = vpop.f32.mrf.mxu1  ;;  %v3985_v56 = vpop.f32.mrf.mxu0  ;;  %3028 = vst.msk [vmem:[%s5036_s14 + $0x30] sm:$0xf] %vm3015_vm3, %v3519_v60  ;;  %v3072_v20 = vsel %vm3048_vm4, %v2867_v32, 0.0  ;;  %v2579_v33 = vadd.f32 %v3950_v29, %v5023_v49  ;;  %v3173_v41 = vsel %vm3048_vm4, %v3130_v51, 0.0  ;;  %v3522_v43 = vpack.c.bf16 %v2870_v37, %v2870_v37 }
 0x1f6   : > { %v2577_v59 = vadd.f32 %v2498_v36, %v5039_v46  ;;  %v3073_v53 = vadd.f32 %v3072_v20, %v3071_v6  ;;  %v3172_v11 = vadd.f32 %v3171_v24, %v3170_v44  ;;  %v3133_v48 = vmul.f32 %v2870_v37, %v2870_v37 }
 0x1f7   : > { %v3951_v13 = vpop.f32.mrf.mxu1  ;;  %v2795_v50 = vpop.f32.mrf.mxu0  ;;  %v3520_v19 = vpack.c.bf16 %v2868_v39, %v2868_v39  ;;  %v3074_v63 = vsel %vm3048_vm4, %v2868_v39, 0.0  ;;  %v3131_v16 = vmul.f32 %v2868_v39, %v2868_v39  ;;  %3031 = vst.msk [vmem:[%s5036_s14 + $0x3c] sm:$0xf] %vm3015_vm3, %v3522_v43  ;;  %v2873_v49 = vadd.f32 %v3984_v62, %v2579_v33 }
 0x1f8   : > { %v3174_v2 = vadd.f32 %v3173_v41, %v3172_v11  ;;  %v3075_v23 = vadd.f32 %v3074_v63, %v3073_v53  ;;  %v2871_v18 = vadd.f32 %v2792_v58, %v2577_v59  ;;  %v3076_v10 = vsel %vm3048_vm4, %v2869_v8, 0.0 }
 0x1f9   : > { %v2501_v46 = vpop.f32.mrf.mxu1  ;;  %v3988_v26 = vpop.f32.mrf.mxu0  ;;  %3029 = vst.msk [vmem:[%s5036_s14 + $0x34] sm:$0xf] %vm3015_vm3, %v3520_v19  ;;  %v3175_v14 = vsel %vm3048_vm4, %v3131_v16, 0.0  ;;  %v2580_v28 = vadd.f32 %v3951_v13, %v5042_v4  ;;  %v3177_v35 = vsel %vm3048_vm4, %v3132_v9, 0.0  ;;  %v3525_v12 = vpack.c.bf16 %v2873_v49, %v2873_v49 }
 0x1fa   : > { %v2578_v1 = vadd.f32 %v2501_v46, %v5051_v42  ;;  %v3077_v22 = vadd.f32 %v3076_v10, %v3075_v23  ;;  %v3176_v32 = vadd.f32 %v3175_v14, %v3174_v2  ;;  %v3078_v61 = vsel %vm3048_vm4, %v2870_v37, 0.0 }
 0x1fb   : > { %v3954_v40 = vpop.f32.mrf.mxu1  ;;  %v2808_v62 = vpop.f32.mrf.mxu0  ;;  %v3179_v8 = vsel %vm3048_vm4, %v3133_v48, 0.0  ;;  %v3523_v55 = vpack.c.bf16 %v2871_v18, %v2871_v18  ;;  %v3134_v38 = vmul.f32 %v2871_v18, %v2871_v18  ;;  %3034 = vst.msk [vmem:[%s5036_s14 + $0x48] sm:$0xf] %vm3015_vm3, %v3525_v12  ;;  %v2874_v17 = vadd.f32 %v3985_v56, %v2580_v28 }
 0x1fc   : > { %v3178_v21 = vadd.f32 %v3177_v35, %v3176_v32  ;;  %v3079_v4 = vadd.f32 %v3078_v61, %v3077_v22  ;;  %v2872_v42 = vadd.f32 %v2795_v50, %v2578_v1  ;;  %v3136_v29 = vmul.f32 %v2873_v49, %v2873_v49 }
 0x1fd   : > { %v2514_v30 = vpop.f32.mrf.mxu1  ;;  %v3989_v5 = vpop.f32.mrf.mxu0  ;;  %3032 = vst.msk [vmem:[%s5036_s14 + $0x40] sm:$0xf] %vm3015_vm3, %v3523_v55  ;;  %v3080_v58 = vsel %vm3048_vm4, %v2871_v18, 0.0  ;;  %v2583_v0 = vadd.f32 %v3954_v40, %v5054_v25  ;;  %v3181_v44 = vsel %vm3048_vm4, %v3134_v38, 0.0  ;;  %v3526_v6 = vpack.c.bf16 %v2874_v17, %v2874_v17 }
 0x1fe   : > { %v2581_v24 = vadd.f32 %v2514_v30, %v5059_v27  ;;  %v3081_v60 = vadd.f32 %v3080_v58, %v3079_v4  ;;  %v3180_v51 = vadd.f32 %v3179_v8, %v3178_v21  ;;  %v3137_v36 = vmul.f32 %v2874_v17, %v2874_v17 }
 0x1ff   : > { %v3955_v37 = vpop.f32.mrf.mxu1  ;;  %v2811_v39 = vpop.f32.mrf.mxu0  ;;  %v3524_v56 = vpack.c.bf16 %v2872_v42, %v2872_v42  ;;  %v3082_v9 = vsel %vm3048_vm4, %v2872_v42, 0.0  ;;  %v3135_v20 = vmul.f32 %v2872_v42, %v2872_v42  ;;  %3035 = vst.msk [vmem:[%s5036_s14 + $0x4c] sm:$0xf] %vm3015_vm3, %v3526_v6  ;;  %v2877_v25 = vadd.f32 %v3988_v26, %v2583_v0 }
 0x200   : > { %v3182_v33 = vadd.f32 %v3181_v44, %v3180_v51  ;;  %v3083_v59 = vadd.f32 %v3082_v9, %v3081_v60  ;;  %v2875_v53 = vadd.f32 %v2808_v62, %v2581_v24  ;;  %v3084_v41 = vsel %vm3048_vm4, %v2873_v49, 0.0 }
 0x201   : > { %v2517_v27 = vpop.f32.mrf.mxu1  ;;  %v3992_v11 = vpop.f32.mrf.mxu0  ;;  %3033 = vst.msk [vmem:[%s5036_s14 + $0x44] sm:$0xf] %vm3015_vm3, %v3524_v56  ;;  %v3183_v43 = vsel %vm3048_vm4, %v3135_v20, 0.0  ;;  %v2584_v13 = vadd.f32 %v3955_v37, %v5062_v7  ;;  %v3185_v48 = vsel %vm3048_vm4, %v3136_v29, 0.0  ;;  %v3529_v16 = vpack.c.bf16 %v2877_v25, %v2877_v25 }
 0x202   : > { %v2582_v50 = vadd.f32 %v2517_v27, %v5065_v45  ;;  %v3085_v19 = vadd.f32 %v3084_v41, %v3083_v59  ;;  %v3184_v63 = vadd.f32 %v3183_v43, %v3182_v33  ;;  %v3086_v18 = vsel %vm3048_vm4, %v2874_v17, 0.0 }
 0x203   : > { %v3958_v2 = vpop.f32.mrf.mxu1  ;;  %v2824_v23 = vpop.f32.mrf.mxu0  ;;  %v3187_v49 = vsel %vm3048_vm4, %v3137_v36, 0.0  ;;  %v3527_v46 = vpack.c.bf16 %v2875_v53, %v2875_v53  ;;  %v3138_v26 = vmul.f32 %v2875_v53, %v2875_v53  ;;  %3038 = vst.msk [vmem:[%s5036_s14 + $0x58] sm:$0xf] %vm3015_vm3, %v3529_v16  ;;  %v2878_v14 = vadd.f32 %v3989_v5, %v2584_v13 }
 0x204   : > { %v3186_v10 = vadd.f32 %v3185_v48, %v3184_v63  ;;  %v3087_v7 = vadd.f32 %v3086_v18, %v3085_v19  ;;  %v2876_v45 = vadd.f32 %v2811_v39, %v2582_v50  ;;  %v3140_v35 = vmul.f32 %v2877_v25, %v2877_v25 }
 0x205   : > { %v2530_v28 = vpop.f32.mrf.mxu1  ;;  %v3993_v1 = vpop.f32.mrf.mxu0  ;;  %3036 = vst.msk [vmem:[%s5036_s14 + $0x50] sm:$0xf] %vm3015_vm3, %v3527_v46  ;;  %v3088_v22 = vsel %vm3048_vm4, %v2875_v53, 0.0  ;;  %v2587_v32 = vadd.f32 %v3958_v2, %v5068_v47  ;;  %v3189_v61 = vsel %vm3048_vm4, %v3138_v26, 0.0  ;;  %v3530_v8 = vpack.c.bf16 %v2878_v14, %v2878_v14 }
 0x206   : > { %v2585_v12 = vadd.f32 %v2530_v28, %v5071_v31  ;;  %v3089_v40 = vadd.f32 %v3088_v22, %v3087_v7  ;;  %v3188_v62 = vadd.f32 %v3187_v49, %v3186_v10  ;;  %v3141_v21 = vmul.f32 %v2878_v14, %v2878_v14 }
 0x207   : > { %v3959_v55 = vpop.f32.mrf.mxu1  ;;  %v2827_v38 = vpop.f32.mrf.mxu0  ;;  %v3528_v4 = vpack.c.bf16 %v2876_v45, %v2876_v45  ;;  %v3090_v17 = vsel %vm3048_vm4, %v2876_v45, 0.0  ;;  %v3139_v42 = vmul.f32 %v2876_v45, %v2876_v45  ;;  %3039 = vst.msk [vmem:[%s5036_s14 + $0x5c] sm:$0xf] %vm3015_vm3, %v3530_v8  ;;  %v2881_v47 = vadd.f32 %v3992_v11, %v2587_v32 }
 0x208   : > { %v3190_v30 = vadd.f32 %v3189_v61, %v3188_v62  ;;  %v3091_v5 = vadd.f32 %v3090_v17, %v3089_v40  ;;  %v2879_v29 = vadd.f32 %v2824_v23, %v2585_v12  ;;  %v3092_v0 = vsel %vm3048_vm4, %v2877_v25, 0.0 }
 0x209   : > { %v2533_v31 = vpop.f32.mrf.mxu1  ;;  %v3996_v58 = vpop.f32.mrf.mxu0  ;;  %3037 = vst.msk [vmem:[%s5036_s14 + $0x54] sm:$0xf] %vm3015_vm3, %v3528_v4  ;;  %v3191_v24 = vsel %vm3048_vm4, %v3139_v42, 0.0  ;;  %v2588_v60 = vadd.f32 %v3959_v55, %v5076_v3  ;;  %v3193_v44 = vsel %vm3048_vm4, %v3140_v35, 0.0  ;;  %v3533_v39 = vpack.c.bf16 %v2881_v47, %v2881_v47 }
 0x20a   : > { %v2586_v51 = vadd.f32 %v2533_v31, %v5079_v52  ;;  %v3093_v6 = vadd.f32 %v3092_v0, %v3091_v5  ;;  %v3192_v37 = vadd.f32 %v3191_v24, %v3190_v30  ;;  %v3094_v56 = vsel %vm3048_vm4, %v2878_v14, 0.0 }
 0x20b   : > { %v3962_v36 = vpop.f32.mrf.mxu1  ;;  %v3195_v9 = vsel %vm3048_vm4, %v3141_v21, 0.0  ;;  %v3531_v20 = vpack.c.bf16 %v2879_v29, %v2879_v29  ;;  %v3142_v33 = vmul.f32 %v2879_v29, %v2879_v29  ;;  %v2840_v59 = vpop.f32.mrf.mxu0  ;;  %3042 = vst.msk [vmem:[%s5036_s14 + $0x68] sm:$0xf] %vm3015_vm3, %v3533_v39  ;;  %v2882_v53 = vadd.f32 %v3993_v1, %v2588_v60 }
 0x20c   : > { %v3194_v25 = vadd.f32 %v3193_v44, %v3192_v37  ;;  %v3095_v3 = vadd.f32 %v3094_v56, %v3093_v6  ;;  %v2880_v52 = vadd.f32 %v2827_v38, %v2586_v51  ;;  %v3100_v11 = vsel %vm3048_vm4, %v2881_v47, 0.0 }
 0x20d   : > { %v2546_v27 = vpop.f32.mrf.mxu1  ;;  %3040 = vst.msk [vmem:[%s5036_s14 + $0x60] sm:$0xf] %vm3015_vm3, %v3531_v20  ;;  %v3096_v41 = vsel %vm3048_vm4, %v2879_v29, 0.0  ;;  %v2591_v43 = vadd.f32 %v3962_v36, %v5086_v57  ;;  %v3144_v50 = vmul.f32 %v2881_v47, %v2881_v47  ;;  %v3534_v63 = vpack.c.bf16 %v2882_v53, %v2882_v53  ;;  %v3997_v46 = vpop.f32.mrf.mxu0 }
 0x20e   : > { %v2589_v13 = vadd.f32 %v2546_v27, %v5123_v54  ;;  %v3097_v48 = vadd.f32 %v3096_v41, %v3095_v3  ;;  %v3196_v19 = vadd.f32 %v3195_v9, %v3194_v25  ;;  %v3197_v2 = vsel %vm3048_vm4, %v3142_v33, 0.0 }
 0x20f   : > { %v3963_v16 = vpop.f32.mrf.mxu1  ;;  %v3532_v23 = vpack.c.bf16 %v2880_v52, %v2880_v52  ;;  %v3098_v18 = vsel %vm3048_vm4, %v2880_v52, 0.0  ;;  %v3143_v49 = vmul.f32 %v2880_v52, %v2880_v52  ;;  %3043 = vst.msk [vmem:[%s5036_s14 + $0x6c] sm:$0xf] %vm3015_vm3, %v3534_v63  ;;  %v2885_v57 = vadd.f32 %v3996_v58, %v2591_v43  ;;  %v2843_v8 = vpop.f32.mrf.mxu0 }
 0x210   : > { %v3198_v26 = vadd.f32 %v3197_v2, %v3196_v19  ;;  %v3099_v10 = vadd.f32 %v3098_v18, %v3097_v48  ;;  %v2883_v7 = vadd.f32 %v2840_v59, %v2589_v13  ;;  %v3145_v14 = vmul.f32 %v2882_v53, %v2882_v53 }
 0x211   : > { %v2549_v54 = vpop.f32.mrf.mxu1  ;;  %3041 = vst.msk [vmem:[%s5036_s14 + $0x64] sm:$0xf] %vm3015_vm3, %v3532_v23  ;;  %v3199_v45 = vsel %vm3048_vm4, %v3143_v49, 0.0  ;;  %v2592_v28 = vadd.f32 %v3963_v16, %v5136_v34  ;;  %v3537_v32 = vpack.c.bf16 %v2885_v57, %v2885_v57  ;;  %v3201_v12 = vsel %vm3048_vm4, %v3144_v50, 0.0 }
 0x212   : > { %v2590_v1 = vadd.f32 %v2549_v54, %v5155_v15  ;;  %v3101_v35 = vadd.f32 %v3100_v11, %v3099_v10  ;;  %v3200_v22 = vadd.f32 %v3199_v45, %v3198_v26  ;;  %v3102_v40 = vsel %vm3048_vm4, %v2882_v53, 0.0 }
 0x213   : > { %v3535_v62 = vpack.c.bf16 %v2883_v7, %v2883_v7  ;;  %v3146_v61 = vmul.f32 %v2883_v7, %v2883_v7  ;;  %3046 = vst.msk [vmem:[%s5036_s14 + $0x78] sm:$0xf] %vm3015_vm3, %v3537_v32  ;;  %v2886_v21 = vadd.f32 %v3997_v46, %v2592_v28  ;;  %v3203_v4 = vsel %vm3048_vm4, %v3145_v14, 0.0 }
 0x214   : > { %v3202_v55 = vadd.f32 %v3201_v12, %v3200_v22  ;;  %v3103_v38 = vadd.f32 %v3102_v40, %v3101_v35  ;;  %v2884_v34 = vadd.f32 %v2843_v8, %v2590_v1  ;;  %v3104_v15 = vsel %vm3048_vm4, %v2883_v7, 0.0 }
 0x215   : > { %3044 = vst.msk [vmem:[%s5036_s14 + $0x70] sm:$0xf] %vm3015_vm3, %v3535_v62  ;;  %v3148_v17 = vmul.f32 %v2885_v57, %v2885_v57  ;;  %v3538_v5 = vpack.c.bf16 %v2886_v21, %v2886_v21  ;;  %v3205_v47 = vsel %vm3048_vm4, %v3146_v61, 0.0  ;;  %v3108_v60 = vsel %vm3048_vm4, %v2885_v57, 0.0 }
 0x216   : > { %v3105_v42 = vadd.f32 %v3104_v15, %v3103_v38  ;;  %v3204_v30 = vadd.f32 %v3203_v4, %v3202_v55  ;;  %v3536_v29 = vpack.c.bf16 %v2884_v34, %v2884_v34  ;;  %v3106_v31 = vsel %vm3048_vm4, %v2884_v34, 0.0 }
 0x217   : > { %v3147_v58 = vmul.f32 %v2884_v34, %v2884_v34  ;;  %3047 = vst.msk [vmem:[%s5036_s14 + $0x7c] sm:$0xf] %vm3015_vm3, %v3538_v5  ;;  %v3149_v51 = vmul.f32 %v2886_v21, %v2886_v21  ;;  %v3209_v39 = vsel %vm3048_vm4, %v3148_v17, 0.0  ;;  %v3110_v36 = vsel %vm3048_vm4, %v2886_v21, 0.0 }
 0x218   : > { %v3206_v0 = vadd.f32 %v3205_v47, %v3204_v30  ;;  %v3107_v24 = vadd.f32 %v3106_v31, %v3105_v42  ;;  %3045 = vst.msk [vmem:[%s5036_s14 + $0x74] sm:$0xf] %vm3015_vm3, %v3536_v29 }
 0x219   : > { %v3207_v44 = vsel %vm3048_vm4, %v3147_v58, 0.0  ;;  %v3211_v20 = vsel %vm3048_vm4, %v3149_v51, 0.0 }
 0x21a   : > { %v3109_v6 = vadd.f32 %v3108_v60, %v3107_v24  ;;  %v3208_v37 = vadd.f32 %v3207_v44, %v3206_v0 }
 0x21c   : > { %v3111_v56 = vadd.f32 %v3110_v36, %v3109_v6  ;;  %v3210_v9 = vadd.f32 %v3209_v39, %v3208_v37 }
 0x21e   : > { %v3112_v33 = vrot.slane %v3111_v56, 4  ;;  %v3212_v59 = vadd.f32 %v3211_v20, %v3210_v9 }
 0x220   : > { %v3113_v25 = vadd.f32 %v3112_v33, %v3111_v56  ;;  %v3213_v3 = vrot.slane %v3212_v59, 4 }
 0x222   : > { %v3114_v53 = vrot.slane %v3113_v25, 2  ;;  %v3214_v52 = vadd.f32 %v3213_v3, %v3212_v59 }
 0x224   : > { %v3115_v27 = vadd.f32 %v3114_v53, %v3113_v25  ;;  %v3215_v11 = vrot.slane %v3214_v52, 2 }
 0x226   : > { %v3116_v41 = vrot.slane %v3115_v27, 1  ;;  %v3216_v43 = vadd.f32 %v3215_v11, %v3214_v52 }
 0x228   : > { %v3217_v13 = vrot.slane %v3216_v43, 1  ;;  %v3117_v50 = vadd.f32 %v3116_v41, %v3115_v27 }
 0x22a   : > { %v3218_v48 = vadd.f32 %v3217_v13, %v3216_v43 }
 0x22c   : > { %v3220_v19 = vsel %vm3219_vm5, %v3117_v50, %v3218_v48 }
 0x22d   : > { %3222 = vst.msk [vmem:[%s181_s18] sm:$0x3] %vm3221_vm6, %v3220_v19 }
 0x22e PF: > { %s14_s12 = sadd.s32 1, %s4025_s12  }
 0x22f   : > { %p11_p4 = scmp.ge.s32.totalorder %s14_s12, 4  }
 0x231   :  { %13 = sbr.rel (!%p11_p4) target bundleno = 1 (0x1), region = 80 }

// kernel: down_conv_forward.4
= control target key start
LH: loop header
LB: loop body
LE: loop exit
PB: predicated region body
PF: predicated region fallthrough
CT: control target
= control target key end

     0   :  { %s4333_s18 = smov 0   ;;  %s5616_s0 = inlined_call_operand.vmem [shape: bf16[2,16,16,8], index: 0, kind: input, shape index: {}]   ;;  %s5617_s1 = inlined_call_operand.vmem [shape: bf16[3,3,8,8], index: 1, kind: input, shape index: {}]   ;;  %s5618_s2 = inlined_call_operand.vmem [shape: f32[1,1,1,8], index: 2, kind: input, shape index: {}]   ;;  %s5619_s3 = inlined_call_operand.vmem [shape: f32[1,1,1,8], index: 3, kind: input, shape index: {}]   ;;  %s5620_s4 = inlined_call_operand.vmem [shape: bf16[2,16,16,8], index: 4, kind: output, shape index: {0}]   ;;  %s5621_s5 = inlined_call_operand.vmem [shape: f32[2,2,8], index: 5, kind: output, shape index: {1}]  }
   0x1 LB: > { %s3503_s19 = sadd.s32 4294967295, %s4300_s18   ;;  %p3507_p0 = scmp.ge.s32.totalorder %s4300_s18, 1  ;;  %s4300_s18 = sphi %s4333_s18, %s16_s18  }
   0x2   : > { %p190_p1 = scmp.lt.s32.totalorder %s4300_s18, 3 }
   0x4   : > { %p191_p2 = pnand %p3507_p0, %p190_p1 }
   0x6   : > { %194 = sbr.rel (%p191_p2) target bundleno = 558 (0x22e), region = 36 }
   0xb   : > { %v3515_v0 = vld [vmem:[%s5617_s1 + $0x4] sm:$0xf]  ;;  %vm647_vm0 = vcmask 1043456   ;;  %vm411_vm1 = vcmask 64512   ;;  %vm414_vm2 = vcmask 58368   ;;  %v4302_v2 = vmov 0.0  }
   0xc   : > { %4275 = vmatprep.subr.msk.bf16.mxu0 %vm647_vm0, %v3515_v0  ;;  %4276 = vmatprep.subr.msk.bf16.mxu1 %vm647_vm0, %v3515_v0  ;;  %v649_v1 = vsel %vm647_vm0, %v3515_v0, 0  ;;  %412 = vst.msk [vmem:[#allocation2] sm:$0xff] %vm411_vm1, %v4302_v2  ;;  %413 = vst.msk [vmem:[#allocation2 + $0x8] sm:$0xff] %vm411_vm1, %v4302_v2  ;;  %p222_p3 = scmp.lt.s32.totalorder %s3503_s19, 1  ;;  %v548_v3 = vld [vmem:[%s5617_s1] sm:$0xf] }
   0xd   : > { %415 = vst.msk [vmem:[#allocation2 + $0x10] sm:$0x3] %vm414_vm2, %v4302_v2  ;;  %418 = vst.msk [vmem:[#allocation2 + $0x28] sm:$0x3] %vm414_vm2, %v4302_v2  ;;  %3968 = vmatpush3.bf16.msra.mxu0 %v649_v1  ;;  %4274 = vmatpush3.bf16.msra.mxu1 %v649_v1  ;;  %v3548_v4 = vld [vmem:[%s5617_s1 + $0x8] sm:$0xf] }
   0xe   : > { %416 = vst.msk [vmem:[#allocation2 + $0x18] sm:$0xff] %vm411_vm1, %v4302_v2  ;;  %417 = vst.msk [vmem:[#allocation2 + $0x20] sm:$0xff] %vm411_vm1, %v4302_v2  ;;  %s5693_s19 = smov (!%p222_p3, %s3503_s19), 1  ;;  %4277 = vmatprep.subr.msk.bf16.mxu1 %vm647_vm0, %v548_v3  ;;  %4278 = vmatprep.subr.msk.bf16.mxu0 %vm647_vm0, %v3548_v4  ;;  %v4426_v5 = vld [vmem:[%s5618_s2] ss:$0 sm:$0xff]  ;;  %v4432_v9 = vsel %vm647_vm0, %v548_v3, 0 }
   0xf   : > { %419 = vst.msk [vmem:[#allocation2 + $0x30] sm:$0xff] %vm411_vm1, %v4302_v2  ;;  %420 = vst.msk [vmem:[#allocation2 + $0x38] sm:$0xff] %vm411_vm1, %v4302_v2  ;;  %s3701_s26 = sshll.u32 %s5693_s19, 7  ;;  %v4435_v10 = vsel %vm647_vm0, %v3548_v4, 0  ;;  %v4441_v19 = vld [vmem:[%s5619_s3] ss:$0 sm:$0xff] }
  0x10   : > { %421 = vst.msk [vmem:[#allocation2 + $0x40] sm:$0x3] %vm414_vm2, %v4302_v2  ;;  %424 = vst.msk [vmem:[#allocation2 + $0x58] sm:$0x3] %vm414_vm2, %v4302_v2  ;;  %s4421_s29 = scalar_lea.vmem %s5616_s0, %s3701_s26  ;;  %vm3211_vm3 = vcmask 60416   ;;  %s5384_s25 = scalar_lea.vmem %s5620_s4, %s3701_s26  ;;  %vm3414_vm4 = vcmask 1040384  }
  0x11   : > { %422 = vst.msk [vmem:[#allocation2 + $0x48] sm:$0xff] %vm411_vm1, %v4302_v2  ;;  %423 = vst.msk [vmem:[#allocation2 + $0x50] sm:$0xff] %vm411_vm1, %v4302_v2  ;;  %v3736_v6 = vld [vmem:[%s4421_s29] sm:$0xff]   ;;  %v3805_v7 = vld [vmem:[%s4421_s29 + $0x38] sm:$0xff]   ;;  %s3512_s26 = sshll.u32 %s5693_s19, 1 }
  0x12   : > { %425 = vst.msk [vmem:[#allocation2 + $0x60] sm:$0xff] %vm411_vm1, %v4302_v2  ;;  %426 = vst.msk [vmem:[#allocation2 + $0x68] sm:$0xff] %vm411_vm1, %v4302_v2  ;;  %v3806_v8 = vld [vmem:[%s4421_s29 + $0x40] sm:$0xff]   ;;  %v3737_v13 = vunpack.c.l.bf16 %v3736_v6  ;;  %v3738_v14 = vunpack.c.h.bf16 %v3736_v6  ;;  %v3765_v15 = vunpack.c.l.bf16 %v3805_v7  ;;  %v3766_v16 = vunpack.c.h.bf16 %v3805_v7  ;;  %v3799_v17 = vld [vmem:[%s4421_s29 + $0x8] sm:$0xff]  }
  0x13   : > { %427 = vst.msk [vmem:[#allocation2 + $0x70] sm:$0x3] %vm414_vm2, %v4302_v2  ;;  %430 = vst.msk [vmem:[#allocation2 + $0x88] sm:$0x3] %vm414_vm2, %v4302_v2  ;;  %v549_v11 = vld [vmem:[#allocation2 + $0x1] sm:$0xff]  ;;  %v3769_v20 = vunpack.c.l.bf16 %v3806_v8  ;;  %v3770_v21 = vunpack.c.h.bf16 %v3806_v8  ;;  %v3741_v22 = vunpack.c.l.bf16 %v3799_v17  ;;  %v3742_v29 = vunpack.c.h.bf16 %v3799_v17  ;;  %v3800_v39 = vld [vmem:[%s4421_s29 + $0x10] sm:$0xff]  }
  0x14   : > { %428 = vst.msk [vmem:[#allocation2 + $0x78] sm:$0xff] %vm411_vm1, %v4302_v2  ;;  %429 = vst.msk [vmem:[#allocation2 + $0x80] sm:$0xff] %vm411_vm1, %v4302_v2  ;;  %v550_v12 = vld [vmem:[#allocation2 + $0x9] sm:$0xff]  ;;  %v308_v23 = vmul.f32 %v3737_v13, %v4426_v5  ;;  %v309_v24 = vmul.f32 %v3738_v14, %v4426_v5  ;;  %v322_v25 = vmul.f32 %v3765_v15, %v4426_v5  ;;  %v3801_v46 = vld [vmem:[%s4421_s29 + $0x18] sm:$0xff]   ;;  %v3745_v51 = vunpack.c.l.bf16 %v3800_v39 }
  0x15   : > { %431 = vst.msk [vmem:[#allocation2 + $0x90] sm:$0xff] %vm411_vm1, %v4302_v2  ;;  %432 = vst.msk [vmem:[#allocation2 + $0x98] sm:$0xff] %vm411_vm1, %v4302_v2  ;;  %v581_v18 = vpack.c.bf16 %v550_v12, %v549_v11  ;;  %v323_v26 = vmul.f32 %v3766_v16, %v4426_v5  ;;  %v324_v27 = vmul.f32 %v3769_v20, %v4426_v5  ;;  %v3807_v40 = vld [vmem:[%s4421_s29 + $0x48] sm:$0xff]   ;;  %v3808_v45 = vld [vmem:[%s4421_s29 + $0x50] sm:$0xff]   ;;  %v3746_v52 = vunpack.c.h.bf16 %v3800_v39 }
  0x16   : > { %433 = vst.msk [vmem:[#allocation2 + $0xa0] sm:$0x3] %vm414_vm2, %v4302_v2  ;;  %436 = vst.msk [vmem:[#allocation2 + $0xb8] sm:$0x3] %vm414_vm2, %v4302_v2  ;;  %v325_v28 = vmul.f32 %v3770_v21, %v4426_v5  ;;  %v310_v30 = vmul.f32 %v3741_v22, %v4426_v5  ;;  %v347_v31 = vadd.f32 %v4441_v19, %v308_v23  ;;  %v3773_v53 = vunpack.c.l.bf16 %v3807_v40  ;;  %v3802_v14 = vld [vmem:[%s4421_s29 + $0x20] sm:$0xff]   ;;  %v3809_v15 = vld [vmem:[%s4421_s29 + $0x58] sm:$0xff]  }
  0x17   : > { %434 = vst.msk [vmem:[#allocation2 + $0xa8] sm:$0xff] %vm411_vm1, %v4302_v2  ;;  %435 = vst.msk [vmem:[#allocation2 + $0xb0] sm:$0xff] %vm411_vm1, %v4302_v2  ;;  %3969 = vmatprep.mubr.msk.bf16.mxu0 %vm411_vm1, %v581_v18  ;;  %v348_v32 = vadd.f32 %v4441_v19, %v309_v24  ;;  %v361_v33 = vadd.f32 %v4441_v19, %v322_v25  ;;  %v362_v34 = vadd.f32 %v4441_v19, %v323_v26  ;;  %v3810_v21 = vld [vmem:[%s4421_s29 + $0x60] sm:$0xff]   ;;  %v4491_v22 = vld [vmem:[%s4421_s29 + $0x28] sm:$0xff]  }
  0x18   : > { %437 = vst.msk [vmem:[#allocation2 + $0xc0] sm:$0xff] %vm411_vm1, %v4302_v2  ;;  %438 = vst.msk [vmem:[#allocation2 + $0xc8] sm:$0xff] %vm411_vm1, %v4302_v2  ;;  %v363_v35 = vadd.f32 %v4441_v19, %v324_v27  ;;  %v364_v36 = vadd.f32 %v4441_v19, %v325_v28  ;;  %v311_v37 = vmul.f32 %v3742_v29, %v4426_v5  ;;  %v379_v41 = vmax.f32 %v347_v31, 0.0 }
  0x19   : > { %439 = vst.msk [vmem:[#allocation2 + $0xd0] sm:$0x3] %vm414_vm2, %v4302_v2  ;;  %442 = vst.msk [vmem:[#allocation2 + $0xe8] sm:$0x3] %vm414_vm2, %v4302_v2  ;;  %v349_v38 = vadd.f32 %v4441_v19, %v310_v30  ;;  %v380_v42 = vmax.f32 %v348_v32, 0.0  ;;  %v393_v43 = vmax.f32 %v361_v33, 0.0  ;;  %v3774_v54 = vunpack.c.h.bf16 %v3807_v40 }
  0x1a   : > { %440 = vst.msk [vmem:[#allocation2 + $0xd8] sm:$0xff] %vm411_vm1, %v4302_v2  ;;  %441 = vst.msk [vmem:[#allocation2 + $0xe0] sm:$0xff] %vm411_vm1, %v4302_v2  ;;  %v394_v44 = vmax.f32 %v362_v34, 0.0  ;;  %v395_v47 = vmax.f32 %v363_v35, 0.0  ;;  %v396_v48 = vmax.f32 %v364_v36, 0.0  ;;  %v350_v49 = vadd.f32 %v4441_v19, %v311_v37 }
  0x1b   : > { %443 = vst.msk [vmem:[#allocation2 + $0xf0] sm:$0xff] %vm411_vm1, %v4302_v2  ;;  %444 = vst.msk [vmem:[#allocation2 + $0xf8] sm:$0xff] %vm411_vm1, %v4302_v2  ;;  %v381_v50 = vmax.f32 %v349_v38, 0.0  ;;  %v3777_v56 = vunpack.c.l.bf16 %v3808_v45  ;;  %v3778_v57 = vunpack.c.h.bf16 %v3808_v45  ;;  %v3749_v58 = vunpack.c.l.bf16 %v3801_v46 }
  0x1c   : > { %445 = vst.msk [vmem:[#allocation2 + $0x100] sm:$0x3] %vm414_vm2, %v4302_v2  ;;  %448 = vst.msk [vmem:[#allocation2 + $0x118] sm:$0x3] %vm414_vm2, %v4302_v2  ;;  %v382_v55 = vmax.f32 %v350_v49, 0.0  ;;  %v312_v59 = vmul.f32 %v3745_v51, %v4426_v5  ;;  %v313_v60 = vmul.f32 %v3746_v52, %v4426_v5  ;;  %v326_v61 = vmul.f32 %v3773_v53, %v4426_v5 }
  0x1d   : > { %446 = vst.msk [vmem:[#allocation2 + $0x108] sm:$0xff] %vm411_vm1, %v4302_v2  ;;  %447 = vst.msk [vmem:[#allocation2 + $0x110] sm:$0xff] %vm411_vm1, %v4302_v2  ;;  %v327_v62 = vmul.f32 %v3774_v54, %v4426_v5  ;;  %v328_v63 = vmul.f32 %v3777_v56, %v4426_v5  ;;  %v329_v0 = vmul.f32 %v3778_v57, %v4426_v5  ;;  %v3750_v1 = vunpack.c.h.bf16 %v3801_v46  ;;  %v4523_v51 = vld [vmem:[%s5617_s1 + $0xc] sm:$0xf]  ;;  %v4528_v52 = vld [vmem:[%s5617_s1 + $0x10] sm:$0xf] }
  0x1e   : > { %449 = vst.msk [vmem:[#allocation2 + $0x120] sm:$0xff] %vm411_vm1, %v4302_v2  ;;  %450 = vst.msk [vmem:[#allocation2 + $0x128] sm:$0xff] %vm411_vm1, %v4302_v2  ;;  %v351_v3 = vadd.f32 %v4441_v19, %v312_v59  ;;  %v352_v4 = vadd.f32 %v4441_v19, %v313_v60  ;;  %v365_v6 = vadd.f32 %v4441_v19, %v326_v61  ;;  %v3753_v34 = vunpack.c.l.bf16 %v3802_v14  ;;  %v3804_v60 = vld [vmem:[%s4421_s29 + $0x30] sm:$0xff]  }
  0x1f   : > { %451 = vst.msk [vmem:[#allocation2 + $0x130] sm:$0x3] %vm414_vm2, %v4302_v2  ;;  %454 = vst.msk [vmem:[#allocation2 + $0x148] sm:$0x3] %vm414_vm2, %v4302_v2  ;;  %v366_v7 = vadd.f32 %v4441_v19, %v327_v62  ;;  %v367_v8 = vadd.f32 %v4441_v19, %v328_v63  ;;  %v368_v11 = vadd.f32 %v4441_v19, %v329_v0  ;;  %v3754_v35 = vunpack.c.h.bf16 %v3802_v14 }
  0x20   : > { %452 = vst.msk [vmem:[#allocation2 + $0x138] sm:$0xff] %vm411_vm1, %v4302_v2  ;;  %453 = vst.msk [vmem:[#allocation2 + $0x140] sm:$0xff] %vm411_vm1, %v4302_v2  ;;  %v315_v12 = vmul.f32 %v3750_v1, %v4426_v5  ;;  %v383_v16 = vmax.f32 %v351_v3, 0.0  ;;  %v384_v17 = vmax.f32 %v352_v4, 0.0  ;;  %v397_v18 = vmax.f32 %v365_v6, 0.0  ;;  %v3811_v1 = vld [vmem:[%s4421_s29 + $0x68] sm:$0xff]  }
  0x21   : > { %455 = vst.msk [vmem:[#allocation2 + $0x150] sm:$0xff] %vm411_vm1, %v4302_v2  ;;  %456 = vst.msk [vmem:[#allocation2 + $0x158] sm:$0xff] %vm411_vm1, %v4302_v2  ;;  %v398_v20 = vmax.f32 %v366_v7, 0.0  ;;  %v399_v26 = vmax.f32 %v367_v8, 0.0  ;;  %v400_v27 = vmax.f32 %v368_v11, 0.0  ;;  %v3781_v36 = vunpack.c.l.bf16 %v3809_v15 }
  0x22   : > { %457 = vst.msk [vmem:[#allocation2 + $0x160] sm:$0x3] %vm414_vm2, %v4302_v2  ;;  %460 = vst.msk [vmem:[#allocation2 + $0x178] sm:$0x3] %vm414_vm2, %v4302_v2  ;;  %v354_v28 = vadd.f32 %v4441_v19, %v315_v12  ;;  %v3785_v46 = vunpack.c.l.bf16 %v3810_v21  ;;  %v3786_v49 = vunpack.c.h.bf16 %v3810_v21 }
  0x23   : > { %458 = vst.msk [vmem:[#allocation2 + $0x168] sm:$0xff] %vm411_vm1, %v4302_v2  ;;  %459 = vst.msk [vmem:[#allocation2 + $0x170] sm:$0xff] %vm411_vm1, %v4302_v2  ;;  %v330_v45 = vmul.f32 %v3781_v36, %v4426_v5 }
  0x24   : > { %461 = vst.msk [vmem:[#allocation2 + $0x180] sm:$0xff] %vm411_vm1, %v4302_v2  ;;  %462 = vst.msk [vmem:[#allocation2 + $0x188] sm:$0xff] %vm411_vm1, %v4302_v2  ;;  %v386_v40 = vmax.f32 %v354_v28, 0.0  ;;  %v333_v57 = vmul.f32 %v3786_v49, %v4426_v5 }
  0x25   : > { %463 = vst.msk [vmem:[#allocation2 + $0x190] sm:$0x3] %vm414_vm2, %v4302_v2  ;;  %466 = vst.msk [vmem:[#allocation2 + $0x1a8] sm:$0x3] %vm414_vm2, %v4302_v2  ;;  %v369_v54 = vadd.f32 %v4441_v19, %v330_v45 }
  0x26   : > { %464 = vst.msk [vmem:[#allocation2 + $0x198] sm:$0xff] %vm411_vm1, %v4302_v2  ;;  %465 = vst.msk [vmem:[#allocation2 + $0x1a0] sm:$0xff] %vm411_vm1, %v4302_v2  ;;  %v314_v2 = vmul.f32 %v3749_v58, %v4426_v5  ;;  %v3758_v58 = vunpack.c.h.bf16 %v4491_v22  ;;  %v372_v7 = vadd.f32 %v4441_v19, %v333_v57 }
  0x27   : > { %468 = vst.msk [vmem:[#allocation2 + $0x19] sm:$0xff] %vm411_vm1, %v379_v41  ;;  %469 = vst.msk [vmem:[#allocation2 + $0x21] sm:$0xff] %vm411_vm1, %v380_v42  ;;  %v3782_v41 = vunpack.c.h.bf16 %v3809_v15  ;;  %v401_v63 = vmax.f32 %v369_v54, 0.0 }
  0x28   : > { %482 = vst.msk [vmem:[#allocation2 + $0xc1] sm:$0xff] %vm411_vm1, %v393_v43  ;;  %483 = vst.msk [vmem:[#allocation2 + $0xc9] sm:$0xff] %vm411_vm1, %v394_v44  ;;  %v353_v13 = vadd.f32 %v4441_v19, %v314_v2  ;;  %v316_v43 = vmul.f32 %v3753_v34, %v4426_v5  ;;  %v317_v44 = vmul.f32 %v3754_v35, %v4426_v5  ;;  %v3812_v2 = vld [vmem:[%s4421_s29 + $0x70] sm:$0xff]  }
  0x29   : > { %484 = vst.msk [vmem:[#allocation2 + $0xd9] sm:$0xff] %vm411_vm1, %v395_v47  ;;  %485 = vst.msk [vmem:[#allocation2 + $0xe1] sm:$0xff] %vm411_vm1, %v396_v48  ;;  %v331_v48 = vmul.f32 %v3782_v41, %v4426_v5  ;;  %v319_v8 = vmul.f32 %v3758_v58, %v4426_v5  ;;  %v3793_v34 = vunpack.c.l.bf16 %v3812_v2 }
  0x2a   : > { %470 = vst.msk [vmem:[#allocation2 + $0x31] sm:$0xff] %vm411_vm1, %v381_v50  ;;  %471 = vst.msk [vmem:[#allocation2 + $0x39] sm:$0xff] %vm411_vm1, %v382_v55  ;;  %v385_v29 = vmax.f32 %v353_v13, 0.0  ;;  %v3757_v50 = vunpack.c.l.bf16 %v4491_v22  ;;  %v356_v53 = vadd.f32 %v4441_v19, %v317_v44  ;;  %v332_v55 = vmul.f32 %v3785_v46, %v4426_v5 }
  0x2b   : > { %472 = vst.msk [vmem:[#allocation2 + $0x49] sm:$0xff] %vm411_vm1, %v383_v16  ;;  %473 = vst.msk [vmem:[#allocation2 + $0x51] sm:$0xff] %vm411_vm1, %v384_v17  ;;  %v370_v56 = vadd.f32 %v4441_v19, %v331_v48  ;;  %v3761_v17 = vunpack.c.l.bf16 %v3804_v60 }
  0x2c   : > { %486 = vst.msk [vmem:[#allocation2 + $0xf1] sm:$0xff] %vm411_vm1, %v397_v18  ;;  %487 = vst.msk [vmem:[#allocation2 + $0xf9] sm:$0xff] %vm411_vm1, %v398_v20  ;;  %v318_v59 = vmul.f32 %v3757_v50, %v4426_v5  ;;  %v388_v62 = vmax.f32 %v356_v53, 0.0  ;;  %v371_v0 = vadd.f32 %v4441_v19, %v332_v55  ;;  %v3762_v18 = vunpack.c.h.bf16 %v3804_v60 }
  0x2d   : > { %488 = vst.msk [vmem:[#allocation2 + $0x109] sm:$0xff] %vm411_vm1, %v399_v26  ;;  %489 = vst.msk [vmem:[#allocation2 + $0x111] sm:$0xff] %vm411_vm1, %v400_v27  ;;  %v402_v6 = vmax.f32 %v370_v56, 0.0  ;;  %v320_v27 = vmul.f32 %v3761_v17, %v4426_v5 }
  0x2e   : > { %v551_v23 = vld [vmem:[#allocation2 + $0x19] sm:$0xff]  ;;  %v552_v24 = vld [vmem:[#allocation2 + $0x21] sm:$0xff]  ;;  %474 = vst.msk [vmem:[#allocation2 + $0x61] sm:$0xff] %vm411_vm1, %v385_v29  ;;  %475 = vst.msk [vmem:[#allocation2 + $0x69] sm:$0xff] %vm411_vm1, %v386_v40  ;;  %v357_v11 = vadd.f32 %v4441_v19, %v318_v59  ;;  %v403_v16 = vmax.f32 %v371_v0, 0.0  ;;  %v321_v28 = vmul.f32 %v3762_v18, %v4426_v5  ;;  %v3789_v29 = vunpack.c.l.bf16 %v3811_v1 }
  0x2f   : > { %v565_v25 = vld [vmem:[#allocation2 + $0xc1] sm:$0xff]  ;;  %v4494_v30 = vpack.c.bf16 %v552_v24, %v551_v23  ;;  %v566_v31 = vld [vmem:[#allocation2 + $0xc9] sm:$0xff]  ;;  %477 = vst.msk [vmem:[#allocation2 + $0x81] sm:$0xff] %vm411_vm1, %v388_v62  ;;  %490 = vst.msk [vmem:[#allocation2 + $0x121] sm:$0xff] %vm411_vm1, %v401_v63  ;;  %v404_v23 = vmax.f32 %v372_v7, 0.0  ;;  %v358_v24 = vadd.f32 %v4441_v19, %v319_v8  ;;  %v359_v35 = vadd.f32 %v4441_v19, %v320_v27 }
  0x30   : > { %v567_v32 = vld [vmem:[#allocation2 + $0xd9] sm:$0xff]  ;;  %v568_v33 = vld [vmem:[#allocation2 + $0xe1] sm:$0xff]  ;;  %v4500_v37 = vpack.c.bf16 %v566_v31, %v565_v25  ;;  %491 = vst.msk [vmem:[#allocation2 + $0x129] sm:$0xff] %vm411_vm1, %v402_v6  ;;  %492 = vst.msk [vmem:[#allocation2 + $0x139] sm:$0xff] %vm411_vm1, %v403_v16  ;;  %v389_v26 = vmax.f32 %v357_v11, 0.0  ;;  %v360_v36 = vadd.f32 %v4441_v19, %v321_v28  ;;  %v3794_v40 = vunpack.c.h.bf16 %v3812_v2 }
  0x31   : > { %v4502_v38 = vpack.c.bf16 %v568_v33, %v567_v32  ;;  %v553_v39 = vld [vmem:[#allocation2 + $0x31] sm:$0xff]  ;;  %3970 = vmatmul.mubr.msk.bf16.vlgmr.msra.gmra.mxu0 %vm411_vm1, %v4494_v30  ;;  %v554_v42 = vld [vmem:[#allocation2 + $0x39] sm:$0xff]  ;;  %493 = vst.msk [vmem:[#allocation2 + $0x141] sm:$0xff] %vm411_vm1, %v404_v23  ;;  %v390_v32 = vmax.f32 %v358_v24, 0.0  ;;  %v3790_v33 = vunpack.c.h.bf16 %v3811_v1  ;;  %v1027_v28 = vld [vmem:[#allocation2 + $0x22] sm:$0xff] }
  0x32   : > { %3985 = vmatprep.mubr.msk.bf16.mxu1 %vm411_vm1, %v4500_v37  ;;  %4036 = vmatpush3.bf16.msra.mxu0 %v4435_v10  ;;  %v4515_v47 = vpack.c.bf16 %v554_v42, %v553_v39  ;;  %v355_v10 = vadd.f32 %v4441_v19, %v316_v43  ;;  %v556_v3 = vld [vmem:[#allocation2 + $0x51] sm:$0xff]  ;;  %478 = vst.msk [vmem:[#allocation2 + $0x91] sm:$0xff] %vm411_vm1, %v389_v26  ;;  %v391_v43 = vmax.f32 %v359_v35, 0.0  ;;  %v392_v44 = vmax.f32 %v360_v36, 0.0  ;;  %v1026_v27 = vld [vmem:[#allocation2 + $0x1a] sm:$0xff] }
  0x33   : > { %3986 = vmatmul.mubr.msk.bf16.vlgmr.msra.gmra.mxu1 %vm411_vm1, %v4502_v38  ;;  %4280 = vmatprep.subr.msk.bf16.mxu0 %vm647_vm0, %v4528_v52  ;;  %v569_v4 = vld [vmem:[#allocation2 + $0xf1] sm:$0xff]  ;;  %v570_v13 = vld [vmem:[#allocation2 + $0xf9] sm:$0xff]  ;;  %v334_v39 = vmul.f32 %v3789_v29, %v4426_v5  ;;  %479 = vst.msk [vmem:[#allocation2 + $0x99] sm:$0xff] %vm411_vm1, %v390_v32  ;;  %v335_v41 = vmul.f32 %v3790_v33, %v4426_v5 }
  0x34   : > { %4002 = vmatpush3.bf16.msra.mxu1 %v4432_v9  ;;  %3973 = vmatprep.mubr.msk.bf16.mxu0 %vm411_vm1, %v4515_v47  ;;  %v387_v61 = vmax.f32 %v355_v10, 0.0  ;;  %v555_v9 = vld [vmem:[#allocation2 + $0x49] sm:$0xff]  ;;  %v572_v15 = vld [vmem:[#allocation2 + $0x111] sm:$0xff]  ;;  %v4559_v20 = vpack.c.bf16 %v570_v13, %v569_v4  ;;  %v336_v42 = vmul.f32 %v3793_v34, %v4426_v5  ;;  %v337_v46 = vmul.f32 %v3794_v40, %v4426_v5  ;;  %v500_v13 = vld [vmem:[#allocation2] sm:$0xff] }
  0x35   : > { %4279 = vmatprep.subr.msk.bf16.mxu1 %vm647_vm0, %v4523_v51  ;;  %v4554_v12 = vpack.c.bf16 %v556_v3, %v555_v9  ;;  %v571_v14 = vld [vmem:[#allocation2 + $0x109] sm:$0xff]  ;;  %v557_v22 = vld [vmem:[#allocation2 + $0x61] sm:$0xff]  ;;  %v373_v45 = vadd.f32 %v4441_v19, %v334_v39  ;;  %v374_v10 = vadd.f32 %v4441_v19, %v335_v41  ;;  %480 = vst.msk [vmem:[#allocation2 + $0xa9] sm:$0xff] %vm411_vm1, %v391_v43  ;;  %481 = vst.msk [vmem:[#allocation2 + $0xb1] sm:$0xff] %vm411_vm1, %v392_v44 }
  0x36   : > { %476 = vst.msk [vmem:[#allocation2 + $0x79] sm:$0xff] %vm411_vm1, %v387_v61  ;;  %v4561_v21 = vpack.c.bf16 %v572_v15, %v571_v14  ;;  %v558_v25 = vld [vmem:[#allocation2 + $0x69] sm:$0xff]  ;;  %3989 = vmatprep.mubr.msk.bf16.mxu1 %vm411_vm1, %v4559_v20  ;;  %v560_v49 = vld [vmem:[#allocation2 + $0x81] sm:$0xff]  ;;  %v375_v53 = vadd.f32 %v4441_v19, %v336_v42  ;;  %v376_v57 = vadd.f32 %v4441_v19, %v337_v46  ;;  %v3813_v16 = vld [vmem:[%s4421_s29 + $0x78] sm:$0xff]   ;;  %v1711_v44 = vsel %vm647_vm0, %v4528_v52, 0  ;;  %s235_s29 = scalar_lea.vmem %s5621_s5, %s3512_s26 }
  0x37   : > { %v4572_v31 = vpack.c.bf16 %v558_v25, %v557_v22  ;;  %v573_v50 = vld [vmem:[#allocation2 + $0x121] sm:$0xff]  ;;  %v574_v55 = vld [vmem:[#allocation2 + $0x129] sm:$0xff]  ;;  %v405_v56 = vmax.f32 %v373_v45, 0.0  ;;  %v575_v59 = vld [vmem:[#allocation2 + $0x139] sm:$0xff]  ;;  %v406_v60 = vmax.f32 %v374_v10, 0.0  ;;  %v3797_v22 = vunpack.c.l.bf16 %v3813_v16 }
  0x38   : > { %v4595_v58 = vpack.c.bf16 %v574_v55, %v573_v50  ;;  %v407_v61 = vmax.f32 %v375_v53, 0.0  ;;  %v576_v62 = vld [vmem:[#allocation2 + $0x141] sm:$0xff]  ;;  %v408_v63 = vmax.f32 %v376_v57, 0.0  ;;  %v1025_v3 = vld [vmem:[#allocation2 + $0xa] sm:$0xff]  ;;  %v3798_v23 = vunpack.c.h.bf16 %v3813_v16  ;;  %v1028_v32 = vld [vmem:[#allocation2 + $0x32] sm:$0xff] }
  0x39   : > { %3974 = vmatmul.mubr.msk.bf16.gmra.mxu0 %vm411_vm1, %v4554_v12  ;;  %494 = vst.msk [vmem:[#allocation2 + $0x151] sm:$0xff] %vm411_vm1, %v405_v56  ;;  %v4602_v0 = vpack.c.bf16 %v576_v62, %v575_v59  ;;  %v561_v1 = vld [vmem:[#allocation2 + $0x91] sm:$0xff]  ;;  %495 = vst.msk [vmem:[#allocation2 + $0x159] sm:$0xff] %vm411_vm1, %v406_v60  ;;  %v1024_v9 = vld [vmem:[#allocation2 + $0x2] sm:$0xff]  ;;  %v338_v34 = vmul.f32 %v3797_v22, %v4426_v5  ;;  %v4629_v36 = vpack.c.bf16 %v1027_v28, %v1026_v27 }
  0x3a   : > { %3977 = vmatprep.mubr.msk.bf16.mxu0 %vm411_vm1, %v4572_v31  ;;  %496 = vst.msk [vmem:[#allocation2 + $0x169] sm:$0xff] %vm411_vm1, %v407_v61  ;;  %v562_v2 = vld [vmem:[#allocation2 + $0x99] sm:$0xff]  ;;  %497 = vst.msk [vmem:[#allocation2 + $0x171] sm:$0xff] %vm411_vm1, %v408_v63  ;;  %v1056_v8 = vpack.c.bf16 %v1025_v3, %v1024_v9  ;;  %v501_v14 = vld [vmem:[#allocation2 + $0x8] sm:$0xff]  ;;  %v339_v35 = vmul.f32 %v3798_v23, %v4426_v5  ;;  %v1417_v53 = vsel %vm647_vm0, %v4523_v51, 0 }
  0x3b   : > { %3990 = vmatmul.mubr.msk.bf16.gmra.mxu1 %vm411_vm1, %v4561_v21  ;;  %v4609_v4 = vpack.c.bf16 %v562_v2, %v561_v1  ;;  %v532_v26 = vpack.c.bf16 %v501_v14, %v500_v13  ;;  %v1029_v33 = vld [vmem:[#allocation2 + $0x3a] sm:$0xff]  ;;  %v377_v39 = vadd.f32 %v4441_v19, %v338_v34  ;;  %v504_v45 = vld [vmem:[#allocation2 + $0x30] sm:$0xff]  ;;  %v1032_v55 = vld [vmem:[#allocation2 + $0x62] sm:$0xff] }
  0x3c   : > { %3993 = vmatprep.mubr.msk.bf16.mxu1 %vm411_vm1, %v4595_v58  ;;  %v563_v6 = vld [vmem:[#allocation2 + $0xa9] sm:$0xff]  ;;  %v564_v7 = vld [vmem:[#allocation2 + $0xb1] sm:$0xff]  ;;  %v503_v41 = vld [vmem:[#allocation2 + $0x20] sm:$0xff]  ;;  %v4633_v42 = vpack.c.bf16 %v1029_v33, %v1028_v32  ;;  %v378_v43 = vadd.f32 %v4441_v19, %v339_v35 }
  0x3d   : > { %v559_v48 = vld [vmem:[#allocation2 + $0x79] sm:$0xff]  ;;  %v4613_v11 = vpack.c.bf16 %v564_v7, %v563_v6  ;;  %v409_v46 = vmax.f32 %v377_v39, 0.0  ;;  %v1030_v52 = vld [vmem:[#allocation2 + $0x4a] sm:$0xff]  ;;  %v4660_v57 = vld [vmem:[%s5617_s1 + $0x14] sm:$0xf] }
  0x3e   : > { %v4590_v54 = vpack.c.bf16 %v560_v49, %v559_v48  ;;  %v502_v40 = vld [vmem:[#allocation2 + $0x18] sm:$0xff]  ;;  %v410_v49 = vmax.f32 %v378_v43, 0.0  ;;  %v1033_v56 = vld [vmem:[#allocation2 + $0x6a] sm:$0xff]  ;;  %v508_v62 = vld [vmem:[#allocation2 + $0x60] sm:$0xff] }
  0x3f   : > { %v505_v5 = vld [vmem:[#allocation2 + $0x38] sm:$0xff]  ;;  %v4645_v50 = vpack.c.bf16 %v503_v41, %v502_v40  ;;  %498 = vst.msk [vmem:[#allocation2 + $0x181] sm:$0xff] %vm411_vm1, %v409_v46  ;;  %v506_v51 = vld [vmem:[#allocation2 + $0x48] sm:$0xff]  ;;  %v507_v60 = vld [vmem:[#allocation2 + $0x50] sm:$0xff]  ;;  %v4668_v61 = vpack.c.bf16 %v1033_v56, %v1032_v55 }
  0x40   : > { %v577_v15 = vld [vmem:[#allocation2 + $0x151] sm:$0xff]  ;;  %v578_v17 = vld [vmem:[#allocation2 + $0x159] sm:$0xff]  ;;  %v4650_v19 = vpack.c.bf16 %v505_v5, %v504_v45  ;;  %499 = vst.msk [vmem:[#allocation2 + $0x189] sm:$0xff] %vm411_vm1, %v410_v49  ;;  %v509_v63 = vld [vmem:[#allocation2 + $0x68] sm:$0xff]  ;;  %v4674_v1 = vpack.c.bf16 %v507_v60, %v506_v51 }
  0x41   : > { %3978 = vmatmul.mubr.msk.bf16.gmra.mxu0 %vm411_vm1, %v4590_v54  ;;  %v579_v18 = vld [vmem:[#allocation2 + $0x169] sm:$0xff]  ;;  %v4618_v24 = vpack.c.bf16 %v578_v17, %v577_v15  ;;  %v580_v25 = vld [vmem:[#allocation2 + $0x171] sm:$0xff]  ;;  %v4678_v2 = vpack.c.bf16 %v509_v63, %v508_v62  ;;  %v1034_v9 = vld [vmem:[#allocation2 + $0x7a] sm:$0xff] }
  0x42   : > { %3981 = vmatprep.mubr.msk.bf16.mxu0 %vm411_vm1, %v4609_v4  ;;  %v4621_v29 = vpack.c.bf16 %v580_v25, %v579_v18  ;;  %v4641_v48 = vld [vmem:[%s5617_s1 + $0x18] sm:$0xf]  ;;  %v1035_v3 = vld [vmem:[#allocation2 + $0x82] sm:$0xff]  ;;  %v512_v16 = vld [vmem:[#allocation2 + $0x90] sm:$0xff] }
  0x43   : > { %3994 = vmatmul.mubr.msk.bf16.gmra.mxu1 %vm411_vm1, %v4602_v0  ;;  %v1031_v10 = vld [vmem:[#allocation2 + $0x52] sm:$0xff]  ;;  %v1037_v7 = vld [vmem:[#allocation2 + $0x9a] sm:$0xff]  ;;  %v1038_v23 = vld [vmem:[#allocation2 + $0xaa] sm:$0xff] }
  0x44   : > { %3997 = vmatprep.mubr.msk.bf16.mxu1 %vm411_vm1, %v4618_v24  ;;  %v4664_v59 = vpack.c.bf16 %v1031_v10, %v1030_v52  ;;  %v1036_v6 = vld [vmem:[#allocation2 + $0x92] sm:$0xff]  ;;  %v511_v14 = vld [vmem:[#allocation2 + $0x80] sm:$0xff]  ;;  %v1041_v27 = vld [vmem:[#allocation2 + $0xca] sm:$0xff] }
  0x45   : > { %v510_v13 = vld [vmem:[#allocation2 + $0x78] sm:$0xff]  ;;  %v4686_v15 = vpack.c.bf16 %v1037_v7, %v1036_v6  ;;  %v514_v32 = vld [vmem:[#allocation2 + $0xa8] sm:$0xff]  ;;  %v515_v33 = vld [vmem:[#allocation2 + $0xb0] sm:$0xff] }
  0x46   : > { %v513_v17 = vld [vmem:[#allocation2 + $0x98] sm:$0xff]  ;;  %v4690_v18 = vpack.c.bf16 %v511_v14, %v510_v13  ;;  %v516_v35 = vld [vmem:[#allocation2 + $0xc0] sm:$0xff]  ;;  %v517_v39 = vld [vmem:[#allocation2 + $0xc8] sm:$0xff]  ;;  %v4706_v40 = vpack.c.bf16 %v515_v33, %v514_v32 }
  0x47   : > { %v4694_v22 = vpack.c.bf16 %v513_v17, %v512_v16  ;;  %v1039_v25 = vld [vmem:[#allocation2 + $0xb2] sm:$0xff]  ;;  %v4710_v41 = vpack.c.bf16 %v517_v39, %v516_v35  ;;  %v1042_v43 = vld [vmem:[#allocation2 + $0xda] sm:$0xff]  ;;  %v1046_v60 = vld [vmem:[#allocation2 + $0x10a] sm:$0xff] }
  0x48   : > { %v4698_v28 = vpack.c.bf16 %v1039_v25, %v1038_v23  ;;  %v1044_v45 = vld [vmem:[#allocation2 + $0xf2] sm:$0xff]  ;;  %v1045_v5 = vld [vmem:[#allocation2 + $0xfa] sm:$0xff]  ;;  %v1048_v63 = vld [vmem:[#allocation2 + $0x122] sm:$0xff] }
  0x49   : > { %3982 = vmatmul.mubr.msk.bf16.gmra.mxu0 %vm411_vm1, %v4613_v11  ;;  %v518_v49 = vld [vmem:[#allocation2 + $0xd8] sm:$0xff]  ;;  %v519_v52 = vld [vmem:[#allocation2 + $0xe0] sm:$0xff]  ;;  %v4718_v10 = vpack.c.bf16 %v1045_v5, %v1044_v45  ;;  %v522_v6 = vld [vmem:[#allocation2 + $0x108] sm:$0xff] }
  0x4a   : > { %4037 = vmatprep.mubr.msk.bf16.mxu0 %vm411_vm1, %v1056_v8  ;;  %v4682_v8 = vpack.c.bf16 %v1035_v3, %v1034_v9  ;;  %v521_v55 = vld [vmem:[#allocation2 + $0xf8] sm:$0xff]  ;;  %v4722_v56 = vpack.c.bf16 %v519_v52, %v518_v49  ;;  %v1049_v9 = vld [vmem:[#allocation2 + $0x12a] sm:$0xff]  ;;  %v524_v14 = vld [vmem:[#allocation2 + $0x120] sm:$0xff] }
  0x4b   : > { %3998 = vmatmul.mubr.msk.bf16.gmra.mxu1 %vm411_vm1, %v4621_v29  ;;  %v1047_v62 = vld [vmem:[#allocation2 + $0x112] sm:$0xff]  ;;  %v4734_v13 = vpack.c.bf16 %v1049_v9, %v1048_v63  ;;  %v525_v16 = vld [vmem:[#allocation2 + $0x128] sm:$0xff]  ;;  %v1050_v25 = vld [vmem:[#allocation2 + $0x13a] sm:$0xff]  ;;  %v2300_v9 = vsel %vm647_vm0, %v4641_v48, 0 }
  0x4c   : > { %4003 = vmatprep.mubr.msk.bf16.mxu1 %vm411_vm1, %v532_v26  ;;  %v1040_v26 = vld [vmem:[#allocation2 + $0xc2] sm:$0xff]  ;;  %v4730_v3 = vpack.c.bf16 %v1047_v62, %v1046_v60  ;;  %v523_v7 = vld [vmem:[#allocation2 + $0x110] sm:$0xff]  ;;  %v4742_v23 = vpack.c.bf16 %v525_v16, %v524_v14  ;;  %v1053_v32 = vld [vmem:[#allocation2 + $0x15a] sm:$0xff] }
  0x4d   : > { %v4702_v34 = vpack.c.bf16 %v1041_v27, %v1040_v26  ;;  %v4738_v17 = vpack.c.bf16 %v523_v7, %v522_v6  ;;  %v1051_v26 = vld [vmem:[#allocation2 + $0x142] sm:$0xff]  ;;  %v1052_v27 = vld [vmem:[#allocation2 + $0x152] sm:$0xff]  ;;  %v1054_v52 = vld [vmem:[#allocation2 + $0x16a] sm:$0xff] }
  0x4e   : > { %v4746_v33 = vpack.c.bf16 %v1051_v26, %v1050_v25  ;;  %v526_v35 = vld [vmem:[#allocation2 + $0x138] sm:$0xff]  ;;  %v527_v39 = vld [vmem:[#allocation2 + $0x140] sm:$0xff]  ;;  %v530_v60 = vld [vmem:[#allocation2 + $0x168] sm:$0xff] }
  0x4f   : > { %v529_v45 = vld [vmem:[#allocation2 + $0x158] sm:$0xff]  ;;  %v4754_v5 = vpack.c.bf16 %v527_v39, %v526_v35  ;;  %v531_v62 = vld [vmem:[#allocation2 + $0x170] sm:$0xff]  ;;  %v3650_v6 = vld [vmem:[%s5617_s1 + $0x20] sm:$0xf] }
  0x50   : > { %v4768_v63 = vpack.c.bf16 %v531_v62, %v530_v60  ;;  %v2232_v7 = vld [vmem:[#allocation2 + $0x1a0] sm:$0xff]  ;;  %v2495_v35 = vld [vmem:[#allocation2 + $0x31] sm:$0xff] }
  0x51   : > { %4038 = vmatmul.mubr.msk.bf16.vlgmr.msra.gmra.mxu0 %vm411_vm1, %v4629_v36  ;;  %v1936_v26 = vld [vmem:[#allocation2 + $0x182] sm:$0xff]  ;;  %v2496_v39 = vld [vmem:[#allocation2 + $0x39] sm:$0xff] }
  0x52   : > { %4104 = vmatpush3.bf16.msra.mxu0 %v1711_v44  ;;  %4041 = vmatprep.mubr.msk.bf16.mxu0 %vm411_vm1, %v4633_v42  ;;  %v1043_v44 = vld [vmem:[#allocation2 + $0xe2] sm:$0xff] }
  0x53   : > { %4282 = vmatprep.subr.msk.bf16.mxu0 %vm647_vm0, %v4641_v48  ;;  %4004 = vmatmul.mubr.msk.bf16.vlgmr.msra.gmra.mxu1 %vm411_vm1, %v4645_v50  ;;  %v4714_v46 = vpack.c.bf16 %v1043_v44, %v1042_v43  ;;  %v4750_v43 = vpack.c.bf16 %v1053_v32, %v1052_v27  ;;  %v528_v44 = vld [vmem:[#allocation2 + $0x150] sm:$0xff]  ;;  %v3633_v48 = vld [vmem:[%s5617_s1 + $0x1c] sm:$0xf] }
  0x54   : > { %4070 = vmatpush3.bf16.msra.mxu1 %v1417_v53  ;;  %4007 = vmatprep.mubr.msk.bf16.mxu1 %vm411_vm1, %v4650_v19  ;;  %v520_v53 = vld [vmem:[#allocation2 + $0xf0] sm:$0xff]  ;;  %v4758_v49 = vpack.c.bf16 %v529_v45, %v528_v44 }
  0x55   : > { %4281 = vmatprep.subr.msk.bf16.mxu1 %vm647_vm0, %v4660_v57  ;;  %v4726_v51 = vpack.c.bf16 %v521_v55, %v520_v53  ;;  %v1055_v53 = vld [vmem:[#allocation2 + $0x172] sm:$0xff]  ;;  %v1937_v27 = vld [vmem:[#allocation2 + $0x18a] sm:$0xff] }
  0x56   : > { %v4762_v55 = vpack.c.bf16 %v1055_v53, %v1054_v52  ;;  %v2527_v52 = vpack.c.bf16 %v2496_v39, %v2495_v35  ;;  %v2503_v35 = vld [vmem:[#allocation2 + $0x91] sm:$0xff]  ;;  %v2504_v39 = vld [vmem:[#allocation2 + $0x99] sm:$0xff] }
  0x59   : > { %4042 = vmatmul.mubr.msk.bf16.gmra.mxu0 %vm411_vm1, %v4664_v59 }
  0x5a   : > { %4045 = vmatprep.mubr.msk.bf16.mxu0 %vm411_vm1, %v4668_v61 }
  0x5b   : > { %4008 = vmatmul.mubr.msk.bf16.gmra.mxu1 %vm411_vm1, %v4674_v1 }
  0x5c   : > { %4011 = vmatprep.mubr.msk.bf16.mxu1 %vm411_vm1, %v4678_v2 }
  0x61   : > { %4046 = vmatmul.mubr.msk.bf16.gmra.mxu0 %vm411_vm1, %v4682_v8 }
  0x62   : > { %4049 = vmatprep.mubr.msk.bf16.mxu0 %vm411_vm1, %v4686_v15 }
  0x63   : > { %4012 = vmatmul.mubr.msk.bf16.gmra.mxu1 %vm411_vm1, %v4690_v18 }
  0x64   : > { %4015 = vmatprep.mubr.msk.bf16.mxu1 %vm411_vm1, %v4694_v22 }
  0x69   : > { %4050 = vmatmul.mubr.msk.bf16.gmra.mxu0 %vm411_vm1, %v4698_v28 }
  0x6a   : > { %4053 = vmatprep.mubr.msk.bf16.mxu0 %vm411_vm1, %v4702_v34 }
  0x6b   : > { %4016 = vmatmul.mubr.msk.bf16.gmra.mxu1 %vm411_vm1, %v4706_v40 }
  0x6c   : > { %4019 = vmatprep.mubr.msk.bf16.mxu1 %vm411_vm1, %v4710_v41 }
  0x71   : > { %4054 = vmatmul.mubr.msk.bf16.gmra.mxu0 %vm411_vm1, %v4714_v46 }
  0x72   : > { %4057 = vmatprep.mubr.msk.bf16.mxu0 %vm411_vm1, %v4718_v10 }
  0x73   : > { %4020 = vmatmul.mubr.msk.bf16.gmra.mxu1 %vm411_vm1, %v4722_v56 }
  0x74   : > { %4023 = vmatprep.mubr.msk.bf16.mxu1 %vm411_vm1, %v4726_v51 }
  0x79   : > { %4058 = vmatmul.mubr.msk.bf16.gmra.mxu0 %vm411_vm1, %v4730_v3 }
  0x7a   : > { %4061 = vmatprep.mubr.msk.bf16.mxu0 %vm411_vm1, %v4734_v13 }
  0x7b   : > { %4024 = vmatmul.mubr.msk.bf16.gmra.mxu1 %vm411_vm1, %v4738_v17 }
  0x7c   : > { %4027 = vmatprep.mubr.msk.bf16.mxu1 %vm411_vm1, %v4742_v23 }
  0x81   : > { %4062 = vmatmul.mubr.msk.bf16.gmra.mxu0 %vm411_vm1, %v4746_v33 }
  0x82   : > { %4065 = vmatprep.mubr.msk.bf16.mxu0 %vm411_vm1, %v4750_v43 }
  0x83   : > { %4028 = vmatmul.mubr.msk.bf16.gmra.mxu1 %vm411_vm1, %v4754_v5 }
  0x84   : > { %4031 = vmatprep.mubr.msk.bf16.mxu1 %vm411_vm1, %v4758_v49 }
  0x89   : > { %4066 = vmatmul.mubr.msk.bf16.gmra.mxu0 %vm411_vm1, %v4762_v55 }
  0x8a   : > { %4105 = vmatprep.mubr.msk.bf16.mxu0 %vm411_vm1, %v4494_v30  ;;  %v2005_v30 = vsel %vm647_vm0, %v4660_v57, 0 }
  0x8b   : > { %4032 = vmatmul.mubr.msk.bf16.gmra.mxu1 %vm411_vm1, %v4768_v63 }
  0x8c   : > { %4071 = vmatprep.mubr.msk.bf16.mxu1 %vm411_vm1, %v4645_v50 }
  0x91   : > { %4106 = vmatmul.mubr.msk.bf16.vlgmr.msra.gmra.mxu0 %vm411_vm1, %v4515_v47 }
  0x92   : > { %4172 = vmatpush3.bf16.msra.mxu0 %v2300_v9  ;;  %4109 = vmatprep.mubr.msk.bf16.mxu0 %vm411_vm1, %v4554_v12  ;;  %v1348_v12 = vld [vmem:[#allocation2 + $0x180] sm:$0xff]  ;;  %v2498_v9 = vld [vmem:[#allocation2 + $0x51] sm:$0xff] }
  0x93   : > { %4284 = vmatprep.subr.msk.bf16.mxu0 %vm647_vm0, %v3650_v6  ;;  %4072 = vmatmul.mubr.msk.bf16.vlgmr.msra.gmra.mxu1 %vm411_vm1, %v4650_v19 }
  0x94   : > { %4138 = vmatpush3.bf16.msra.mxu1 %v2005_v30  ;;  %4075 = vmatprep.mubr.msk.bf16.mxu1 %vm411_vm1, %v4674_v1 }
  0x95   : > { %4283 = vmatprep.subr.msk.bf16.mxu1 %vm647_vm0, %v3633_v48 }
  0x99   : > { %4110 = vmatmul.mubr.msk.bf16.gmra.mxu0 %vm411_vm1, %v4572_v31  ;;  %v2888_v31 = vsel %vm647_vm0, %v3650_v6, 0 }
  0x9a   : > { %4113 = vmatprep.mubr.msk.bf16.mxu0 %vm411_vm1, %v4590_v54  ;;  %v2594_v54 = vsel %vm647_vm0, %v3633_v48, 0  ;;  %v2499_v48 = vld [vmem:[#allocation2 + $0x61] sm:$0xff] }
  0x9b   : > { %4076 = vmatmul.mubr.msk.bf16.gmra.mxu1 %vm411_vm1, %v4678_v2 }
  0x9c   : > { %4079 = vmatprep.mubr.msk.bf16.mxu1 %vm411_vm1, %v4690_v18 }
  0xa1   : > { %4114 = vmatmul.mubr.msk.bf16.gmra.mxu0 %vm411_vm1, %v4609_v4 }
  0xa2   : > { %4117 = vmatprep.mubr.msk.bf16.mxu0 %vm411_vm1, %v4613_v11 }
  0xa3   : > { %4080 = vmatmul.mubr.msk.bf16.gmra.mxu1 %vm411_vm1, %v4694_v22 }
  0xa4   : > { %4083 = vmatprep.mubr.msk.bf16.mxu1 %vm411_vm1, %v4706_v40 }
  0xa9   : > { %4118 = vmatmul.mubr.msk.bf16.gmra.mxu0 %vm411_vm1, %v4500_v37  ;;  %v1642_v37 = vld [vmem:[#allocation2 + $0x181] sm:$0xff] }
  0xaa   : > { %4121 = vmatprep.mubr.msk.bf16.mxu0 %vm411_vm1, %v4502_v38  ;;  %v1643_v38 = vld [vmem:[#allocation2 + $0x189] sm:$0xff] }
  0xab   : > { %4084 = vmatmul.mubr.msk.bf16.gmra.mxu1 %vm411_vm1, %v4710_v41  ;;  %v4842_v47 = vpack.c.bf16 %v1643_v38, %v1642_v37 }
  0xac   : > { %4087 = vmatprep.mubr.msk.bf16.mxu1 %vm411_vm1, %v4722_v56 }
  0xb1   : > { %4122 = vmatmul.mubr.msk.bf16.gmra.mxu0 %vm411_vm1, %v4559_v20  ;;  %v1349_v20 = vld [vmem:[#allocation2 + $0x188] sm:$0xff] }
  0xb2   : > { %4125 = vmatprep.mubr.msk.bf16.mxu0 %vm411_vm1, %v4561_v21  ;;  %v1365_v21 = vpack.c.bf16 %v1349_v20, %v1348_v12 }
  0xb3   : > { %4088 = vmatmul.mubr.msk.bf16.gmra.mxu1 %vm411_vm1, %v4726_v51 }
  0xb4   : > { %4091 = vmatprep.mubr.msk.bf16.mxu1 %vm411_vm1, %v4738_v17 }
  0xb9   : > { %4126 = vmatmul.mubr.msk.bf16.gmra.mxu0 %vm411_vm1, %v4595_v58 }
  0xba   : > { %4129 = vmatprep.mubr.msk.bf16.mxu0 %vm411_vm1, %v4602_v0 }
  0xbb   : > { %4092 = vmatmul.mubr.msk.bf16.gmra.mxu1 %vm411_vm1, %v4742_v23 }
  0xbc   : > { %4095 = vmatprep.mubr.msk.bf16.mxu1 %vm411_vm1, %v4754_v5 }
  0xc1   : > { %4130 = vmatmul.mubr.msk.bf16.gmra.mxu0 %vm411_vm1, %v4618_v24 }
  0xc2   : > { %4133 = vmatprep.mubr.msk.bf16.mxu0 %vm411_vm1, %v4621_v29 }
  0xc3   : > { %4096 = vmatmul.mubr.msk.bf16.gmra.mxu1 %vm411_vm1, %v4758_v49 }
  0xc4   : > { %4099 = vmatprep.mubr.msk.bf16.mxu1 %vm411_vm1, %v4768_v63 }
  0xc9   : > { %4134 = vmatmul.mubr.msk.bf16.gmra.mxu0 %vm411_vm1, %v4842_v47 }
  0xca   : > { %4173 = vmatprep.mubr.msk.bf16.mxu0 %vm411_vm1, %v4650_v19 }
  0xcb   : > { %4100 = vmatmul.mubr.msk.bf16.gmra.mxu1 %vm411_vm1, %v1365_v21 }
  0xcc   : > { %4139 = vmatprep.mubr.msk.bf16.mxu1 %vm411_vm1, %v4629_v36 }
  0xd1   : > { %4174 = vmatmul.mubr.msk.bf16.vlgmr.msra.gmra.mxu0 %vm411_vm1, %v4674_v1 }
  0xd2   : > { %4240 = vmatpush3.bf16.msra.mxu0 %v2888_v31  ;;  %4177 = vmatprep.mubr.msk.bf16.mxu0 %vm411_vm1, %v4678_v2 }
  0xd3   : > { %4140 = vmatmul.mubr.msk.bf16.vlgmr.msra.gmra.mxu1 %vm411_vm1, %v4633_v42 }
  0xd4   : > { %4206 = vmatpush3.bf16.msra.mxu1 %v2594_v54  ;;  %4143 = vmatprep.mubr.msk.bf16.mxu1 %vm411_vm1, %v4664_v59 }
  0xd9   : > { %4178 = vmatmul.mubr.msk.bf16.gmra.mxu0 %vm411_vm1, %v4690_v18 }
  0xda   : > { %4181 = vmatprep.mubr.msk.bf16.mxu0 %vm411_vm1, %v4694_v22 }
  0xdb   : > { %4144 = vmatmul.mubr.msk.bf16.gmra.mxu1 %vm411_vm1, %v4668_v61 }
  0xdc   : > { %4147 = vmatprep.mubr.msk.bf16.mxu1 %vm411_vm1, %v4682_v8 }
  0xe1   : > { %4182 = vmatmul.mubr.msk.bf16.gmra.mxu0 %vm411_vm1, %v4706_v40 }
  0xe2   : > { %4185 = vmatprep.mubr.msk.bf16.mxu0 %vm411_vm1, %v4710_v41 }
  0xe3   : > { %4148 = vmatmul.mubr.msk.bf16.gmra.mxu1 %vm411_vm1, %v4686_v15 }
  0xe4   : > { %4151 = vmatprep.mubr.msk.bf16.mxu1 %vm411_vm1, %v4698_v28 }
  0xe9   : > { %4186 = vmatmul.mubr.msk.bf16.gmra.mxu0 %vm411_vm1, %v4722_v56 }
  0xea   : > { %4189 = vmatprep.mubr.msk.bf16.mxu0 %vm411_vm1, %v4726_v51  ;;  %v2231_v51 = vld [vmem:[#allocation2 + $0x198] sm:$0xff] }
  0xeb   : > { %4152 = vmatmul.mubr.msk.bf16.gmra.mxu1 %vm411_vm1, %v4702_v34 }
  0xec   : > { %4155 = vmatprep.mubr.msk.bf16.mxu1 %vm411_vm1, %v4714_v46 }
  0xf1   : > { %v4887_v58 = vpop.f32.mrf.mxu0  ;;  %4190 = vmatmul.mubr.msk.bf16.gmra.mxu0 %vm411_vm1, %v4738_v17 }
  0xf2   : > { %4193 = vmatprep.mubr.msk.bf16.mxu0 %vm411_vm1, %v4742_v23  ;;  %v2248_v23 = vpack.c.bf16 %v2232_v7, %v2231_v51 }
  0xf3   : > { %v4893_v0 = vpop.f32.mrf.mxu1  ;;  %v4895_v4 = vpop.f32.mrf.mxu0  ;;  %4156 = vmatmul.mubr.msk.bf16.gmra.mxu1 %vm411_vm1, %v4718_v10 }
  0xf4   : > { %4159 = vmatprep.mubr.msk.bf16.mxu1 %vm411_vm1, %v4730_v3 }
  0xf5   : > { %v4899_v11 = vpop.f32.mrf.mxu1  ;;  %v4901_v24 = vpop.f32.mrf.mxu0 }
  0xf7   : > { %v4905_v29 = vpop.f32.mrf.mxu1  ;;  %v4907_v36 = vpop.f32.mrf.mxu0 }
  0xf9   : > { %v4909_v50 = vpop.f32.mrf.mxu1  ;;  %v4911_v19 = vpop.f32.mrf.mxu0  ;;  %4194 = vmatmul.mubr.msk.bf16.gmra.mxu0 %vm411_vm1, %v4754_v5  ;;  %v4959_v5 = vpack.c.bf16 %v1937_v27, %v1936_v26  ;;  %v2502_v26 = vld [vmem:[#allocation2 + $0x81] sm:$0xff] }
  0xfa   : > { %4197 = vmatprep.mubr.msk.bf16.mxu0 %vm411_vm1, %v4758_v49 }
  0xfb   : > { %v4917_v57 = vpop.f32.mrf.mxu1  ;;  %v4919_v1 = vpop.f32.mrf.mxu0  ;;  %4160 = vmatmul.mubr.msk.bf16.gmra.mxu1 %vm411_vm1, %v4734_v13 }
  0xfc   : > { %4163 = vmatprep.mubr.msk.bf16.mxu1 %vm411_vm1, %v4746_v33 }
  0xfd   : > { %v4923_v2 = vpop.f32.mrf.mxu1  ;;  %v4925_v18 = vpop.f32.mrf.mxu0 }
  0xff   : > { %v4929_v22 = vpop.f32.mrf.mxu1  ;;  %v4931_v40 = vpop.f32.mrf.mxu0 }
 0x101   : > { %v4933_v41 = vpop.f32.mrf.mxu1  ;;  %v4935_v56 = vpop.f32.mrf.mxu0  ;;  %4198 = vmatmul.mubr.msk.bf16.gmra.mxu0 %vm411_vm1, %v4768_v63  ;;  %v2497_v63 = vld [vmem:[#allocation2 + $0x49] sm:$0xff] }
 0x102   : > { %4201 = vmatprep.mubr.msk.bf16.mxu0 %vm411_vm1, %v1365_v21  ;;  %v2528_v12 = vpack.c.bf16 %v2498_v9, %v2497_v63 }
 0x103   : > { %v4940_v14 = vpop.f32.mrf.mxu0  ;;  %v4942_v16 = vpop.f32.mrf.mxu1  ;;  %4164 = vmatmul.mubr.msk.bf16.gmra.mxu1 %vm411_vm1, %v4750_v43 }
 0x104   : > { %4167 = vmatprep.mubr.msk.bf16.mxu1 %vm411_vm1, %v4762_v55 }
 0x105   : > { %v4946_v17 = vpop.f32.mrf.mxu0  ;;  %v4948_v25 = vpop.f32.mrf.mxu1 }
 0x107   : > { %v4952_v32 = vpop.f32.mrf.mxu0  ;;  %v4954_v44 = vpop.f32.mrf.mxu1 }
 0x109   : > { %v4956_v45 = vpop.f32.mrf.mxu0  ;;  %4202 = vmatmul.mubr.msk.bf16.gmra.mxu0 %vm411_vm1, %v2248_v23  ;;  %v4961_v49 = vpop.f32.mrf.mxu1  ;;  %v2501_v23 = vld [vmem:[#allocation2 + $0x79] sm:$0xff] }
 0x10a   : > { %4241 = vmatprep.mubr.msk.bf16.mxu0 %vm411_vm1, %v4633_v42  ;;  %v2500_v42 = vld [vmem:[#allocation2 + $0x69] sm:$0xff] }
 0x10b   : > { %v4965_v53 = vpop.f32.mrf.mxu0  ;;  %v4967_v60 = vpop.f32.mrf.mxu1  ;;  %4168 = vmatmul.mubr.msk.bf16.gmra.mxu1 %vm411_vm1, %v4959_v5  ;;  %v2529_v20 = vpack.c.bf16 %v2500_v42, %v2499_v48  ;;  %v2530_v48 = vpack.c.bf16 %v2502_v26, %v2501_v23  ;;  %v2531_v42 = vpack.c.bf16 %v2504_v39, %v2503_v35  ;;  %v2506_v23 = vld [vmem:[#allocation2 + $0xb1] sm:$0xff]  ;;  %v2507_v35 = vld [vmem:[#allocation2 + $0xc1] sm:$0xff]  ;;  %v2508_v39 = vld [vmem:[#allocation2 + $0xc9] sm:$0xff] }
 0x10c   : > { %4207 = vmatprep.mubr.msk.bf16.mxu1 %vm411_vm1, %v2527_v52 }
 0x10d   : > { %v4971_v62 = vpop.f32.mrf.mxu0  ;;  %v4974_v6 = vpop.f32.mrf.mxu1 }
 0x10f   : > { %v4976_v30 = vpop.f32.mrf.mxu0  ;;  %v4978_v37 = vpop.f32.mrf.mxu1 }
 0x111   : > { %v4039_v38 = vpop.f32.mrf.mxu0  ;;  %4242 = vmatmul.mubr.msk.bf16.vlgmr.msra.gmra.mxu0 %vm411_vm1, %v4664_v59  ;;  %v4984_v21 = vpop.f32.mrf.mxu1 }
 0x112   : > { %4245 = vmatprep.mubr.msk.bf16.mxu0 %vm411_vm1, %v4668_v61 }
 0x113   : > { %v1159_v31 = vpop.f32.mrf.mxu0  ;;  %v4005_v54 = vpop.f32.mrf.mxu1  ;;  %4208 = vmatmul.mubr.msk.bf16.vlgmr.msra.gmra.mxu1 %vm411_vm1, %v2528_v12 }
 0x114   : > { %v906_v7 = vadd.f32 %v4005_v54, %v4887_v58  ;;  %4211 = vmatprep.mubr.msk.bf16.mxu1 %vm411_vm1, %v2529_v20 }
 0x115   : > { %v4040_v51 = vpop.f32.mrf.mxu0  ;;  %v897_v27 = vpop.f32.mrf.mxu1 }
 0x116   : > { %v898_v61 = vadd.f32 %v897_v27, %v4895_v4  ;;  %v4990_v52 = vadd.f32 %v4039_v38, %v906_v7 }
 0x117   : > { %v1162_v59 = vpop.f32.mrf.mxu0  ;;  %v4006_v63 = vpop.f32.mrf.mxu1 }
 0x118   : > { %v909_v58 = vadd.f32 %v4006_v63, %v4901_v24  ;;  %v4997_v12 = vadd.f32 %v1159_v31, %v898_v61  ;;  %v2505_v24 = vld [vmem:[#allocation2 + $0xa9] sm:$0xff] }
 0x119   : > { %v4043_v9 = vpop.f32.mrf.mxu0  ;;  %4246 = vmatmul.mubr.msk.bf16.gmra.mxu0 %vm411_vm1, %v4682_v8  ;;  %v900_v20 = vpop.f32.mrf.mxu1 }
 0x11a   : > { %4249 = vmatprep.mubr.msk.bf16.mxu0 %vm411_vm1, %v4686_v15  ;;  %v901_v4 = vadd.f32 %v900_v20, %v4907_v36  ;;  %v5000_v38 = vadd.f32 %v4040_v51, %v909_v58 }
 0x11b   : > { %v1175_v54 = vpop.f32.mrf.mxu0  ;;  %v4009_v7 = vpop.f32.mrf.mxu1  ;;  %4212 = vmatmul.mubr.msk.bf16.gmra.mxu1 %vm411_vm1, %v2530_v48 }
 0x11c   : > { %v922_v8 = vadd.f32 %v4009_v7, %v4911_v19  ;;  %4215 = vmatprep.mubr.msk.bf16.mxu1 %vm411_vm1, %v2531_v42  ;;  %v5005_v15 = vadd.f32 %v1162_v59, %v901_v4  ;;  %v2532_v19 = vpack.c.bf16 %v2506_v23, %v2505_v24  ;;  %v2533_v59 = vpack.c.bf16 %v2508_v39, %v2507_v35  ;;  %v2511_v23 = vld [vmem:[#allocation2 + $0xf1] sm:$0xff] }
 0x11d   : > { %v4044_v27 = vpop.f32.mrf.mxu0  ;;  %v913_v31 = vpop.f32.mrf.mxu1 }
 0x11e   : > { %v914_v36 = vadd.f32 %v913_v31, %v4919_v1  ;;  %v5008_v51 = vadd.f32 %v4043_v9, %v922_v8  ;;  %v2510_v8 = vld [vmem:[#allocation2 + $0xe1] sm:$0xff]  ;;  %v2512_v31 = vld [vmem:[#allocation2 + $0xf9] sm:$0xff] }
 0x11f   : > { %v1178_v26 = vpop.f32.mrf.mxu0  ;;  %v4010_v61 = vpop.f32.mrf.mxu1 }
 0x120   : > { %v925_v48 = vadd.f32 %v4010_v61, %v4925_v18  ;;  %v5015_v58 = vadd.f32 %v1175_v54, %v914_v36  ;;  %v2509_v18 = vld [vmem:[#allocation2 + $0xd9] sm:$0xff] }
 0x121   : > { %v4047_v63 = vpop.f32.mrf.mxu0  ;;  %4250 = vmatmul.mubr.msk.bf16.gmra.mxu0 %vm411_vm1, %v4698_v28  ;;  %v916_v42 = vpop.f32.mrf.mxu1 }
 0x122   : > { %4253 = vmatprep.mubr.msk.bf16.mxu0 %vm411_vm1, %v4702_v34  ;;  %v917_v1 = vadd.f32 %v916_v42, %v4931_v40  ;;  %v5018_v9 = vadd.f32 %v4044_v27, %v925_v48 }
 0x123   : > { %v1191_v20 = vpop.f32.mrf.mxu0  ;;  %v4013_v4 = vpop.f32.mrf.mxu1  ;;  %4216 = vmatmul.mubr.msk.bf16.gmra.mxu1 %vm411_vm1, %v2532_v19 }
 0x124   : > { %v938_v28 = vadd.f32 %v4013_v4, %v4935_v56  ;;  %4219 = vmatprep.mubr.msk.bf16.mxu1 %vm411_vm1, %v2533_v59  ;;  %v5023_v34 = vadd.f32 %v1178_v26, %v917_v1  ;;  %v2534_v56 = vpack.c.bf16 %v2510_v8, %v2509_v18  ;;  %v2535_v26 = vpack.c.bf16 %v2512_v31, %v2511_v23  ;;  %v2514_v1 = vld [vmem:[#allocation2 + $0x111] sm:$0xff]  ;;  %v2516_v18 = vld [vmem:[#allocation2 + $0x129] sm:$0xff] }
 0x125   : > { %v4048_v7 = vpop.f32.mrf.mxu0  ;;  %v929_v54 = vpop.f32.mrf.mxu1 }
 0x126   : > { %v930_v40 = vadd.f32 %v929_v54, %v4940_v14  ;;  %v5026_v27 = vadd.f32 %v4047_v63, %v938_v28  ;;  %v2515_v28 = vld [vmem:[#allocation2 + $0x121] sm:$0xff] }
 0x127   : > { %v1194_v24 = vpop.f32.mrf.mxu0  ;;  %v4014_v35 = vpop.f32.mrf.mxu1 }
 0x128   : > { %v941_v36 = vadd.f32 %v4014_v35, %v4946_v17  ;;  %v5033_v61 = vadd.f32 %v1191_v20, %v930_v40  ;;  %v2513_v17 = vld [vmem:[#allocation2 + $0x109] sm:$0xff] }
 0x129   : > { %v4051_v39 = vpop.f32.mrf.mxu0  ;;  %4254 = vmatmul.mubr.msk.bf16.gmra.mxu0 %vm411_vm1, %v4714_v46  ;;  %v932_v19 = vpop.f32.mrf.mxu1 }
 0x12a   : > { %4257 = vmatprep.mubr.msk.bf16.mxu0 %vm411_vm1, %v4718_v10  ;;  %v933_v14 = vadd.f32 %v932_v19, %v4952_v32  ;;  %v5036_v63 = vadd.f32 %v4048_v7, %v941_v36 }
 0x12b   : > { %v1207_v48 = vpop.f32.mrf.mxu0  ;;  %v4017_v59 = vpop.f32.mrf.mxu1  ;;  %4220 = vmatmul.mubr.msk.bf16.gmra.mxu1 %vm411_vm1, %v2534_v56 }
 0x12c   : > { %v954_v46 = vadd.f32 %v4017_v59, %v4956_v45  ;;  %4223 = vmatprep.mubr.msk.bf16.mxu1 %vm411_vm1, %v2535_v26  ;;  %v5041_v10 = vadd.f32 %v1194_v24, %v933_v14  ;;  %v2536_v45 = vpack.c.bf16 %v2514_v1, %v2513_v17  ;;  %v2537_v24 = vpack.c.bf16 %v2516_v18, %v2515_v28  ;;  %v2518_v26 = vld [vmem:[#allocation2 + $0x141] sm:$0xff]  ;;  %v2519_v14 = vld [vmem:[#allocation2 + $0x151] sm:$0xff]  ;;  %v2520_v59 = vld [vmem:[#allocation2 + $0x159] sm:$0xff] }
 0x12d   : > { %v4052_v42 = vpop.f32.mrf.mxu0  ;;  %v945_v20 = vpop.f32.mrf.mxu1 }
 0x12e   : > { %v946_v32 = vadd.f32 %v945_v20, %v4965_v53  ;;  %v5044_v7 = vadd.f32 %v4051_v39, %v954_v46  ;;  %v2539_v20 = vpack.c.bf16 %v2520_v59, %v2519_v14 }
 0x12f   : > { %v1210_v4 = vpop.f32.mrf.mxu0  ;;  %v4018_v8 = vpop.f32.mrf.mxu1 }
 0x130   : > { %v957_v23 = vadd.f32 %v4018_v8, %v4971_v62  ;;  %v5051_v31 = vadd.f32 %v1207_v48, %v946_v32  ;;  %v2517_v62 = vld [vmem:[#allocation2 + $0x139] sm:$0xff] }
 0x131   : > { %v4055_v54 = vpop.f32.mrf.mxu0  ;;  %4258 = vmatmul.mubr.msk.bf16.gmra.mxu0 %vm411_vm1, %v4730_v3  ;;  %v948_v40 = vpop.f32.mrf.mxu1 }
 0x132   : > { %4261 = vmatprep.mubr.msk.bf16.mxu0 %vm411_vm1, %v4734_v13  ;;  %v949_v53 = vadd.f32 %v948_v40, %v4976_v30  ;;  %v5054_v39 = vadd.f32 %v4052_v42, %v957_v23 }
 0x133   : > { %v1223_v35 = vpop.f32.mrf.mxu0  ;;  %v4021_v56 = vpop.f32.mrf.mxu1  ;;  %4224 = vmatmul.mubr.msk.bf16.gmra.mxu1 %vm411_vm1, %v2536_v45  ;;  %v2522_v45 = vld [vmem:[#allocation2 + $0x171] sm:$0xff] }
 0x134   : > { %v970_v3 = vadd.f32 %v4021_v56, %v4893_v0  ;;  %4227 = vmatprep.mubr.msk.bf16.mxu1 %vm411_vm1, %v2537_v24  ;;  %v5059_v13 = vadd.f32 %v1210_v4, %v949_v53  ;;  %v2538_v0 = vpack.c.bf16 %v2518_v26, %v2517_v62 }
 0x135   : > { %v4056_v36 = vpop.f32.mrf.mxu0  ;;  %v961_v19 = vpop.f32.mrf.mxu1 }
 0x136   : > { %v962_v30 = vadd.f32 %v961_v19, %v4899_v11  ;;  %v5062_v42 = vadd.f32 %v4055_v54, %v970_v3  ;;  %v2820_v3 = vld [vmem:[#allocation2 + $0x1a2] sm:$0xff] }
 0x137   : > { %v1226_v48 = vpop.f32.mrf.mxu0  ;;  %v4022_v46 = vpop.f32.mrf.mxu1 }
 0x138   : > { %v973_v1 = vadd.f32 %v4022_v46, %v4905_v29  ;;  %v5069_v4 = vadd.f32 %v1223_v35, %v962_v30  ;;  %v2521_v29 = vld [vmem:[#allocation2 + $0x169] sm:$0xff]  ;;  %v2526_v30 = vld [vmem:[#allocation2 + $0x1a1] sm:$0xff] }
 0x139   : > { %v4059_v17 = vpop.f32.mrf.mxu0  ;;  %4262 = vmatmul.mubr.msk.bf16.gmra.mxu0 %vm411_vm1, %v4746_v33  ;;  %v964_v28 = vpop.f32.mrf.mxu1  ;;  %v2540_v56 = vpack.c.bf16 %v2522_v45, %v2521_v29 }
 0x13a   : > { %4265 = vmatprep.mubr.msk.bf16.mxu0 %vm411_vm1, %v4750_v43  ;;  %v965_v11 = vadd.f32 %v964_v28, %v4909_v50  ;;  %v5072_v32 = vadd.f32 %v4056_v36, %v973_v1  ;;  %v2819_v36 = vld [vmem:[#allocation2 + $0x19a] sm:$0xff] }
 0x13b   : > { %v1239_v18 = vpop.f32.mrf.mxu0  ;;  %v4025_v8 = vpop.f32.mrf.mxu1  ;;  %4228 = vmatmul.mubr.msk.bf16.gmra.mxu1 %vm411_vm1, %v2538_v0  ;;  %v2836_v59 = vpack.c.bf16 %v2820_v3, %v2819_v36 }
 0x13c   : > { %v986_v33 = vadd.f32 %v4025_v8, %v4917_v57  ;;  %4231 = vmatprep.mubr.msk.bf16.mxu1 %vm411_vm1, %v2539_v20  ;;  %v5077_v43 = vadd.f32 %v1226_v48, %v965_v11 }
 0x13d   : > { %v4060_v54 = vpop.f32.mrf.mxu0  ;;  %v977_v23 = vpop.f32.mrf.mxu1 }
 0x13e   : > { %v978_v40 = vadd.f32 %v977_v23, %v4923_v2  ;;  %v5080_v35 = vadd.f32 %v4059_v17, %v986_v33 }
 0x13f   : > { %v1242_v24 = vpop.f32.mrf.mxu0  ;;  %v4026_v50 = vpop.f32.mrf.mxu1 }
 0x140   : > { %v989_v57 = vadd.f32 %v4026_v50, %v4929_v22  ;;  %v5087_v62 = vadd.f32 %v1239_v18, %v978_v40 }
 0x141   : > { %v4063_v53 = vpop.f32.mrf.mxu0  ;;  %4266 = vmatmul.mubr.msk.bf16.gmra.mxu0 %vm411_vm1, %v4762_v55  ;;  %v980_v26 = vpop.f32.mrf.mxu1 }
 0x142   : > { %4269 = vmatprep.mubr.msk.bf16.mxu0 %vm411_vm1, %v4959_v5  ;;  %v981_v2 = vadd.f32 %v980_v26, %v4933_v41  ;;  %v5090_v48 = vadd.f32 %v4060_v54, %v989_v57  ;;  %v2525_v5 = vld [vmem:[#allocation2 + $0x199] sm:$0xff] }
 0x143   : > { %v1255_v19 = vpop.f32.mrf.mxu0  ;;  %v4029_v14 = vpop.f32.mrf.mxu1  ;;  %4232 = vmatmul.mubr.msk.bf16.gmra.mxu1 %vm411_vm1, %v2540_v56  ;;  %v2542_v18 = vpack.c.bf16 %v2526_v30, %v2525_v5 }
 0x144   : > { %v1002_v22 = vadd.f32 %v4029_v14, %v4942_v16  ;;  %4235 = vmatprep.mubr.msk.bf16.mxu1 %vm411_vm1, %v4842_v47  ;;  %v5096_v46 = vadd.f32 %v1242_v24, %v981_v2 }
 0x145   : > { %v4064_v55 = vpop.f32.mrf.mxu0  ;;  %v993_v17 = vpop.f32.mrf.mxu1 }
 0x146   : > { %v994_v41 = vadd.f32 %v993_v17, %v4948_v25  ;;  %v5099_v1 = vadd.f32 %v4063_v53, %v1002_v22 }
 0x147   : > { %v1258_v0 = vpop.f32.mrf.mxu0  ;;  %v4030_v20 = vpop.f32.mrf.mxu1 }
 0x148   : > { %v1005_v16 = vadd.f32 %v4030_v20, %v4954_v44  ;;  %v5103_v11 = vadd.f32 %v1255_v19, %v994_v41 }
 0x149   : > { %v4067_v28 = vpop.f32.mrf.mxu0  ;;  %4270 = vmatmul.mubr.msk.bf16.gmra.mxu0 %vm411_vm1, %v2836_v59  ;;  %v996_v47 = vpop.f32.mrf.mxu1 }
 0x14a   : > { %v997_v54 = vadd.f32 %v996_v47, %v4961_v49  ;;  %v5106_v33 = vadd.f32 %v4064_v55, %v1005_v16 }
 0x14b   : > { %v1271_v8 = vpop.f32.mrf.mxu0  ;;  %v4033_v29 = vpop.f32.mrf.mxu1  ;;  %4236 = vmatmul.mubr.msk.bf16.gmra.mxu1 %vm411_vm1, %v2542_v18 }
 0x14c   : > { %v1018_v45 = vadd.f32 %v4033_v29, %v4967_v60  ;;  %v5110_v23 = vadd.f32 %v1258_v0, %v997_v54 }
 0x14d   : > { %v4068_v25 = vpop.f32.mrf.mxu0  ;;  %v1009_v24 = vpop.f32.mrf.mxu1 }
 0x14e   : > { %v1010_v44 = vadd.f32 %v1009_v24, %v4974_v6  ;;  %v5113_v50 = vadd.f32 %v4067_v28, %v1018_v45 }
 0x14f   : > { %v1274_v40 = vpop.f32.mrf.mxu0  ;;  %v4034_v53 = vpop.f32.mrf.mxu1 }
 0x150   : > { %v1021_v49 = vadd.f32 %v4034_v53, %v4978_v37  ;;  %v5116_v57 = vadd.f32 %v1271_v8, %v1010_v44 }
 0x151   : > { %v4107_v56 = vpop.f32.mrf.mxu0  ;;  %v1012_v36 = vpop.f32.mrf.mxu1 }
 0x152   : > { %v1013_v26 = vadd.f32 %v1012_v36, %v4984_v21  ;;  %v5119_v19 = vadd.f32 %v4068_v25, %v1021_v49 }
 0x153   : > { %v1747_v3 = vpop.f32.mrf.mxu0  ;;  %v4073_v60 = vpop.f32.mrf.mxu1 }
 0x154   : > { %v1582_v14 = vadd.f32 %v4073_v60, %v4990_v52  ;;  %v5122_v55 = vadd.f32 %v1274_v40, %v1013_v26 }
 0x155   : > { %v4108_v2 = vpop.f32.mrf.mxu0  ;;  %v1453_v6 = vpop.f32.mrf.mxu1 }
 0x156   : > { %v1580_v22 = vadd.f32 %v1453_v6, %v4997_v12  ;;  %v5125_v5 = vadd.f32 %v4107_v56, %v1582_v14 }
 0x157   : > { %v1750_v59 = vpop.f32.mrf.mxu0  ;;  %v4074_v37 = vpop.f32.mrf.mxu1 }
 0x158   : > { %v1583_v17 = vadd.f32 %v4074_v37, %v5000_v38  ;;  %v5128_v0 = vadd.f32 %v1747_v3, %v1580_v22 }
 0x159   : > { %v4111_v30 = vpop.f32.mrf.mxu0  ;;  %v1456_v21 = vpop.f32.mrf.mxu1 }
 0x15a   : > { %v1581_v20 = vadd.f32 %v1456_v21, %v5005_v15  ;;  %v5131_v28 = vadd.f32 %v4108_v2, %v1583_v17 }
 0x15b   : > { %v1763_v41 = vpop.f32.mrf.mxu0  ;;  %v4077_v52 = vpop.f32.mrf.mxu1 }
 0x15c   : > { %v1586_v16 = vadd.f32 %v4077_v52, %v5008_v51  ;;  %v5134_v47 = vadd.f32 %v1750_v59, %v1581_v20 }
 0x15d   : > { %v4112_v18 = vpop.f32.mrf.mxu0  ;;  %v1469_v12 = vpop.f32.mrf.mxu1 }
 0x15e   : > { %v1584_v54 = vadd.f32 %v1469_v12, %v5015_v58  ;;  %v5137_v29 = vadd.f32 %v4111_v30, %v1586_v16 }
 0x15f   : > { %v1766_v8 = vpop.f32.mrf.mxu0  ;;  %v4078_v38 = vpop.f32.mrf.mxu1 }
 0x160   : > { %v1587_v45 = vadd.f32 %v4078_v38, %v5018_v9  ;;  %v5140_v24 = vadd.f32 %v1763_v41, %v1584_v54 }
 0x161   : > { %v4115_v25 = vpop.f32.mrf.mxu0  ;;  %v1472_v15 = vpop.f32.mrf.mxu1 }
 0x162   : > { %v1585_v44 = vadd.f32 %v1472_v15, %v5023_v34  ;;  %v5143_v53 = vadd.f32 %v4112_v18, %v1587_v45 }
 0x163   : > { %v1779_v40 = vpop.f32.mrf.mxu0  ;;  %v4081_v51 = vpop.f32.mrf.mxu1 }
 0x164   : > { %v1590_v49 = vadd.f32 %v4081_v51, %v5026_v27  ;;  %v5146_v36 = vadd.f32 %v1766_v8, %v1585_v44 }
 0x165   : > { %v4116_v56 = vpop.f32.mrf.mxu0  ;;  %v1485_v58 = vpop.f32.mrf.mxu1 }
 0x166   : > { %v1588_v26 = vadd.f32 %v1485_v58, %v5033_v61  ;;  %v5149_v60 = vadd.f32 %v4115_v25, %v1590_v49 }
 0x167   : > { %v1782_v3 = vpop.f32.mrf.mxu0  ;;  %v4082_v9 = vpop.f32.mrf.mxu1 }
 0x168   : > { %v1591_v14 = vadd.f32 %v4082_v9, %v5036_v63  ;;  %v5152_v6 = vadd.f32 %v1779_v40, %v1588_v26 }
 0x169   : > { %v4119_v2 = vpop.f32.mrf.mxu0  ;;  %v1488_v34 = vpop.f32.mrf.mxu1 }
 0x16a   : > { %v1589_v22 = vadd.f32 %v1488_v34, %v5041_v10  ;;  %v5155_v37 = vadd.f32 %v4116_v56, %v1591_v14 }
 0x16b   : > { %v1795_v59 = vpop.f32.mrf.mxu0  ;;  %v4085_v27 = vpop.f32.mrf.mxu1 }
 0x16c   : > { %v1594_v17 = vadd.f32 %v4085_v27, %v5044_v7  ;;  %v5158_v21 = vadd.f32 %v1782_v3, %v1589_v22 }
 0x16d   : > { %v4120_v30 = vpop.f32.mrf.mxu0  ;;  %v1501_v61 = vpop.f32.mrf.mxu1 }
 0x16e   : > { %v1592_v20 = vadd.f32 %v1501_v61, %v5051_v31  ;;  %v5161_v52 = vadd.f32 %v4119_v2, %v1594_v17 }
 0x16f   : > { %v1798_v41 = vpop.f32.mrf.mxu0  ;;  %v4086_v63 = vpop.f32.mrf.mxu1 }
 0x170   : > { %v1595_v16 = vadd.f32 %v4086_v63, %v5054_v39  ;;  %v5164_v12 = vadd.f32 %v1795_v59, %v1592_v20 }
 0x171   : > { %v4123_v18 = vpop.f32.mrf.mxu0  ;;  %v1504_v10 = vpop.f32.mrf.mxu1 }
 0x172   : > { %v1593_v54 = vadd.f32 %v1504_v10, %v5059_v13  ;;  %v5167_v38 = vadd.f32 %v4120_v30, %v1595_v16 }
 0x173   : > { %v1811_v8 = vpop.f32.mrf.mxu0  ;;  %v4089_v7 = vpop.f32.mrf.mxu1 }
 0x174   : > { %v1598_v45 = vadd.f32 %v4089_v7, %v5062_v42  ;;  %v5170_v15 = vadd.f32 %v1798_v41, %v1593_v54 }
 0x175   : > { %v4124_v25 = vpop.f32.mrf.mxu0  ;;  %v1517_v31 = vpop.f32.mrf.mxu1 }
 0x176   : > { %v1596_v44 = vadd.f32 %v1517_v31, %v5069_v4  ;;  %v5173_v51 = vadd.f32 %v4123_v18, %v1598_v45 }
 0x177   : > { %v1814_v40 = vpop.f32.mrf.mxu0  ;;  %v4090_v39 = vpop.f32.mrf.mxu1 }
 0x178   : > { %v1599_v49 = vadd.f32 %v4090_v39, %v5072_v32  ;;  %v5176_v58 = vadd.f32 %v1811_v8, %v1596_v44 }
 0x179   : > { %v4127_v56 = vpop.f32.mrf.mxu0  ;;  %v1520_v13 = vpop.f32.mrf.mxu1 }
 0x17a   : > { %v1597_v26 = vadd.f32 %v1520_v13, %v5077_v43  ;;  %v5179_v9 = vadd.f32 %v4124_v25, %v1599_v49 }
 0x17b   : > { %v1827_v3 = vpop.f32.mrf.mxu0  ;;  %v4093_v42 = vpop.f32.mrf.mxu1 }
 0x17c   : > { %v1602_v14 = vadd.f32 %v4093_v42, %v5080_v35  ;;  %v5182_v34 = vadd.f32 %v1814_v40, %v1597_v26 }
 0x17d   : > { %v4128_v2 = vpop.f32.mrf.mxu0  ;;  %v1533_v4 = vpop.f32.mrf.mxu1 }
 0x17e   : > { %5622 = vst [vmem:[#allocation3_spill] sm:$0xff] %v5182_v34  ;;  %v1600_v22 = vadd.f32 %v1533_v4, %v5087_v62  ;;  %v5185_v27 = vadd.f32 %v4127_v56, %v1602_v14 }
 0x17f   : > { %v1830_v59 = vpop.f32.mrf.mxu0  ;;  %v4094_v32 = vpop.f32.mrf.mxu1 }
 0x180   : > { %5623 = vst [vmem:[#allocation4_spill] sm:$0xff] %v5185_v27  ;;  %v1603_v17 = vadd.f32 %v4094_v32, %v5090_v48  ;;  %v5188_v61 = vadd.f32 %v1827_v3, %v1600_v22 }
 0x181   : > { %v4131_v30 = vpop.f32.mrf.mxu0  ;;  %v1536_v43 = vpop.f32.mrf.mxu1 }
 0x182   : > { %5624 = vst [vmem:[#allocation5_spill] sm:$0xff] %v5188_v61  ;;  %v1601_v20 = vadd.f32 %v1536_v43, %v5096_v46  ;;  %v5191_v63 = vadd.f32 %v4128_v2, %v1603_v17 }
 0x183   : > { %v1843_v41 = vpop.f32.mrf.mxu0  ;;  %v4097_v35 = vpop.f32.mrf.mxu1 }
 0x184   : > { %5625 = vst [vmem:[#allocation6_spill] sm:$0xff] %v5191_v63  ;;  %v1606_v16 = vadd.f32 %v4097_v35, %v5099_v1  ;;  %v5194_v10 = vadd.f32 %v1830_v59, %v1601_v20 }
 0x185   : > { %v4132_v18 = vpop.f32.mrf.mxu0  ;;  %v1549_v62 = vpop.f32.mrf.mxu1 }
 0x186   : > { %5626 = vst [vmem:[#allocation7_spill] sm:$0xff] %v5194_v10  ;;  %v1604_v54 = vadd.f32 %v1549_v62, %v5103_v11  ;;  %v5197_v7 = vadd.f32 %v4131_v30, %v1606_v16 }
 0x187   : > { %v1846_v8 = vpop.f32.mrf.mxu0  ;;  %v4098_v48 = vpop.f32.mrf.mxu1 }
 0x188   : > { %5627 = vst [vmem:[#allocation8_spill] sm:$0xff] %v5197_v7  ;;  %v1607_v45 = vadd.f32 %v4098_v48, %v5106_v33  ;;  %v5200_v31 = vadd.f32 %v1843_v41, %v1604_v54 }
 0x189   : > { %v4135_v25 = vpop.f32.mrf.mxu0  ;;  %v1552_v46 = vpop.f32.mrf.mxu1 }
 0x18a   : > { %5628 = vst [vmem:[#allocation9_spill] sm:$0xff] %v5200_v31  ;;  %v1605_v44 = vadd.f32 %v1552_v46, %v5110_v23  ;;  %v5203_v39 = vadd.f32 %v4132_v18, %v1607_v45 }
 0x18b   : > { %v1859_v40 = vpop.f32.mrf.mxu0  ;;  %v4101_v1 = vpop.f32.mrf.mxu1 }
 0x18c   : > { %5629 = vst [vmem:[#allocation10_spill] sm:$0xff] %v5203_v39  ;;  %v1610_v49 = vadd.f32 %v4101_v1, %v5113_v50  ;;  %v5206_v13 = vadd.f32 %v1846_v8, %v1605_v44 }
 0x18d   : > { %v4136_v56 = vpop.f32.mrf.mxu0  ;;  %v1565_v11 = vpop.f32.mrf.mxu1 }
 0x18e   : > { %5630 = vst [vmem:[#allocation11_spill] sm:$0xff] %v5206_v13  ;;  %v1608_v26 = vadd.f32 %v1565_v11, %v5116_v57  ;;  %v5209_v42 = vadd.f32 %v4135_v25, %v1610_v49 }
 0x18f   : > { %v1862_v3 = vpop.f32.mrf.mxu0  ;;  %v4102_v33 = vpop.f32.mrf.mxu1 }
 0x190   : > { %5631 = vst [vmem:[#allocation12_spill] sm:$0xff] %v5209_v42  ;;  %v1611_v14 = vadd.f32 %v4102_v33, %v5119_v19  ;;  %v5214_v23 = vadd.f32 %v1859_v40, %v1608_v26 }
 0x191   : > { %v5211_v2 = vpop.f32.mrf.mxu0  ;;  %v1568_v4 = vpop.f32.mrf.mxu1 }
 0x192   : > { %5632 = vst [vmem:[#allocation13_spill] sm:$0xff] %v5214_v23  ;;  %v1609_v50 = vadd.f32 %v1568_v4, %v5122_v55  ;;  %v5219_v22 = vadd.f32 %v4136_v56, %v1611_v14 }
 0x193   : > { %v5216_v59 = vpop.f32.mrf.mxu0  ;;  %v4141_v32 = vpop.f32.mrf.mxu1 }
 0x194   : > { %5633 = vst [vmem:[#allocation14_spill] sm:$0xff] %v5219_v22  ;;  %v5223_v57 = vadd.f32 %v1862_v3, %v1609_v50 }
 0x195   : > { %v5221_v30 = vpop.f32.mrf.mxu0  ;;  %v2041_v17 = vpop.f32.mrf.mxu1 }
 0x196   : > { %5634 = vst [vmem:[#allocation15_spill] sm:$0xff] %v5223_v57 }
 0x197   : > { %v5225_v43 = vpop.f32.mrf.mxu0  ;;  %v4142_v41 = vpop.f32.mrf.mxu1 }
 0x199   : > { %v5227_v20 = vpop.f32.mrf.mxu0  ;;  %v2044_v19 = vpop.f32.mrf.mxu1 }
 0x19b   : > { %v5229_v35 = vpop.f32.mrf.mxu0  ;;  %v4145_v18 = vpop.f32.mrf.mxu1 }
 0x19d   : > { %v5231_v16 = vpop.f32.mrf.mxu0  ;;  %v2057_v55 = vpop.f32.mrf.mxu1 }
 0x19f   : > { %v5233_v62 = vpop.f32.mrf.mxu0  ;;  %v4146_v8 = vpop.f32.mrf.mxu1 }
 0x1a1   : > { %v5235_v54 = vpop.f32.mrf.mxu0  ;;  %v2060_v48 = vpop.f32.mrf.mxu1 }
 0x1a3   : > { %v5237_v25 = vpop.f32.mrf.mxu0  ;;  %v4149_v45 = vpop.f32.mrf.mxu1 }
 0x1a5   : > { %v5239_v46 = vpop.f32.mrf.mxu0  ;;  %v2073_v40 = vpop.f32.mrf.mxu1 }
 0x1a7   : > { %v5241_v44 = vpop.f32.mrf.mxu0  ;;  %v4150_v1 = vpop.f32.mrf.mxu1 }
 0x1a9   : > { %v5243_v56 = vpop.f32.mrf.mxu0  ;;  %v2076_v49 = vpop.f32.mrf.mxu1 }
 0x1ab   : > { %v5245_v11 = vpop.f32.mrf.mxu0  ;;  %v4153_v3 = vpop.f32.mrf.mxu1 }
 0x1ad   : > { %v5247_v26 = vpop.f32.mrf.mxu0  ;;  %v2089_v33 = vpop.f32.mrf.mxu1 }
 0x1af   : > { %v5249_v14 = vpop.f32.mrf.mxu0  ;;  %v4154_v4 = vpop.f32.mrf.mxu1 }
 0x1b0   : > { %5635 = vst [vmem:[#allocation16_spill] sm:$0xff] %v5249_v14 }
 0x1b1   : > { %v5251_v50 = vpop.f32.mrf.mxu0  ;;  %v2092_v57 = vpop.f32.mrf.mxu1 }
 0x1b2   : > { %5636 = vst [vmem:[#allocation17_spill] sm:$0xff] %v5251_v50 }
 0x1b3   : > { %v5253_v22 = vpop.f32.mrf.mxu0  ;;  %v4157_v23 = vpop.f32.mrf.mxu1 }
 0x1b4   : > { %5637 = vst [vmem:[#allocation18_spill] sm:$0xff] %v5253_v22 }
 0x1b5   : > { %v5255_v42 = vpop.f32.mrf.mxu0  ;;  %v2105_v13 = vpop.f32.mrf.mxu1 }
 0x1b6   : > { %5638 = vst [vmem:[#allocation19_spill] sm:$0xff] %v5255_v42 }
 0x1b7   : > { %v5257_v39 = vpop.f32.mrf.mxu0  ;;  %v4158_v31 = vpop.f32.mrf.mxu1 }
 0x1b8   : > { %5639 = vst [vmem:[#allocation20_spill] sm:$0xff] %v5257_v39 }
 0x1b9   : > { %v5259_v7 = vpop.f32.mrf.mxu0  ;;  %v5261_v10 = vpop.f32.mrf.mxu1 }
 0x1ba   : > { %5640 = vst [vmem:[#allocation21_spill] sm:$0xff] %v5259_v7  ;;  %5641 = vst [vmem:[#allocation22_spill] sm:$0xff] %v5261_v10 }
 0x1bb   : > { %v5263_v63 = vpop.f32.mrf.mxu0  ;;  %v5265_v61 = vpop.f32.mrf.mxu1 }
 0x1bc   : > { %5642 = vst [vmem:[#allocation23_spill] sm:$0xff] %v5263_v63  ;;  %5643 = vst [vmem:[#allocation24_spill] sm:$0xff] %v5265_v61 }
 0x1bd   : > { %v5267_v27 = vpop.f32.mrf.mxu0  ;;  %v5269_v50 = vpop.f32.mrf.mxu1 }
 0x1be   : > { %5644 = vst [vmem:[#allocation25_spill] sm:$0xff] %v5267_v27  ;;  %5645 = vst [vmem:[#allocation26_spill] sm:$0xff] %v5269_v50 }
 0x1bf   : > { %v5271_v22 = vpop.f32.mrf.mxu0  ;;  %v5273_v34 = vpop.f32.mrf.mxu1 }
 0x1c0   : > { %5646 = vst [vmem:[#allocation27_spill] sm:$0xff] %v5271_v22  ;;  %5647 = vst [vmem:[#allocation28_spill] sm:$0xff] %v5273_v34  ;;  %v2170_v22 = vadd.f32 %v4141_v32, %v5125_v5  ;;  %v2175_v5 = vadd.f32 %v4146_v8, %v5143_v53 }
 0x1c1   : > { %v5275_v42 = vpop.f32.mrf.mxu0  ;;  %v5277_v39 = vpop.f32.mrf.mxu1 }
 0x1c2   : > { %5648 = vst [vmem:[#allocation29_spill] sm:$0xff] %v5275_v42  ;;  %5649 = vst [vmem:[#allocation30_spill] sm:$0xff] %v5277_v39 }
 0x1c3   : > { %v5279_v14 = vpop.f32.mrf.mxu0  ;;  %v5281_v7 = vpop.f32.mrf.mxu1 }
 0x1c4   : > { %5650 = vst [vmem:[#allocation31_spill] sm:$0xff] %v5279_v14  ;;  %5651 = vst [vmem:[#allocation32_spill] sm:$0xff] %v5281_v7  ;;  %v2168_v14 = vadd.f32 %v2041_v17, %v5128_v0  ;;  %v2171_v7 = vadd.f32 %v4142_v41, %v5131_v28  ;;  %v2465_v0 = vadd.f32 %v5211_v2, %v2170_v22 }
 0x1c5   : > { %v5283_v10 = vpop.f32.mrf.mxu0  ;;  %v5285_v63 = vpop.f32.mrf.mxu1  ;;  %v2173_v28 = vadd.f32 %v2060_v48, %v5146_v36  ;;  %v2178_v17 = vadd.f32 %v4149_v45, %v5149_v60  ;;  %v2176_v41 = vadd.f32 %v2073_v40, %v5152_v6  ;;  %v2180_v36 = vadd.f32 %v2089_v33, %v5164_v12  ;;  %v5663_v45 = vld [vmem:[#allocation26_spill] sm:$0xff] }
 0x1c6   : > { %5652 = vst [vmem:[#allocation33_spill] sm:$0xff] %v5283_v10  ;;  %v2466_v2 = vadd.f32 %v5221_v30, %v2171_v7  ;;  %v2183_v60 = vadd.f32 %v4154_v4, %v5167_v38  ;;  %v2181_v6 = vadd.f32 %v2092_v57, %v5170_v15  ;;  %v5335_v7 = vadd.f32 %v5231_v16, %v2175_v5  ;;  %v5657_v16 = vld [vmem:[#allocation16_spill] sm:$0xff] }
 0x1c7   : > { %v5287_v61 = vpop.f32.mrf.mxu0  ;;  %v5289_v27 = vpop.f32.mrf.mxu1  ;;  %v5338_v12 = vadd.f32 %v5233_v62, %v2173_v28  ;;  %v5341_v38 = vadd.f32 %v5235_v54, %v2178_v17  ;;  %v5344_v15 = vadd.f32 %v5237_v25, %v2176_v41  ;;  %v5660_v62 = vld [vmem:[#allocation4_spill] sm:$0xff]  ;;  %v5662_v25 = vld [vmem:[#allocation5_spill] sm:$0xff] }
 0x1c8   : > { %5653 = vst [vmem:[#allocation34_spill] sm:$0xff] %v5287_v61  ;;  %5654 = vst [vmem:[#allocation35_spill] sm:$0xff] %v5289_v27  ;;  %v2169_v61 = vadd.f32 %v2044_v19, %v5134_v47  ;;  %v2174_v27 = vadd.f32 %v4145_v18, %v5137_v29  ;;  %v2179_v47 = vadd.f32 %v4150_v1, %v5155_v37  ;;  %v5661_v54 = vld [vmem:[#allocation24_spill] sm:$0xff]  ;;  %v5664_v1 = vld [vmem:[#allocation17_spill] sm:$0xff] }
 0x1c9   : > { %v5291_v50 = vpop.f32.mrf.mxu0  ;;  %v5294_v34 = vpop.f32.mrf.mxu1  ;;  %v2177_v29 = vadd.f32 %v2076_v49, %v5158_v21  ;;  %v2463_v18 = vadd.f32 %v5216_v59, %v2168_v14  ;;  %v2186_v21 = vadd.f32 %v4157_v23, %v5173_v51  ;;  %v2190_v48 = vadd.f32 %v5661_v54, %v5660_v62  ;;  %v5665_v49 = vld [vmem:[#allocation6_spill] sm:$0xff]  ;;  %v5669_v5 = vld [vmem:[#allocation8_spill] sm:$0xff]  ;;  %v5671_v17 = vld [vmem:[#allocation9_spill] sm:$0xff] }
 0x1ca   : > { %5655 = vst [vmem:[#allocation36_spill] sm:$0xff] %v5291_v50  ;;  %5656 = vst [vmem:[#allocation37_spill] sm:$0xff] %v5294_v34  ;;  %v2172_v50 = vadd.f32 %v2057_v55, %v5140_v24  ;;  %v2182_v24 = vadd.f32 %v4153_v3, %v5161_v52  ;;  %v2464_v37 = vadd.f32 %v5225_v43, %v2169_v61  ;;  %v5668_v33 = vld [vmem:[#allocation30_spill] sm:$0xff]  ;;  %v5678_v62 = vld [vmem:[#allocation12_spill] sm:$0xff] }
 0x1cb   : > { %v5296_v42 = vpop.f32.mrf.mxu0  ;;  %v5300_v39 = vpop.f32.mrf.mxu1  ;;  %v2469_v55 = vadd.f32 %v5227_v20, %v2174_v27  ;;  %v5347_v51 = vadd.f32 %v5239_v46, %v2179_v47  ;;  %v2184_v27 = vadd.f32 %v2105_v13, %v5176_v58  ;;  %v2187_v61 = vadd.f32 %v4158_v31, %v5179_v9  ;;  %v5658_v9 = vld [vmem:[#allocation3_spill] sm:$0xff]  ;;  %v5659_v31 = vld [vmem:[#allocation22_spill] sm:$0xff] }
 0x1cc   : > { %v5332_v8 = vadd.f32 %v5229_v35, %v2172_v50  ;;  %v5352_v30 = vadd.f32 %v5241_v44, %v2177_v29  ;;  %v5355_v57 = vadd.f32 %v5243_v56, %v2182_v24  ;;  %v5358_v20 = vadd.f32 %v5245_v11, %v2180_v36  ;;  %v5666_v11 = vld [vmem:[#allocation28_spill] sm:$0xff]  ;;  %v5672_v24 = vld [vmem:[#allocation18_spill] sm:$0xff] }
 0x1cd   : > { %v5302_v10 = vpop.f32.mrf.mxu0  ;;  %v5308_v32 = vpop.f32.mrf.mxu1  ;;  %v5361_v35 = vadd.f32 %v5247_v26, %v2183_v60  ;;  %v5364_v58 = vadd.f32 %v5657_v16, %v2181_v6  ;;  %v2185_v13 = vadd.f32 %v5659_v31, %v5658_v9  ;;  %v2188_v46 = vadd.f32 %v5663_v45, %v5662_v25  ;;  %v5667_v26 = vld [vmem:[#allocation7_spill] sm:$0xff]  ;;  %v5674_v60 = vld [vmem:[#allocation10_spill] sm:$0xff] }
 0x1ce   : > { %v5373_v56 = vadd.f32 %v5664_v1, %v2186_v21  ;;  %v2191_v3 = vadd.f32 %v5666_v11, %v5665_v49  ;;  %v2189_v14 = vadd.f32 %v5668_v33, %v5667_v26  ;;  %v2192_v41 = vadd.f32 %v5285_v63, %v5671_v17  ;;  %v5681_v11 = vld [vmem:[#allocation23_spill] sm:$0xff]  ;;  %v5684_v17 = vld [vmem:[#allocation29_spill] sm:$0xff] }
 0x1cf   : > { %v5310_v34 = vpop.f32.mrf.mxu0  ;;  %v5319_v19 = vpop.f32.mrf.mxu1  ;;  %v5391_v36 = vadd.f32 %v5672_v24, %v2184_v27  ;;  %v5675_v6 = vld [vmem:[#allocation35_spill] sm:$0xff]  ;;  %v2198_v54 = vadd.f32 %v5300_v39, %v5678_v62  ;;  %v5679_v27 = vld [vmem:[#allocation20_spill] sm:$0xff]  ;;  %v5411_v26 = vadd.f32 %v5681_v11, %v2188_v46 }
 0x1d0   : > { %v2195_v21 = vadd.f32 %v5675_v6, %v5674_v60  ;;  %v5683_v39 = vld [vmem:[#allocation27_spill] sm:$0xff] }
 0x1d1   : > { %v4243_v53 = vpop.f32.mrf.mxu0  ;;  %v5328_v22 = vpop.f32.mrf.mxu1 }
 0x1d3   : > { %v2924_v52 = vpop.f32.mrf.mxu0  ;;  %v4209_v23 = vpop.f32.mrf.mxu1 }
 0x1d4   : > { %v2759_v43 = vadd.f32 %v4209_v23, %v2465_v0  ;;  %v5670_v0 = vld [vmem:[#allocation32_spill] sm:$0xff]  ;;  %v5676_v23 = vld [vmem:[#allocation11_spill] sm:$0xff] }
 0x1d5   : > { %v4244_v59 = vpop.f32.mrf.mxu0  ;;  %v2630_v40 = vpop.f32.mrf.mxu1  ;;  %v2194_v28 = vadd.f32 %v5670_v0, %v5669_v5 }
 0x1d6   : > { %v3053_v4 = vadd.f32 %v4243_v53, %v2759_v43  ;;  %v2757_v50 = vadd.f32 %v2630_v40, %v2463_v18  ;;  %v5673_v53 = vld [vmem:[#allocation19_spill] sm:$0xff]  ;;  %v5677_v43 = vld [vmem:[#allocation37_spill] sm:$0xff]  ;;  %v5403_v40 = vadd.f32 %v5679_v27, %v2185_v13 }
 0x1d7   : > { %v2927_v44 = vpop.f32.mrf.mxu0  ;;  %v4210_v47 = vpop.f32.mrf.mxu1  ;;  %v5394_v18 = vadd.f32 %v5673_v53, %v2187_v61  ;;  %v2193_v16 = vadd.f32 %v5677_v43, %v5676_v23  ;;  %v5680_v61 = vld [vmem:[#allocation21_spill] sm:$0xff] }
 0x1d8   : > { %v3705_v9 = vpack.c.bf16 %v3053_v4, %v3053_v4  ;;  %v3051_v31 = vadd.f32 %v2924_v52, %v2757_v50  ;;  %v2760_v63 = vadd.f32 %v4210_v47, %v2466_v2  ;;  %v5406_v1 = vadd.f32 %v5680_v61, %v2190_v48  ;;  %v5682_v52 = vld [vmem:[#allocation25_spill] sm:$0xff]  ;;  %v5685_v48 = vld [vmem:[#allocation31_spill] sm:$0xff] }
 0x1d9   : > { %v4247_v29 = vpop.f32.mrf.mxu0  ;;  %v2633_v25 = vpop.f32.mrf.mxu1  ;;  %v5414_v33 = vadd.f32 %v5682_v52, %v2191_v3  ;;  %v5417_v2 = vadd.f32 %v5683_v39, %v2189_v14  ;;  %v5420_v47 = vadd.f32 %v5684_v17, %v2194_v28  ;;  %v5423_v24 = vadd.f32 %v5685_v48, %v2192_v41  ;;  %v5686_v3 = vld [vmem:[#allocation33_spill] sm:$0xff]  ;;  %v5687_v14 = vld [vmem:[#allocation34_spill] sm:$0xff] }
 0x1da   : > { %3214 = vst.msk [vmem:[%s5384_s25 + $0x8] sm:$0xf] %vm3211_vm3, %v3705_v9  ;;  %v3703_v49 = vpack.c.bf16 %v3051_v31, %v3051_v31  ;;  %v3054_v50 = vadd.f32 %v4244_v59, %v2760_v63  ;;  %v2758_v5 = vadd.f32 %v2633_v25, %v2464_v37  ;;  %v3313_v46 = vmul.f32 %v3051_v31, %v3051_v31  ;;  %v5688_v37 = vld [vmem:[#allocation13_spill] sm:$0xff]  ;;  %v5689_v9 = vld [vmem:[#allocation36_spill] sm:$0xff]  ;;  %v5690_v63 = vld [vmem:[#allocation14_spill] sm:$0xff] }
 0x1db   : > { %v2940_v45 = vpop.f32.mrf.mxu0  ;;  %v4213_v0 = vpop.f32.mrf.mxu1  ;;  %v5428_v60 = vadd.f32 %v5686_v3, %v2195_v21  ;;  %v5431_v6 = vadd.f32 %v5687_v14, %v2193_v16  ;;  %v5435_v59 = vadd.f32 %v5308_v32, %v5688_v37  ;;  %v5438_v62 = vadd.f32 %v5689_v9, %v2198_v54 }
 0x1dc   : > { %3212 = vst.msk [vmem:[%s5384_s25] sm:$0xf] %vm3211_vm3, %v3703_v49  ;;  %v2763_v53 = vadd.f32 %v4213_v0, %v2469_v55  ;;  %v3706_v28 = vpack.c.bf16 %v3054_v50, %v3054_v50  ;;  %v3052_v23 = vadd.f32 %v2927_v44, %v2758_v5  ;;  %v5442_v55 = vadd.f32 %v5319_v19, %v5690_v63 }
 0x1dd   : > { %v4248_v13 = vpop.f32.mrf.mxu0  ;;  %v2646_v43 = vpop.f32.mrf.mxu1  ;;  %v3315_v21 = vmul.f32 %v3053_v4, %v3053_v4  ;;  %v3244_v27 = vsel %vm411_vm1, %v3051_v31, 0.0  ;;  %v3247_v11 = vsel %vm411_vm1, %v3053_v4, 0.0  ;;  %v3345_v19 = vsel %vm411_vm1, %v3313_v46, 0.0 }
 0x1de   : > { %v3057_v25 = vadd.f32 %v4247_v29, %v2763_v53  ;;  %v2761_v16 = vadd.f32 %v2646_v43, %v5332_v8  ;;  %3215 = vst.msk [vmem:[%s5384_s25 + $0xc] sm:$0xf] %vm3211_vm3, %v3706_v28  ;;  %v3704_v32 = vpack.c.bf16 %v3052_v23, %v3052_v23  ;;  %v3245_v44 = vsel %vm411_vm1, %v3052_v23, 0.0 }
 0x1df   : > { %v2943_v41 = vpop.f32.mrf.mxu0  ;;  %v3314_v61 = vmul.f32 %v3052_v23, %v3052_v23  ;;  %v4214_v49 = vpop.f32.mrf.mxu1  ;;  %v3246_v52 = vadd.f32 %v3245_v44, %v3244_v27  ;;  %v3316_v29 = vmul.f32 %v3054_v50, %v3054_v50  ;;  %v3348_v48 = vsel %vm411_vm1, %v3315_v21, 0.0 }
 0x1e0   : > { %v3709_v39 = vpack.c.bf16 %v3057_v25, %v3057_v25  ;;  %3213 = vst.msk [vmem:[%s5384_s25 + $0x4] sm:$0xf] %vm3211_vm3, %v3704_v32  ;;  %v3055_v31 = vadd.f32 %v2940_v45, %v2761_v16  ;;  %v2764_v5 = vadd.f32 %v4214_v49, %v5335_v7  ;;  %v3249_v46 = vsel %vm411_vm1, %v3054_v50, 0.0 }
 0x1e1   : > { %v4251_v54 = vpop.f32.mrf.mxu0  ;;  %v3346_v8 = vsel %vm411_vm1, %v3314_v61, 0.0  ;;  %v2649_v0 = vpop.f32.mrf.mxu1  ;;  %v3248_v53 = vadd.f32 %v3247_v11, %v3246_v52  ;;  %v3350_v21 = vsel %vm411_vm1, %v3316_v29, 0.0  ;;  %v3319_v16 = vmul.f32 %v3057_v25, %v3057_v25 }
 0x1e2   : > { %v3347_v3 = vadd.f32 %v3346_v8, %v3345_v19  ;;  %3218 = vst.msk [vmem:[%s5384_s25 + $0x18] sm:$0xf] %vm3211_vm3, %v3709_v39  ;;  %v2762_v4 = vadd.f32 %v2649_v0, %v5338_v12  ;;  %v3707_v14 = vpack.c.bf16 %v3055_v31, %v3055_v31  ;;  %v3317_v37 = vmul.f32 %v3055_v31, %v3055_v31 }
 0x1e3   : > { %v2956_v17 = vpop.f32.mrf.mxu0  ;;  %v3058_v28 = vadd.f32 %v4248_v13, %v2764_v5  ;;  %v4217_v23 = vpop.f32.mrf.mxu1  ;;  %v3250_v7 = vadd.f32 %v3249_v46, %v3248_v53  ;;  %v3251_v12 = vsel %vm411_vm1, %v3055_v31, 0.0  ;;  %v5475_v5 = vadd.f32 %v5296_v42, %v5435_v59 }
 0x1e4   : > { %v3349_v43 = vadd.f32 %v3348_v48, %v3347_v3  ;;  %v3056_v9 = vadd.f32 %v2943_v41, %v2762_v4  ;;  %v2767_v63 = vadd.f32 %v4217_v23, %v5341_v38  ;;  %3216 = vst.msk [vmem:[%s5384_s25 + $0x10] sm:$0xf] %vm3211_vm3, %v3707_v14  ;;  %v3352_v41 = vsel %vm411_vm1, %v3317_v37, 0.0  ;;  %v5691_v23 = vld [vmem:[#allocation15_spill] sm:$0xff] }
 0x1e5   : > { %v4252_v45 = vpop.f32.mrf.mxu0  ;;  %v3710_v50 = vpack.c.bf16 %v3058_v28, %v3058_v28  ;;  %v2662_v27 = vpop.f32.mrf.mxu1  ;;  %v3252_v13 = vadd.f32 %v3251_v12, %v3250_v7  ;;  %v3255_v0 = vsel %vm411_vm1, %v3057_v25, 0.0  ;;  %v3320_v48 = vmul.f32 %v3058_v28, %v3058_v28 }
 0x1e6   : > { %v3351_v44 = vadd.f32 %v3350_v21, %v3349_v43  ;;  %v3708_v61 = vpack.c.bf16 %v3056_v9, %v3056_v9  ;;  %v3253_v49 = vsel %vm411_vm1, %v3056_v9, 0.0  ;;  %v3318_v38 = vmul.f32 %v3056_v9, %v3056_v9 }
 0x1e7   : > { %v2959_v32 = vpop.f32.mrf.mxu0  ;;  %3219 = vst.msk [vmem:[%s5384_s25 + $0x1c] sm:$0xf] %vm3211_vm3, %v3710_v50  ;;  %v3061_v11 = vadd.f32 %v4251_v54, %v2767_v63  ;;  %v2765_v19 = vadd.f32 %v2662_v27, %v5344_v15  ;;  %v4218_v52 = vpop.f32.mrf.mxu1  ;;  %v3254_v8 = vadd.f32 %v3253_v49, %v3252_v13  ;;  %v2197_v43 = vadd.f32 %v5328_v22, %v5691_v23 }
 0x1e8   : > { %v3353_v29 = vadd.f32 %v3352_v41, %v3351_v44  ;;  %3217 = vst.msk [vmem:[%s5384_s25 + $0x14] sm:$0xf] %vm3211_vm3, %v3708_v61  ;;  %v2768_v31 = vadd.f32 %v4218_v52, %v5347_v51  ;;  %v3354_v54 = vsel %vm411_vm1, %v3318_v38, 0.0  ;;  %v3356_v51 = vsel %vm411_vm1, %v3319_v16, 0.0 }
 0x1e9   : > { %v4255_v39 = vpop.f32.mrf.mxu0  ;;  %v3713_v53 = vpack.c.bf16 %v3061_v11, %v3061_v11  ;;  %v2665_v15 = vpop.f32.mrf.mxu1  ;;  %v3256_v4 = vadd.f32 %v3255_v0, %v3254_v8  ;;  %v3059_v14 = vadd.f32 %v2956_v17, %v2765_v19  ;;  %v3257_v42 = vsel %vm411_vm1, %v3058_v28, 0.0 }
 0x1ea   : > { %v3355_v46 = vadd.f32 %v3354_v54, %v3353_v29  ;;  %v3062_v37 = vadd.f32 %v4252_v45, %v2768_v31  ;;  %v2766_v59 = vadd.f32 %v2665_v15, %v5352_v30  ;;  %v5488_v17 = vadd.f32 %v5302_v10, %v5442_v55 }
 0x1eb   : > { %v2972_v3 = vpop.f32.mrf.mxu0  ;;  %3222 = vst.msk [vmem:[%s5384_s25 + $0x28] sm:$0xf] %vm3211_vm3, %v3713_v53  ;;  %v4221_v25 = vpop.f32.mrf.mxu1  ;;  %v3711_v63 = vpack.c.bf16 %v3059_v14, %v3059_v14  ;;  %v3258_v21 = vadd.f32 %v3257_v42, %v3256_v4  ;;  %v3358_v22 = vsel %vm411_vm1, %v3320_v48, 0.0  ;;  %v3259_v45 = vsel %vm411_vm1, %v3059_v14, 0.0 }
 0x1ec   : > { %v3357_v9 = vadd.f32 %v3356_v51, %v3355_v46  ;;  %v3321_v16 = vmul.f32 %v3059_v14, %v3059_v14  ;;  %v3714_v28 = vpack.c.bf16 %v3062_v37, %v3062_v37  ;;  %v3060_v13 = vadd.f32 %v2959_v32, %v2766_v59 }
 0x1ed   : > { %v4256_v7 = vpop.f32.mrf.mxu0  ;;  %v2678_v12 = vpop.f32.mrf.mxu1  ;;  %3220 = vst.msk [vmem:[%s5384_s25 + $0x20] sm:$0xf] %vm3211_vm3, %v3711_v63  ;;  %v3260_v30 = vadd.f32 %v3259_v45, %v3258_v21  ;;  %v2771_v44 = vadd.f32 %v4221_v25, %v5355_v57  ;;  %v3323_v61 = vmul.f32 %v3061_v11, %v3061_v11  ;;  %v3324_v10 = vmul.f32 %v3062_v37, %v3062_v37 }
 0x1ee   : > { %v3359_v27 = vadd.f32 %v3358_v22, %v3357_v9  ;;  %v3360_v49 = vsel %vm411_vm1, %v3321_v16, 0.0  ;;  %3223 = vst.msk [vmem:[%s5384_s25 + $0x2c] sm:$0xf] %vm3211_vm3, %v3714_v28  ;;  %v2769_v55 = vadd.f32 %v2678_v12, %v5358_v20  ;;  %v3712_v52 = vpack.c.bf16 %v3060_v13, %v3060_v13 }
 0x1ef   : > { %v2975_v50 = vpop.f32.mrf.mxu0  ;;  %v4222_v41 = vpop.f32.mrf.mxu1  ;;  %v3261_v29 = vsel %vm411_vm1, %v3060_v13, 0.0  ;;  %v3322_v8 = vmul.f32 %v3060_v13, %v3060_v13  ;;  %v3065_v32 = vadd.f32 %v4255_v39, %v2771_v44  ;;  %v3263_v53 = vsel %vm411_vm1, %v3061_v11, 0.0 }
 0x1f0   : > { %v3361_v19 = vadd.f32 %v3360_v49, %v3359_v27  ;;  %v3262_v31 = vadd.f32 %v3261_v29, %v3260_v30  ;;  %v3063_v0 = vadd.f32 %v2972_v3, %v2769_v55  ;;  %v2772_v57 = vadd.f32 %v4222_v41, %v5361_v35  ;;  %3221 = vst.msk [vmem:[%s5384_s25 + $0x24] sm:$0xf] %vm3211_vm3, %v3712_v52 }
 0x1f1   : > { %v4259_v38 = vpop.f32.mrf.mxu0  ;;  %v2681_v48 = vpop.f32.mrf.mxu1  ;;  %v3362_v20 = vsel %vm411_vm1, %v3322_v8, 0.0  ;;  %v5507_v4 = vadd.f32 %v5310_v34, %v2197_v43  ;;  %v3364_v46 = vsel %vm411_vm1, %v3323_v61, 0.0  ;;  %v3717_v35 = vpack.c.bf16 %v3065_v32, %v3065_v32 }
 0x1f2   : > { %v2770_v15 = vadd.f32 %v2681_v48, %v5364_v58  ;;  %v3264_v39 = vadd.f32 %v3263_v53, %v3262_v31  ;;  %v3363_v3 = vadd.f32 %v3362_v20, %v3361_v19  ;;  %v3265_v11 = vsel %vm411_vm1, %v3062_v37, 0.0 }
 0x1f3   : > { %v2988_v54 = vpop.f32.mrf.mxu0  ;;  %v4225_v14 = vpop.f32.mrf.mxu1  ;;  %v3366_v51 = vsel %vm411_vm1, %v3324_v10, 0.0  ;;  %v3715_v42 = vpack.c.bf16 %v3063_v0, %v3063_v0  ;;  %v3325_v59 = vmul.f32 %v3063_v0, %v3063_v0  ;;  %3226 = vst.msk [vmem:[%s5384_s25 + $0x38] sm:$0xf] %vm3211_vm3, %v3717_v35  ;;  %v3066_v34 = vadd.f32 %v4256_v7, %v2772_v57 }
 0x1f4   : > { %v3365_v25 = vadd.f32 %v3364_v46, %v3363_v3  ;;  %v3266_v58 = vadd.f32 %v3265_v11, %v3264_v39  ;;  %v3064_v43 = vadd.f32 %v2975_v50, %v2770_v15  ;;  %v3327_v21 = vmul.f32 %v3065_v32, %v3065_v32 }
 0x1f5   : > { %v4260_v23 = vpop.f32.mrf.mxu0  ;;  %v2694_v9 = vpop.f32.mrf.mxu1  ;;  %3224 = vst.msk [vmem:[%s5384_s25 + $0x30] sm:$0xf] %vm3211_vm3, %v3715_v42  ;;  %v3267_v22 = vsel %vm411_vm1, %v3063_v0, 0.0  ;;  %v2775_v37 = vadd.f32 %v4225_v14, %v5373_v56  ;;  %v3368_v12 = vsel %vm411_vm1, %v3325_v59, 0.0  ;;  %v3718_v30 = vpack.c.bf16 %v3066_v34, %v3066_v34 }
 0x1f6   : > { %v2773_v45 = vadd.f32 %v2694_v9, %v5391_v36  ;;  %v3268_v16 = vadd.f32 %v3267_v22, %v3266_v58  ;;  %v3367_v28 = vadd.f32 %v3366_v51, %v3365_v25  ;;  %v3328_v27 = vmul.f32 %v3066_v34, %v3066_v34 }
 0x1f7   : > { %v2991_v63 = vpop.f32.mrf.mxu0  ;;  %v4226_v7 = vpop.f32.mrf.mxu1  ;;  %v3716_v13 = vpack.c.bf16 %v3064_v43, %v3064_v43  ;;  %v3269_v44 = vsel %vm411_vm1, %v3064_v43, 0.0  ;;  %v3326_v61 = vmul.f32 %v3064_v43, %v3064_v43  ;;  %3227 = vst.msk [vmem:[%s5384_s25 + $0x3c] sm:$0xf] %vm3211_vm3, %v3718_v30  ;;  %v3069_v56 = vadd.f32 %v4259_v38, %v2775_v37 }
 0x1f8   : > { %v3369_v49 = vadd.f32 %v3368_v12, %v3367_v28  ;;  %v3270_v10 = vadd.f32 %v3269_v44, %v3268_v16  ;;  %v3067_v55 = vadd.f32 %v2988_v54, %v2773_v45  ;;  %v3271_v19 = vsel %vm411_vm1, %v3065_v32, 0.0 }
 0x1f9   : > { %v4263_v50 = vpop.f32.mrf.mxu0  ;;  %v2697_v36 = vpop.f32.mrf.mxu1  ;;  %3225 = vst.msk [vmem:[%s5384_s25 + $0x34] sm:$0xf] %vm3211_vm3, %v3716_v13  ;;  %v3370_v52 = vsel %vm411_vm1, %v3326_v61, 0.0  ;;  %v2776_v29 = vadd.f32 %v4226_v7, %v5394_v18  ;;  %v3372_v31 = vsel %vm411_vm1, %v3327_v21, 0.0  ;;  %v3721_v38 = vpack.c.bf16 %v3069_v56, %v3069_v56 }
 0x1fa   : > { %v2774_v8 = vadd.f32 %v2697_v36, %v5403_v40  ;;  %v3272_v0 = vadd.f32 %v3271_v19, %v3270_v10  ;;  %v3371_v57 = vadd.f32 %v3370_v52, %v3369_v49  ;;  %v3273_v53 = vsel %vm411_vm1, %v3066_v34, 0.0 }
 0x1fb   : > { %v3004_v41 = vpop.f32.mrf.mxu0  ;;  %v4229_v48 = vpop.f32.mrf.mxu1  ;;  %v3374_v32 = vsel %vm411_vm1, %v3328_v27, 0.0  ;;  %v3719_v20 = vpack.c.bf16 %v3067_v55, %v3067_v55  ;;  %v3329_v15 = vmul.f32 %v3067_v55, %v3067_v55  ;;  %3230 = vst.msk [vmem:[%s5384_s25 + $0x48] sm:$0xf] %vm3211_vm3, %v3721_v38  ;;  %v3070_v39 = vadd.f32 %v4260_v23, %v2776_v29 }
 0x1fc   : > { %v3373_v46 = vadd.f32 %v3372_v31, %v3371_v57  ;;  %v3274_v18 = vadd.f32 %v3273_v53, %v3272_v0  ;;  %v3068_v40 = vadd.f32 %v2991_v63, %v2774_v8  ;;  %v3331_v14 = vmul.f32 %v3069_v56, %v3069_v56 }
 0x1fd   : > { %v4264_v54 = vpop.f32.mrf.mxu0  ;;  %v2710_v3 = vpop.f32.mrf.mxu1  ;;  %3228 = vst.msk [vmem:[%s5384_s25 + $0x40] sm:$0xf] %vm3211_vm3, %v3719_v20  ;;  %v3275_v11 = vsel %vm411_vm1, %v3067_v55, 0.0  ;;  %v2779_v51 = vadd.f32 %v4229_v48, %v5406_v1  ;;  %v3376_v58 = vsel %vm411_vm1, %v3329_v15, 0.0  ;;  %v3722_v34 = vpack.c.bf16 %v3070_v39, %v3070_v39 }
 0x1fe   : > { %v2777_v42 = vadd.f32 %v2710_v3, %v5411_v26  ;;  %v3276_v59 = vadd.f32 %v3275_v11, %v3274_v18  ;;  %v3375_v25 = vadd.f32 %v3374_v32, %v3373_v46  ;;  %v3332_v9 = vmul.f32 %v3070_v39, %v3070_v39 }
 0x1ff   : > { %v3007_v35 = vpop.f32.mrf.mxu0  ;;  %v4230_v23 = vpop.f32.mrf.mxu1  ;;  %v3720_v63 = vpack.c.bf16 %v3068_v40, %v3068_v40  ;;  %v3277_v21 = vsel %vm411_vm1, %v3068_v40, 0.0  ;;  %v3330_v22 = vmul.f32 %v3068_v40, %v3068_v40  ;;  %3231 = vst.msk [vmem:[%s5384_s25 + $0x4c] sm:$0xf] %vm3211_vm3, %v3722_v34  ;;  %v3073_v1 = vadd.f32 %v4263_v50, %v2779_v51 }
 0x200   : > { %v3377_v37 = vadd.f32 %v3376_v58, %v3375_v25  ;;  %v3278_v45 = vadd.f32 %v3277_v21, %v3276_v59  ;;  %v3071_v16 = vadd.f32 %v3004_v41, %v2777_v42  ;;  %v3279_v12 = vsel %vm411_vm1, %v3069_v56, 0.0 }
 0x201   : > { %v4267_v43 = vpop.f32.mrf.mxu0  ;;  %v2713_v26 = vpop.f32.mrf.mxu1  ;;  %3229 = vst.msk [vmem:[%s5384_s25 + $0x44] sm:$0xf] %vm3211_vm3, %v3720_v63  ;;  %v3378_v30 = vsel %vm411_vm1, %v3330_v22, 0.0  ;;  %v2780_v7 = vadd.f32 %v4230_v23, %v5414_v33  ;;  %v3380_v13 = vsel %vm411_vm1, %v3331_v14, 0.0  ;;  %v3725_v50 = vpack.c.bf16 %v3073_v1, %v3073_v1 }
 0x202   : > { %v2778_v27 = vadd.f32 %v2713_v26, %v5417_v2  ;;  %v3280_v44 = vadd.f32 %v3279_v12, %v3278_v45  ;;  %v3379_v61 = vadd.f32 %v3378_v30, %v3377_v37  ;;  %v3281_v55 = vsel %vm411_vm1, %v3070_v39, 0.0 }
 0x203   : > { %v3020_v28 = vpop.f32.mrf.mxu0  ;;  %v4233_v49 = vpop.f32.mrf.mxu1  ;;  %v3382_v56 = vsel %vm411_vm1, %v3332_v9, 0.0  ;;  %v3723_v36 = vpack.c.bf16 %v3071_v16, %v3071_v16  ;;  %v3333_v41 = vmul.f32 %v3071_v16, %v3071_v16  ;;  %3234 = vst.msk [vmem:[%s5384_s25 + $0x58] sm:$0xf] %vm3211_vm3, %v3725_v50  ;;  %v3074_v52 = vadd.f32 %v4264_v54, %v2780_v7 }
 0x204   : > { %v3381_v19 = vadd.f32 %v3380_v13, %v3379_v61  ;;  %v3282_v33 = vadd.f32 %v3281_v55, %v3280_v44  ;;  %v3072_v2 = vadd.f32 %v3007_v35, %v2778_v27  ;;  %v3335_v31 = vmul.f32 %v3073_v1, %v3073_v1 }
 0x205   : > { %v4268_v10 = vpop.f32.mrf.mxu0  ;;  %v2726_v29 = vpop.f32.mrf.mxu1  ;;  %3232 = vst.msk [vmem:[%s5384_s25 + $0x50] sm:$0xf] %vm3211_vm3, %v3723_v36  ;;  %v3283_v0 = vsel %vm411_vm1, %v3071_v16, 0.0  ;;  %v2783_v57 = vadd.f32 %v4233_v49, %v5420_v47  ;;  %v3384_v32 = vsel %vm411_vm1, %v3333_v41, 0.0  ;;  %v3726_v20 = vpack.c.bf16 %v3074_v52, %v3074_v52 }
 0x206   : > { %v2781_v38 = vadd.f32 %v2726_v29, %v5423_v24  ;;  %v3284_v48 = vadd.f32 %v3283_v0, %v3282_v33  ;;  %v3383_v53 = vadd.f32 %v3382_v56, %v3381_v19  ;;  %v3336_v15 = vmul.f32 %v3074_v52, %v3074_v52 }
 0x207   : > { %v3023_v8 = vpop.f32.mrf.mxu0  ;;  %v4234_v54 = vpop.f32.mrf.mxu1  ;;  %v3724_v46 = vpack.c.bf16 %v3072_v2, %v3072_v2  ;;  %v3285_v18 = vsel %vm411_vm1, %v3072_v2, 0.0  ;;  %v3334_v39 = vmul.f32 %v3072_v2, %v3072_v2  ;;  %3235 = vst.msk [vmem:[%s5384_s25 + $0x5c] sm:$0xf] %vm3211_vm3, %v3726_v20  ;;  %v3077_v47 = vadd.f32 %v4267_v43, %v2783_v57 }
 0x208   : > { %v3385_v3 = vadd.f32 %v3384_v32, %v3383_v53  ;;  %v3286_v35 = vadd.f32 %v3285_v18, %v3284_v48  ;;  %v3075_v14 = vadd.f32 %v3020_v28, %v2781_v38  ;;  %v3287_v11 = vsel %vm411_vm1, %v3073_v1, 0.0 }
 0x209   : > { %v4271_v40 = vpop.f32.mrf.mxu0  ;;  %v2729_v24 = vpop.f32.mrf.mxu1  ;;  %3233 = vst.msk [vmem:[%s5384_s25 + $0x54] sm:$0xf] %vm3211_vm3, %v3724_v46  ;;  %v3386_v51 = vsel %vm411_vm1, %v3334_v39, 0.0  ;;  %v2784_v42 = vadd.f32 %v4234_v54, %v5428_v60  ;;  %v3388_v25 = vsel %vm411_vm1, %v3335_v31, 0.0  ;;  %v3729_v23 = vpack.c.bf16 %v3077_v47, %v3077_v47 }
 0x20a   : > { %v2782_v59 = vadd.f32 %v2729_v24, %v5431_v6  ;;  %v3288_v58 = vadd.f32 %v3287_v11, %v3286_v35  ;;  %v3387_v34 = vadd.f32 %v3386_v51, %v3385_v3  ;;  %v3289_v9 = vsel %vm411_vm1, %v3074_v52, 0.0 }
 0x20b   : > { %v4237_v43 = vpop.f32.mrf.mxu1  ;;  %v3390_v63 = vsel %vm411_vm1, %v3336_v15, 0.0  ;;  %v3727_v21 = vpack.c.bf16 %v3075_v14, %v3075_v14  ;;  %v3337_v22 = vmul.f32 %v3075_v14, %v3075_v14  ;;  %v3036_v37 = vpop.f32.mrf.mxu0  ;;  %3238 = vst.msk [vmem:[%s5384_s25 + $0x68] sm:$0xf] %vm3211_vm3, %v3729_v23  ;;  %v3078_v1 = vadd.f32 %v4268_v10, %v2784_v42 }
 0x20c   : > { %v3389_v45 = vadd.f32 %v3388_v25, %v3387_v34  ;;  %v3290_v60 = vadd.f32 %v3289_v9, %v3288_v58  ;;  %v3076_v6 = vadd.f32 %v3023_v8, %v2782_v59  ;;  %v3295_v26 = vsel %vm411_vm1, %v3077_v47, 0.0 }
 0x20d   : > { %v2742_v16 = vpop.f32.mrf.mxu1  ;;  %3236 = vst.msk [vmem:[%s5384_s25 + $0x60] sm:$0xf] %vm3211_vm3, %v3727_v21  ;;  %v3291_v28 = vsel %vm411_vm1, %v3075_v14, 0.0  ;;  %v2787_v12 = vadd.f32 %v4237_v43, %v5438_v62  ;;  %v3339_v7 = vmul.f32 %v3077_v47, %v3077_v47  ;;  %v3730_v44 = vpack.c.bf16 %v3078_v1, %v3078_v1  ;;  %v4272_v56 = vpop.f32.mrf.mxu0 }
 0x20e   : > { %v2785_v30 = vadd.f32 %v2742_v16, %v5475_v5  ;;  %v3292_v27 = vadd.f32 %v3291_v28, %v3290_v60  ;;  %v3391_v13 = vadd.f32 %v3390_v63, %v3389_v45  ;;  %v3392_v50 = vsel %vm411_vm1, %v3337_v22, 0.0 }
 0x20f   : > { %v4238_v61 = vpop.f32.mrf.mxu1  ;;  %v3728_v49 = vpack.c.bf16 %v3076_v6, %v3076_v6  ;;  %v3293_v10 = vsel %vm411_vm1, %v3076_v6, 0.0  ;;  %v3338_v55 = vmul.f32 %v3076_v6, %v3076_v6  ;;  %3239 = vst.msk [vmem:[%s5384_s25 + $0x6c] sm:$0xf] %vm3211_vm3, %v3730_v44  ;;  %v3081_v62 = vadd.f32 %v4271_v40, %v2787_v12  ;;  %v3039_v32 = vpop.f32.mrf.mxu0 }
 0x210   : > { %v3393_v36 = vadd.f32 %v3392_v50, %v3391_v13  ;;  %v3294_v41 = vadd.f32 %v3293_v10, %v3292_v27  ;;  %v3079_v19 = vadd.f32 %v3036_v37, %v2785_v30  ;;  %v3340_v33 = vmul.f32 %v3078_v1, %v3078_v1 }
 0x211   : > { %v2745_v5 = vpop.f32.mrf.mxu1  ;;  %3237 = vst.msk [vmem:[%s5384_s25 + $0x64] sm:$0xf] %vm3211_vm3, %v3728_v49  ;;  %v3394_v52 = vsel %vm411_vm1, %v3338_v55, 0.0  ;;  %v2788_v2 = vadd.f32 %v4238_v61, %v5488_v17  ;;  %v3733_v0 = vpack.c.bf16 %v3081_v62, %v3081_v62  ;;  %v3396_v57 = vsel %vm411_vm1, %v3339_v7, 0.0 }
 0x212   : > { %v2786_v29 = vadd.f32 %v2745_v5, %v5507_v4  ;;  %v3296_v8 = vadd.f32 %v3295_v26, %v3294_v41  ;;  %v3395_v31 = vadd.f32 %v3394_v52, %v3393_v36  ;;  %v3297_v38 = vsel %vm411_vm1, %v3078_v1, 0.0 }
 0x213   : > { %v3731_v48 = vpack.c.bf16 %v3079_v19, %v3079_v19  ;;  %v3341_v53 = vmul.f32 %v3079_v19, %v3079_v19  ;;  %3242 = vst.msk [vmem:[%s5384_s25 + $0x78] sm:$0xf] %vm3211_vm3, %v3733_v0  ;;  %v3082_v15 = vadd.f32 %v4272_v56, %v2788_v2  ;;  %v3398_v46 = vsel %vm411_vm1, %v3340_v33, 0.0 }
 0x214   : > { %v3397_v20 = vadd.f32 %v3396_v57, %v3395_v31  ;;  %v3298_v54 = vadd.f32 %v3297_v38, %v3296_v8  ;;  %v3080_v17 = vadd.f32 %v3039_v32, %v2786_v29  ;;  %v3299_v4 = vsel %vm411_vm1, %v3079_v19, 0.0 }
 0x215   : > { %3240 = vst.msk [vmem:[%s5384_s25 + $0x70] sm:$0xf] %vm3211_vm3, %v3731_v48  ;;  %v3343_v18 = vmul.f32 %v3081_v62, %v3081_v62  ;;  %v3734_v3 = vpack.c.bf16 %v3082_v15, %v3082_v15  ;;  %v3400_v35 = vsel %vm411_vm1, %v3341_v53, 0.0  ;;  %v3303_v42 = vsel %vm411_vm1, %v3081_v62, 0.0 }
 0x216   : > { %v3300_v39 = vadd.f32 %v3299_v4, %v3298_v54  ;;  %v3399_v40 = vadd.f32 %v3398_v46, %v3397_v20  ;;  %v3732_v47 = vpack.c.bf16 %v3080_v17, %v3080_v17  ;;  %v3301_v14 = vsel %vm411_vm1, %v3080_v17, 0.0 }
 0x217   : > { %v3342_v24 = vmul.f32 %v3080_v17, %v3080_v17  ;;  %3243 = vst.msk [vmem:[%s5384_s25 + $0x7c] sm:$0xf] %vm3211_vm3, %v3734_v3  ;;  %v3344_v59 = vmul.f32 %v3082_v15, %v3082_v15  ;;  %v3404_v23 = vsel %vm411_vm1, %v3343_v18, 0.0  ;;  %v3305_v43 = vsel %vm411_vm1, %v3082_v15, 0.0 }
 0x218   : > { %v3401_v11 = vadd.f32 %v3400_v35, %v3399_v40  ;;  %v3302_v51 = vadd.f32 %v3301_v14, %v3300_v39  ;;  %3241 = vst.msk [vmem:[%s5384_s25 + $0x74] sm:$0xf] %vm3211_vm3, %v3732_v47 }
 0x219   : > { %v3402_v25 = vsel %vm411_vm1, %v3342_v24, 0.0  ;;  %v3406_v21 = vsel %vm411_vm1, %v3344_v59, 0.0 }
 0x21a   : > { %v3304_v58 = vadd.f32 %v3303_v42, %v3302_v51  ;;  %v3403_v34 = vadd.f32 %v3402_v25, %v3401_v11 }
 0x21c   : > { %v3306_v9 = vadd.f32 %v3305_v43, %v3304_v58  ;;  %v3405_v63 = vadd.f32 %v3404_v23, %v3403_v34 }
 0x21e   : > { %v3307_v22 = vrot.slane %v3306_v9, 4  ;;  %v3407_v37 = vadd.f32 %v3406_v21, %v3405_v63 }
 0x220   : > { %v3308_v45 = vadd.f32 %v3307_v22, %v3306_v9  ;;  %v3408_v60 = vrot.slane %v3407_v37, 4 }
 0x222   : > { %v3309_v1 = vrot.slane %v3308_v45, 2  ;;  %v3409_v6 = vadd.f32 %v3408_v60, %v3407_v37 }
 0x224   : > { %v3310_v16 = vadd.f32 %v3309_v1, %v3308_v45  ;;  %v3410_v26 = vrot.slane %v3409_v6, 2 }
 0x226   : > { %v3311_v28 = vrot.slane %v3310_v16, 1  ;;  %v3411_v12 = vadd.f32 %v3410_v26, %v3409_v6 }
 0x228   : > { %v3412_v30 = vrot.slane %v3411_v12, 1  ;;  %v3312_v7 = vadd.f32 %v3311_v28, %v3310_v16 }
 0x22a   : > { %v3413_v27 = vadd.f32 %v3412_v30, %v3411_v12 }
 0x22c   : > { %v3415_v13 = vsel %vm3414_vm4, %v3312_v7, %v3413_v27 }
 0x22d   : > { %3416 = vst.msk [vmem:[%s235_s29] sm:$0x3] %vm414_vm2, %v3415_v13 }
 0x22e PF: > { %s16_s18 = sadd.s32 1, %s4300_s18  }
 0x22f   : > { %p13_p4 = scmp.ge.s32.totalorder %s16_s18, 4  }
 0x231   :  { %15 = sbr.rel (!%p13_p4) target bundleno = 1 (0x1), region = 88 }

</bundles_post_ra>
